<compile_context>
chip_gen: v5e
topology: v5e:2x2
jax: 0.10.0
libtpu: 0.0.40
codegen_flags: <defaults>
</compile_context>

<pallas_src>
import jax
import jax.numpy as jnp
from jax import lax
from jax.experimental import pallas as pl
from jax.experimental.pallas import tpu as pltpu

# Problem sizes (fixed by the PyTorch module's weights).
C_IN = 248
C_MID = 1488
C_BLK = 256                       # channel block on the lane axis
N_BLK = 6                         # C_MID padded to 1536 = 6 * 256
C_MID_PAD = N_BLK * C_BLK
H = W = 7
HW = H * W
K = 5
PAD = 2
HP = H + 2 * PAD                  # 11
WP = 8                            # width padded to one sublane group (7 valid + 1 zero)
HPP = 12                          # padded height so a plane has 96 rows (bf16-tile aligned)
RPLANE = HPP * WP                 # 96 rows per width-shifted plane
HW8 = H * WP                      # 56 rows covering the 7x7 outputs (+ zero w==7 column)
EPS = 1e-5
INV_HW = 1.0 / HW


def _fused_kernel(x_ref, m_ref, w1_ref, g1_ref, b1_ref, wd_ref, g2_ref, b2_ref,
                  w3_ref, g3_ref, b3_ref, out_ref, y1s_ref):
    j = pl.program_id(0)
    last = pl.num_programs(0) - 1

    # ---- conv2d42: 1x1 conv (248 -> C_BLK of 1488) on the MXU, bf16 operands.
    # The unshifted (dw == 2) copy supplies the BN42 batch statistics; padded
    # rows / padded channels are exact zeros so sum / sumsq over all 96 rows
    # equal the sums over the 49 valid pixels.
    yc = jnp.dot(x_ref[2 * RPLANE:3 * RPLANE, :], w1_ref[...],
                 preferred_element_type=jnp.float32)          # (96, C_BLK) f32
    s1 = jnp.sum(yc, axis=0, keepdims=True)
    q1 = jnp.sum(yc * yc, axis=0, keepdims=True)
    m1 = s1 * INV_HW
    v1 = q1 * INV_HW - m1 * m1
    sc1 = g1_ref[...] * lax.rsqrt(v1 + EPS)
    sh1 = b1_ref[...] - m1 * sc1

    # BN42 + ReLU28, re-zero the halo/shift-invalid rows, store all 5 planes.
    y1s_ref[2 * RPLANE:3 * RPLANE, :] = (
        jnp.maximum(yc * sc1 + sh1, 0.0) * m_ref[2 * RPLANE:3 * RPLANE, :])
    for dw in (0, 1, 3, 4):
        y = jnp.dot(x_ref[dw * RPLANE:(dw + 1) * RPLANE, :], w1_ref[...],
                    preferred_element_type=jnp.float32)
        y1s_ref[dw * RPLANE:(dw + 1) * RPLANE, :] = (
            jnp.maximum(y * sc1 + sh1, 0.0)
            * m_ref[dw * RPLANE:(dw + 1) * RPLANE, :])

    # ---- conv2d43: depthwise 5x5 = 25 aligned-slice FMAs.  Width shifts were
    # pre-materialized per dw; height shifts are multiples of 8 rows.
    acc = jnp.zeros((HW8, C_BLK), jnp.float32)
    for dh in range(K):
        for dw in range(K):
            t = dh * K + dw
            src = y1s_ref[dw * RPLANE + dh * WP:dw * RPLANE + dh * WP + HW8, :]
            acc = acc + src * wd_ref[t:t + 1, :]

    # BN43 (training stats; the w == 7 column of acc is exactly zero) + ReLU29.
    s2 = jnp.sum(acc, axis=0, keepdims=True)
    q2 = jnp.sum(acc * acc, axis=0, keepdims=True)
    m2 = s2 * INV_HW
    v2 = q2 * INV_HW - m2 * m2
    sc2 = g2_ref[...] * lax.rsqrt(v2 + EPS)
    sh2 = b2_ref[...] - m2 * sc2
    y2 = jnp.maximum(acc * sc2 + sh2, 0.0)
    # zero the w == 7 padding column so the conv44 accumulation / BN44 stay exact
    y2 = y2 * m_ref[2 * RPLANE + PAD * WP:2 * RPLANE + PAD * WP + HW8, :]

    # ---- conv2d44: 1x1 conv (1488 -> 248), accumulated over channel blocks
    # directly in the resident output block.
    @pl.when(j == 0)
    def _init():
        out_ref[...] = jnp.zeros_like(out_ref)

    out_ref[...] += jnp.dot(y2.astype(jnp.bfloat16), w3_ref[...],
                            preferred_element_type=jnp.float32)

    # ---- BN44 on the accumulated result (last channel block only).
    @pl.when(j == last)
    def _finalize():
        y3 = out_ref[...]
        s3 = jnp.sum(y3, axis=0, keepdims=True)
        q3 = jnp.sum(y3 * y3, axis=0, keepdims=True)
        m3 = s3 * INV_HW
        v3 = q3 * INV_HW - m3 * m3
        sc3 = g3_ref[...] * lax.rsqrt(v3 + EPS)
        out_ref[...] = (y3 - m3) * sc3 + b3_ref[...]


@jax.jit
def fused_block(x_nchw, w1, g1, b1, wd, g2, b2, w3, g3, b3):
    n = x_nchw.shape[0]
    assert n == 1, "kernel is specialized to the module's batch size of 1"

    # ---- build the 5 width-shifted, zero-padded input copies: (5*96, 248) bf16
    x_hwc = jnp.transpose(x_nchw[0], (1, 2, 0))                 # (7, 7, 248)
    x_w = jnp.pad(x_hwc, ((0, 0), (PAD, PAD), (0, 0)))          # (7, 11, 248)
    planes = []
    for dw in range(K):
        shifted = x_w[:, dw:dw + W, :]                          # x[h, w+dw-2]
        planes.append(jnp.pad(shifted,
                              ((PAD, HPP - H - PAD), (0, WP - W), (0, 0))))
    x5 = jnp.stack(planes).reshape(K * RPLANE, C_IN).astype(jnp.bfloat16)

    # validity mask (1.0 where a real, in-bounds pixel lives) per shifted copy
    hh = jnp.arange(HPP)
    ww = jnp.arange(WP)
    masks = []
    for dw in range(K):
        mh = (hh >= PAD) & (hh < PAD + H)
        mw = (ww < W) & (ww + dw >= PAD) & (ww + dw < PAD + W)
        masks.append((mh[:, None] & mw[None, :]).astype(jnp.float32))
    mask5 = jnp.stack(masks).reshape(K * RPLANE, 1)

    # ---- pad C_MID 1488 -> 1536 (zero-fill) and cast matmul weights to bf16
    pc = C_MID_PAD - C_MID
    w1p = jnp.pad(w1, ((0, 0), (0, pc))).astype(jnp.bfloat16)   # (248, 1536)
    wdp = jnp.pad(wd, ((0, 0), (0, pc)))                        # (25, 1536) f32
    w3p = jnp.pad(w3, ((0, pc), (0, 0))).astype(jnp.bfloat16)   # (1536, 248)
    g1p = jnp.pad(g1, ((0, 0), (0, pc)))
    b1p = jnp.pad(b1, ((0, 0), (0, pc)))
    g2p = jnp.pad(g2, ((0, 0), (0, pc)))
    b2p = jnp.pad(b2, ((0, 0), (0, pc)))

    def fixed(shape):
        return pl.BlockSpec(shape, lambda j: (0, 0))

    def col_block(shape):
        return pl.BlockSpec(shape, lambda j: (0, j))

    grid_spec = pltpu.PrefetchScalarGridSpec(
        num_scalar_prefetch=0,
        grid=(N_BLK,),
        in_specs=[
            fixed((K * RPLANE, C_IN)),                          # x5 (bf16)
            fixed((K * RPLANE, 1)),                             # validity mask
            col_block((C_IN, C_BLK)),                           # w1 block (bf16)
            col_block((1, C_BLK)),                              # gamma1
            col_block((1, C_BLK)),                              # beta1
            col_block((K * K, C_BLK)),                          # depthwise taps
            col_block((1, C_BLK)),                              # gamma2
            col_block((1, C_BLK)),                              # beta2
            pl.BlockSpec((C_BLK, C_IN), lambda j: (j, 0)),      # w3 block (bf16)
            fixed((1, C_IN)),                                   # gamma3
            fixed((1, C_IN)),                                   # beta3
        ],
        out_specs=pl.BlockSpec((HW8, C_IN), lambda j: (0, 0)),
        scratch_shapes=[pltpu.VMEM((K * RPLANE, C_BLK), jnp.float32)],
    )

    out2d = pl.pallas_call(
        _fused_kernel,
        out_shape=jax.ShapeDtypeStruct((HW8, C_IN), jnp.float32),
        grid_spec=grid_spec,
        compiler_params=pltpu.CompilerParams(
            dimension_semantics=("arbitrary",)),
        cost_estimate=pl.CostEstimate(
            flops=420_000_000, transcendentals=8_192,
            bytes_accessed=2_200_000),
    )(x5, mask5, w1p, g1p, b1p, wdp, g2p, b2p, w3p, g3, b3)

    out = out2d.reshape(H, WP, C_IN)[:, :W, :]                  # drop w==7 pad
    return jnp.transpose(out, (2, 0, 1))[None]                  # (1, 248, 7, 7)


def _reference(x, w1, g1, b1, wd, g2, b2, w3, g3, b3):
    """Pure-JAX reference using lax convolutions (NCHW, training-mode BN)."""
    def bn(y, g, b):
        m = y.mean(axis=(0, 2, 3), keepdims=True)
        v = jnp.square(y - m).mean(axis=(0, 2, 3), keepdims=True)
        return (y - m) / jnp.sqrt(v + EPS) * g.reshape(1, -1, 1, 1) + b.reshape(1, -1, 1, 1)

    dn = ('NCHW', 'OIHW', 'NCHW')
    hi = lax.Precision.HIGHEST
    y = lax.conv_general_dilated(x, w1.T[:, :, None, None], (1, 1), 'VALID',
                                 dimension_numbers=dn, precision=hi)
    y = jnp.maximum(bn(y, g1, b1), 0.0)
    wd_oihw = wd.T.reshape(C_MID, 1, K, K)
    y = lax.conv_general_dilated(y, wd_oihw, (1, 1), ((PAD, PAD), (PAD, PAD)),
                                 dimension_numbers=dn, feature_group_count=C_MID,
                                 precision=hi)
    y = jnp.maximum(bn(y, g2, b2), 0.0)
    y = lax.conv_general_dilated(y, w3.T[:, :, None, None], (1, 1), 'VALID',
                                 dimension_numbers=dn, precision=hi)
    return bn(y, g3, b3)


if __name__ == "__main__":
    key = jax.random.PRNGKey(0)
    keys = jax.random.split(key, 10)

    # Input, matching the module's expected shape [1, 248, 7, 7] (NCHW).
    x = jax.random.normal(keys[0], (1, C_IN, H, W), dtype=jnp.float32)

    # Deterministic synthetic parameters (same shapes as the PyTorch module).
    # conv2d42: torch (1488, 248, 1, 1) -> stored as (Cin, Cout) matmul weight.
    w1 = 0.05 * jax.random.normal(keys[1], (C_IN, C_MID), dtype=jnp.float32)
    # conv2d43 (depthwise): torch (1488, 1, 5, 5) -> stored as (25, C), row = kh*5+kw.
    wd = 0.05 * jax.random.normal(keys[2], (K * K, C_MID), dtype=jnp.float32)
    # conv2d44: torch (248, 1488, 1, 1) -> stored as (Cin, Cout) matmul weight.
    w3 = 0.05 * jax.random.normal(keys[3], (C_MID, C_IN), dtype=jnp.float32)
    # BatchNorm affine parameters (gamma, beta), stored as (1, C) for lane broadcast.
    g1 = 1.0 + 0.1 * jax.random.normal(keys[4], (1, C_MID), dtype=jnp.float32)
    b1 = 0.1 * jax.random.normal(keys[5], (1, C_MID), dtype=jnp.float32)
    g2 = 1.0 + 0.1 * jax.random.normal(keys[6], (1, C_MID), dtype=jnp.float32)
    b2 = 0.1 * jax.random.normal(keys[7], (1, C_MID), dtype=jnp.float32)
    g3 = 1.0 + 0.1 * jax.random.normal(keys[8], (1, C_IN), dtype=jnp.float32)
    b3 = 0.1 * jax.random.normal(keys[9], (1, C_IN), dtype=jnp.float32)

    out = fused_block(x, w1, g1, b1, wd, g2, b2, w3, g3, b3)
    out = jax.block_until_ready(out)

    assert out.shape == (1, C_IN, H, W), out.shape
    assert out.dtype == jnp.float32, out.dtype

    ref = _reference(x, w1, g1, b1, wd, g2, b2, w3, g3, b3)
    ref = jax.block_until_ready(ref)
    max_err = float(jnp.max(jnp.abs(out - ref)))
    assert max_err < 5e-2, f"max abs error {max_err}"

    print("KERNEL_OK")
</pallas_src>

<mosaic_0001>
module attributes {stable_mosaic.version = 11 : i64} {
  func.func @_fused_kernel(%arg0: i32, %arg1: memref<480x248xbf16, #tpu.memory_space<vmem>>, %arg2: memref<480x1xf32, #tpu.memory_space<vmem>>, %arg3: memref<248x256xbf16, #tpu.memory_space<vmem>>, %arg4: memref<1x256xf32, #tpu.memory_space<vmem>>, %arg5: memref<1x256xf32, #tpu.memory_space<vmem>>, %arg6: memref<25x256xf32, #tpu.memory_space<vmem>>, %arg7: memref<1x256xf32, #tpu.memory_space<vmem>>, %arg8: memref<1x256xf32, #tpu.memory_space<vmem>>, %arg9: memref<256x248xbf16, #tpu.memory_space<vmem>>, %arg10: memref<1x248xf32, #tpu.memory_space<vmem>>, %arg11: memref<1x248xf32, #tpu.memory_space<vmem>>, %arg12: memref<56x248xf32, #tpu.memory_space<vmem>>, %arg13: memref<480x256xf32, #tpu.memory_space<vmem>>) attributes {dimension_semantics = [#tpu.dimension_semantics<arbitrary>], iteration_bounds = array<i64: 6>, scalar_prefetch = 0 : i64, scratch_operands = 1 : i64, tpu.core_type = #tpu.core_type<tc>, window_params = [{pipeline_mode = #tpu.pipeline_mode<synchronous>, transform_indices = @transform_0, window_bounds = array<i64: 480, 248>}, {pipeline_mode = #tpu.pipeline_mode<synchronous>, transform_indices = @transform_1, window_bounds = array<i64: 480, 1>}, {transform_indices = @transform_2, window_bounds = array<i64: 248, 256>}, {transform_indices = @transform_3, window_bounds = array<i64: 1, 256>}, {transform_indices = @transform_4, window_bounds = array<i64: 1, 256>}, {transform_indices = @transform_5, window_bounds = array<i64: 25, 256>}, {transform_indices = @transform_6, window_bounds = array<i64: 1, 256>}, {transform_indices = @transform_7, window_bounds = array<i64: 1, 256>}, {transform_indices = @transform_8, window_bounds = array<i64: 256, 248>}, {pipeline_mode = #tpu.pipeline_mode<synchronous>, transform_indices = @transform_9, window_bounds = array<i64: 1, 248>}, {pipeline_mode = #tpu.pipeline_mode<synchronous>, transform_indices = @transform_10, window_bounds = array<i64: 1, 248>}, {pipeline_mode = #tpu.pipeline_mode<synchronous>, transform_indices = @transform_11, window_bounds = array<i64: 56, 248>}]} {
    %c192 = arith.constant 192 : index
    %c0 = arith.constant 0 : index
    %0 = vector.load %arg1[%c192, %c0] : memref<480x248xbf16, #tpu.memory_space<vmem>>, vector<96x248xbf16>
    %c0_0 = arith.constant 0 : index
    %c0_1 = arith.constant 0 : index
    %1 = vector.load %arg3[%c0_0, %c0_1] : memref<248x256xbf16, #tpu.memory_space<vmem>>, vector<248x256xbf16>
    %cst = arith.constant dense<0.000000e+00> : vector<96x256xf32>
    %2 = tpu.matmul %0, %1, %cst {dimension_numbers = #tpu.dot_dimension_numbers<[1], [0], [0], [1], [0, 0, 1, 1], [], []>} : vector<96x248xbf16>, vector<248x256xbf16>, vector<96x256xf32> -> vector<96x256xf32>
    %cst_2 = arith.constant dense<0.000000e+00> : vector<256xf32>
    %3 = vector.multi_reduction <add>, %2, %cst_2 [0] : vector<96x256xf32> to vector<256xf32>
    %4 = vector.shape_cast %3 : vector<256xf32> to vector<1x256xf32>
    %5 = arith.mulf %2, %2 : vector<96x256xf32>
    %cst_3 = arith.constant dense<0.000000e+00> : vector<256xf32>
    %6 = vector.multi_reduction <add>, %5, %cst_3 [0] : vector<96x256xf32> to vector<256xf32>
    %7 = vector.shape_cast %6 : vector<256xf32> to vector<1x256xf32>
    %cst_4 = arith.constant 0.0204081628 : f32
    %8 = vector.broadcast %cst_4 : f32 to vector<1x256xf32>
    %9 = arith.mulf %4, %8 : vector<1x256xf32>
    %cst_5 = arith.constant 0.0204081628 : f32
    %10 = vector.broadcast %cst_5 : f32 to vector<1x256xf32>
    %11 = arith.mulf %7, %10 : vector<1x256xf32>
    %12 = arith.mulf %9, %9 : vector<1x256xf32>
    %13 = arith.subf %11, %12 : vector<1x256xf32>
    %c0_6 = arith.constant 0 : index
    %c0_7 = arith.constant 0 : index
    %14 = vector.load %arg4[%c0_6, %c0_7] : memref<1x256xf32, #tpu.memory_space<vmem>>, vector<1x256xf32>
    %cst_8 = arith.constant 9.99999974E-6 : f32
    %15 = vector.broadcast %cst_8 : f32 to vector<1x256xf32>
    %16 = arith.addf %13, %15 : vector<1x256xf32>
    %17 = math.rsqrt %16 : vector<1x256xf32>
    %18 = arith.mulf %14, %17 : vector<1x256xf32>
    %c0_9 = arith.constant 0 : index
    %c0_10 = arith.constant 0 : index
    %19 = vector.load %arg5[%c0_9, %c0_10] : memref<1x256xf32, #tpu.memory_space<vmem>>, vector<1x256xf32>
    %20 = arith.mulf %9, %18 : vector<1x256xf32>
    %21 = arith.subf %19, %20 : vector<1x256xf32>
    %22 = vector.broadcast %18 : vector<1x256xf32> to vector<96x256xf32>
    %23 = arith.mulf %2, %22 : vector<96x256xf32>
    %24 = vector.broadcast %21 : vector<1x256xf32> to vector<96x256xf32>
    %25 = arith.addf %23, %24 : vector<96x256xf32>
    %cst_11 = arith.constant 0.000000e+00 : f32
    %26 = vector.broadcast %cst_11 : f32 to vector<96x256xf32>
    %27 = arith.maximumf %25, %26 : vector<96x256xf32>
    %c192_12 = arith.constant 192 : index
    %c0_13 = arith.constant 0 : index
    %28 = vector.load %arg2[%c192_12, %c0_13] : memref<480x1xf32, #tpu.memory_space<vmem>>, vector<96x1xf32>
    %29 = vector.broadcast %28 : vector<96x1xf32> to vector<96x256xf32>
    %30 = arith.mulf %27, %29 : vector<96x256xf32>
    %c192_14 = arith.constant 192 : index
    %c0_15 = arith.constant 0 : index
    %31 = vector.load %arg13[%c192_14, %c0_15] : memref<480x256xf32, #tpu.memory_space<vmem>>, vector<96x256xf32>
    tpu.vector_store %arg13[%c192_14, %c0_15], %30 {strides = array<i32>} : memref<480x256xf32, #tpu.memory_space<vmem>>, vector<96x256xf32>,
    %c0_16 = arith.constant 0 : index
    %c0_17 = arith.constant 0 : index
    %32 = vector.load %arg1[%c0_16, %c0_17] : memref<480x248xbf16, #tpu.memory_space<vmem>>, vector<96x248xbf16>
    %c0_18 = arith.constant 0 : index
    %c0_19 = arith.constant 0 : index
    %33 = vector.load %arg3[%c0_18, %c0_19] : memref<248x256xbf16, #tpu.memory_space<vmem>>, vector<248x256xbf16>
    %cst_20 = arith.constant dense<0.000000e+00> : vector<96x256xf32>
    %34 = tpu.matmul %32, %33, %cst_20 {dimension_numbers = #tpu.dot_dimension_numbers<[1], [0], [0], [1], [0, 0, 1, 1], [], []>} : vector<96x248xbf16>, vector<248x256xbf16>, vector<96x256xf32> -> vector<96x256xf32>
    %35 = vector.broadcast %18 : vector<1x256xf32> to vector<96x256xf32>
    %36 = arith.mulf %34, %35 : vector<96x256xf32>
    %37 = vector.broadcast %21 : vector<1x256xf32> to vector<96x256xf32>
    %38 = arith.addf %36, %37 : vector<96x256xf32>
    %cst_21 = arith.constant 0.000000e+00 : f32
    %39 = vector.broadcast %cst_21 : f32 to vector<96x256xf32>
    %40 = arith.maximumf %38, %39 : vector<96x256xf32>
    %c0_22 = arith.constant 0 : index
    %c0_23 = arith.constant 0 : index
    %41 = vector.load %arg2[%c0_22, %c0_23] : memref<480x1xf32, #tpu.memory_space<vmem>>, vector<96x1xf32>
    %42 = vector.broadcast %41 : vector<96x1xf32> to vector<96x256xf32>
    %43 = arith.mulf %40, %42 : vector<96x256xf32>
    %c0_24 = arith.constant 0 : index
    %c0_25 = arith.constant 0 : index
    %44 = vector.load %arg13[%c0_24, %c0_25] : memref<480x256xf32, #tpu.memory_space<vmem>>, vector<96x256xf32>
    tpu.vector_store %arg13[%c0_24, %c0_25], %43 {strides = array<i32>} : memref<480x256xf32, #tpu.memory_space<vmem>>, vector<96x256xf32>,
    %c96 = arith.constant 96 : index
    %c0_26 = arith.constant 0 : index
    %45 = vector.load %arg1[%c96, %c0_26] : memref<480x248xbf16, #tpu.memory_space<vmem>>, vector<96x248xbf16>
    %c0_27 = arith.constant 0 : index
    %c0_28 = arith.constant 0 : index
    %46 = vector.load %arg3[%c0_27, %c0_28] : memref<248x256xbf16, #tpu.memory_space<vmem>>, vector<248x256xbf16>
    %cst_29 = arith.constant dense<0.000000e+00> : vector<96x256xf32>
    %47 = tpu.matmul %45, %46, %cst_29 {dimension_numbers = #tpu.dot_dimension_numbers<[1], [0], [0], [1], [0, 0, 1, 1], [], []>} : vector<96x248xbf16>, vector<248x256xbf16>, vector<96x256xf32> -> vector<96x256xf32>
    %48 = vector.broadcast %18 : vector<1x256xf32> to vector<96x256xf32>
    %49 = arith.mulf %47, %48 : vector<96x256xf32>
    %50 = vector.broadcast %21 : vector<1x256xf32> to vector<96x256xf32>
    %51 = arith.addf %49, %50 : vector<96x256xf32>
    %cst_30 = arith.constant 0.000000e+00 : f32
    %52 = vector.broadcast %cst_30 : f32 to vector<96x256xf32>
    %53 = arith.maximumf %51, %52 : vector<96x256xf32>
    %c96_31 = arith.constant 96 : index
    %c0_32 = arith.constant 0 : index
    %54 = vector.load %arg2[%c96_31, %c0_32] : memref<480x1xf32, #tpu.memory_space<vmem>>, vector<96x1xf32>
    %55 = vector.broadcast %54 : vector<96x1xf32> to vector<96x256xf32>
    %56 = arith.mulf %53, %55 : vector<96x256xf32>
    %c96_33 = arith.constant 96 : index
    %c0_34 = arith.constant 0 : index
    %57 = vector.load %arg13[%c96_33, %c0_34] : memref<480x256xf32, #tpu.memory_space<vmem>>, vector<96x256xf32>
    tpu.vector_store %arg13[%c96_33, %c0_34], %56 {strides = array<i32>} : memref<480x256xf32, #tpu.memory_space<vmem>>, vector<96x256xf32>,
    %c288 = arith.constant 288 : index
    %c0_35 = arith.constant 0 : index
    %58 = vector.load %arg1[%c288, %c0_35] : memref<480x248xbf16, #tpu.memory_space<vmem>>, vector<96x248xbf16>
    %c0_36 = arith.constant 0 : index
    %c0_37 = arith.constant 0 : index
    %59 = vector.load %arg3[%c0_36, %c0_37] : memref<248x256xbf16, #tpu.memory_space<vmem>>, vector<248x256xbf16>
    %cst_38 = arith.constant dense<0.000000e+00> : vector<96x256xf32>
    %60 = tpu.matmul %58, %59, %cst_38 {dimension_numbers = #tpu.dot_dimension_numbers<[1], [0], [0], [1], [0, 0, 1, 1], [], []>} : vector<96x248xbf16>, vector<248x256xbf16>, vector<96x256xf32> -> vector<96x256xf32>
    %61 = vector.broadcast %18 : vector<1x256xf32> to vector<96x256xf32>
    %62 = arith.mulf %60, %61 : vector<96x256xf32>
    %63 = vector.broadcast %21 : vector<1x256xf32> to vector<96x256xf32>
    %64 = arith.addf %62, %63 : vector<96x256xf32>
    %cst_39 = arith.constant 0.000000e+00 : f32
    %65 = vector.broadcast %cst_39 : f32 to vector<96x256xf32>
    %66 = arith.maximumf %64, %65 : vector<96x256xf32>
    %c288_40 = arith.constant 288 : index
    %c0_41 = arith.constant 0 : index
    %67 = vector.load %arg2[%c288_40, %c0_41] : memref<480x1xf32, #tpu.memory_space<vmem>>, vector<96x1xf32>
    %68 = vector.broadcast %67 : vector<96x1xf32> to vector<96x256xf32>
    %69 = arith.mulf %66, %68 : vector<96x256xf32>
    %c288_42 = arith.constant 288 : index
    %c0_43 = arith.constant 0 : index
    %70 = vector.load %arg13[%c288_42, %c0_43] : memref<480x256xf32, #tpu.memory_space<vmem>>, vector<96x256xf32>
    tpu.vector_store %arg13[%c288_42, %c0_43], %69 {strides = array<i32>} : memref<480x256xf32, #tpu.memory_space<vmem>>, vector<96x256xf32>,
    %c384 = arith.constant 384 : index
    %c0_44 = arith.constant 0 : index
    %71 = vector.load %arg1[%c384, %c0_44] : memref<480x248xbf16, #tpu.memory_space<vmem>>, vector<96x248xbf16>
    %c0_45 = arith.constant 0 : index
    %c0_46 = arith.constant 0 : index
    %72 = vector.load %arg3[%c0_45, %c0_46] : memref<248x256xbf16, #tpu.memory_space<vmem>>, vector<248x256xbf16>
    %cst_47 = arith.constant dense<0.000000e+00> : vector<96x256xf32>
    %73 = tpu.matmul %71, %72, %cst_47 {dimension_numbers = #tpu.dot_dimension_numbers<[1], [0], [0], [1], [0, 0, 1, 1], [], []>} : vector<96x248xbf16>, vector<248x256xbf16>, vector<96x256xf32> -> vector<96x256xf32>
    %74 = vector.broadcast %18 : vector<1x256xf32> to vector<96x256xf32>
    %75 = arith.mulf %73, %74 : vector<96x256xf32>
    %76 = vector.broadcast %21 : vector<1x256xf32> to vector<96x256xf32>
    %77 = arith.addf %75, %76 : vector<96x256xf32>
    %cst_48 = arith.constant 0.000000e+00 : f32
    %78 = vector.broadcast %cst_48 : f32 to vector<96x256xf32>
    %79 = arith.maximumf %77, %78 : vector<96x256xf32>
    %c384_49 = arith.constant 384 : index
    %c0_50 = arith.constant 0 : index
    %80 = vector.load %arg2[%c384_49, %c0_50] : memref<480x1xf32, #tpu.memory_space<vmem>>, vector<96x1xf32>
    %81 = vector.broadcast %80 : vector<96x1xf32> to vector<96x256xf32>
    %82 = arith.mulf %79, %81 : vector<96x256xf32>
    %c384_51 = arith.constant 384 : index
    %c0_52 = arith.constant 0 : index
    %83 = vector.load %arg13[%c384_51, %c0_52] : memref<480x256xf32, #tpu.memory_space<vmem>>, vector<96x256xf32>
    tpu.vector_store %arg13[%c384_51, %c0_52], %82 {strides = array<i32>} : memref<480x256xf32, #tpu.memory_space<vmem>>, vector<96x256xf32>,
    %cst_53 = arith.constant 0.000000e+00 : f32
    %84 = vector.broadcast %cst_53 : f32 to vector<56x256xf32>
    %c0_54 = arith.constant 0 : index
    %c0_55 = arith.constant 0 : index
    %85 = vector.load %arg13[%c0_54, %c0_55] : memref<480x256xf32, #tpu.memory_space<vmem>>, vector<56x256xf32>
    %c0_56 = arith.constant 0 : index
    %c0_57 = arith.constant 0 : index
    %86 = vector.load %arg6[%c0_56, %c0_57] : memref<25x256xf32, #tpu.memory_space<vmem>>, vector<1x256xf32>
    %87 = vector.broadcast %86 : vector<1x256xf32> to vector<56x256xf32>
    %88 = arith.mulf %85, %87 : vector<56x256xf32>
    %89 = arith.addf %84, %88 : vector<56x256xf32>
    %c96_58 = arith.constant 96 : index
    %c0_59 = arith.constant 0 : index
    %90 = vector.load %arg13[%c96_58, %c0_59] : memref<480x256xf32, #tpu.memory_space<vmem>>, vector<56x256xf32>
    %c1 = arith.constant 1 : index
    %c0_60 = arith.constant 0 : index
    %91 = vector.load %arg6[%c1, %c0_60] : memref<25x256xf32, #tpu.memory_space<vmem>>, vector<1x256xf32>
    %92 = vector.broadcast %91 : vector<1x256xf32> to vector<56x256xf32>
    %93 = arith.mulf %90, %92 : vector<56x256xf32>
    %94 = arith.addf %89, %93 : vector<56x256xf32>
    %c192_61 = arith.constant 192 : index
    %c0_62 = arith.constant 0 : index
    %95 = vector.load %arg13[%c192_61, %c0_62] : memref<480x256xf32, #tpu.memory_space<vmem>>, vector<56x256xf32>
    %c2 = arith.constant 2 : index
    %c0_63 = arith.constant 0 : index
    %96 = vector.load %arg6[%c2, %c0_63] : memref<25x256xf32, #tpu.memory_space<vmem>>, vector<1x256xf32>
    %97 = vector.broadcast %96 : vector<1x256xf32> to vector<56x256xf32>
    %98 = arith.mulf %95, %97 : vector<56x256xf32>
    %99 = arith.addf %94, %98 : vector<56x256xf32>
    %c288_64 = arith.constant 288 : index
    %c0_65 = arith.constant 0 : index
    %100 = vector.load %arg13[%c288_64, %c0_65] : memref<480x256xf32, #tpu.memory_space<vmem>>, vector<56x256xf32>
    %c3 = arith.constant 3 : index
    %c0_66 = arith.constant 0 : index
    %101 = vector.load %arg6[%c3, %c0_66] : memref<25x256xf32, #tpu.memory_space<vmem>>, vector<1x256xf32>
    %102 = vector.broadcast %101 : vector<1x256xf32> to vector<56x256xf32>
    %103 = arith.mulf %100, %102 : vector<56x256xf32>
    %104 = arith.addf %99, %103 : vector<56x256xf32>
    %c384_67 = arith.constant 384 : index
    %c0_68 = arith.constant 0 : index
    %105 = vector.load %arg13[%c384_67, %c0_68] : memref<480x256xf32, #tpu.memory_space<vmem>>, vector<56x256xf32>
    %c4 = arith.constant 4 : index
    %c0_69 = arith.constant 0 : index
    %106 = vector.load %arg6[%c4, %c0_69] : memref<25x256xf32, #tpu.memory_space<vmem>>, vector<1x256xf32>
    %107 = vector.broadcast %106 : vector<1x256xf32> to vector<56x256xf32>
    %108 = arith.mulf %105, %107 : vector<56x256xf32>
    %109 = arith.addf %104, %108 : vector<56x256xf32>
    %c8 = arith.constant 8 : index
    %c0_70 = arith.constant 0 : index
    %110 = vector.load %arg13[%c8, %c0_70] : memref<480x256xf32, #tpu.memory_space<vmem>>, vector<56x256xf32>
    %c5 = arith.constant 5 : index
    %c0_71 = arith.constant 0 : index
    %111 = vector.load %arg6[%c5, %c0_71] : memref<25x256xf32, #tpu.memory_space<vmem>>, vector<1x256xf32>
    %112 = vector.broadcast %111 : vector<1x256xf32> to vector<56x256xf32>
    %113 = arith.mulf %110, %112 : vector<56x256xf32>
    %114 = arith.addf %109, %113 : vector<56x256xf32>
    %c104 = arith.constant 104 : index
    %c0_72 = arith.constant 0 : index
    %115 = vector.load %arg13[%c104, %c0_72] : memref<480x256xf32, #tpu.memory_space<vmem>>, vector<56x256xf32>
    %c6 = arith.constant 6 : index
    %c0_73 = arith.constant 0 : index
    %116 = vector.load %arg6[%c6, %c0_73] : memref<25x256xf32, #tpu.memory_space<vmem>>, vector<1x256xf32>
    %117 = vector.broadcast %116 : vector<1x256xf32> to vector<56x256xf32>
    %118 = arith.mulf %115, %117 : vector<56x256xf32>
    %119 = arith.addf %114, %118 : vector<56x256xf32>
    %c200 = arith.constant 200 : index
    %c0_74 = arith.constant 0 : index
    %120 = vector.load %arg13[%c200, %c0_74] : memref<480x256xf32, #tpu.memory_space<vmem>>, vector<56x256xf32>
    %c7 = arith.constant 7 : index
    %c0_75 = arith.constant 0 : index
    %121 = vector.load %arg6[%c7, %c0_75] : memref<25x256xf32, #tpu.memory_space<vmem>>, vector<1x256xf32>
    %122 = vector.broadcast %121 : vector<1x256xf32> to vector<56x256xf32>
    %123 = arith.mulf %120, %122 : vector<56x256xf32>
    %124 = arith.addf %119, %123 : vector<56x256xf32>
    %c296 = arith.constant 296 : index
    %c0_76 = arith.constant 0 : index
    %125 = vector.load %arg13[%c296, %c0_76] : memref<480x256xf32, #tpu.memory_space<vmem>>, vector<56x256xf32>
    %c8_77 = arith.constant 8 : index
    %c0_78 = arith.constant 0 : index
    %126 = vector.load %arg6[%c8_77, %c0_78] : memref<25x256xf32, #tpu.memory_space<vmem>>, vector<1x256xf32>
    %127 = vector.broadcast %126 : vector<1x256xf32> to vector<56x256xf32>
    %128 = arith.mulf %125, %127 : vector<56x256xf32>
    %129 = arith.addf %124, %128 : vector<56x256xf32>
    %c392 = arith.constant 392 : index
    %c0_79 = arith.constant 0 : index
    %130 = vector.load %arg13[%c392, %c0_79] : memref<480x256xf32, #tpu.memory_space<vmem>>, vector<56x256xf32>
    %c9 = arith.constant 9 : index
    %c0_80 = arith.constant 0 : index
    %131 = vector.load %arg6[%c9, %c0_80] : memref<25x256xf32, #tpu.memory_space<vmem>>, vector<1x256xf32>
    %132 = vector.broadcast %131 : vector<1x256xf32> to vector<56x256xf32>
    %133 = arith.mulf %130, %132 : vector<56x256xf32>
    %134 = arith.addf %129, %133 : vector<56x256xf32>
    %c16 = arith.constant 16 : index
    %c0_81 = arith.constant 0 : index
    %135 = vector.load %arg13[%c16, %c0_81] : memref<480x256xf32, #tpu.memory_space<vmem>>, vector<56x256xf32>
    %c10 = arith.constant 10 : index
    %c0_82 = arith.constant 0 : index
    %136 = vector.load %arg6[%c10, %c0_82] : memref<25x256xf32, #tpu.memory_space<vmem>>, vector<1x256xf32>
    %137 = vector.broadcast %136 : vector<1x256xf32> to vector<56x256xf32>
    %138 = arith.mulf %135, %137 : vector<56x256xf32>
    %139 = arith.addf %134, %138 : vector<56x256xf32>
    %c112 = arith.constant 112 : index
    %c0_83 = arith.constant 0 : index
    %140 = vector.load %arg13[%c112, %c0_83] : memref<480x256xf32, #tpu.memory_space<vmem>>, vector<56x256xf32>
    %c11 = arith.constant 11 : index
    %c0_84 = arith.constant 0 : index
    %141 = vector.load %arg6[%c11, %c0_84] : memref<25x256xf32, #tpu.memory_space<vmem>>, vector<1x256xf32>
    %142 = vector.broadcast %141 : vector<1x256xf32> to vector<56x256xf32>
    %143 = arith.mulf %140, %142 : vector<56x256xf32>
    %144 = arith.addf %139, %143 : vector<56x256xf32>
    %c208 = arith.constant 208 : index
    %c0_85 = arith.constant 0 : index
    %145 = vector.load %arg13[%c208, %c0_85] : memref<480x256xf32, #tpu.memory_space<vmem>>, vector<56x256xf32>
    %c12 = arith.constant 12 : index
    %c0_86 = arith.constant 0 : index
    %146 = vector.load %arg6[%c12, %c0_86] : memref<25x256xf32, #tpu.memory_space<vmem>>, vector<1x256xf32>
    %147 = vector.broadcast %146 : vector<1x256xf32> to vector<56x256xf32>
    %148 = arith.mulf %145, %147 : vector<56x256xf32>
    %149 = arith.addf %144, %148 : vector<56x256xf32>
    %c304 = arith.constant 304 : index
    %c0_87 = arith.constant 0 : index
    %150 = vector.load %arg13[%c304, %c0_87] : memref<480x256xf32, #tpu.memory_space<vmem>>, vector<56x256xf32>
    %c13 = arith.constant 13 : index
    %c0_88 = arith.constant 0 : index
    %151 = vector.load %arg6[%c13, %c0_88] : memref<25x256xf32, #tpu.memory_space<vmem>>, vector<1x256xf32>
    %152 = vector.broadcast %151 : vector<1x256xf32> to vector<56x256xf32>
    %153 = arith.mulf %150, %152 : vector<56x256xf32>
    %154 = arith.addf %149, %153 : vector<56x256xf32>
    %c400 = arith.constant 400 : index
    %c0_89 = arith.constant 0 : index
    %155 = vector.load %arg13[%c400, %c0_89] : memref<480x256xf32, #tpu.memory_space<vmem>>, vector<56x256xf32>
    %c14 = arith.constant 14 : index
    %c0_90 = arith.constant 0 : index
    %156 = vector.load %arg6[%c14, %c0_90] : memref<25x256xf32, #tpu.memory_space<vmem>>, vector<1x256xf32>
    %157 = vector.broadcast %156 : vector<1x256xf32> to vector<56x256xf32>
    %158 = arith.mulf %155, %157 : vector<56x256xf32>
    %159 = arith.addf %154, %158 : vector<56x256xf32>
    %c24 = arith.constant 24 : index
    %c0_91 = arith.constant 0 : index
    %160 = vector.load %arg13[%c24, %c0_91] : memref<480x256xf32, #tpu.memory_space<vmem>>, vector<56x256xf32>
    %c15 = arith.constant 15 : index
    %c0_92 = arith.constant 0 : index
    %161 = vector.load %arg6[%c15, %c0_92] : memref<25x256xf32, #tpu.memory_space<vmem>>, vector<1x256xf32>
    %162 = vector.broadcast %161 : vector<1x256xf32> to vector<56x256xf32>
    %163 = arith.mulf %160, %162 : vector<56x256xf32>
    %164 = arith.addf %159, %163 : vector<56x256xf32>
    %c120 = arith.constant 120 : index
    %c0_93 = arith.constant 0 : index
    %165 = vector.load %arg13[%c120, %c0_93] : memref<480x256xf32, #tpu.memory_space<vmem>>, vector<56x256xf32>
    %c16_94 = arith.constant 16 : index
    %c0_95 = arith.constant 0 : index
    %166 = vector.load %arg6[%c16_94, %c0_95] : memref<25x256xf32, #tpu.memory_space<vmem>>, vector<1x256xf32>
    %167 = vector.broadcast %166 : vector<1x256xf32> to vector<56x256xf32>
    %168 = arith.mulf %165, %167 : vector<56x256xf32>
    %169 = arith.addf %164, %168 : vector<56x256xf32>
    %c216 = arith.constant 216 : index
    %c0_96 = arith.constant 0 : index
    %170 = vector.load %arg13[%c216, %c0_96] : memref<480x256xf32, #tpu.memory_space<vmem>>, vector<56x256xf32>
    %c17 = arith.constant 17 : index
    %c0_97 = arith.constant 0 : index
    %171 = vector.load %arg6[%c17, %c0_97] : memref<25x256xf32, #tpu.memory_space<vmem>>, vector<1x256xf32>
    %172 = vector.broadcast %171 : vector<1x256xf32> to vector<56x256xf32>
    %173 = arith.mulf %170, %172 : vector<56x256xf32>
    %174 = arith.addf %169, %173 : vector<56x256xf32>
    %c312 = arith.constant 312 : index
    %c0_98 = arith.constant 0 : index
    %175 = vector.load %arg13[%c312, %c0_98] : memref<480x256xf32, #tpu.memory_space<vmem>>, vector<56x256xf32>
    %c18 = arith.constant 18 : index
    %c0_99 = arith.constant 0 : index
    %176 = vector.load %arg6[%c18, %c0_99] : memref<25x256xf32, #tpu.memory_space<vmem>>, vector<1x256xf32>
    %177 = vector.broadcast %176 : vector<1x256xf32> to vector<56x256xf32>
    %178 = arith.mulf %175, %177 : vector<56x256xf32>
    %179 = arith.addf %174, %178 : vector<56x256xf32>
    %c408 = arith.constant 408 : index
    %c0_100 = arith.constant 0 : index
    %180 = vector.load %arg13[%c408, %c0_100] : memref<480x256xf32, #tpu.memory_space<vmem>>, vector<56x256xf32>
    %c19 = arith.constant 19 : index
    %c0_101 = arith.constant 0 : index
    %181 = vector.load %arg6[%c19, %c0_101] : memref<25x256xf32, #tpu.memory_space<vmem>>, vector<1x256xf32>
    %182 = vector.broadcast %181 : vector<1x256xf32> to vector<56x256xf32>
    %183 = arith.mulf %180, %182 : vector<56x256xf32>
    %184 = arith.addf %179, %183 : vector<56x256xf32>
    %c32 = arith.constant 32 : index
    %c0_102 = arith.constant 0 : index
    %185 = vector.load %arg13[%c32, %c0_102] : memref<480x256xf32, #tpu.memory_space<vmem>>, vector<56x256xf32>
    %c20 = arith.constant 20 : index
    %c0_103 = arith.constant 0 : index
    %186 = vector.load %arg6[%c20, %c0_103] : memref<25x256xf32, #tpu.memory_space<vmem>>, vector<1x256xf32>
    %187 = vector.broadcast %186 : vector<1x256xf32> to vector<56x256xf32>
    %188 = arith.mulf %185, %187 : vector<56x256xf32>
    %189 = arith.addf %184, %188 : vector<56x256xf32>
    %c128 = arith.constant 128 : index
    %c0_104 = arith.constant 0 : index
    %190 = vector.load %arg13[%c128, %c0_104] : memref<480x256xf32, #tpu.memory_space<vmem>>, vector<56x256xf32>
    %c21 = arith.constant 21 : index
    %c0_105 = arith.constant 0 : index
    %191 = vector.load %arg6[%c21, %c0_105] : memref<25x256xf32, #tpu.memory_space<vmem>>, vector<1x256xf32>
    %192 = vector.broadcast %191 : vector<1x256xf32> to vector<56x256xf32>
    %193 = arith.mulf %190, %192 : vector<56x256xf32>
    %194 = arith.addf %189, %193 : vector<56x256xf32>
    %c224 = arith.constant 224 : index
    %c0_106 = arith.constant 0 : index
    %195 = vector.load %arg13[%c224, %c0_106] : memref<480x256xf32, #tpu.memory_space<vmem>>, vector<56x256xf32>
    %c22 = arith.constant 22 : index
    %c0_107 = arith.constant 0 : index
    %196 = vector.load %arg6[%c22, %c0_107] : memref<25x256xf32, #tpu.memory_space<vmem>>, vector<1x256xf32>
    %197 = vector.broadcast %196 : vector<1x256xf32> to vector<56x256xf32>
    %198 = arith.mulf %195, %197 : vector<56x256xf32>
    %199 = arith.addf %194, %198 : vector<56x256xf32>
    %c320 = arith.constant 320 : index
    %c0_108 = arith.constant 0 : index
    %200 = vector.load %arg13[%c320, %c0_108] : memref<480x256xf32, #tpu.memory_space<vmem>>, vector<56x256xf32>
    %c23 = arith.constant 23 : index
    %c0_109 = arith.constant 0 : index
    %201 = vector.load %arg6[%c23, %c0_109] : memref<25x256xf32, #tpu.memory_space<vmem>>, vector<1x256xf32>
    %202 = vector.broadcast %201 : vector<1x256xf32> to vector<56x256xf32>
    %203 = arith.mulf %200, %202 : vector<56x256xf32>
    %204 = arith.addf %199, %203 : vector<56x256xf32>
    %c416 = arith.constant 416 : index
    %c0_110 = arith.constant 0 : index
    %205 = vector.load %arg13[%c416, %c0_110] : memref<480x256xf32, #tpu.memory_space<vmem>>, vector<56x256xf32>
    %c24_111 = arith.constant 24 : index
    %c0_112 = arith.constant 0 : index
    %206 = vector.load %arg6[%c24_111, %c0_112] : memref<25x256xf32, #tpu.memory_space<vmem>>, vector<1x256xf32>
    %207 = vector.broadcast %206 : vector<1x256xf32> to vector<56x256xf32>
    %208 = arith.mulf %205, %207 : vector<56x256xf32>
    %209 = arith.addf %204, %208 : vector<56x256xf32>
    %cst_113 = arith.constant dense<0.000000e+00> : vector<256xf32>
    %210 = vector.multi_reduction <add>, %209, %cst_113 [0] : vector<56x256xf32> to vector<256xf32>
    %211 = vector.shape_cast %210 : vector<256xf32> to vector<1x256xf32>
    %212 = arith.mulf %209, %209 : vector<56x256xf32>
    %cst_114 = arith.constant dense<0.000000e+00> : vector<256xf32>
    %213 = vector.multi_reduction <add>, %212, %cst_114 [0] : vector<56x256xf32> to vector<256xf32>
    %214 = vector.shape_cast %213 : vector<256xf32> to vector<1x256xf32>
    %cst_115 = arith.constant 0.0204081628 : f32
    %215 = vector.broadcast %cst_115 : f32 to vector<1x256xf32>
    %216 = arith.mulf %211, %215 : vector<1x256xf32>
    %cst_116 = arith.constant 0.0204081628 : f32
    %217 = vector.broadcast %cst_116 : f32 to vector<1x256xf32>
    %218 = arith.mulf %214, %217 : vector<1x256xf32>
    %219 = arith.mulf %216, %216 : vector<1x256xf32>
    %220 = arith.subf %218, %219 : vector<1x256xf32>
    %c0_117 = arith.constant 0 : index
    %c0_118 = arith.constant 0 : index
    %221 = vector.load %arg7[%c0_117, %c0_118] : memref<1x256xf32, #tpu.memory_space<vmem>>, vector<1x256xf32>
    %cst_119 = arith.constant 9.99999974E-6 : f32
    %222 = vector.broadcast %cst_119 : f32 to vector<1x256xf32>
    %223 = arith.addf %220, %222 : vector<1x256xf32>
    %224 = math.rsqrt %223 : vector<1x256xf32>
    %225 = arith.mulf %221, %224 : vector<1x256xf32>
    %c0_120 = arith.constant 0 : index
    %c0_121 = arith.constant 0 : index
    %226 = vector.load %arg8[%c0_120, %c0_121] : memref<1x256xf32, #tpu.memory_space<vmem>>, vector<1x256xf32>
    %227 = arith.mulf %216, %225 : vector<1x256xf32>
    %228 = arith.subf %226, %227 : vector<1x256xf32>
    %229 = vector.broadcast %225 : vector<1x256xf32> to vector<56x256xf32>
    %230 = arith.mulf %209, %229 : vector<56x256xf32>
    %231 = vector.broadcast %228 : vector<1x256xf32> to vector<56x256xf32>
    %232 = arith.addf %230, %231 : vector<56x256xf32>
    %cst_122 = arith.constant 0.000000e+00 : f32
    %233 = vector.broadcast %cst_122 : f32 to vector<56x256xf32>
    %234 = arith.maximumf %232, %233 : vector<56x256xf32>
    %c208_123 = arith.constant 208 : index
    %c0_124 = arith.constant 0 : index
    %235 = vector.load %arg2[%c208_123, %c0_124] : memref<480x1xf32, #tpu.memory_space<vmem>>, vector<56x1xf32>
    %236 = vector.broadcast %235 : vector<56x1xf32> to vector<56x256xf32>
    %237 = arith.mulf %234, %236 : vector<56x256xf32>
    %c0_i32 = arith.constant 0 : i32
    %238 = arith.cmpi eq, %arg0, %c0_i32 : i32
    %239 = arith.extui %238 : i1 to i32
    %c0_i32_125 = arith.constant 0 : i32
    %240 = arith.cmpi ne, %239, %c0_i32_125 : i32
    scf.if %240 {
      %cst_134 = arith.constant 0.000000e+00 : f32
      %250 = vector.broadcast %cst_134 : f32 to vector<56x248xf32>
      %c0_135 = arith.constant 0 : index
      %c0_136 = arith.constant 0 : index
      %251 = vector.load %arg12[%c0_135, %c0_136] : memref<56x248xf32, #tpu.memory_space<vmem>>, vector<56x248xf32>
      tpu.vector_store %arg12[%c0_135, %c0_136], %250 {strides = array<i32>} : memref<56x248xf32, #tpu.memory_space<vmem>>, vector<56x248xf32>,
    } else {
    }
    %c0_126 = arith.constant 0 : index
    %c0_127 = arith.constant 0 : index
    %241 = vector.load %arg12[%c0_126, %c0_127] : memref<56x248xf32, #tpu.memory_space<vmem>>, vector<56x248xf32>
    %242 = arith.truncf %237 : vector<56x256xf32> to vector<56x256xbf16>
    %c0_128 = arith.constant 0 : index
    %c0_129 = arith.constant 0 : index
    %243 = vector.load %arg9[%c0_128, %c0_129] : memref<256x248xbf16, #tpu.memory_space<vmem>>, vector<256x248xbf16>
    %cst_130 = arith.constant dense<0.000000e+00> : vector<56x248xf32>
    %244 = tpu.matmul %242, %243, %cst_130 {dimension_numbers = #tpu.dot_dimension_numbers<[1], [0], [0], [1], [0, 0, 1, 1], [], []>} : vector<56x256xbf16>, vector<256x248xbf16>, vector<56x248xf32> -> vector<56x248xf32>
    %245 = arith.addf %241, %244 : vector<56x248xf32>
    %c0_131 = arith.constant 0 : index
    %c0_132 = arith.constant 0 : index
    %246 = vector.load %arg12[%c0_131, %c0_132] : memref<56x248xf32, #tpu.memory_space<vmem>>, vector<56x248xf32>
    tpu.vector_store %arg12[%c0_131, %c0_132], %245 {strides = array<i32>} : memref<56x248xf32, #tpu.memory_space<vmem>>, vector<56x248xf32>,
    %c5_i32 = arith.constant 5 : i32
    %247 = arith.cmpi eq, %arg0, %c5_i32 : i32
    %248 = arith.extui %247 : i1 to i32
    %c0_i32_133 = arith.constant 0 : i32
    %249 = arith.cmpi ne, %248, %c0_i32_133 : i32
    scf.if %249 {
      %c0_134 = arith.constant 0 : index
      %c0_135 = arith.constant 0 : index
      %250 = vector.load %arg12[%c0_134, %c0_135] : memref<56x248xf32, #tpu.memory_space<vmem>>, vector<56x248xf32>
      %cst_136 = arith.constant dense<0.000000e+00> : vector<248xf32>
      %251 = vector.multi_reduction <add>, %250, %cst_136 [0] : vector<56x248xf32> to vector<248xf32>
      %252 = vector.shape_cast %251 : vector<248xf32> to vector<1x248xf32>
      %253 = arith.mulf %250, %250 : vector<56x248xf32>
      %cst_137 = arith.constant dense<0.000000e+00> : vector<248xf32>
      %254 = vector.multi_reduction <add>, %253, %cst_137 [0] : vector<56x248xf32> to vector<248xf32>
      %255 = vector.shape_cast %254 : vector<248xf32> to vector<1x248xf32>
      %cst_138 = arith.constant 0.0204081628 : f32
      %256 = vector.broadcast %cst_138 : f32 to vector<1x248xf32>
      %257 = arith.mulf %252, %256 : vector<1x248xf32>
      %cst_139 = arith.constant 0.0204081628 : f32
      %258 = vector.broadcast %cst_139 : f32 to vector<1x248xf32>
      %259 = arith.mulf %255, %258 : vector<1x248xf32>
      %260 = arith.mulf %257, %257 : vector<1x248xf32>
      %261 = arith.subf %259, %260 : vector<1x248xf32>
      %c0_140 = arith.constant 0 : index
      %c0_141 = arith.constant 0 : index
      %262 = vector.load %arg10[%c0_140, %c0_141] : memref<1x248xf32, #tpu.memory_space<vmem>>, vector<1x248xf32>
      %cst_142 = arith.constant 9.99999974E-6 : f32
      %263 = vector.broadcast %cst_142 : f32 to vector<1x248xf32>
      %264 = arith.addf %261, %263 : vector<1x248xf32>
      %265 = math.rsqrt %264 : vector<1x248xf32>
      %266 = arith.mulf %262, %265 : vector<1x248xf32>
      %267 = vector.broadcast %257 : vector<1x248xf32> to vector<56x248xf32>
      %268 = arith.subf %250, %267 : vector<56x248xf32>
      %269 = vector.broadcast %266 : vector<1x248xf32> to vector<56x248xf32>
      %270 = arith.mulf %268, %269 : vector<56x248xf32>
      %c0_143 = arith.constant 0 : index
      %c0_144 = arith.constant 0 : index
      %271 = vector.load %arg11[%c0_143, %c0_144] : memref<1x248xf32, #tpu.memory_space<vmem>>, vector<1x248xf32>
      %272 = vector.broadcast %271 : vector<1x248xf32> to vector<56x248xf32>
      %273 = arith.addf %270, %272 : vector<56x248xf32>
      %c0_145 = arith.constant 0 : index
      %c0_146 = arith.constant 0 : index
      %274 = vector.load %arg12[%c0_145, %c0_146] : memref<56x248xf32, #tpu.memory_space<vmem>>, vector<56x248xf32>
      tpu.vector_store %arg12[%c0_145, %c0_146], %273 {strides = array<i32>} : memref<56x248xf32, #tpu.memory_space<vmem>>, vector<56x248xf32>,
    } else {
    }
    return
  }
  func.func @transform_0(%arg0: i32) -> (i32, i32) {
    %c0_i32 = arith.constant 0 : i32
    %c0_i32_0 = arith.constant 0 : i32
    %c0_i32_1 = arith.constant 0 : i32
    return %c0_i32, %c0_i32_0 : i32, i32
  }
  func.func @transform_1(%arg0: i32) -> (i32, i32) {
    %c0_i32 = arith.constant 0 : i32
    %c0_i32_0 = arith.constant 0 : i32
    %c0_i32_1 = arith.constant 0 : i32
    return %c0_i32, %c0_i32_0 : i32, i32
  }
  func.func @transform_2(%arg0: i32) -> (i32, i32) {
    %c0_i32 = arith.constant 0 : i32
    %c0_i32_0 = arith.constant 0 : i32
    return %c0_i32, %arg0 : i32, i32
  }
  func.func @transform_3(%arg0: i32) -> (i32, i32) {
    %c0_i32 = arith.constant 0 : i32
    %c0_i32_0 = arith.constant 0 : i32
    return %c0_i32, %arg0 : i32, i32
  }
  func.func @transform_4(%arg0: i32) -> (i32, i32) {
    %c0_i32 = arith.constant 0 : i32
    %c0_i32_0 = arith.constant 0 : i32
    return %c0_i32, %arg0 : i32, i32
  }
  func.func @transform_5(%arg0: i32) -> (i32, i32) {
    %c0_i32 = arith.constant 0 : i32
    %c0_i32_0 = arith.constant 0 : i32
    return %c0_i32, %arg0 : i32, i32
  }
  func.func @transform_6(%arg0: i32) -> (i32, i32) {
    %c0_i32 = arith.constant 0 : i32
    %c0_i32_0 = arith.constant 0 : i32
    return %c0_i32, %arg0 : i32, i32
  }
  func.func @transform_7(%arg0: i32) -> (i32, i32) {
    %c0_i32 = arith.constant 0 : i32
    %c0_i32_0 = arith.constant 0 : i32
    return %c0_i32, %arg0 : i32, i32
  }
  func.func @transform_8(%arg0: i32) -> (i32, i32) {
    %c0_i32 = arith.constant 0 : i32
    %c0_i32_0 = arith.constant 0 : i32
    return %arg0, %c0_i32 : i32, i32
  }
  func.func @transform_9(%arg0: i32) -> (i32, i32) {
    %c0_i32 = arith.constant 0 : i32
    %c0_i32_0 = arith.constant 0 : i32
    %c0_i32_1 = arith.constant 0 : i32
    return %c0_i32, %c0_i32_0 : i32, i32
  }
  func.func @transform_10(%arg0: i32) -> (i32, i32) {
    %c0_i32 = arith.constant 0 : i32
    %c0_i32_0 = arith.constant 0 : i32
    %c0_i32_1 = arith.constant 0 : i32
    return %c0_i32, %c0_i32_0 : i32, i32
  }
  func.func @transform_11(%arg0: i32) -> (i32, i32) {
    %c0_i32 = arith.constant 0 : i32
    %c0_i32_0 = arith.constant 0 : i32
    %c0_i32_1 = arith.constant 0 : i32
    return %c0_i32, %c0_i32_0 : i32, i32
  }
}

</mosaic_0001>

<bundles_post_ra>
// kernel: fused_block.1
= control target key start
LH: loop header
LB: loop body
LE: loop exit
PB: predicated region body
PF: predicated region fallthrough
CT: control target
= control target key end

     0   :  { %s7273_s17 = smov 0   ;;  %s7275_s18 = smov 0   ;;  %s11297_s0 = inlined_call_operand.vmem [shape: bf16[480,248], index: 0, kind: input, shape index: {}]   ;;  %s11298_s1 = inlined_call_operand.vmem [shape: f32[480,1], index: 1, kind: input, shape index: {}]   ;;  %s11299_s2 = inlined_call_operand.vmem [shape: bf16[248,1536], index: 2, kind: input, shape index: {}]   ;;  %s11300_s3 = inlined_call_operand.vmem [shape: f32[1,1536], index: 3, kind: input, shape index: {}]   ;;  %s11301_s4 = inlined_call_operand.vmem [shape: f32[1,1536], index: 4, kind: input, shape index: {}]   ;;  %s11302_s5 = inlined_call_operand.vmem [shape: f32[25,1536], index: 5, kind: input, shape index: {}]   ;;  %s11303_s6 = inlined_call_operand.vmem [shape: f32[1,1536], index: 6, kind: input, shape index: {}]   ;;  %s11304_s7 = inlined_call_operand.vmem [shape: f32[1,1536], index: 7, kind: input, shape index: {}]   ;;  %s11305_s8 = inlined_call_operand.vmem [shape: bf16[1536,248], index: 8, kind: input, shape index: {}]   ;;  %s11306_s9 = inlined_call_operand.vmem [shape: f32[1,248], index: 9, kind: input, shape index: {}]   ;;  %s11307_s10 = inlined_call_operand.vmem [shape: f32[1,248], index: 10, kind: input, shape index: {}]   ;;  %s11308_s11 = inlined_call_operand.vmem [shape: f32[56,248], index: 11, kind: output, shape index: {}]  }
   0x1   :  { %s7277_s19 = smov 0  }
   0x2 LB: > { %s7289_s20 = sadd.s32 4294967295, %s7209_s19   ;;  %s7292_s21 = sadd.s32 1, %s7209_s19   ;;  %s7209_s19 = sphi %s7277_s19, %s11969_s19   ;;  %s7205_s18 = sphi %s7275_s18, %s11968_s18   ;;  %s7201_s17 = sphi %s7273_s17, %s11967_s17  }
   0x3   : > { %s67_s22 = ssub.s32 %s7209_s19, %s7292_s21  ;;  %s70_s23 = sadd.s32 1, %s7205_s18 }
   0x4   : > { %p68_p0 = scmp.eq.s32.totalorder %s67_s22, 0  ;;  %p77_p1 = scmp.ne.s32.totalorder %s7205_s18, %s7201_s17 }
   0x5   : > { %p78_p2 = scmp.eq.s32.totalorder %s7209_s19, 0  ;;  %p5828_p4 = scmp.ge.s32.totalorder %s7209_s19, 6 }
   0x6   : > { %s7301_s24 = scalar_select %p68_p0, %s7205_s18, %s70_s23  }
   0x7   : > { %p7303_p3 = por %p78_p2, %p77_p1  ;;  %334 = sbr.rel (%p5828_p4) target bundleno = 59 (0x3b), region = 32 }
   0xc   : > { %337 = sbr.rel (!%p7303_p3) target bundleno = 47 (0x2f), region = 36  ;;  %s339_s26 = sand.u32 (%p7303_p3), 1, %s7205_s18  }
   0xd   : > { %s6899_s27 = sshll.u32 (%p7303_p3), %s7209_s19, 3  ;;  %s7144_s28 = smul.u32 (%p7303_p3), 248, %s339_s26 }
   0xe   : > { %s7315_s12 = scalar_lea.vmem (%p7303_p3), %s11299_s2, %s6899_s27 }
   0xf   : > { %v433_v0 = vld [vmem:[%s7315_s12] sm:$0xff] (%p7303_p3)  ;;  %v435_v1 = vld [vmem:[%s7315_s12 + $0x30] sm:$0xff] (%p7303_p3)  ;;  %s7320_s13 = scalar_lea.vmem (%p7303_p3), [#allocation3], %s7144_s28 }
  0x10   : > { %v437_v2 = vld [vmem:[%s7315_s12 + $0x60] sm:$0xff] (%p7303_p3)  ;;  %434 = vst [vmem:[%s7320_s13] sm:$0xff] (%p7303_p3), %v433_v0  ;;  %v439_v3 = vld [vmem:[%s7315_s12 + $0x90] sm:$0xff] (%p7303_p3) }
  0x11   : > { %436 = vst [vmem:[%s7320_s13 + $0x8] sm:$0xff] %v435_v1  ;;  %v441_v4 = vld [vmem:[%s7315_s12 + $0xc0] sm:$0xff]  ;;  %v443_v5 = vld [vmem:[%s7315_s12 + $0xf0] sm:$0xff] }
  0x12   : > { %438 = vst [vmem:[%s7320_s13 + $0x10] sm:$0xff] %v437_v2  ;;  %v445_v6 = vld [vmem:[%s7315_s12 + $0x120] sm:$0xff]  ;;  %v447_v7 = vld [vmem:[%s7315_s12 + $0x150] sm:$0xff] }
  0x13   : > { %440 = vst [vmem:[%s7320_s13 + $0x18] sm:$0xff] %v439_v3  ;;  %v449_v8 = vld [vmem:[%s7315_s12 + $0x180] sm:$0xff]  ;;  %v451_v9 = vld [vmem:[%s7315_s12 + $0x1b0] sm:$0xff] }
  0x14   : > { %442 = vst [vmem:[%s7320_s13 + $0x20] sm:$0xff] %v441_v4  ;;  %v453_v10 = vld [vmem:[%s7315_s12 + $0x1e0] sm:$0xff]  ;;  %v455_v11 = vld [vmem:[%s7315_s12 + $0x210] sm:$0xff] }
  0x15   : > { %444 = vst [vmem:[%s7320_s13 + $0x28] sm:$0xff] %v443_v5  ;;  %v457_v12 = vld [vmem:[%s7315_s12 + $0x240] sm:$0xff]  ;;  %v459_v13 = vld [vmem:[%s7315_s12 + $0x270] sm:$0xff] }
  0x16   : > { %446 = vst [vmem:[%s7320_s13 + $0x30] sm:$0xff] %v445_v6  ;;  %v461_v14 = vld [vmem:[%s7315_s12 + $0x2a0] sm:$0xff]  ;;  %v463_v15 = vld [vmem:[%s7315_s12 + $0x2d0] sm:$0xff] }
  0x17   : > { %448 = vst [vmem:[%s7320_s13 + $0x38] sm:$0xff] %v447_v7  ;;  %v465_v16 = vld [vmem:[%s7315_s12 + $0x300] sm:$0xff]  ;;  %v467_v17 = vld [vmem:[%s7315_s12 + $0x330] sm:$0xff] }
  0x18   : > { %450 = vst [vmem:[%s7320_s13 + $0x40] sm:$0xff] %v449_v8  ;;  %v469_v18 = vld [vmem:[%s7315_s12 + $0x360] sm:$0xff]  ;;  %v471_v19 = vld [vmem:[%s7315_s12 + $0x390] sm:$0xff] }
  0x19   : > { %452 = vst [vmem:[%s7320_s13 + $0x48] sm:$0xff] %v451_v9  ;;  %v473_v20 = vld [vmem:[%s7315_s12 + $0x3c0] sm:$0xff]  ;;  %v475_v21 = vld [vmem:[%s7315_s12 + $0x3f0] sm:$0xff] }
  0x1a   : > { %454 = vst [vmem:[%s7320_s13 + $0x50] sm:$0xff] %v453_v10  ;;  %v477_v22 = vld [vmem:[%s7315_s12 + $0x420] sm:$0xff]  ;;  %v479_v23 = vld [vmem:[%s7315_s12 + $0x450] sm:$0xff] }
  0x1b   : > { %456 = vst [vmem:[%s7320_s13 + $0x58] sm:$0xff] %v455_v11  ;;  %v481_v24 = vld [vmem:[%s7315_s12 + $0x480] sm:$0xff]  ;;  %v483_v25 = vld [vmem:[%s7315_s12 + $0x4b0] sm:$0xff] }
  0x1c   : > { %458 = vst [vmem:[%s7320_s13 + $0x60] sm:$0xff] %v457_v12  ;;  %v485_v26 = vld [vmem:[%s7315_s12 + $0x4e0] sm:$0xff]  ;;  %v487_v27 = vld [vmem:[%s7315_s12 + $0x510] sm:$0xff] }
  0x1d   : > { %460 = vst [vmem:[%s7320_s13 + $0x68] sm:$0xff] %v459_v13  ;;  %v489_v28 = vld [vmem:[%s7315_s12 + $0x540] sm:$0xff]  ;;  %v491_v29 = vld [vmem:[%s7315_s12 + $0x570] sm:$0xff] }
  0x1e   : > { %462 = vst [vmem:[%s7320_s13 + $0x70] sm:$0xff] %v461_v14  ;;  %v493_v30 = vld [vmem:[%s7315_s12 + $0x5a0] sm:$0xff] }
  0x1f   : > { %464 = vst [vmem:[%s7320_s13 + $0x78] sm:$0xff] %v463_v15 }
  0x20   : > { %466 = vst [vmem:[%s7320_s13 + $0x80] sm:$0xff] %v465_v16 }
  0x21   : > { %468 = vst [vmem:[%s7320_s13 + $0x88] sm:$0xff] %v467_v17 }
  0x22   : > { %470 = vst [vmem:[%s7320_s13 + $0x90] sm:$0xff] %v469_v18 }
  0x23   : > { %472 = vst [vmem:[%s7320_s13 + $0x98] sm:$0xff] %v471_v19 }
  0x24   : > { %474 = vst [vmem:[%s7320_s13 + $0xa0] sm:$0xff] %v473_v20 }
  0x25   : > { %476 = vst [vmem:[%s7320_s13 + $0xa8] sm:$0xff] %v475_v21 }
  0x26   : > { %478 = vst [vmem:[%s7320_s13 + $0xb0] sm:$0xff] %v477_v22 }
  0x27   : > { %480 = vst [vmem:[%s7320_s13 + $0xb8] sm:$0xff] %v479_v23 }
  0x28   : > { %482 = vst [vmem:[%s7320_s13 + $0xc0] sm:$0xff] %v481_v24 }
  0x29   : > { %484 = vst [vmem:[%s7320_s13 + $0xc8] sm:$0xff] %v483_v25 }
  0x2a   : > { %486 = vst [vmem:[%s7320_s13 + $0xd0] sm:$0xff] %v485_v26 }
  0x2b   : > { %488 = vst [vmem:[%s7320_s13 + $0xd8] sm:$0xff] %v487_v27 }
  0x2c   : > { %490 = vst [vmem:[%s7320_s13 + $0xe0] sm:$0xff] %v489_v28 }
  0x2d   : > { %492 = vst [vmem:[%s7320_s13 + $0xe8] sm:$0xff] %v491_v29 }
  0x2e   : > { %494 = vst [vmem:[%s7320_s13 + $0xf0] sm:$0xff] %v493_v30 }
  0x2f PF: > { %516 = sbr.rel (!%p7303_p3) target bundleno = 59 (0x3b), region = 82  ;;  %s518_s14 = sand.u32 (%p7303_p3), 1, %s7205_s18  }
  0x30   : > { %s6900_s15 = sshll.u32 (%p7303_p3), %s7209_s19, 4  ;;  %s5831_s16 = sshll.u32 (%p7303_p3), %s518_s14, 6 }
  0x31   : > { %s523_s26 = scalar_lea.vmem (%p7303_p3), %s11302_s5, %s6900_s15  ;;  %s520_s27 = scalar_lea.vmem (%p7303_p3), [#allocation4], %s5831_s16 }
  0x32   : > { %v536_v31 = vld [vmem:[%s523_s26] sm:$0xff] (%p7303_p3)  ;;  %v538_v32 = vld [vmem:[%s523_s26 + $0x8] sm:$0xff] (%p7303_p3) }
  0x33   : > { %v540_v33 = vld [vmem:[%s523_s26 + $0x60] sm:$0xff] (%p7303_p3)  ;;  %537 = vst [vmem:[%s520_s27] sm:$0xff] (%p7303_p3), %v536_v31  ;;  %v542_v34 = vld [vmem:[%s523_s26 + $0x68] sm:$0xff] (%p7303_p3) }
  0x34   : > { %539 = vst [vmem:[%s520_s27 + $0x8] sm:$0xff] %v538_v32  ;;  %v544_v35 = vld [vmem:[%s523_s26 + $0xc0] sm:$0xff]  ;;  %v546_v36 = vld [vmem:[%s523_s26 + $0xc8] sm:$0xff] }
  0x35   : > { %541 = vst [vmem:[%s520_s27 + $0x10] sm:$0xff] %v540_v33  ;;  %v548_v37 = vld [vmem:[%s523_s26 + $0x120] sm:$0xff]  ;;  %v550_v38 = vld [vmem:[%s523_s26 + $0x128] sm:$0xff] }
  0x36   : > { %543 = vst [vmem:[%s520_s27 + $0x18] sm:$0xff] %v542_v34 }
  0x37   : > { %545 = vst [vmem:[%s520_s27 + $0x20] sm:$0xff] %v544_v35 }
  0x38   : > { %547 = vst [vmem:[%s520_s27 + $0x28] sm:$0xff] %v546_v36 }
  0x39   : > { %549 = vst [vmem:[%s520_s27 + $0x30] sm:$0xff] %v548_v37 }
  0x3a   : > { %551 = vst [vmem:[%s520_s27 + $0x38] sm:$0xff] %v550_v38 }
  0x3b PF: > { %p5834_p5 = scmp.ge.s32.totalorder %s7209_s19, 1  ;;  %p582_p6 = scmp.lt.s32.totalorder %s7209_s19, 7 }
  0x3d   : > { %p583_p7 = pnand %p5834_p5, %p582_p6 }
  0x3f   : > { %586 = sbr.rel (%p583_p7) target bundleno = 1272 (0x4f8), region = 117 }
  0x44   : > { %s589_s25 = sand.u32 1, %s7201_s17   ;;  %s5840_s28 = sshll.u32 %s7289_s20, 5  ;;  %vm956_vm0 = vcmask 1043456   ;;  %vm937_vm1 = vcmask 982016   ;;  %vm1245_vm7 = vcmask 1040384  }
  0x45   : > { %s7145_s29 = smul.u32 248, %s589_s25  ;;  %p679_p8 = scmp.lt.s32.totalorder %s5840_s28, 191 }
  0x46   : > { %s5836_s12 = sshll.u32 %s7289_s20, 1  ;;  %s5835_s13 = sshll.u32 %s589_s25, 6 }
  0x47   : > { %s7394_s30 = scalar_lea.vmem [#allocation3], %s7145_s29  ;;  %s11971_s28 = smov (!%p679_p8, %s5840_s28), 191 }
  0x48   : > { %v6928_v39 = vld [vmem:[%s7394_s30 + $0x74] sm:$0xf]  ;;  %v5951_v40 = vld [vmem:[%s7394_s30 + $0x78] sm:$0xf0]  ;;  %v5949_v43 = vld [vmem:[%s7394_s30 + $0x70] sm:$0xf] }
  0x49   : > { %v727_v41 = vld [vmem:[%s7394_s30 + $0xf0] sm:$0xff]  ;;  %v5954_v42 = vor.u32 %v6928_v39, %v5951_v40  ;;  %v6929_v44 = vld [vmem:[%s7394_s30 + $0x74] sm:$0xf0]  ;;  %v6926_v47 = vld [vmem:[%s7394_s30 + $0x64] sm:$0xf]  ;;  %s6901_s19 = sshll.u32 %s11971_s28, 3 }
  0x4a   : > { %v873_v45 = vunpack.c.l.b16 %v727_v41  ;;  %v874_v46 = vunpack.c.h.b16 %v727_v41  ;;  %v5950_v48 = vor.u32 %v6929_v44, %v5949_v43  ;;  %v5943_v49 = vld [vmem:[%s7394_s30 + $0x68] sm:$0xf0]  ;;  %v5941_v50 = vld [vmem:[%s7394_s30 + $0x60] sm:$0xf]  ;;  %s7407_s14 = scalar_lea.vmem %s11305_s8, %s6901_s19  ;;  %v6927_v54 = vld [vmem:[%s7394_s30 + $0x64] sm:$0xf0] }
  0x4b   : > { %1041 = vmatpush.bf16.msra.mxu2 %v5954_v42  ;;  %v5946_v53 = vor.u32 %v6926_v47, %v5943_v49  ;;  %v6005_v55 = vld [vmem:[%s7394_s30 + $0xe0] sm:$0xf]  ;;  %v6943_v56 = vld [vmem:[%s7394_s30 + $0xe4] sm:$0xf0]  ;;  %v5942_v57 = vor.u32 %v6927_v54, %v5941_v50  ;;  %v6942_v58 = vld [vmem:[%s7394_s30 + $0xe4] sm:$0xf] }
  0x4c   : > { %v905_v51 = vpack.c.b16 %v873_v45, %v873_v45  ;;  %v906_v52 = vpack.c.b16 %v874_v46, %v874_v46  ;;  %963 = vmatpush.bf16.msra.mxu0 %v5950_v48  ;;  %v6007_v59 = vld [vmem:[%s7394_s30 + $0xe8] sm:$0xf0]  ;;  %v6924_v60 = vld [vmem:[%s7394_s30 + $0x54] sm:$0xf]  ;;  %v5935_v63 = vld [vmem:[%s7394_s30 + $0x58] sm:$0xf0]  ;;  %v6006_v1 = vor.u32 %v6943_v56, %v6005_v55 }
  0x4d   : > { %v5933_v0 = vld [vmem:[%s7394_s30 + $0x50] sm:$0xf]  ;;  %v6010_v2 = vor.u32 %v6942_v58, %v6007_v59  ;;  %v6925_v3 = vld [vmem:[%s7394_s30 + $0x54] sm:$0xf0]  ;;  %v5938_v5 = vor.u32 %v6924_v60, %v5935_v63  ;;  %v6940_v7 = vld [vmem:[%s7394_s30 + $0xd4] sm:$0xf] }
  0x4e   : > { %v7416_v61 = vsel %vm956_vm0, %v905_v51, 0  ;;  %v7419_v62 = vsel %vm956_vm0, %v906_v52, 0  ;;  %v5997_v4 = vld [vmem:[%s7394_s30 + $0xd0] sm:$0xf]  ;;  %v6941_v6 = vld [vmem:[%s7394_s30 + $0xd4] sm:$0xf0]  ;;  %v5934_v9 = vor.u32 %v6925_v3, %v5933_v0 }
  0x4f   : > { %1002 = vmatpush.bf16.msra.mxu1 %v7416_v61  ;;  %1080 = vmatpush.bf16.msra.mxu3 %v7419_v62  ;;  %v5999_v8 = vld [vmem:[%s7394_s30 + $0xd8] sm:$0xf0]  ;;  %v6922_v10 = vld [vmem:[%s7394_s30 + $0x44] sm:$0xf]  ;;  %v5927_v11 = vld [vmem:[%s7394_s30 + $0x48] sm:$0xf0]  ;;  %v5998_v14 = vor.u32 %v6941_v6, %v5997_v4 }
  0x50   : > { %1042 = vmatpush.bf16.msra.mxu2 %v5946_v53  ;;  %964 = vmatpush.bf16.msra.mxu0 %v5942_v57  ;;  %v5925_v12 = vld [vmem:[%s7394_s30 + $0x40] sm:$0xf]  ;;  %v6923_v13 = vld [vmem:[%s7394_s30 + $0x44] sm:$0xf0]  ;;  %v6002_v15 = vor.u32 %v6940_v7, %v5999_v8  ;;  %v5930_v17 = vor.u32 %v6922_v10, %v5927_v11  ;;  %v6938_v19 = vld [vmem:[%s7394_s30 + $0xc4] sm:$0xf] }
  0x51   : > { %v5989_v16 = vld [vmem:[%s7394_s30 + $0xc0] sm:$0xf]  ;;  %v6939_v18 = vld [vmem:[%s7394_s30 + $0xc4] sm:$0xf0]  ;;  %v5991_v20 = vld [vmem:[%s7394_s30 + $0xc8] sm:$0xf0]  ;;  %v5926_v21 = vor.u32 %v6923_v13, %v5925_v12 }
  0x52   : > { %v6920_v22 = vld [vmem:[%s7394_s30 + $0x34] sm:$0xf]  ;;  %v5919_v23 = vld [vmem:[%s7394_s30 + $0x38] sm:$0xf0]  ;;  %v5917_v24 = vld [vmem:[%s7394_s30 + $0x30] sm:$0xf]  ;;  %v5990_v26 = vor.u32 %v6939_v18, %v5989_v16  ;;  %v5994_v27 = vor.u32 %v6938_v19, %v5991_v20 }
  0x53   : > { %1003 = vmatpush.bf16.msra.mxu1 %v6006_v1  ;;  %1081 = vmatpush.bf16.msra.mxu3 %v6010_v2  ;;  %v6921_v25 = vld [vmem:[%s7394_s30 + $0x34] sm:$0xf0]  ;;  %v5981_v28 = vld [vmem:[%s7394_s30 + $0xb0] sm:$0xf]  ;;  %v5922_v29 = vor.u32 %v6920_v22, %v5919_v23  ;;  %v6936_v31 = vld [vmem:[%s7394_s30 + $0xb4] sm:$0xf] }
  0x54   : > { %1043 = vmatpush.bf16.msra.mxu2 %v5938_v5  ;;  %965 = vmatpush.bf16.msra.mxu0 %v5934_v9  ;;  %v6937_v30 = vld [vmem:[%s7394_s30 + $0xb4] sm:$0xf0]  ;;  %v5983_v32 = vld [vmem:[%s7394_s30 + $0xb8] sm:$0xf0]  ;;  %v5918_v33 = vor.u32 %v6921_v25, %v5917_v24  ;;  %v6918_v34 = vld [vmem:[%s7394_s30 + $0x24] sm:$0xf] }
  0x55   : > { %v5911_v35 = vld [vmem:[%s7394_s30 + $0x28] sm:$0xf0]  ;;  %v5909_v36 = vld [vmem:[%s7394_s30 + $0x20] sm:$0xf]  ;;  %v6919_v37 = vld [vmem:[%s7394_s30 + $0x24] sm:$0xf0]  ;;  %v5982_v38 = vor.u32 %v6937_v30, %v5981_v28  ;;  %v5986_v39 = vor.u32 %v6936_v31, %v5983_v32 }
  0x56   : > { %v5973_v40 = vld [vmem:[%s7394_s30 + $0xa0] sm:$0xf]  ;;  %v5914_v41 = vor.u32 %v6918_v34, %v5911_v35  ;;  %v6935_v42 = vld [vmem:[%s7394_s30 + $0xa4] sm:$0xf0]  ;;  %v6934_v43 = vld [vmem:[%s7394_s30 + $0xa4] sm:$0xf]  ;;  %v5910_v45 = vor.u32 %v6919_v37, %v5909_v36 }
  0x57   : > { %1004 = vmatpush.bf16.msra.mxu1 %v5998_v14  ;;  %1082 = vmatpush.bf16.msra.mxu3 %v6002_v15  ;;  %v5975_v44 = vld [vmem:[%s7394_s30 + $0xa8] sm:$0xf0]  ;;  %v6916_v46 = vld [vmem:[%s7394_s30 + $0x14] sm:$0xf]  ;;  %v5903_v47 = vld [vmem:[%s7394_s30 + $0x18] sm:$0xf0]  ;;  %v5974_v50 = vor.u32 %v6935_v42, %v5973_v40 }
  0x58   : > { %1044 = vmatpush.bf16.msra.mxu2 %v5930_v17  ;;  %966 = vmatpush.bf16.msra.mxu0 %v5926_v21  ;;  %v5901_v48 = vld [vmem:[%s7394_s30 + $0x10] sm:$0xf]  ;;  %v6917_v49 = vld [vmem:[%s7394_s30 + $0x14] sm:$0xf0]  ;;  %v5978_v51 = vor.u32 %v6934_v43, %v5975_v44  ;;  %v5906_v53 = vor.u32 %v6916_v46, %v5903_v47  ;;  %v6932_v55 = vld [vmem:[%s7394_s30 + $0x94] sm:$0xf] }
  0x59   : > { %v5965_v52 = vld [vmem:[%s7394_s30 + $0x90] sm:$0xf]  ;;  %v6933_v54 = vld [vmem:[%s7394_s30 + $0x94] sm:$0xf0]  ;;  %v5967_v56 = vld [vmem:[%s7394_s30 + $0x98] sm:$0xf0]  ;;  %v5902_v57 = vor.u32 %v6917_v49, %v5901_v48 }
  0x5a   : > { %v6914_v58 = vld [vmem:[%s7394_s30 + $0x4] sm:$0xf]  ;;  %v5895_v59 = vld [vmem:[%s7394_s30 + $0x8] sm:$0xf0]  ;;  %v5893_v60 = vld [vmem:[%s7394_s30] sm:$0xf]  ;;  %v5966_v2 = vor.u32 %v6933_v54, %v5965_v52  ;;  %v5970_v3 = vor.u32 %v6932_v55, %v5967_v56 }
  0x5b   : > { %1005 = vmatpush.bf16.msra.mxu1 %v5990_v26  ;;  %1083 = vmatpush.bf16.msra.mxu3 %v5994_v27  ;;  %v6915_v63 = vld [vmem:[%s7394_s30 + $0x4] sm:$0xf0]  ;;  %v6970_v0 = vld [vmem:[%s7394_s30 + $0x74] sm:$0xf]  ;;  %v6131_v1 = vld [vmem:[%s7394_s30 + $0x78] sm:$0xf0]  ;;  %v5898_v7 = vor.u32 %v6914_v58, %v5895_v59 }
  0x5c   : > { %1045 = vmatpush.bf16.msra.mxu2 %v5922_v29  ;;  %967 = vmatpush.bf16.msra.mxu0 %v5918_v33  ;;  %v5845_v4 = vld [vmem:[%s11297_s0 + $0xc0] sm:$0xf]  ;;  %v6129_v5 = vld [vmem:[%s7394_s30 + $0x70] sm:$0xf]  ;;  %v6971_v6 = vld [vmem:[%s7394_s30 + $0x74] sm:$0xf0]  ;;  %v5894_v11 = vor.u32 %v6915_v63, %v5893_v60  ;;  %v6134_v14 = vor.u32 %v6970_v0, %v6131_v1 }
  0x5d   : > { %v5957_v8 = vld [vmem:[%s7394_s30 + $0x80] sm:$0xf]  ;;  %v6931_v9 = vld [vmem:[%s7394_s30 + $0x84] sm:$0xf0]  ;;  %v6930_v12 = vld [vmem:[%s7394_s30 + $0x84] sm:$0xf]  ;;  %v6130_v16 = vor.u32 %v6971_v6, %v6129_v5 }
  0x5e   : > { %v6903_v10 = vld [vmem:[%s11297_s0 + $0xc4] sm:$0xf0]  ;;  %v5959_v13 = vld [vmem:[%s7394_s30 + $0x88] sm:$0xf0]  ;;  %v5958_v17 = vor.u32 %v6931_v9, %v5957_v8  ;;  %v6968_v20 = vld [vmem:[%s7394_s30 + $0x64] sm:$0xf] }
  0x5f   : > { %1006 = vmatpush.bf16.msra.mxu1 %v5982_v38  ;;  %1084 = vmatpush.bf16.msra.mxu3 %v5986_v39  ;;  %v6902_v15 = vld [vmem:[%s11297_s0 + $0xc4] sm:$0xf]  ;;  %v5846_v18 = vor.u32 %v6903_v10, %v5845_v4  ;;  %v5847_v19 = vld [vmem:[%s11297_s0 + $0xc8] sm:$0xf0]  ;;  %v5962_v22 = vor.u32 %v6930_v12, %v5959_v13  ;;  %v6121_v23 = vld [vmem:[%s7394_s30 + $0x60] sm:$0xf] }
  0x60   : > { %1046 = vmatpush.bf16.msra.mxu2 %v5914_v41  ;;  %968 = vmatpush.bf16.msra.mxu0 %v5910_v45  ;;  %v6123_v21 = vld [vmem:[%s7394_s30 + $0x68] sm:$0xf0]  ;;  %v6969_v24 = vld [vmem:[%s7394_s30 + $0x64] sm:$0xf0]  ;;  %v6984_v25 = vld [vmem:[%s7394_s30 + $0xe4] sm:$0xf]  ;;  %v5850_v26 = vor.u32 %v6902_v15, %v5847_v19 }
  0x61   : > { %v6126_v27 = vor.u32 %v6968_v20, %v6123_v21  ;;  %v6187_v28 = vld [vmem:[%s7394_s30 + $0xe8] sm:$0xf0]  ;;  %v6185_v29 = vld [vmem:[%s7394_s30 + $0xe0] sm:$0xf]  ;;  %v6985_v30 = vld [vmem:[%s7394_s30 + $0xe4] sm:$0xf0]  ;;  %v6122_v31 = vor.u32 %v6969_v24, %v6121_v23 }
  0x62   : > { %v6966_v32 = vld [vmem:[%s7394_s30 + $0x54] sm:$0xf]  ;;  %v6115_v33 = vld [vmem:[%s7394_s30 + $0x58] sm:$0xf0]  ;;  %v6190_v34 = vor.u32 %v6984_v25, %v6187_v28  ;;  %v6186_v35 = vor.u32 %v6985_v30, %v6185_v29  ;;  %v6113_v39 = vld [vmem:[%s7394_s30 + $0x50] sm:$0xf] }
  0x63   : > { %1007 = vmatpush.bf16.msra.mxu1 %v5974_v50  ;;  %1085 = vmatpush.bf16.msra.mxu3 %v5978_v51  ;;  %v6118_v36 = vor.u32 %v6966_v32, %v6115_v33  ;;  %v6982_v37 = vld [vmem:[%s7394_s30 + $0xd4] sm:$0xf]  ;;  %v6179_v38 = vld [vmem:[%s7394_s30 + $0xd8] sm:$0xf0]  ;;  %v6967_v40 = vld [vmem:[%s7394_s30 + $0x54] sm:$0xf0] }
  0x64   : > { %1047 = vmatpush.bf16.msra.mxu2 %v5906_v53  ;;  %969 = vmatpush.bf16.msra.mxu0 %v5902_v57  ;;  %v6177_v41 = vld [vmem:[%s7394_s30 + $0xd0] sm:$0xf]  ;;  %v6114_v42 = vor.u32 %v6967_v40, %v6113_v39  ;;  %v6983_v43 = vld [vmem:[%s7394_s30 + $0xd4] sm:$0xf0]  ;;  %v6964_v44 = vld [vmem:[%s7394_s30 + $0x44] sm:$0xf]  ;;  %v6182_v46 = vor.u32 %v6982_v37, %v6179_v38 }
  0x65   : > { %v6107_v45 = vld [vmem:[%s7394_s30 + $0x48] sm:$0xf0]  ;;  %v6178_v47 = vor.u32 %v6983_v43, %v6177_v41  ;;  %v6980_v48 = vld [vmem:[%s7394_s30 + $0xc4] sm:$0xf]  ;;  %v6105_v50 = vld [vmem:[%s7394_s30 + $0x40] sm:$0xf] }
  0x66   : > { %v6171_v49 = vld [vmem:[%s7394_s30 + $0xc8] sm:$0xf0]  ;;  %v6110_v51 = vor.u32 %v6964_v44, %v6107_v45  ;;  %v6965_v52 = vld [vmem:[%s7394_s30 + $0x44] sm:$0xf0]  ;;  %v6169_v53 = vld [vmem:[%s7394_s30 + $0xc0] sm:$0xf] }
  0x67   : > { %1008 = vmatpush.bf16.msra.mxu1 %v5966_v2  ;;  %1086 = vmatpush.bf16.msra.mxu3 %v5970_v3  ;;  %v6981_v54 = vld [vmem:[%s7394_s30 + $0xc4] sm:$0xf0]  ;;  %v6106_v55 = vor.u32 %v6965_v52, %v6105_v50  ;;  %v5853_v56 = vld [vmem:[%s11297_s0 + $0xd0] sm:$0xf]  ;;  %v6905_v57 = vld [vmem:[%s11297_s0 + $0xd4] sm:$0xf0]  ;;  %v6174_v58 = vor.u32 %v6980_v48, %v6171_v49 }
  0x68   : > { %1048 = vmatpush.bf16.msra.mxu2 %v5898_v7  ;;  %970 = vmatpush.bf16.msra.mxu0 %v5894_v11  ;;  %v6170_v59 = vor.u32 %v6981_v54, %v6169_v53  ;;  %v5854_v60 = vor.u32 %v6905_v57, %v5853_v56  ;;  %v6904_v63 = vld [vmem:[%s11297_s0 + $0xd4] sm:$0xf]  ;;  %v5855_v0 = vld [vmem:[%s11297_s0 + $0xd8] sm:$0xf0]  ;;  %v6097_v7 = vld [vmem:[%s7394_s30 + $0x30] sm:$0xf] }
  0x69   : > { %v5858_v1 = vor.u32 %v6904_v63, %v5855_v0  ;;  %v6962_v2 = vld [vmem:[%s7394_s30 + $0x34] sm:$0xf]  ;;  %v6099_v3 = vld [vmem:[%s7394_s30 + $0x38] sm:$0xf0]  ;;  %v6963_v8 = vld [vmem:[%s7394_s30 + $0x34] sm:$0xf0] }
  0x6a   : > { %v6978_v4 = vld [vmem:[%s7394_s30 + $0xb4] sm:$0xf]  ;;  %v6102_v5 = vor.u32 %v6962_v2, %v6099_v3  ;;  %v6163_v6 = vld [vmem:[%s7394_s30 + $0xb8] sm:$0xf0]  ;;  %v6098_v10 = vor.u32 %v6963_v8, %v6097_v7  ;;  %v6161_v11 = vld [vmem:[%s7394_s30 + $0xb0] sm:$0xf] }
  0x6b   : > { %1009 = vmatpush.bf16.msra.mxu1 %v5958_v17  ;;  %1049 = vmatmul.bf16.vlgmr.msra.gmra.mxu2 %v5846_v18  ;;  %v6166_v9 = vor.u32 %v6978_v4, %v6163_v6  ;;  %v6979_v12 = vld [vmem:[%s7394_s30 + $0xb4] sm:$0xf0]  ;;  %v6960_v13 = vld [vmem:[%s7394_s30 + $0x24] sm:$0xf]  ;;  %v6091_v15 = vld [vmem:[%s7394_s30 + $0x28] sm:$0xf0] }
  0x6c   : > { %1814 = vmatpush.bf16.msrb.mxu2 %v6134_v14  ;;  %1736 = vmatpush.bf16.msrb.mxu0 %v6130_v16  ;;  %v6162_v14 = vor.u32 %v6979_v12, %v6161_v11  ;;  %v6976_v16 = vld [vmem:[%s7394_s30 + $0xa4] sm:$0xf]  ;;  %v6155_v17 = vld [vmem:[%s7394_s30 + $0xa8] sm:$0xf0]  ;;  %v5861_v20 = vld [vmem:[%s11297_s0 + $0xe0] sm:$0xf] }
  0x6d   : > { %1087 = vmatpush.bf16.msra.mxu3 %v5962_v22  ;;  %971 = vmatmul.bf16.vlgmr.msra.gmra.mxu0 %v5846_v18  ;;  %v6094_v18 = vor.u32 %v6960_v13, %v6091_v15  ;;  %v6158_v19 = vor.u32 %v6976_v16, %v6155_v17  ;;  %v6907_v21 = vld [vmem:[%s11297_s0 + $0xe4] sm:$0xf0]  ;;  %v6906_v23 = vld [vmem:[%s11297_s0 + $0xe4] sm:$0xf]  ;;  %v5863_v24 = vld [vmem:[%s11297_s0 + $0xe8] sm:$0xf0] }
  0x6e   : > { %6011 = vmatmul.msk.bf16.vlgmr.msra.gmra.mxu1 %vm937_vm1, %v5850_v26  ;;  %v5862_v22 = vor.u32 %v6907_v21, %v5861_v20  ;;  %v5866_v25 = vor.u32 %v6906_v23, %v5863_v24  ;;  %v6153_v28 = vld [vmem:[%s7394_s30 + $0xa0] sm:$0xf]  ;;  %v6977_v30 = vld [vmem:[%s7394_s30 + $0xa4] sm:$0xf0]  ;;  %v6083_v32 = vld [vmem:[%s7394_s30 + $0x18] sm:$0xf0] }
  0x6f   : > { %1775 = vmatpush.bf16.msrb.mxu1 %v7416_v61  ;;  %v6154_v33 = vor.u32 %v6977_v30, %v6153_v28  ;;  %v5869_v38 = vld [vmem:[%s11297_s0 + $0xf0] sm:$0xf]  ;;  %v6909_v39 = vld [vmem:[%s11297_s0 + $0xf4] sm:$0xf0]  ;;  %v6908_v41 = vld [vmem:[%s11297_s0 + $0xf4] sm:$0xf] }
  0x70   : > { %1815 = vmatpush.bf16.msrb.mxu2 %v6126_v27  ;;  %6017 = vmatmul.msk.bf16.vlgmr.msra.gmra.mxu3 %vm937_vm1, %v5850_v26  ;;  %v6089_v26 = vld [vmem:[%s7394_s30 + $0x20] sm:$0xf]  ;;  %v6961_v27 = vld [vmem:[%s7394_s30 + $0x24] sm:$0xf0]  ;;  %v5870_v40 = vor.u32 %v6909_v39, %v5869_v38  ;;  %v6081_v44 = vld [vmem:[%s7394_s30 + $0x10] sm:$0xf] }
  0x71   : > { %1853 = vmatpush.bf16.msrb.mxu3 %v7419_v62  ;;  %1737 = vmatpush.bf16.msrb.mxu0 %v6122_v31  ;;  %v6090_v29 = vor.u32 %v6961_v27, %v6089_v26  ;;  %v6958_v31 = vld [vmem:[%s7394_s30 + $0x14] sm:$0xf]  ;;  %v6959_v45 = vld [vmem:[%s7394_s30 + $0x14] sm:$0xf0]  ;;  %v6956_v49 = vld [vmem:[%s7394_s30 + $0x4] sm:$0xf] }
  0x72   : > { %v6975_v48 = vld [vmem:[%s7394_s30 + $0x94] sm:$0xf0]  ;;  %v6075_v50 = vld [vmem:[%s7394_s30 + $0x8] sm:$0xf0]  ;;  %v6972_v53 = vld [vmem:[%s7394_s30 + $0x84] sm:$0xf] }
  0x73   : > { %1776 = vmatpush.bf16.msrb.mxu1 %v6186_v35  ;;  %v6974_v35 = vld [vmem:[%s7394_s30 + $0x94] sm:$0xf]  ;;  %v6078_v52 = vor.u32 %v6956_v49, %v6075_v50  ;;  %v6139_v54 = vld [vmem:[%s7394_s30 + $0x88] sm:$0xf0]  ;;  %v6957_v57 = vld [vmem:[%s7394_s30 + $0x4] sm:$0xf0] }
  0x74   : > { %1816 = vmatpush.bf16.msrb.mxu2 %v6118_v36  ;;  %v6147_v36 = vld [vmem:[%s7394_s30 + $0x98] sm:$0xf0]  ;;  %v6142_v56 = vor.u32 %v6972_v53, %v6139_v54  ;;  %v5877_v0 = vld [vmem:[%s11297_s0 + $0x100] sm:$0xf]  ;;  %v6910_v3 = vld [vmem:[%s11297_s0 + $0x104] sm:$0xf] }
  0x75   : > { %1854 = vmatpush.bf16.msrb.mxu3 %v6190_v34  ;;  %1738 = vmatpush.bf16.msrb.mxu0 %v6114_v42  ;;  %v6086_v34 = vor.u32 %v6958_v31, %v6083_v32  ;;  %v6150_v37 = vor.u32 %v6974_v35, %v6147_v36  ;;  %v5871_v42 = vld [vmem:[%s11297_s0 + $0xf8] sm:$0xf0]  ;;  %v5879_v4 = vld [vmem:[%s11297_s0 + $0x108] sm:$0xf0]  ;;  %v6309_v7 = vld [vmem:[%s7394_s30 + $0x70] sm:$0xf] }
  0x76   : > { %v5874_v43 = vor.u32 %v6908_v41, %v5871_v42  ;;  %v6311_v6 = vld [vmem:[%s7394_s30 + $0x78] sm:$0xf0]  ;;  %v6303_v11 = vld [vmem:[%s7394_s30 + $0x68] sm:$0xf0]  ;;  %v7026_v13 = vld [vmem:[%s7394_s30 + $0xe4] sm:$0xf] }
  0x77   : > { %1777 = vmatpush.bf16.msrb.mxu1 %v6178_v47  ;;  %v6082_v47 = vor.u32 %v6959_v45, %v6081_v44  ;;  %v5885_v16 = vld [vmem:[%s11297_s0 + $0x110] sm:$0xf]  ;;  %v6913_v17 = vld [vmem:[%s11297_s0 + $0x114] sm:$0xf0]  ;;  %v5887_v20 = vld [vmem:[%s11297_s0 + $0x118] sm:$0xf0] }
  0x78   : > { %1817 = vmatpush.bf16.msrb.mxu2 %v6110_v51  ;;  %v7011_v23 = vld [vmem:[%s7394_s30 + $0x64] sm:$0xf0]  ;;  %v6365_v24 = vld [vmem:[%s7394_s30 + $0xe0] sm:$0xf]  ;;  %v7008_v27 = vld [vmem:[%s7394_s30 + $0x54] sm:$0xf] }
  0x79   : > { %1855 = vmatpush.bf16.msrb.mxu3 %v6182_v46  ;;  %1739 = vmatpush.bf16.msrb.mxu0 %v6106_v55  ;;  %v6145_v46 = vld [vmem:[%s7394_s30 + $0x90] sm:$0xf]  ;;  %v6073_v55 = vld [vmem:[%s7394_s30] sm:$0xf]  ;;  %v7027_v26 = vld [vmem:[%s7394_s30 + $0xe4] sm:$0xf0] }
  0x7a   : > { %v6146_v51 = vor.u32 %v6975_v48, %v6145_v46  ;;  %v6295_v28 = vld [vmem:[%s7394_s30 + $0x58] sm:$0xf0]  ;;  %v7024_v31 = vld [vmem:[%s7394_s30 + $0xd4] sm:$0xf]  ;;  %v7211_v35 = vmov 0   ;;  %p658_p9 = scmp.lt.s32.totalorder %s5836_s12, 11 }
  0x7b   : > { %1778 = vmatpush.bf16.msrb.mxu1 %v6170_v59  ;;  %1054 = vmatmul.bf16.gmra.mxu2 %v5854_v60  ;;  %v6973_v59 = vld [vmem:[%s7394_s30 + $0x84] sm:$0xf0]  ;;  %v6298_v30 = vor.u32 %v7008_v27, %v6295_v28  ;;  %v6359_v32 = vld [vmem:[%s7394_s30 + $0xd8] sm:$0xf0]  ;;  %v6944_v39 = vld [vmem:[%s11297_s0 + $0x4] sm:$0xf] }
  0x7c   : > { %1818 = vmatpush.bf16.msrb.mxu2 %v6102_v5  ;;  %v5882_v5 = vor.u32 %v6910_v3, %v5879_v4  ;;  %7172 = vset.pattern.permute.xlu0 %v7211_v35  ;;  %v6025_v36 = vld [vmem:[%s11297_s0] sm:$0xf]  ;;  %v1342_v42 = vld [vmem:[%s11298_s1 + $0xd0] sm:$0xff]  ;;  %v1341_v48 = vld [vmem:[%s11298_s1 + $0xc8] sm:$0xff]  ;;  %s11973_s12 = smov (!%p658_p9, %s5836_s12), 11  ;;  %p6767_p10 = scmp.ne.s32.totalorder %s7289_s20, 0 }
  0x7d   : > { %1856 = vmatpush.bf16.msrb.mxu3 %v6174_v58  ;;  %976 = vmatmul.bf16.gmra.mxu0 %v5854_v60  ;;  %v6137_v58 = vld [vmem:[%s7394_s30 + $0x80] sm:$0xf]  ;;  %v6074_v60 = vor.u32 %v6957_v57, %v6073_v55  ;;  %v7009_v44 = vld [vmem:[%s7394_s30 + $0x54] sm:$0xf0]  ;;  %v6357_v45 = vld [vmem:[%s7394_s30 + $0xd0] sm:$0xf]  ;;  %s660_s27 = scalar_lea.vmem %s11300_s3, %s11973_s12  ;;  %s665_s26 = scalar_lea.vmem %s11301_s4, %s11973_s12 }
  0x7e   : > { %6012 = vmatmul.msk.bf16.gmra.mxu1 %vm937_vm1, %v5858_v1  ;;  %1740 = vmatpush.bf16.msrb.mxu0 %v6098_v10  ;;  %v6138_v63 = vor.u32 %v6973_v59, %v6137_v58  ;;  %v7010_v10 = vld [vmem:[%s7394_s30 + $0x64] sm:$0xf]  ;;  %v6033_v50 = vld [vmem:[%s11297_s0 + $0x10] sm:$0xf]  ;;  %v6287_v53 = vld [vmem:[%s7394_s30 + $0x48] sm:$0xf0]  ;;  %s671_s29 = scalar_lea.vmem %s11303_s6, %s11973_s12  ;;  %s676_s15 = scalar_lea.vmem %s11304_s7, %s11973_s12 }
  0x7f   : > { %1779 = vmatpush.bf16.msrb.mxu1 %v6162_v14  ;;  %v6367_v14 = vld [vmem:[%s7394_s30 + $0xe8] sm:$0xf0]  ;;  %7173 = vset.pattern.permute.xlu1 %v7211_v35  ;;  %v7022_v54 = vld [vmem:[%s7394_s30 + $0xc4] sm:$0xf]  ;;  %v6946_v59 = vld [vmem:[%s11297_s0 + $0x14] sm:$0xf] }
  0x80   : > { %6018 = vmatmul.msk.bf16.gmra.mxu3 %vm937_vm1, %v5858_v1  ;;  %1819 = vmatpush.bf16.msrb.mxu2 %v6094_v18  ;;  %v6911_v1 = vld [vmem:[%s11297_s0 + $0x104] sm:$0xf0]  ;;  %v6370_v15 = vor.u32 %v7026_v13, %v6367_v14  ;;  %v5886_v18 = vor.u32 %v6913_v17, %v5885_v16  ;;  %v1343_v57 = vld [vmem:[%s11298_s1 + $0xd8] sm:$0xff]  ;;  %v1344_v16 = vld [vmem:[%s11298_s1 + $0xe0] sm:$0xff] }
  0x81   : > { %1857 = vmatpush.bf16.msrb.mxu3 %v6166_v9  ;;  %v5878_v2 = vor.u32 %v6911_v1, %v5877_v0  ;;  %v7013_v9 = vld [vmem:[%s7394_s30 + $0x74] sm:$0xf0]  ;;  %7174 = vset.pattern.permute.xlu2 %v7211_v35  ;;  %v6285_v3 = vld [vmem:[%s7394_s30 + $0x40] sm:$0xf]  ;;  %v7007_v4 = vld [vmem:[%s7394_s30 + $0x44] sm:$0xf0] }
  0x82   : > { %1741 = vmatpush.bf16.msrb.mxu0 %v6090_v29  ;;  %v6310_v12 = vor.u32 %v7013_v9, %v6309_v7  ;;  %v6366_v29 = vor.u32 %v7027_v26, %v6365_v24  ;;  %1364 = vperm.xlu1 %7173, %v1342_v42   ;;  %v1346_v0 = vld [vmem:[%s11298_s1 + $0xf0] sm:$0xff]  ;;  %v1349_v13 = vld [vmem:[%s11298_s1 + $0x108] sm:$0xff]  ;;  %v7002_v35 = vld [vmem:[%s7394_s30 + $0x24] sm:$0xf] }
  0x83   : > { %1780 = vmatpush.bf16.msrb.mxu1 %v6154_v33  ;;  %v1340_v33 = vld [vmem:[%s11298_s1 + $0xc0] sm:$0xff]  ;;  %v7004_v7 = vld [vmem:[%s7394_s30 + $0x34] sm:$0xf]  ;;  %1374 = vperm.xlu2 %7174, %v1344_v16   ;;  %v7021_v26 = vld [vmem:[%s7394_s30 + $0xb4] sm:$0xf0] }
  0x84   : > { %1820 = vmatpush.bf16.msrb.mxu2 %v6086_v34  ;;  %v6362_v34 = vor.u32 %v7024_v31, %v6359_v32  ;;  %1354 = vperm.xlu0 %7172, %v1340_v33   ;;  %v1350_v17 = vld [vmem:[%s11298_s1 + $0x110] sm:$0xff]  ;;  %v1965_v27 = vld [vmem:[%s11298_s1 + $0x8] sm:$0xff] }
  0x85   : > { %1858 = vmatpush.bf16.msrb.mxu3 %v6158_v19  ;;  %v6912_v19 = vld [vmem:[%s11297_s0 + $0x114] sm:$0xf]  ;;  %v1345_v32 = vld [vmem:[%s11298_s1 + $0xe8] sm:$0xff] }
  0x86   : > { %1742 = vmatpush.bf16.msrb.mxu0 %v6082_v47  ;;  %v5890_v21 = vor.u32 %v6912_v19, %v5887_v20  ;;  %v7025_v47 = vld [vmem:[%s7394_s30 + $0xd4] sm:$0xf0]  ;;  %v6948_v19 = vld [vmem:[%s11297_s0 + $0x24] sm:$0xf]  ;;  %v6043_v20 = vld [vmem:[%s11297_s0 + $0x28] sm:$0xf0] }
  0x87   : > { %1781 = vmatpush.bf16.msrb.mxu1 %v6146_v51  ;;  %v6358_v49 = vor.u32 %v7025_v47, %v6357_v45  ;;  %v6947_v51 = vld [vmem:[%s11297_s0 + $0x14] sm:$0xf0]  ;;  %v6046_v28 = vor.u32 %v6948_v19, %v6043_v20  ;;  %v1966_v33 = vld [vmem:[%s11298_s1 + $0x10] sm:$0xff] }
  0x88   : > { %1821 = vmatpush.bf16.msrb.mxu2 %v6078_v52  ;;  %v7006_v52 = vld [vmem:[%s7394_s30 + $0x44] sm:$0xf]  ;;  %v6034_v58 = vor.u32 %v6947_v51, %v6033_v50  ;;  %v6049_v47 = vld [vmem:[%s11297_s0 + $0x30] sm:$0xf]  ;;  %v1969_v50 = vld [vmem:[%s11298_s1 + $0x28] sm:$0xff] }
  0x89   : > { %1859 = vmatpush.bf16.msrb.mxu3 %v6150_v37  ;;  %v6945_v37 = vld [vmem:[%s11297_s0 + $0x4] sm:$0xf0]  ;;  %v6290_v55 = vor.u32 %v7006_v52, %v6287_v53  ;;  %v6950_v52 = vld [vmem:[%s11297_s0 + $0x34] sm:$0xf]  ;;  %v6051_v53 = vld [vmem:[%s11297_s0 + $0x38] sm:$0xf0] }
  0x8a   : > { %1743 = vmatpush.bf16.msrb.mxu0 %v6074_v60  ;;  %v6026_v38 = vor.u32 %v6945_v37, %v6025_v36  ;;  %v6035_v60 = vld [vmem:[%s11297_s0 + $0x18] sm:$0xf0]  ;;  %1369 = vperm.xlu1 %7173, %v1343_v57   ;;  %v6271_v36 = vld [vmem:[%s7394_s30 + $0x28] sm:$0xf0]  ;;  %v6333_v57 = vld [vmem:[%s7394_s30 + $0xa0] sm:$0xf] }
  0x8b   : > { %1059 = vmatmul.bf16.gmra.mxu2 %v5862_v22  ;;  %1782 = vmatpush.bf16.msrb.mxu1 %v6138_v63  ;;  %v6038_v1 = vor.u32 %v6946_v59, %v6035_v60  ;;  %v7018_v37 = vld [vmem:[%s7394_s30 + $0xa4] sm:$0xf]  ;;  %v7019_v59 = vld [vmem:[%s7394_s30 + $0xa4] sm:$0xf0]  ;;  %v7000_v60 = vld [vmem:[%s7394_s30 + $0x14] sm:$0xf] }
  0x8c   : > { %1359 = vperm.xlu0 %7172, %v1341_v48   ;;  %1379 = vperm.xlu2 %7174, %v1345_v32   ;;  %v6951_v48 = vld [vmem:[%s11297_s0 + $0x34] sm:$0xf0] }
  0x8d   : > { %981 = vmatmul.bf16.gmra.mxu0 %v5862_v22  ;;  %1860 = vmatpush.bf16.msrb.mxu3 %v6142_v56  ;;  %v6301_v22 = vld [vmem:[%s7394_s30 + $0x60] sm:$0xf]  ;;  %v6351_v56 = vld [vmem:[%s7394_s30 + $0xc8] sm:$0xf0] }
  0x8e   : > { %6013 = vmatmul.msk.bf16.gmra.mxu1 %vm937_vm1, %v5866_v25  ;;  %2360 = vmatpush.bf16.msra.mxu0 %v6310_v12  ;;  %v6354_v63 = vor.u32 %v7022_v54, %v6351_v56  ;;  %v6343_v12 = vld [vmem:[%s7394_s30 + $0xb8] sm:$0xf0]  ;;  %v6050_v54 = vor.u32 %v6951_v48, %v6049_v47  ;;  %v7003_v56 = vld [vmem:[%s7394_s30 + $0x24] sm:$0xf0] }
  0x8f   : > { %2399 = vmatpush.bf16.msra.mxu1 %v7416_v61  ;;  %v6306_v61 = vor.u32 %v7010_v10, %v6303_v11  ;;  %v7020_v11 = vld [vmem:[%s7394_s30 + $0xb4] sm:$0xf]  ;;  %v7015_v47 = vld [vmem:[%s7394_s30 + $0x84] sm:$0xf0] }
  0x90   : > { %6019 = vmatmul.msk.bf16.gmra.mxu3 %vm937_vm1, %v5866_v25  ;;  %v6302_v25 = vor.u32 %v7011_v23, %v6301_v22  ;;  %v6346_v14 = vor.u32 %v7020_v11, %v6343_v12  ;;  %v7005_v22 = vld [vmem:[%s7394_s30 + $0x34] sm:$0xf0]  ;;  %v6341_v23 = vld [vmem:[%s7394_s30 + $0xb0] sm:$0xf]  ;;  %v1964_v11 = vld [vmem:[%s11298_s1] sm:$0xff] }
  0x91   : > { %2477 = vmatpush.bf16.msra.mxu3 %v7419_v62  ;;  %v7012_v62 = vld [vmem:[%s7394_s30 + $0x74] sm:$0xf] }
  0x92   : > { %v6314_v8 = vor.u32 %v7012_v62, %v6311_v6  ;;  %2361 = vmatpush.bf16.msra.mxu0 %v6302_v25  ;;  %v6286_v62 = vor.u32 %v7007_v4, %v6285_v3  ;;  %v7023_v6 = vld [vmem:[%s7394_s30 + $0xc4] sm:$0xf0]  ;;  %v7016_v3 = vld [vmem:[%s7394_s30 + $0x94] sm:$0xf]  ;;  %v6327_v4 = vld [vmem:[%s7394_s30 + $0x98] sm:$0xf0] }
  0x93   : > { %2400 = vmatpush.bf16.msra.mxu1 %v6366_v29  ;;  %v6342_v29 = vor.u32 %v7021_v26, %v6341_v23  ;;  %v1967_v26 = vld [vmem:[%s11298_s1 + $0x18] sm:$0xff] }
  0x94   : > { %2438 = vmatpush.bf16.msra.mxu2 %v6314_v8  ;;  %1384 = vperm.xlu0 %7172, %v1346_v0   ;;  %v6279_v8 = vld [vmem:[%s7394_s30 + $0x38] sm:$0xf0] }
  0x95   : > { %2478 = vmatpush.bf16.msra.mxu3 %v6370_v15  ;;  %v6282_v10 = vor.u32 %v7004_v7, %v6279_v8  ;;  %v6949_v15 = vld [vmem:[%s11297_s0 + $0x24] sm:$0xf0]  ;;  %v6330_v7 = vor.u32 %v7016_v3, %v6327_v4  ;;  %v6065_v4 = vld [vmem:[%s11297_s0 + $0x50] sm:$0xf] }
  0x97   : > { %2401 = vmatpush.bf16.msra.mxu1 %v6358_v49  ;;  %v1348_v49 = vld [vmem:[%s11298_s1 + $0x100] sm:$0xff] }
  0x98   : > { %2439 = vmatpush.bf16.msra.mxu2 %v6306_v61  ;;  %v6041_v61 = vld [vmem:[%s11297_s0 + $0x20] sm:$0xf]  ;;  %1394 = vperm.xlu2 %7174, %v1348_v49  }
  0x99   : > { %2479 = vmatpush.bf16.msra.mxu3 %v6362_v34 }
  0x9b   : > { %1064 = vmatmul.bf16.gmra.mxu2 %v5870_v40 }
  0x9c   : > { %2440 = vmatpush.bf16.msra.mxu2 %v6298_v30  ;;  %1399 = vperm.xlu0 %7172, %v1349_v13   ;;  %v6261_v13 = vld [vmem:[%s7394_s30 + $0x10] sm:$0xf] }
  0x9d   : > { %986 = vmatmul.bf16.gmra.mxu0 %v5870_v40  ;;  %v6027_v40 = vld [vmem:[%s11297_s0 + $0x8] sm:$0xf0]  ;;  %2480 = vmatpush.bf16.msra.mxu3 %v6354_v63  ;;  %v6263_v63 = vld [vmem:[%s7394_s30 + $0x18] sm:$0xf0] }
  0x9e   : > { %6014 = vmatmul.msk.bf16.gmra.mxu1 %vm937_vm1, %v5874_v43  ;;  %v6030_v41 = vor.u32 %v6944_v39, %v6027_v40  ;;  %v6335_v39 = vld [vmem:[%s7394_s30 + $0xa8] sm:$0xf0] }
  0x9f   : > { %v1968_v40 = vld [vmem:[%s11298_s1 + $0x20] sm:$0xff]  ;;  %v6338_v42 = vor.u32 %v7018_v37, %v6335_v39 }
  0xa0   : > { %6020 = vmatmul.msk.bf16.gmra.mxu3 %vm937_vm1, %v5874_v43  ;;  %v6293_v43 = vld [vmem:[%s7394_s30 + $0x50] sm:$0xf]  ;;  %2441 = vmatpush.bf16.msra.mxu2 %v6290_v55  ;;  %v6269_v55 = vld [vmem:[%s7394_s30 + $0x20] sm:$0xf] }
  0xa1   : > { %v6294_v46 = vor.u32 %v7009_v44, %v6293_v43  ;;  %2481 = vmatpush.bf16.msra.mxu3 %v6346_v14  ;;  %1978 = vperm.xlu2 %7174, %v1964_v11   ;;  %v7001_v14 = vld [vmem:[%s7394_s30 + $0x14] sm:$0xf0]  ;;  %v6253_v39 = vld [vmem:[%s7394_s30] sm:$0xf]  ;;  %v6067_v11 = vld [vmem:[%s11297_s0 + $0x58] sm:$0xf0] }
  0xa2   : > { %v6262_v16 = vor.u32 %v7001_v14, %v6261_v13  ;;  %v7055_v13 = vld [vmem:[%s7394_s30 + $0x74] sm:$0xf0] }
  0xa3   : > { %2362 = vmatpush.bf16.msra.mxu0 %v6294_v46 }
  0xa4   : > { %2442 = vmatpush.bf16.msra.mxu2 %v6282_v10  ;;  %1983 = vperm.xlu0 %7172, %v1965_v27  }
  0xa5   : > { %2482 = vmatpush.bf16.msra.mxu3 %v6338_v42 }
  0xa7   : > { %2363 = vmatpush.bf16.msra.mxu0 %v6286_v62 }
  0xa9   : > { %2483 = vmatpush.bf16.msra.mxu3 %v6330_v7  ;;  %1993 = vperm.xlu2 %7174, %v1967_v26   ;;  %v7052_v26 = vld [vmem:[%s7394_s30 + $0x64] sm:$0xf] }
  0xab   : > { %1069 = vmatmul.bf16.gmra.mxu2 %v5878_v2 }
  0xac   : > { %1998 = vperm.xlu0 %7172, %v1968_v40   ;;  %v6999_v40 = vld [vmem:[%s7394_s30 + $0x4] sm:$0xf0] }
  0xad   : > { %991 = vmatmul.bf16.gmra.mxu0 %v5878_v2  ;;  %v1347_v2 = vld [vmem:[%s11298_s1 + $0xf8] sm:$0xff] }
  0xae   : > { %6015 = vmatmul.msk.bf16.gmra.mxu1 %vm937_vm1, %v5882_v5  ;;  %1389 = vperm.xlu1 %7173, %v1347_v2   ;;  %v6266_v2 = vor.u32 %v7000_v60, %v6263_v63  ;;  %v1974_v60 = vld [vmem:[%s11298_s1 + $0x50] sm:$0xff] }
  0xb0   : > { %6021 = vmatmul.msk.bf16.gmra.mxu3 %vm937_vm1, %v5882_v5  ;;  %v6349_v5 = vld [vmem:[%s7394_s30 + $0xc0] sm:$0xf] }
  0xb1   : > { %v6350_v9 = vor.u32 %v7023_v6, %v6349_v5  ;;  %v1971_v5 = vld [vmem:[%s11298_s1 + $0x38] sm:$0xff]  ;;  %v6054_v6 = vor.u32 %v6950_v52, %v6051_v53  ;;  %v1970_v52 = vld [vmem:[%s11298_s1 + $0x30] sm:$0xff] }
  0xb2   : > { %2008 = vperm.xlu2 %7174, %v1970_v52   ;;  %v6545_v52 = vld [vmem:[%s7394_s30 + $0xe0] sm:$0xf] }
  0xb3   : > { %2402 = vmatpush.bf16.msra.mxu1 %v6350_v9 }
  0xb4   : > { %2013 = vperm.xlu0 %7172, %v1971_v5   ;;  %v6955_v5 = vld [vmem:[%s11297_s0 + $0x54] sm:$0xf0] }
  0xb5   : > { %v6066_v7 = vor.u32 %v6955_v5, %v6065_v4 }
  0xb6   : > { %1404 = vperm.xlu1 %7173, %v1350_v17   ;;  %v7017_v17 = vld [vmem:[%s7394_s30 + $0x94] sm:$0xf0] }
  0xb7   : > { %2403 = vmatpush.bf16.msra.mxu1 %v6342_v29  ;;  %v6998_v29 = vld [vmem:[%s7394_s30 + $0x4] sm:$0xf] }
  0xbb   : > { %1074 = vmatmul.bf16.gmra.mxu2 %v5886_v18 }
  0xbc   : > { %2028 = vperm.xlu0 %7172, %v1974_v60  }
  0xbd   : > { %996 = vmatmul.bf16.gmra.mxu0 %v5886_v18  ;;  %v6042_v18 = vor.u32 %v6949_v15, %v6041_v61  ;;  %v6325_v61 = vld [vmem:[%s7394_s30 + $0x90] sm:$0xf] }
  0xbe   : > { %6016 = vmatmul.msk.bf16.gmra.mxu1 %vm937_vm1, %v5890_v21  ;;  %1988 = vperm.xlu1 %7173, %v1966_v33   ;;  %v6326_v20 = vor.u32 %v7017_v17, %v6325_v61  ;;  %v6059_v33 = vld [vmem:[%s11297_s0 + $0x48] sm:$0xf0] }
  0xc0   : > { %6022 = vmatmul.msk.bf16.gmra.mxu3 %vm937_vm1, %v5890_v21  ;;  %v6277_v21 = vld [vmem:[%s7394_s30 + $0x30] sm:$0xf] }
  0xc1   : > { %v6278_v25 = vor.u32 %v7005_v22, %v6277_v21 }
  0xc3   : > { %2364 = vmatpush.bf16.msra.mxu0 %v6278_v25  ;;  %v6953_v25 = vld [vmem:[%s11297_s0 + $0x44] sm:$0xf0] }
  0xc6   : > { %2003 = vperm.xlu1 %7173, %v1969_v50  }
  0xcb   : > { %1822 = vmatmul.bf16.vlgmr.msrb.gmra.mxu2 %v6026_v38 }
  0xcd   : > { %1744 = vmatmul.bf16.vlgmr.msrb.gmra.mxu0 %v6026_v38  ;;  %v6274_v38 = vor.u32 %v7002_v35, %v6271_v36  ;;  %v7014_v35 = vld [vmem:[%s7394_s30 + $0x84] sm:$0xf]  ;;  %v6319_v36 = vld [vmem:[%s7394_s30 + $0x88] sm:$0xf0] }
  0xce   : > { %6191 = vmatmul.msk.bf16.vlgmr.msrb.gmra.mxu1 %vm937_vm1, %v6030_v41  ;;  %v6322_v37 = vor.u32 %v7014_v35, %v6319_v36 }
  0xcf   : > { %2443 = vmatpush.bf16.msra.mxu2 %v6274_v38 }
  0xd0   : > { %6197 = vmatmul.msk.bf16.vlgmr.msrb.gmra.mxu3 %vm937_vm1, %v6030_v41 }
  0xd1   : > { %2484 = vmatpush.bf16.msra.mxu3 %v6322_v37 }
  0xd3   : > { %2444 = vmatpush.bf16.msra.mxu2 %v6266_v2 }
  0xdb   : > { %1827 = vmatmul.bf16.gmra.mxu2 %v6034_v58 }
  0xdd   : > { %1749 = vmatmul.bf16.gmra.mxu0 %v6034_v58  ;;  %v6270_v58 = vor.u32 %v7003_v56, %v6269_v55  ;;  %v6491_v55 = vld [vmem:[%s7394_s30 + $0x78] sm:$0xf0]  ;;  %v2750_v56 = vld [vmem:[%s7394_s30 + $0xf0] sm:$0xff] }
  0xde   : > { %6192 = vmatmul.msk.bf16.gmra.mxu1 %vm937_vm1, %v6038_v1  ;;  %v2896_v14 = vunpack.c.l.b16 %v2750_v56 }
  0xdf   : > { %2365 = vmatpush.bf16.msra.mxu0 %v6270_v58 }
  0xe0   : > { %6198 = vmatmul.msk.bf16.gmra.mxu3 %vm937_vm1, %v6038_v1  ;;  %v6334_v1 = vor.u32 %v7019_v59, %v6333_v57  ;;  %v2897_v59 = vunpack.c.h.b16 %v2750_v56 }
  0xe2   : > { %2404 = vmatpush.bf16.msra.mxu1 %v6334_v1  ;;  %v2929_v2 = vpack.c.b16 %v2897_v59, %v2897_v59 }
  0xe3   : > { %2366 = vmatpush.bf16.msra.mxu0 %v6262_v16 }
  0xe6   : > { %2405 = vmatpush.bf16.msra.mxu1 %v6326_v20 }
  0xea   : > { %v972_v24 = vpop.f32.mrf.mxu0 }
  0xeb   : > { %v1011_v30 = vpop.f32.mrf.mxu1  ;;  %1832 = vmatmul.bf16.gmra.mxu2 %v6042_v18 }
  0xec   : > { %v7724_v31 = vadd.f32 %v1011_v30, %v972_v24  ;;  %v6057_v24 = vld [vmem:[%s11297_s0 + $0x40] sm:$0xf]  ;;  %v6255_v30 = vld [vmem:[%s7394_s30 + $0x8] sm:$0xf0] }
  0xed   : > { %1754 = vmatmul.bf16.gmra.mxu0 %v6042_v18  ;;  %v1972_v18 = vld [vmem:[%s11298_s1 + $0x40] sm:$0xff]  ;;  %v6058_v32 = vor.u32 %v6953_v25, %v6057_v24 }
  0xee   : > { %11386 = vst [vmem:[#allocation5_spill] sm:$0xff] %v7724_v31  ;;  %v1050_v34 = vpop.f32.mrf.mxu2  ;;  %6193 = vmatmul.msk.bf16.gmra.mxu1 %vm937_vm1, %v6046_v28  ;;  %2018 = vperm.xlu1 %7173, %v1972_v18   ;;  %v2928_v18 = vpack.c.b16 %v2896_v14, %v2896_v14 }
  0xf0   : > { %6199 = vmatmul.msk.bf16.gmra.mxu3 %vm937_vm1, %v6046_v28  ;;  %v6952_v28 = vld [vmem:[%s11297_s0 + $0x44] sm:$0xf]  ;;  %v2979_v24 = vsel %vm956_vm0, %v2928_v18, 0 }
  0xf2   : > { %v974_v41 = vpop.f32.mrf.mxu0 }
  0xf3   : > { %v1089_v43 = vpop.f32.mrf.mxu3  ;;  %v1013_v45 = vpop.f32.mrf.mxu1 }
  0xf4   : > { %v7741_v44 = vadd.f32 %v1089_v43, %v1050_v34  ;;  %v7743_v46 = vadd.f32 %v1013_v45, %v974_v41  ;;  %v6258_v34 = vor.u32 %v6998_v29, %v6255_v30  ;;  %v6317_v41 = vld [vmem:[%s7394_s30 + $0x80] sm:$0xf]  ;;  %v6062_v43 = vor.u32 %v6952_v28, %v6059_v33  ;;  %v7068_v28 = vld [vmem:[%s7394_s30 + $0xe4] sm:$0xf]  ;;  %v6547_v30 = vld [vmem:[%s7394_s30 + $0xe8] sm:$0xf0] }
  0xf5   : > { %v6254_v45 = vor.u32 %v6999_v40, %v6253_v39  ;;  %v6318_v50 = vor.u32 %v7015_v47, %v6317_v41  ;;  %v2588_v33 = vld [vmem:[%s11298_s1 + $0x60] sm:$0xff]  ;;  %v6550_v35 = vor.u32 %v7068_v28, %v6547_v30  ;;  %v6987_v41 = vld [vmem:[%s11297_s0 + $0x64] sm:$0xf0]  ;;  %v6215_v30 = vld [vmem:[%s11297_s0 + $0x78] sm:$0xf0] }
  0xf6   : > { %11387 = vst [vmem:[#allocation6_spill] sm:$0xff] %v7741_v44  ;;  %v1052_v51 = vpop.f32.mrf.mxu2  ;;  %2445 = vmatpush.bf16.msra.mxu2 %v6258_v34  ;;  %2602 = vperm.xlu1 %7173, %v2588_v33   ;;  %v6205_v40 = vld [vmem:[%s11297_s0 + $0x60] sm:$0xf]  ;;  %v1155_v4 = vmul.f32 %v7743_v46, %v7743_v46 }
  0xf7   : > { %2367 = vmatpush.bf16.msra.mxu0 %v6254_v45  ;;  %2406 = vmatpush.bf16.msra.mxu1 %v6318_v50  ;;  %v6207_v45 = vld [vmem:[%s11297_s0 + $0x68] sm:$0xf0]  ;;  %v6206_v47 = vor.u32 %v6987_v41, %v6205_v40  ;;  %v7053_v50 = vld [vmem:[%s7394_s30 + $0x64] sm:$0xf0] }
  0xfa   : > { %v977_v0 = vpop.f32.mrf.mxu0 }
  0xfb   : > { %v1091_v62 = vpop.f32.mrf.mxu3  ;;  %v1016_v9 = vpop.f32.mrf.mxu1  ;;  %1837 = vmatmul.bf16.gmra.mxu2 %v6050_v54  ;;  %3023 = vmatpush.bf16.msrb.mxu1 %v2979_v24 }
  0xfc   : > { %v7774_v8 = vadd.f32 %v1091_v62, %v1052_v51  ;;  %v7776_v10 = vadd.f32 %v1016_v9, %v977_v0  ;;  %v2982_v62 = vsel %vm956_vm0, %v2929_v2, 0  ;;  %v6954_v9 = vld [vmem:[%s11297_s0 + $0x54] sm:$0xf]  ;;  %v1153_v2 = vmul.f32 %v7724_v31, %v7724_v31 }
  0xfd   : > { %1759 = vmatmul.bf16.gmra.mxu0 %v6050_v54  ;;  %v7054_v54 = vld [vmem:[%s7394_s30 + $0x74] sm:$0xf]  ;;  %3101 = vmatpush.bf16.msrb.mxu3 %v2982_v62  ;;  %v6070_v17 = vor.u32 %v6954_v9, %v6067_v11 }
  0xfe   : > { %v1055_v12 = vpop.f32.mrf.mxu2  ;;  %6194 = vmatmul.msk.bf16.gmra.mxu1 %vm937_vm1, %v6054_v6  ;;  %v6494_v58 = vor.u32 %v7054_v54, %v6491_v55  ;;  %v7069_v54 = vld [vmem:[%s7394_s30 + $0xe4] sm:$0xf0]  ;;  %v2590_v62 = vld [vmem:[%s11298_s1 + $0x70] sm:$0xff]  ;;  %v1156_v18 = vmul.f32 %v7774_v8, %v7774_v8 }
  0xff   : > { %v6546_v56 = vor.u32 %v7069_v54, %v6545_v52  ;;  %2612 = vperm.xlu0 %7172, %v2590_v62  }
 0x100   : > { %6200 = vmatmul.msk.bf16.gmra.mxu3 %vm937_vm1, %v6054_v6  ;;  %3062 = vmatpush.bf16.msrb.mxu2 %v6494_v58 }
 0x101   : > { %3102 = vmatpush.bf16.msrb.mxu3 %v6550_v35  ;;  %3024 = vmatpush.bf16.msrb.mxu1 %v6546_v56  ;;  %v1136_v35 = vadd.f32 %v7774_v8, %v7741_v44 }
 0x102   : > { %v979_v15 = vpop.f32.mrf.mxu0 }
 0x103   : > { %v1094_v19 = vpop.f32.mrf.mxu3  ;;  %v1018_v22 = vpop.f32.mrf.mxu1 }
 0x104   : > { %v7790_v21 = vadd.f32 %v1094_v19, %v1055_v12  ;;  %v7792_v23 = vadd.f32 %v1018_v22, %v979_v15  ;;  %v6489_v12 = vld [vmem:[%s7394_s30 + $0x70] sm:$0xf] }
 0x105   : > { %v6490_v15 = vor.u32 %v7055_v13, %v6489_v12  ;;  %v1177_v13 = vadd.f32 %v1155_v4, %v1153_v2 }
 0x106   : > { %v1057_v27 = vpop.f32.mrf.mxu2 }
 0x107   : > { %2984 = vmatpush.bf16.msrb.mxu0 %v6490_v15 }
 0x10a   : > { %v982_v38 = vpop.f32.mrf.mxu0 }
 0x10b   : > { %v1096_v42 = vpop.f32.mrf.mxu3  ;;  %v1021_v49 = vpop.f32.mrf.mxu1  ;;  %1842 = vmatmul.bf16.gmra.mxu2 %v6058_v32 }
 0x10c   : > { %v7817_v48 = vadd.f32 %v1096_v42, %v1057_v27  ;;  %v7819_v51 = vadd.f32 %v1021_v49, %v982_v38  ;;  %v6483_v27 = vld [vmem:[%s7394_s30 + $0x68] sm:$0xf0]  ;;  %v6481_v49 = vld [vmem:[%s7394_s30 + $0x60] sm:$0xf] }
 0x10d   : > { %1764 = vmatmul.bf16.gmra.mxu0 %v6058_v32  ;;  %v6486_v29 = vor.u32 %v7052_v26, %v6483_v27  ;;  %v1973_v32 = vld [vmem:[%s11298_s1 + $0x48] sm:$0xff]  ;;  %v1154_v27 = vmul.f32 %v7741_v44, %v7741_v44 }
 0x10e   : > { %v1060_v53 = vpop.f32.mrf.mxu2  ;;  %6195 = vmatmul.msk.bf16.gmra.mxu1 %vm937_vm1, %v6062_v43  ;;  %2023 = vperm.xlu2 %7174, %v1973_v32   ;;  %v1160_v52 = vmul.f32 %v7817_v48, %v7817_v48  ;;  %v6499_v44 = vld [vmem:[%s7394_s30 + $0x88] sm:$0xf0] }
 0x10f   : > { %3063 = vmatpush.bf16.msrb.mxu2 %v6486_v29  ;;  %v6988_v29 = vld [vmem:[%s11297_s0 + $0x74] sm:$0xf] }
 0x110   : > { %6201 = vmatmul.msk.bf16.gmra.mxu3 %vm937_vm1, %v6062_v43  ;;  %v6986_v43 = vld [vmem:[%s11297_s0 + $0x64] sm:$0xf] }
 0x111   : > { %v6210_v58 = vor.u32 %v6986_v43, %v6207_v45 }
 0x112   : > { %v984_v57 = vpop.f32.mrf.mxu0 }
 0x113   : > { %v1099_v63 = vpop.f32.mrf.mxu3  ;;  %v1023_v1 = vpop.f32.mrf.mxu1 }
 0x114   : > { %v7832_v0 = vadd.f32 %v1099_v63, %v1060_v53  ;;  %v7834_v3 = vadd.f32 %v1023_v1, %v984_v57  ;;  %v6482_v53 = vor.u32 %v7053_v50, %v6481_v49  ;;  %v2591_v49 = vld [vmem:[%s11298_s1 + $0x78] sm:$0xff]  ;;  %v1137_v50 = vadd.f32 %v1136_v35, %v7790_v21 }
 0x115   : > { %2617 = vperm.xlu1 %7173, %v2591_v49  }
 0x116   : > { %v1062_v6 = vpop.f32.mrf.mxu2  ;;  %2985 = vmatpush.bf16.msrb.mxu0 %v6482_v53  ;;  %v1162_v2 = vmul.f32 %v7832_v0, %v7832_v0 }
 0x11a   : > { %v987_v61 = vpop.f32.mrf.mxu0 }
 0x11b   : > { %v1101_v16 = vpop.f32.mrf.mxu3  ;;  %v1026_v20 = vpop.f32.mrf.mxu1  ;;  %1847 = vmatmul.bf16.gmra.mxu2 %v6066_v7 }
 0x11c   : > { %v7851_v19 = vadd.f32 %v1101_v16, %v1062_v6  ;;  %v7853_v22 = vadd.f32 %v1026_v20, %v987_v61  ;;  %v1119_v6 = vadd.f32 %v7743_v46, %v7724_v31  ;;  %v1159_v61 = vmul.f32 %v7792_v23, %v7792_v23  ;;  %v6213_v16 = vld [vmem:[%s11297_s0 + $0x70] sm:$0xf] }
 0x11d   : > { %1769 = vmatmul.bf16.gmra.mxu0 %v6066_v7  ;;  %v1157_v7 = vmul.f32 %v7776_v10, %v7776_v10 }
 0x11e   : > { %v1065_v25 = vpop.f32.mrf.mxu2  ;;  %6196 = vmatmul.msk.bf16.gmra.mxu1 %vm937_vm1, %v6070_v17  ;;  %v1120_v14 = vadd.f32 %v1119_v6, %v7776_v10  ;;  %v1165_v43 = vmul.f32 %v7853_v22, %v7853_v22 }
 0x11f   : > { %v1178_v20 = vadd.f32 %v1177_v13, %v1157_v7 }
 0x120   : > { %6202 = vmatmul.msk.bf16.gmra.mxu3 %vm937_vm1, %v6070_v17  ;;  %v6989_v17 = vld [vmem:[%s11297_s0 + $0x74] sm:$0xf0]  ;;  %v1121_v24 = vadd.f32 %v1120_v14, %v7792_v23 }
 0x121   : > { %v6214_v28 = vor.u32 %v6989_v17, %v6213_v16  ;;  %v1179_v32 = vadd.f32 %v1178_v20, %v1159_v61 }
 0x122   : > { %v989_v34 = vpop.f32.mrf.mxu0  ;;  %v1122_v33 = vadd.f32 %v1121_v24, %v7819_v51 }
 0x123   : > { %v1104_v36 = vpop.f32.mrf.mxu3  ;;  %v1028_v38 = vpop.f32.mrf.mxu1 }
 0x124   : > { %v7868_v37 = vadd.f32 %v1104_v36, %v1065_v25  ;;  %v7870_v39 = vadd.f32 %v1028_v38, %v989_v34  ;;  %v1161_v25 = vmul.f32 %v7819_v51, %v7819_v51  ;;  %v1163_v34 = vmul.f32 %v7834_v3, %v7834_v3 }
 0x125   : > { %v1194_v36 = vadd.f32 %v1156_v18, %v1154_v27  ;;  %v1158_v38 = vmul.f32 %v7790_v21, %v7790_v21 }
 0x126   : > { %11388 = vst [vmem:[#allocation7_spill] sm:$0xff] %v7870_v39  ;;  %v1067_v42 = vpop.f32.mrf.mxu2  ;;  %v1180_v41 = vadd.f32 %v1179_v32, %v1161_v25  ;;  %v1166_v18 = vmul.f32 %v7868_v37, %v7868_v37 }
 0x12a   : > { %v992_v55 = vpop.f32.mrf.mxu0 }
 0x12b   : > { %v1106_v57 = vpop.f32.mrf.mxu3  ;;  %v1031_v60 = vpop.f32.mrf.mxu1  ;;  %2446 = vmatmul.bf16.vlgmr.msra.gmra.mxu2 %v6206_v47 }
 0x12c   : > { %v7888_v59 = vadd.f32 %v1106_v57, %v1067_v42  ;;  %v7890_v63 = vadd.f32 %v1031_v60, %v992_v55  ;;  %v1123_v42 = vadd.f32 %v1122_v33, %v7834_v3  ;;  %v1181_v55 = vadd.f32 %v1180_v41, %v1163_v34 }
 0x12d   : > { %2368 = vmatmul.bf16.vlgmr.msra.gmra.mxu0 %v6206_v47  ;;  %v6218_v47 = vor.u32 %v6988_v29, %v6215_v30  ;;  %v1167_v57 = vmul.f32 %v7870_v39, %v7870_v39  ;;  %v1195_v60 = vadd.f32 %v1194_v36, %v1158_v38  ;;  %v6221_v38 = vld [vmem:[%s11297_s0 + $0x80] sm:$0xf] }
 0x12e   : > { %11389 = vst [vmem:[#allocation8_spill] sm:$0xff] %v7888_v59  ;;  %v1070_v1 = vpop.f32.mrf.mxu2  ;;  %6371 = vmatmul.msk.bf16.vlgmr.msra.gmra.mxu1 %vm937_vm1, %v6210_v58  ;;  %v1124_v56 = vadd.f32 %v1123_v42, %v7853_v22  ;;  %v1182_v4 = vadd.f32 %v1181_v55, %v1165_v43  ;;  %v1169_v62 = vmul.f32 %v7890_v63, %v7890_v63 }
 0x12f   : > { %11390 = vst [vmem:[#allocation9_spill] sm:$0xff] %v7890_v63  ;;  %v1196_v7 = vadd.f32 %v1195_v60, %v1160_v52  ;;  %v1168_v30 = vmul.f32 %v7888_v59, %v7888_v59  ;;  %v6990_v60 = vld [vmem:[%s11297_s0 + $0x84] sm:$0xf] }
 0x130   : > { %6377 = vmatmul.msk.bf16.vlgmr.msra.gmra.mxu3 %vm937_vm1, %v6210_v58  ;;  %v1183_v13 = vadd.f32 %v1182_v4, %v1167_v57 }
 0x131   : > { %v1197_v16 = vadd.f32 %v1196_v7, %v1162_v2 }
 0x132   : > { %v994_v5 = vpop.f32.mrf.mxu0  ;;  %v1184_v24 = vadd.f32 %v1183_v13, %v1169_v62 }
 0x133   : > { %v1109_v9 = vpop.f32.mrf.mxu3  ;;  %v1033_v12 = vpop.f32.mrf.mxu1 }
 0x134   : > { %v7905_v11 = vadd.f32 %v1109_v9, %v1070_v1  ;;  %v7910_v15 = vadd.f32 %v1033_v12, %v994_v5  ;;  %v1138_v1 = vadd.f32 %v1137_v50, %v7817_v48  ;;  %v1125_v5 = vadd.f32 %v1124_v56, %v7870_v39 }
 0x135   : > { %v1164_v12 = vmul.f32 %v7851_v19, %v7851_v19 }
 0x136   : > { %11391 = vst [vmem:[#allocation10_spill] sm:$0xff] %v7905_v11  ;;  %v1072_v26 = vpop.f32.mrf.mxu2  ;;  %v1139_v9 = vadd.f32 %v1138_v1, %v7832_v0  ;;  %v1126_v14 = vadd.f32 %v1125_v5, %v7890_v63  ;;  %v1171_v61 = vmul.f32 %v7910_v15, %v7910_v15  ;;  %v1170_v43 = vmul.f32 %v7905_v11, %v7905_v11  ;;  %v6223_v1 = vld [vmem:[%s11297_s0 + $0x88] sm:$0xf0]  ;;  %v3840_v63 = vld [vmem:[%s11298_s1 + $0x1a0] sm:$0xff] }
 0x137   : > { %11392 = vst [vmem:[#allocation11_spill] sm:$0xff] %v7910_v15 }
 0x138   : > { %v1140_v17 = vadd.f32 %v1139_v9, %v7851_v19  ;;  %v1127_v25 = vadd.f32 %v1126_v14, %v7910_v15  ;;  %v1185_v34 = vadd.f32 %v1184_v24, %v1171_v61  ;;  %v6226_v14 = vor.u32 %v6990_v60, %v6223_v1  ;;  %v2593_v61 = vld [vmem:[%s11298_s1 + $0x88] sm:$0xff] }
 0x139   : > { %2627 = vperm.xlu0 %7172, %v2593_v61   ;;  %v7051_v61 = vld [vmem:[%s7394_s30 + $0x54] sm:$0xf0] }
 0x13a   : > { %v997_v40 = vpop.f32.mrf.mxu0  ;;  %v1141_v29 = vadd.f32 %v1140_v17, %v7868_v37 }
 0x13b   : > { %v1111_v45 = vpop.f32.mrf.mxu3  ;;  %v1036_v54 = vpop.f32.mrf.mxu1  ;;  %2451 = vmatmul.bf16.gmra.mxu2 %v6214_v28 }
 0x13c   : > { %v7947_v53 = vadd.f32 %v1111_v45, %v1072_v26  ;;  %v7952_v58 = vadd.f32 %v1036_v54, %v997_v40  ;;  %v6991_v40 = vld [vmem:[%s11297_s0 + $0x84] sm:$0xf0]  ;;  %v1142_v42 = vadd.f32 %v1141_v29, %v7888_v59  ;;  %v6475_v29 = vld [vmem:[%s7394_s30 + $0x58] sm:$0xf0] }
 0x13d   : > { %2373 = vmatmul.bf16.gmra.mxu0 %v6214_v28  ;;  %v1198_v28 = vadd.f32 %v1197_v16, %v1164_v12  ;;  %v2589_v45 = vld [vmem:[%s11298_s1 + $0x68] sm:$0xff]  ;;  %v6222_v57 = vor.u32 %v6991_v40, %v6221_v38  ;;  %v6539_v40 = vld [vmem:[%s7394_s30 + $0xd8] sm:$0xf0] }
 0x13e   : > { %11393 = vst [vmem:[#allocation12_spill] sm:$0xff] %v7947_v53  ;;  %v1075_v6 = vpop.f32.mrf.mxu2  ;;  %6372 = vmatmul.msk.bf16.gmra.mxu1 %vm937_vm1, %v6218_v47  ;;  %v1173_v26 = vmul.f32 %v7952_v58, %v7952_v58  ;;  %v1128_v35 = vadd.f32 %v1127_v25, %v7952_v58  ;;  %2607 = vperm.xlu2 %7174, %v2589_v45  }
 0x13f   : > { %11394 = vst [vmem:[#allocation13_spill] sm:$0xff] %v7952_v58  ;;  %v1199_v41 = vadd.f32 %v1198_v28, %v1166_v18  ;;  %v1143_v55 = vadd.f32 %v1142_v42, %v7905_v11  ;;  %v1172_v56 = vmul.f32 %v7947_v53, %v7947_v53  ;;  %v7050_v28 = vld [vmem:[%s7394_s30 + $0x54] sm:$0xf] }
 0x140   : > { %6378 = vmatmul.msk.bf16.gmra.mxu3 %vm937_vm1, %v6218_v47  ;;  %v1186_v47 = vadd.f32 %v1185_v34, %v1173_v26  ;;  %v6478_v38 = vor.u32 %v7050_v28, %v6475_v29  ;;  %v7048_v28 = vld [vmem:[%s7394_s30 + $0x44] sm:$0xf]  ;;  %v6467_v29 = vld [vmem:[%s7394_s30 + $0x48] sm:$0xf0] }
 0x141   : > { %v1200_v54 = vadd.f32 %v1199_v41, %v1168_v30  ;;  %v1144_v62 = vadd.f32 %v1143_v55, %v7947_v53  ;;  %v7066_v30 = vld [vmem:[%s7394_s30 + $0xd4] sm:$0xf] }
 0x142   : > { %v999_v20 = vpop.f32.mrf.mxu0  ;;  %v6542_v42 = vor.u32 %v7066_v30, %v6539_v40  ;;  %3064 = vmatpush.bf16.msrb.mxu2 %v6478_v38 }
 0x143   : > { %v1114_v27 = vpop.f32.mrf.mxu3  ;;  %v1038_v33 = vpop.f32.mrf.mxu1  ;;  %v1201_v5 = vadd.f32 %v1200_v54, %v1170_v43 }
 0x144   : > { %v7977_v32 = vadd.f32 %v1114_v27, %v1075_v6  ;;  %v1039_v36 = vadd.f32 %v1038_v33, %v999_v20  ;;  %3103 = vmatpush.bf16.msrb.mxu3 %v6542_v42  ;;  %v7064_v42 = vld [vmem:[%s7394_s30 + $0xc4] sm:$0xf] }
 0x145   : > { %v1202_v16 = vadd.f32 %v1201_v5, %v1172_v56  ;;  %v6229_v5 = vld [vmem:[%s11297_s0 + $0x90] sm:$0xf] }
 0x146   : > { %11395 = vst [vmem:[#allocation14_spill] sm:$0xff] %v7977_v32  ;;  %v1129_v49 = vadd.f32 %v1128_v35, %v1039_v36  ;;  %v1175_v50 = vmul.f32 %v1039_v36, %v1039_v36  ;;  %v1077_v52 = vpop.f32.mrf.mxu2  ;;  %v1174_v6 = vmul.f32 %v7977_v32, %v7977_v32  ;;  %v1145_v17 = vadd.f32 %v1144_v62, %v7977_v32  ;;  %v6507_v32 = vld [vmem:[%s7394_s30 + $0x98] sm:$0xf0] }
 0x148   : > { %v1130_v2 = vrot.slane %v1129_v49, 4  ;;  %v1187_v4 = vadd.f32 %v1186_v47, %v1175_v50  ;;  %v1203_v27 = vadd.f32 %v1202_v16, %v1174_v6 }
 0x14a   : > { %v1745_v7 = vpop.f32.mrf.mxu0  ;;  %v1131_v9 = vadd.f32 %v1130_v2, %v1129_v49  ;;  %v1188_v12 = vrot.slane %v1187_v4, 4 }
 0x14b   : > { %v1116_v13 = vpop.f32.mrf.mxu3  ;;  %v1784_v20 = vpop.f32.mrf.mxu1  ;;  %2456 = vmatmul.bf16.gmra.mxu2 %v6222_v57 }
 0x14c   : > { %v1117_v18 = vadd.f32 %v1116_v13, %v1077_v52  ;;  %v1132_v24 = vrot.slane %v1131_v9, 2  ;;  %v1189_v25 = vadd.f32 %v1188_v12, %v1187_v4  ;;  %v8008_v26 = vadd.f32 %v1784_v20, %v1745_v7  ;;  %v6993_v7 = vld [vmem:[%s11297_s0 + $0x94] sm:$0xf0] }
 0x14d   : > { %2378 = vmatmul.bf16.gmra.mxu0 %v6222_v57  ;;  %v6230_v30 = vor.u32 %v6993_v7, %v6229_v5 }
 0x14e   : > { %v1146_v33 = vadd.f32 %v1145_v17, %v1117_v18  ;;  %v1176_v34 = vmul.f32 %v1117_v18, %v1117_v18  ;;  %v1133_v35 = vadd.f32 %v1132_v24, %v1131_v9  ;;  %v1190_v36 = vrot.slane %v1189_v25, 2  ;;  %v1823_v41 = vpop.f32.mrf.mxu2  ;;  %6373 = vmatmul.msk.bf16.gmra.mxu1 %vm937_vm1, %v6226_v14  ;;  %v2594_v9 = vld [vmem:[%s11298_s1 + $0x90] sm:$0xff] }
 0x14f   : > { %2632 = vperm.xlu1 %7173, %v2594_v9   ;;  %v6537_v17 = vld [vmem:[%s7394_s30 + $0xd0] sm:$0xf]  ;;  %v7067_v18 = vld [vmem:[%s7394_s30 + $0xd4] sm:$0xf0] }
 0x150   : > { %v1147_v43 = vrot.slane %v1146_v33, 4  ;;  %v1204_v45 = vadd.f32 %v1203_v27, %v1176_v34  ;;  %6379 = vmatmul.msk.bf16.gmra.mxu3 %vm937_vm1, %v6226_v14  ;;  %v1134_v47 = vrot.slane %v1133_v35, 1  ;;  %v1191_v49 = vadd.f32 %v1190_v36, %v1189_v25  ;;  %v6473_v14 = vld [vmem:[%s7394_s30 + $0x50] sm:$0xf]  ;;  %v6231_v36 = vld [vmem:[%s11297_s0 + $0x98] sm:$0xf0] }
 0x151   : > { %v6474_v16 = vor.u32 %v7051_v61, %v6473_v14  ;;  %v6538_v27 = vor.u32 %v7067_v18, %v6537_v17  ;;  %v6470_v34 = vor.u32 %v7048_v28, %v6467_v29  ;;  %v6523_v28 = vld [vmem:[%s7394_s30 + $0xb8] sm:$0xf0] }
 0x152   : > { %v1148_v50 = vadd.f32 %v1147_v43, %v1146_v33  ;;  %v1205_v52 = vrot.slane %v1204_v45, 4  ;;  %v8016_v54 = vpop.f32.mrf.mxu0  ;;  %v1135_v55 = vadd.f32 %v1134_v47, %v1133_v35  ;;  %v1192_v56 = vrot.slane %v1191_v49, 1  ;;  %v6992_v35 = vld [vmem:[%s11297_s0 + $0x94] sm:$0xf]  ;;  %v6531_v43 = vld [vmem:[%s7394_s30 + $0xc8] sm:$0xf0] }
 0x153   : > { %v1862_v57 = vpop.f32.mrf.mxu3  ;;  %v8020_v4 = vpop.f32.mrf.mxu1  ;;  %2986 = vmatpush.bf16.msrb.mxu0 %v6474_v16  ;;  %3025 = vmatpush.bf16.msrb.mxu1 %v6538_v27  ;;  %v6534_v47 = vor.u32 %v7064_v42, %v6531_v43  ;;  %v7062_v27 = vld [vmem:[%s7394_s30 + $0xb4] sm:$0xf]  ;;  %v7063_v42 = vld [vmem:[%s7394_s30 + $0xb4] sm:$0xf0] }
 0x154   : > { %v1149_v60 = vrot.slane %v1148_v50, 2  ;;  %v1206_v1 = vadd.f32 %v1205_v52, %v1204_v45  ;;  %v8018_v2 = vadd.f32 %v1862_v57, %v1823_v41  ;;  %v1193_v62 = vadd.f32 %v1192_v56, %v1191_v49  ;;  %3065 = vmatpush.bf16.msrb.mxu2 %v6470_v34  ;;  %v7049_v52 = vld [vmem:[%s7394_s30 + $0x44] sm:$0xf0] }
 0x155   : > { %v8025_v6 = vmul.f32 0.020408163, %v1135_v55  ;;  %3104 = vmatpush.bf16.msrb.mxu3 %v6534_v47  ;;  %v6526_v29 = vor.u32 %v7062_v27, %v6523_v28  ;;  %v6451_v27 = vld [vmem:[%s7394_s30 + $0x28] sm:$0xf0] }
 0x156   : > { %v1150_v12 = vadd.f32 %v1149_v60, %v1148_v50  ;;  %v1207_v13 = vrot.slane %v1206_v1, 2  ;;  %v8037_v20 = vpop.f32.mrf.mxu2  ;;  %v1213_v33 = vmul.f32 0.020408163, %v1193_v62  ;;  %v6465_v50 = vld [vmem:[%s7394_s30 + $0x40] sm:$0xf]  ;;  %v6234_v62 = vor.u32 %v6992_v35, %v6231_v36 }
 0x157   : > { %v1215_v38 = vmul.f32 %v8025_v6, %v8025_v6  ;;  %v6466_v57 = vor.u32 %v7049_v52, %v6465_v50  ;;  %v6529_v60 = vld [vmem:[%s7394_s30 + $0xc0] sm:$0xf]  ;;  %v6457_v36 = vld [vmem:[%s7394_s30 + $0x30] sm:$0xf] }
 0x158   : > { %v1151_v24 = vrot.slane %v1150_v12, 1  ;;  %v1208_v25 = vadd.f32 %v1207_v13, %v1206_v1  ;;  %v7065_v1 = vld [vmem:[%s7394_s30 + $0xc4] sm:$0xf0]  ;;  %v6459_v13 = vld [vmem:[%s7394_s30 + $0x38] sm:$0xf0] }
 0x159   : > { %v6530_v7 = vor.u32 %v7065_v1, %v6529_v60  ;;  %v1217_v14 = vsub.f32 %v1213_v33, %v1215_v38  ;;  %2987 = vmatpush.bf16.msrb.mxu0 %v6466_v57  ;;  %3105 = vmatpush.bf16.msrb.mxu3 %v6526_v29  ;;  %v7047_v38 = vld [vmem:[%s7394_s30 + $0x34] sm:$0xf0]  ;;  %v6237_v50 = vld [vmem:[%s11297_s0 + $0xa0] sm:$0xf]  ;;  %v6995_v52 = vld [vmem:[%s11297_s0 + $0xa4] sm:$0xf0] }
 0x15a   : > { %v1152_v40 = vadd.f32 %v1151_v24, %v1150_v12  ;;  %v1209_v41 = vrot.slane %v1208_v25, 1  ;;  %v1750_v45 = vpop.f32.mrf.mxu0  ;;  %v7046_v12 = vld [vmem:[%s7394_s30 + $0x34] sm:$0xf]  ;;  %v2596_v24 = vld [vmem:[%s11298_s1 + $0xa0] sm:$0xff]  ;;  %v6238_v57 = vor.u32 %v6995_v52, %v6237_v50 }
 0x15b   : > { %v8051_v49 = vpop.f32.mrf.mxu3  ;;  %v1789_v5 = vpop.f32.mrf.mxu1  ;;  %2461 = vmatmul.bf16.gmra.mxu2 %v6230_v30  ;;  %v6462_v17 = vor.u32 %v7046_v12, %v6459_v13  ;;  %3026 = vmatpush.bf16.msrb.mxu1 %v6530_v7  ;;  %v6994_v1 = vld [vmem:[%s11297_s0 + $0xa4] sm:$0xf] }
 0x15c   : > { %v1210_v55 = vadd.f32 %v1209_v41, %v1208_v25  ;;  %v8055_v56 = vmul.f32 0.020408163, %v1152_v40  ;;  %v8059_v9 = vadd.f32 %v1789_v5, %v1750_v45  ;;  %2642 = vperm.xlu0 %7172, %v2596_v24   ;;  %v6521_v40 = vld [vmem:[%s7394_s30 + $0xb0] sm:$0xf]  ;;  %v6458_v45 = vor.u32 %v7047_v38, %v6457_v36  ;;  %v6239_v5 = vld [vmem:[%s11297_s0 + $0xa8] sm:$0xf0] }
 0x15d   : > { %2383 = vmatmul.bf16.gmra.mxu0 %v6230_v30  ;;  %3066 = vmatpush.bf16.msrb.mxu2 %v6462_v17  ;;  %v8072_v30 = vadd.f32 1e-05, %v1217_v14  ;;  %v6522_v47 = vor.u32 %v7063_v42, %v6521_v40  ;;  %v6515_v36 = vld [vmem:[%s7394_s30 + $0xa8] sm:$0xf0] }
 0x15e   : > { %v1214_v61 = vmul.f32 0.020408163, %v1210_v55  ;;  %v1216_v16 = vmul.f32 %v8055_v56, %v8055_v56  ;;  %v1828_v18 = vpop.f32.mrf.mxu2  ;;  %6374 = vmatmul.msk.bf16.gmra.mxu1 %vm937_vm1, %v6234_v62  ;;  %v2597_v55 = vld [vmem:[%s11298_s1 + $0xa8] sm:$0xff]  ;;  %2988 = vmatpush.bf16.msrb.mxu0 %v6458_v45 }
 0x15f   : > { %2647 = vperm.xlu1 %7173, %v2597_v55   ;;  %3027 = vmatpush.bf16.msrb.mxu1 %v6522_v47  ;;  %v3212_v55 = vld [vmem:[%s11298_s1 + $0x120] sm:$0xff]  ;;  %vm1228_vm6 = vweird.f32 %v8072_v30 }
 0x160   : > { %v1218_v25 = vsub.f32 %v1214_v61, %v1216_v16  ;;  %6380 = vmatmul.msk.bf16.gmra.mxu3 %vm937_vm1, %v6234_v62  ;;  %v6242_v16 = vor.u32 %v6994_v1, %v6239_v5  ;;  %v3213_v1 = vld [vmem:[%s11298_s1 + $0x128] sm:$0xff] }
 0x162   : > { %v8074_v33 = vadd.f32 1e-05, %v1218_v25  ;;  %v8076_v34 = vpop.f32.mrf.mxu0  ;;  %v7044_v25 = vld [vmem:[%s7394_s30 + $0x24] sm:$0xf] }
 0x163   : > { %v1867_v35 = vpop.f32.mrf.mxu3  ;;  %v8082_v41 = vpop.f32.mrf.mxu1  ;;  %v6454_v29 = vor.u32 %v7044_v25, %v6451_v27 }
 0x164   : > { %7175 = vrsqrt.f32 %v8074_v33  ;;  %v8085_v43 = vadd.f32 %v1867_v35, %v1828_v18  ;;  %v7060_v35 = vld [vmem:[%s7394_s30 + $0xa4] sm:$0xf]  ;;  %3226 = vperm.xlu0 %7172, %v3212_v55   ;;  %vm1238_vm3 = vweird.f32 %v8074_v33 }
 0x165   : > { %7177 = vrsqrt.f32 %v8072_v30  ;;  %v6518_v38 = vor.u32 %v7060_v35, %v6515_v36  ;;  %3067 = vmatpush.bf16.msrb.mxu2 %v6454_v29  ;;  %v8144_v35 = vpop.permute.xlu2 %1374 }
 0x166   : > { %v8097_v60 = vpop.f32.mrf.mxu2 }
 0x167   : > { %3106 = vmatpush.bf16.msrb.mxu3 %v6518_v38  ;;  %3231 = vperm.xlu1 %7173, %v3213_v1   ;;  %v8150_v38 = vpop.permute.xlu1 %1364 }
 0x16a   : > { %v7176_v62 = vpop.eup %7175  ;;  %v1755_v14 = vpop.f32.mrf.mxu0 }
 0x16b   : > { %v1233_v7 = vmul.f32 %v7176_v62, %v8074_v33  ;;  %v8106_v12 = vpop.f32.mrf.mxu3  ;;  %v7178_v13 = vpop.eup %7177  ;;  %2466 = vmatmul.bf16.gmra.mxu2 %v6238_v57  ;;  %vm1239_vm2 = vweird.f32 %v7176_v62 }
 0x16c   : > { %v1794_v61 = vpop.f32.mrf.mxu1  ;;  %v1223_v24 = vmul.f32 %v7178_v13, %v8072_v30  ;;  %vm1240_vm4 = vmor %vm1238_vm3, %vm1239_vm2  ;;  %vm1229_vm5 = vweird.f32 %v7178_v13  ;;  %v8140_v30 = vpop.permute.xlu0 %1354 }
 0x16d   : > { %v1234_v17 = vmul.f32 %v7176_v62, %v1233_v7  ;;  %v8108_v18 = vadd.f32 %v1794_v61, %v1755_v14  ;;  %2388 = vmatmul.bf16.gmra.mxu0 %v6238_v57  ;;  %vm1230_vm8 = vmor %vm1228_vm6, %vm1229_vm5  ;;  %11396 = vst [vmem:[#allocation15_spill] sm:$0xff] %v8140_v30 }
 0x16e   : > { %6375 = vmatmul.msk.bf16.gmra.mxu1 %vm937_vm1, %v6242_v16  ;;  %v1224_v40 = vmul.f32 %v7178_v13, %v1223_v24  ;;  %v1833_v42 = vpop.f32.mrf.mxu2  ;;  %v1219_v24 = vld [vmem:[%s660_s27] sm:$0x3] }
 0x16f   : > { %v1235_v28 = vmul.f32 0.5, %v1234_v17  ;;  %v7045_v17 = vld [vmem:[%s7394_s30 + $0x24] sm:$0xf0] }
 0x170   : > { %6381 = vmatmul.msk.bf16.gmra.mxu3 %vm937_vm1, %v6242_v16  ;;  %v1225_v52 = vmul.f32 0.5, %v1224_v40  ;;  %v6449_v16 = vld [vmem:[%s7394_s30 + $0x20] sm:$0xf] }
 0x171   : > { %v1236_v50 = vsub.f32 1.5, %v1235_v28  ;;  %v6450_v27 = vor.u32 %v7045_v17, %v6449_v16  ;;  %v8177_v17 = vpop.permute.xlu1 %1369 }
 0x172   : > { %v1226_v5 = vsub.f32 1.5, %v1225_v52  ;;  %v8146_v36 = vpop.f32.mrf.mxu0 }
 0x173   : > { %v1872_v45 = vpop.f32.mrf.mxu3  ;;  %v1237_v57 = vmul.f32 %v7176_v62, %v1236_v50  ;;  %2989 = vmatpush.bf16.msrb.mxu0 %v6450_v27  ;;  %v3215_v50 = vld [vmem:[%s11298_s1 + $0x138] sm:$0xff] }
 0x174   : > { %v8117_v47 = vadd.f32 %v1872_v45, %v1833_v42  ;;  %v1227_v14 = vmul.f32 %v7178_v13, %v1226_v5  ;;  %v8161_v52 = vpop.permute.xlu0 %1359  ;;  %3241 = vperm.xlu0 %7172, %v3215_v50   ;;  %v8174_v5 = vpop.permute.xlu2 %1379  ;;  %v6513_v27 = vld [vmem:[%s7394_s30 + $0xa0] sm:$0xf] }
 0x175   : > { %v1241_v7 = vsel %vm1240_vm4, %v7176_v62, %v1237_v57  ;;  %v2592_v62 = vld [vmem:[%s11298_s1 + $0x80] sm:$0xff]  ;;  %11397 = vst [vmem:[#allocation16_spill] sm:$0xff] %v8174_v5 }
 0x176   : > { %v1244_v61 = vrot.slane %v1241_v7, 7  ;;  %v1231_v33 = vsel %vm1230_vm8, %v7178_v13, %v1227_v14  ;;  %2622 = vperm.xlu2 %7174, %v2592_v62   ;;  %v8148_v13 = vpop.f32.mrf.mxu1  ;;  %v8154_v42 = vpop.f32.mrf.mxu2 }
 0x178   : > { %v1246_v25 = vsel %vm1245_vm7, %v1231_v33, %v1244_v61  ;;  %v1249_v61 = vld [vmem:[%s665_s26] sm:$0x3]  ;;  %s8338_s26 = scalar_lea.vmem [#allocation4], %s5835_s13 }
 0x179   : > { %v1248_v28 = vmul.f32 %v1246_v25, %v1219_v24 }
 0x17a   : > { %v1760_v7 = vpop.f32.mrf.mxu0 }
 0x17b   : > { %v8142_v29 = vperm.slane %v1248_v28, 1  ;;  %v8156_v45 = vperm.slane %v1248_v28, 0  ;;  %v8163_v57 = vpop.f32.mrf.mxu3  ;;  %v3838_v28 = vld [vmem:[%s11298_s1 + $0x190] sm:$0xff] }
 0x17c   : > { %v8181_v25 = vpop.permute.xlu0 %1384  ;;  %3860 = vperm.xlu0 %7172, %v3838_v28   ;;  %v8211_v28 = vpop.permute.xlu1 %1389 }
 0x17d   : > { %v1256_v40 = vmul.f32 %v8142_v29, %v8055_v56  ;;  %v3836_v56 = vld [vmem:[%s11298_s1 + $0x180] sm:$0xff]  ;;  %v1255_v1 = vmul.f32 %v8156_v45, %v8025_v6  ;;  %11398 = vst [vmem:[#allocation17_spill] sm:$0xff] %v8181_v25  ;;  %v1892_v15 = vmul.f32 %v8008_v26, %v8156_v45  ;;  %v1893_v59 = vmul.f32 %v8018_v2, %v8142_v29 }
 0x17e   : > { %3850 = vperm.xlu1 %7173, %v3836_v56   ;;  %v1799_v14 = vpop.f32.mrf.mxu1  ;;  %v8179_v24 = vpop.f32.mrf.mxu2  ;;  %v7061_v6 = vld [vmem:[%s7394_s30 + $0xa4] sm:$0xf0]  ;;  %11402 = vst [vmem:[#allocation21_spill] sm:$0xff] %v8211_v28  ;;  %v1900_v31 = vmul.f32 %v8108_v18, %v8156_v45  ;;  %v1271_v5 = vmul.f32 %v8156_v45, %v7819_v51  ;;  %v1870_v51 = vadd.f32 %v8106_v12, %v8097_v60 }
 0x17f   : > { %v1259_v55 = vrot.slane %v1256_v40, 7  ;;  %v8195_v56 = vpop.permute.xlu2 %1394  ;;  %v1265_v60 = vmul.f32 %v8156_v45, %v7743_v46  ;;  %v6385_v12 = vld [vmem:[%s11297_s0 + $0x120] sm:$0xf]  ;;  %v1266_v46 = vmul.f32 %v8142_v29, %v7774_v8  ;;  %v8408_v8 = vmul.f32 %v8156_v45, %v7834_v3 }
 0x180   : > { %11399 = vst [vmem:[#allocation18_spill] sm:$0xff] %v8195_v56  ;;  %v1270_v3 = vmul.f32 %v8142_v29, %v7817_v48 }
 0x181   : > { %v1260_v16 = vsel %vm1245_vm7, %v1255_v1, %v1259_v55  ;;  %v7042_v55 = vld [vmem:[%s7394_s30 + $0x14] sm:$0xf]  ;;  %v6514_v1 = vor.u32 %v7061_v6, %v6513_v27 }
 0x182   : > { %v1262_v33 = vsub.f32 %v1249_v61, %v1260_v16  ;;  %v6443_v61 = vld [vmem:[%s7394_s30 + $0x18] sm:$0xf0]  ;;  %v7058_v16 = vld [vmem:[%s7394_s30 + $0x94] sm:$0xf]  ;;  %v8200_v58 = vpop.f32.mrf.mxu0 }
 0x183   : > { %v8185_v62 = vpop.f32.mrf.mxu3  ;;  %11400 = vst [vmem:[#allocation19_spill] sm:$0xff] %v8200_v58  ;;  %3028 = vmatpush.bf16.msrb.mxu1 %v6514_v1  ;;  %v6446_v27 = vor.u32 %v7042_v55, %v6443_v61  ;;  %v6510_v6 = vor.u32 %v7058_v16, %v6507_v32  ;;  %v6247_v16 = vld [vmem:[%s11297_s0 + $0xb8] sm:$0xf0] }
 0x184   : > { %v8190_v40 = vperm.slane %v1262_v33, 0  ;;  %v8192_v50 = vperm.slane %v1262_v33, 1  ;;  %v3216_v33 = vld [vmem:[%s11298_s1 + $0x140] sm:$0xff]  ;;  %v8217_v56 = vpop.permute.xlu0 %1399 }
 0x185   : > { %3068 = vmatpush.bf16.msrb.mxu2 %v6446_v27  ;;  %3107 = vmatpush.bf16.msrb.mxu3 %v6510_v6  ;;  %11404 = vst [vmem:[#allocation23_spill] sm:$0xff] %v8217_v56  ;;  %v3217_v27 = vld [vmem:[%s11298_s1 + $0x148] sm:$0xff]  ;;  %v1800_v6 = vadd.f32 %v1799_v14, %v1760_v7 }
 0x186   : > { %v8202_v53 = vpop.f32.mrf.mxu1  ;;  %3246 = vperm.xlu1 %7173, %v3216_v33   ;;  %v1916_v58 = vadd.f32 %v1892_v15, %v8190_v40  ;;  %v8215_v26 = vpop.f32.mrf.mxu2  ;;  %3251 = vperm.xlu0 %7172, %v3217_v27   ;;  %v6505_v56 = vld [vmem:[%s7394_s30 + $0x90] sm:$0xf]  ;;  %v7056_v27 = vld [vmem:[%s7394_s30 + $0x84] sm:$0xf] }
 0x187   : > { %11401 = vst [vmem:[#allocation20_spill] sm:$0xff] %v8202_v53  ;;  %v1917_v53 = vadd.f32 %v1893_v59, %v8192_v50  ;;  %v1979_v28 = vpop.permute.xlu2 %1978  ;;  %v6245_v59 = vld [vmem:[%s11297_s0 + $0xb0] sm:$0xf]  ;;  %v8241_v33 = vpop.permute.xlu1 %1404  ;;  %v6502_v18 = vor.u32 %v7056_v27, %v6499_v44 }
 0x188   : > { %11403 = vst [vmem:[#allocation22_spill] sm:$0xff] %v8215_v26  ;;  %v1940_v2 = vmax.f32 %v1916_v58, 0.0  ;;  %v6996_v58 = vld [vmem:[%s11297_s0 + $0xb4] sm:$0xf] }
 0x189   : > { %v1941_v1 = vmax.f32 %v1917_v53, 0.0  ;;  %v6997_v53 = vld [vmem:[%s11297_s0 + $0xb4] sm:$0xf0]  ;;  %11406 = vst [vmem:[#allocation25_spill] sm:$0xff] %v8241_v33  ;;  %v6250_v26 = vor.u32 %v6996_v58, %v6247_v16  ;;  %v1897_v58 = vmul.f32 %v8085_v43, %v8142_v29  ;;  %3108 = vmatpush.bf16.msrb.mxu3 %v6502_v18  ;;  %v3842_v27 = vld [vmem:[%s11298_s1 + $0x1b0] sm:$0xff] }
 0x18a   : > { %v8221_v55 = vmul.f32 %v1979_v28, %v1940_v2  ;;  %v8228_v15 = vpop.f32.mrf.mxu0  ;;  %v6441_v2 = vld [vmem:[%s7394_s30 + $0x10] sm:$0xf]  ;;  %v7059_v33 = vld [vmem:[%s7394_s30 + $0x94] sm:$0xf0] }
 0x18b   : > { %v8219_v39 = vpop.f32.mrf.mxu3  ;;  %v8223_v32 = vmul.f32 %v1979_v28, %v1941_v1  ;;  %v2595_v28 = vld [vmem:[%s11298_s1 + $0x98] sm:$0xff]  ;;  %6376 = vmatmul.msk.bf16.gmra.mxu1 %vm937_vm1, %v6250_v26  ;;  %6382 = vmatmul.msk.bf16.gmra.mxu3 %vm937_vm1, %v6250_v26  ;;  %v6506_v16 = vor.u32 %v7059_v33, %v6505_v56  ;;  %v1921_v43 = vadd.f32 %v1897_v58, %v8192_v50 }
 0x18c   : > { %11405 = vst [vmem:[#allocation24_spill] sm:$0xff] %v8219_v39  ;;  %v7043_v1 = vld [vmem:[%s7394_s30 + $0x14] sm:$0xf0]  ;;  %2637 = vperm.xlu2 %7174, %v2595_v28   ;;  %v6246_v39 = vor.u32 %v6997_v53, %v6245_v59  ;;  %v8260_v7 = vpop.permute.xlu0 %1983  ;;  %v7040_v28 = vld [vmem:[%s7394_s30 + $0x4] sm:$0xf]  ;;  %v1896_v53 = vmul.f32 %v8059_v9, %v8156_v45 }
 0x18d   : > { %v6442_v14 = vor.u32 %v7043_v1, %v6441_v2  ;;  %v6435_v59 = vld [vmem:[%s7394_s30 + $0x8] sm:$0xf0]  ;;  %3029 = vmatpush.bf16.msrb.mxu1 %v6506_v16  ;;  %v1878_v2 = vadd.f32 %v8185_v62, %v8179_v24  ;;  %v1945_v24 = vmax.f32 %v1921_v43, 0.0  ;;  %v1904_v43 = vmul.f32 %v1800_v6, %v8156_v45 }
 0x18e   : > { %v8230_v61 = vpop.f32.mrf.mxu1  ;;  %v8253_v11 = vpop.f32.mrf.mxu2  ;;  %2471 = vmatmul.bf16.gmra.mxu2 %v6246_v39  ;;  %2393 = vmatmul.bf16.gmra.mxu0 %v6246_v39  ;;  %v1901_v39 = vmul.f32 %v8117_v47, %v8142_v29  ;;  %v1920_v9 = vadd.f32 %v1896_v53, %v8190_v40  ;;  %v6438_v26 = vor.u32 %v7040_v28, %v6435_v59 }
 0x18f   : > { %2990 = vmatpush.bf16.msrb.mxu0 %v6442_v14  ;;  %3870 = vperm.xlu1 %7173, %v3840_v63   ;;  %v8284_v1 = vpop.permute.xlu2 %1993  ;;  %v1924_v47 = vadd.f32 %v1900_v31, %v8190_v40  ;;  %v2598_v63 = vld [vmem:[%s11298_s1 + $0xb0] sm:$0xff]  ;;  %v3841_v14 = vld [vmem:[%s11298_s1 + $0x1a8] sm:$0xff]  ;;  %v1989_v28 = vpop.permute.xlu1 %1988  ;;  %v1928_v6 = vadd.f32 %v1904_v43, %v8190_v40  ;;  %v1787_v43 = vadd.f32 %v8020_v4, %v8016_v54 }
 0x190   : > { %v1944_v53 = vmax.f32 %v1920_v9, 0.0  ;;  %3069 = vmatpush.bf16.msrb.mxu2 %v6438_v26  ;;  %v1925_v62 = vadd.f32 %v1901_v39, %v8192_v50  ;;  %3875 = vperm.xlu0 %7172, %v3841_v14   ;;  %v8298_v59 = vmul.f32 %v1989_v28, %v1945_v24  ;;  %v1905_v39 = vmul.f32 %v1878_v2, %v8142_v29  ;;  %v3214_v2 = vld [vmem:[%s11298_s1 + $0x130] sm:$0xff] }
 0x191   : > { %v1948_v58 = vmax.f32 %v1924_v47, 0.0  ;;  %v1792_v54 = vadd.f32 %v8082_v41, %v8076_v34 }
 0x192   : > { %v8280_v56 = vpop.f32.mrf.mxu0  ;;  %v8296_v31 = vmul.f32 %v1989_v28, %v1944_v53  ;;  %v1949_v16 = vmax.f32 %v1925_v62, 0.0  ;;  %v3843_v53 = vld [vmem:[%s11298_s1 + $0x1b8] sm:$0xff]  ;;  %v1929_v24 = vadd.f32 %v1905_v39, %v8192_v50 }
 0x193   : > { %v8258_v30 = vpop.f32.mrf.mxu3  ;;  %11407 = vst [vmem:[#allocation26_spill] sm:$0xff] %v8280_v56  ;;  %v6433_v62 = vld [vmem:[%s7394_s30] sm:$0xf] }
 0x194   : > { %2652 = vperm.xlu2 %7174, %v2598_v63   ;;  %v1999_v26 = vpop.permute.xlu0 %1998  ;;  %v6744_v39 = vld [vmem:[%s8338_s26 + $0x2] ss:$8 sm:$0x3] }
 0x195   : > { %v8309_v18 = vmul.f32 %v1999_v26, %v1948_v58  ;;  %v8311_v47 = vmul.f32 %v1999_v26, %v1949_v16  ;;  %v7041_v58 = vld [vmem:[%s7394_s30 + $0x4] sm:$0xf0]  ;;  %v6497_v16 = vld [vmem:[%s7394_s30 + $0x80] sm:$0xf] }
 0x196   : > { %v8282_v33 = vpop.f32.mrf.mxu1  ;;  %v8294_v44 = vpop.f32.mrf.mxu2 }
 0x197   : > { %11408 = vst [vmem:[#allocation27_spill] sm:$0xff] %v8282_v33  ;;  %3880 = vperm.xlu1 %7173, %v3842_v27   ;;  %v2009_v28 = vpop.permute.xlu2 %2008  ;;  %v7057_v27 = vld [vmem:[%s7394_s30 + $0x84] sm:$0xf0] }
 0x198   : > { %11409 = vst [vmem:[#allocation28_spill] sm:$0xff] %v8294_v44  ;;  %3885 = vperm.xlu0 %7172, %v3843_v53   ;;  %v3220_v44 = vld [vmem:[%s11298_s1 + $0x160] sm:$0xff]  ;;  %v1865_v53 = vadd.f32 %v8051_v49, %v8037_v20  ;;  %v6498_v25 = vor.u32 %v7057_v27, %v6497_v16  ;;  %v3837_v20 = vld [vmem:[%s11298_s1 + $0x188] sm:$0xff]  ;;  %v8356_v49 = vperm.slane %v6744_v39, 0  ;;  %v8404_v16 = vmul.f32 %v1792_v54, %v8156_v45  ;;  %v8410_v27 = vpop.permute.xlu1 %2003 }
 0x199   : > { %11411 = vst [vmem:[#allocation30_spill] sm:$0xff] %v8311_v47  ;;  %v1267_v47 = vmul.f32 %v8156_v45, %v7776_v10  ;;  %v8364_v10 = vadd.f32 %v8148_v13, %v8146_v36  ;;  %v8383_v36 = vmul.f32 %v1787_v43, %v8156_v45  ;;  %v7096_v43 = vld [vmem:[%s7394_s30 + $0x74] sm:$0xf]  ;;  %v1269_v54 = vmul.f32 %v8156_v45, %v7792_v23  ;;  %v7097_v23 = vld [vmem:[%s7394_s30 + $0x74] sm:$0xf0] }
 0x19a   : > { %v8313_v63 = vpop.f32.mrf.mxu0  ;;  %3030 = vmatpush.bf16.msrb.mxu1 %v6498_v25  ;;  %v8386_v13 = vmul.f32 %v1865_v53, %v8142_v29  ;;  %v7028_v25 = vld [vmem:[%s11297_s0 + $0x124] sm:$0xf]  ;;  %11414 = vst [vmem:[#allocation33_spill] sm:$0xff] %v8410_v27 }
 0x19b   : > { %v8303_v9 = vpop.f32.mrf.mxu3 }
 0x19c   : > { %11410 = vst [vmem:[#allocation29_spill] sm:$0xff] %v8303_v9  ;;  %3236 = vperm.xlu2 %7174, %v3214_v2   ;;  %v1952_v9 = vmax.f32 %v1928_v6, 0.0  ;;  %v1953_v2 = vmax.f32 %v1929_v24, 0.0  ;;  %v6434_v6 = vor.u32 %v7041_v58, %v6433_v62  ;;  %v8370_v24 = vadd.f32 %v8190_v40, %v1271_v5  ;;  %v7029_v5 = vld [vmem:[%s11297_s0 + $0x124] sm:$0xf0] }
 0x19d   : > { %v1268_v62 = vmul.f32 %v8142_v29, %v7790_v21  ;;  %v1272_v21 = vmul.f32 %v8142_v29, %v7832_v0  ;;  %v1294_v0 = vadd.f32 %v8190_v40, %v1265_v60 }
 0x19e   : > { %v8315_v14 = vpop.f32.mrf.mxu1  ;;  %v8329_v26 = vpop.f32.mrf.mxu2  ;;  %v8343_v56 = vmul.f32 %v2009_v28, %v1952_v9  ;;  %v8351_v4 = vmul.f32 %v2009_v28, %v1953_v2  ;;  %v8358_v9 = vperm.slane %v6744_v39, 1  ;;  %2991 = vmatpush.bf16.msrb.mxu0 %v6434_v6  ;;  %v8375_v28 = vadd.f32 %v8190_v40, %v1267_v47  ;;  %v6387_v47 = vld [vmem:[%s11297_s0 + $0x128] sm:$0xf0]  ;;  %v6671_v39 = vld [vmem:[%s7394_s30 + $0x78] sm:$0xf0] }
 0x19f   : > { %3266 = vperm.xlu1 %7173, %v3220_v44   ;;  %v3221_v44 = vld [vmem:[%s11298_s1 + $0x168] sm:$0xff]  ;;  %v1297_v58 = vadd.f32 %v8192_v50, %v1268_v62  ;;  %v1295_v6 = vadd.f32 %v8192_v50, %v1266_v46  ;;  %v1324_v62 = vmax.f32 %v8370_v24, 0.0  ;;  %v6674_v48 = vor.u32 %v7096_v43, %v6671_v39 }
 0x1a0   : > { %11412 = vst [vmem:[#allocation31_spill] sm:$0xff] %v8343_v56  ;;  %v3374_v2 = vld [vmem:[%s7394_s30 + $0xf0] sm:$0xff]  ;;  %3271 = vperm.xlu0 %7172, %v3221_v44   ;;  %v8428_v44 = vadd.f32 %v8192_v50, %v1272_v21  ;;  %v1320_v60 = vmax.f32 %v8375_v28, 0.0  ;;  %v1883_v21 = vadd.f32 %v8258_v30, %v8253_v11  ;;  %v8448_v11 = vmul.f32 %v1870_v51, %v8142_v29 }
 0x1a1   : > { %11413 = vst [vmem:[#allocation32_spill] sm:$0xff] %v8351_v4  ;;  %v6669_v46 = vld [vmem:[%s7394_s30 + $0x70] sm:$0xf]  ;;  %v6390_v4 = vor.u32 %v7028_v25, %v6387_v47  ;;  %v3521_v56 = vunpack.c.h.b16 %v3374_v2  ;;  %v1321_v27 = vmax.f32 %v1297_v58, 0.0  ;;  %v1319_v24 = vmax.f32 %v1295_v6, 0.0  ;;  %3686 = vmatpush.bf16.msra.mxu2 %v6674_v48 }
 0x1a2   : > { %v1772_v34 = vpop.f32.mrf.mxu0  ;;  %v3520_v28 = vunpack.c.l.b16 %v3374_v2  ;;  %v1325_v25 = vmax.f32 %v8428_v44, 0.0  ;;  %v8445_v47 = vadd.f32 %v8190_v40, %v1269_v54  ;;  %v8452_v30 = vmul.f32 %v8156_v45, %v7853_v22  ;;  %v6663_v58 = vld [vmem:[%s7394_s30 + $0x68] sm:$0xf0]  ;;  %v7110_v2 = vld [vmem:[%s7394_s30 + $0xe4] sm:$0xf]  ;;  %v3846_v54 = vld [vmem:[%s11298_s1 + $0x1d0] sm:$0xff] }
 0x1a3   : > { %v8334_v33 = vpop.f32.mrf.mxu3  ;;  %v3845_v34 = vld [vmem:[%s11298_s1 + $0x1c8] sm:$0xff]  ;;  %6551 = vmatmul.msk.bf16.vlgmr.msrb.gmra.mxu1 %vm937_vm1, %v6390_v4  ;;  %v8461_v43 = vadd.f32 %v8192_v50, %v1270_v3  ;;  %6557 = vmatmul.msk.bf16.vlgmr.msrb.gmra.mxu3 %vm937_vm1, %v6390_v4  ;;  %v1909_v39 = vmul.f32 %v1883_v21, %v8142_v29  ;;  %v8476_v3 = vmul.f32 %v8150_v38, %v1320_v60 }
 0x1a4   : > { %3855 = vperm.xlu2 %7174, %v3837_v20   ;;  %v8418_v20 = vmul.f32 %v8142_v29, %v7851_v19  ;;  %v1805_v19 = vadd.f32 %v8230_v61, %v8228_v15  ;;  %v3553_v15 = vpack.c.b16 %v3521_v56, %v3521_v56  ;;  %v6670_v61 = vor.u32 %v7097_v23, %v6669_v46  ;;  %v7094_v56 = vld [vmem:[%s7394_s30 + $0x64] sm:$0xf]  ;;  %v6727_v6 = vld [vmem:[%s7394_s30 + $0xe8] sm:$0xf0] }
 0x1a5   : > { %11417 = vst [vmem:[#allocation36_spill] sm:$0xff] %v8476_v3  ;;  %v8479_v4 = vmul.f32 %v8150_v38, %v1321_v27  ;;  %v8487_v23 = vmul.f32 %v8161_v52, %v1319_v24  ;;  %v3552_v48 = vpack.c.b16 %v3520_v28, %v3520_v28  ;;  %v1322_v38 = vmax.f32 %v8445_v47, 0.0  ;;  %v8494_v27 = vld [vmem:[%s8338_s26] ss:$8 sm:$0x3] }
 0x1a6   : > { %v1811_v41 = vpop.f32.mrf.mxu1  ;;  %v1850_v53 = vpop.f32.mrf.mxu2  ;;  %11415 = vst [vmem:[#allocation34_spill] sm:$0xff] %v8418_v20  ;;  %v1318_v20 = vmax.f32 %v1294_v0, 0.0  ;;  %v3839_v0 = vld [vmem:[%s11298_s1 + $0x198] sm:$0xff]  ;;  %v3606_v51 = vsel %vm956_vm0, %v3553_v15, 0  ;;  %3608 = vmatpush.bf16.msra.mxu0 %v6670_v61  ;;  %v6730_v21 = vor.u32 %v7110_v2, %v6727_v6  ;;  %v1323_v24 = vmax.f32 %v8461_v43, 0.0 }
 0x1a7   : > { %v6386_v53 = vor.u32 %v7029_v5, %v6385_v12  ;;  %3895 = vperm.xlu1 %7173, %v3845_v34   ;;  %v8473_v34 = vmul.f32 %v8144_v35, %v1324_v62  ;;  %11418 = vst [vmem:[#allocation37_spill] sm:$0xff] %v8479_v4  ;;  %3725 = vmatpush.bf16.msra.mxu3 %v3606_v51  ;;  %v3603_v28 = vsel %vm956_vm0, %v3552_v48, 0  ;;  %v6393_v47 = vld [vmem:[%s11297_s0 + $0x130] sm:$0xf]  ;;  %v6661_v43 = vld [vmem:[%s7394_s30 + $0x60] sm:$0xf] }
 0x1a8   : > { %v8482_v44 = vmul.f32 %v8161_v52, %v1318_v20  ;;  %11420 = vst [vmem:[#allocation39_spill] sm:$0xff] %v8487_v23  ;;  %v8496_v20 = vpop.permute.xlu0 %2013  ;;  %v1810_v52 = vadd.f32 %v8315_v14, %v8313_v63  ;;  %3900 = vperm.xlu0 %7172, %v3846_v54   ;;  %v8511_v63 = vmul.f32 %v8144_v35, %v1325_v25  ;;  %v7095_v51 = vld [vmem:[%s7394_s30 + $0x64] sm:$0xf0]  ;;  %v7092_v2 = vld [vmem:[%s7394_s30 + $0x54] sm:$0xf] }
 0x1a9   : > { %3070 = vmatmul.bf16.vlgmr.msrb.gmra.mxu2 %v6386_v53  ;;  %2992 = vmatmul.bf16.vlgmr.msrb.gmra.mxu0 %v6386_v53  ;;  %11416 = vst [vmem:[#allocation35_spill] sm:$0xff] %v8473_v34  ;;  %v1933_v53 = vadd.f32 %v1909_v39, %v8192_v50  ;;  %v8515_v14 = vmul.f32 %v8142_v29, %v7868_v37  ;;  %v6725_v39 = vld [vmem:[%s7394_s30 + $0xe0] sm:$0xf] }
 0x1aa   : > { %v8439_v12 = vpop.f32.mrf.mxu0  ;;  %11419 = vst [vmem:[#allocation38_spill] sm:$0xff] %v8482_v44  ;;  %3647 = vmatpush.bf16.msra.mxu1 %v3603_v28  ;;  %v8528_v35 = vmul.f32 %v8356_v49, %v8473_v34  ;;  %v8532_v37 = vmul.f32 %v8356_v49, %v8476_v3  ;;  %v1912_v25 = vmul.f32 %v1810_v52, %v8156_v45  ;;  %v6719_v52 = vld [vmem:[%s7394_s30 + $0xd8] sm:$0xf0]  ;;  %v8566_v28 = vperm.slane %v8494_v27, 0 }
 0x1ab   : > { %v1889_v41 = vpop.f32.mrf.mxu3  ;;  %11421 = vst [vmem:[#allocation40_spill] sm:$0xff] %v8496_v20  ;;  %v1957_v15 = vmax.f32 %v1933_v53, 0.0  ;;  %3726 = vmatpush.bf16.msra.mxu3 %v6730_v21  ;;  %v8546_v53 = vmul.f32 %v8358_v9, %v8479_v4  ;;  %v1888_v48 = vadd.f32 %v8334_v33, %v8329_v26  ;;  %v7108_v21 = vld [vmem:[%s7394_s30 + $0xd4] sm:$0xf]  ;;  %v6395_v26 = vld [vmem:[%s11297_s0 + $0x138] sm:$0xf0] }
 0x1ac   : > { %v1908_v41 = vmul.f32 %v1805_v19, %v8156_v45  ;;  %v2019_v19 = vpop.permute.xlu1 %2018  ;;  %3865 = vperm.xlu2 %7174, %v3839_v0   ;;  %v7031_v0 = vld [vmem:[%s11297_s0 + $0x134] sm:$0xf0]  ;;  %11423 = vst [vmem:[#allocation42_spill] sm:$0xff] %v8528_v35  ;;  %v7030_v33 = vld [vmem:[%s11297_s0 + $0x134] sm:$0xf]  ;;  %v1936_v3 = vadd.f32 %v1912_v25, %v8190_v40  ;;  %v6722_v35 = vor.u32 %v7108_v21, %v6719_v52  ;;  %v8605_v21 = vperm.slane %v8494_v27, 1  ;;  %v8618_v27 = vpop.permute.xlu2 %2023 }
 0x1ad   : > { %v1913_v20 = vmul.f32 %v1888_v48, %v8142_v29  ;;  %v7093_v4 = vld [vmem:[%s7394_s30 + $0x54] sm:$0xf0]  ;;  %v8598_v25 = vmul.f32 %v8177_v17, %v1323_v24  ;;  %v7090_v48 = vld [vmem:[%s7394_s30 + $0x44] sm:$0xf]  ;;  %v8609_v52 = vmul.f32 %v8566_v28, %v8221_v55  ;;  %v6711_v24 = vld [vmem:[%s7394_s30 + $0xc8] sm:$0xf0] }
 0x1ae   : > { %v8441_v5 = vpop.f32.mrf.mxu1  ;;  %v1932_v22 = vadd.f32 %v1908_v41, %v8190_v40  ;;  %v8484_v46 = vpop.f32.mrf.mxu2  ;;  %v6666_v41 = vor.u32 %v7094_v56, %v6663_v58  ;;  %v5100_v56 = vld [vmem:[%s11298_s1 + $0xd0] sm:$0xff]  ;;  %v8519_v58 = vadd.f32 %v8383_v36, %v8190_v40  ;;  %v8534_v36 = vmul.f32 %v2019_v19, %v1957_v15  ;;  %11425 = vst [vmem:[#allocation44_spill] sm:$0xff] %v8618_v27 }
 0x1af   : > { %5109 = vperm.xlu1 %7173, %v5100_v56   ;;  %v8563_v15 = vadd.f32 %v8190_v40, %v8408_v8  ;;  %v6662_v56 = vor.u32 %v7095_v51, %v6661_v43  ;;  %v2409_v43 = vadd.f32 %v8441_v5, %v8439_v12  ;;  %v1937_v5 = vadd.f32 %v1913_v20, %v8192_v50  ;;  %v7105_v27 = vld [vmem:[%s7394_s30 + $0xb4] sm:$0xf0] }
 0x1b0   : > { %v1956_v62 = vmax.f32 %v1932_v22, 0.0  ;;  %3687 = vmatpush.bf16.msra.mxu2 %v6666_v41  ;;  %11424 = vst [vmem:[#allocation43_spill] sm:$0xff] %v8534_v36  ;;  %v7111_v22 = vld [vmem:[%s7394_s30 + $0xe4] sm:$0xf0]  ;;  %v6655_v41 = vld [vmem:[%s7394_s30 + $0x58] sm:$0xf0]  ;;  %v8570_v36 = vadd.f32 %v8386_v13, %v8192_v50  ;;  %v2029_v12 = vpop.permute.xlu0 %2028  ;;  %3727 = vmatpush.bf16.msra.mxu3 %v6722_v35 }
 0x1b1   : > { %v1942_v8 = vmax.f32 %v8519_v58, 0.0  ;;  %3609 = vmatpush.bf16.msra.mxu0 %v6662_v56  ;;  %v6658_v34 = vor.u32 %v7092_v2, %v6655_v41  ;;  %v6717_v58 = vld [vmem:[%s7394_s30 + $0xd0] sm:$0xf]  ;;  %v7109_v2 = vld [vmem:[%s7394_s30 + $0xd4] sm:$0xf0] }
 0x1b2   : > { %v8501_v61 = vmul.f32 %v2019_v19, %v1956_v62  ;;  %v8540_v6 = vpop.f32.mrf.mxu0  ;;  %v8550_v62 = vmul.f32 %v8356_v49, %v8482_v44  ;;  %v8554_v19 = vmul.f32 %v8358_v9, %v8487_v23  ;;  %v6726_v23 = vor.u32 %v7111_v22, %v6725_v39  ;;  %v6653_v44 = vld [vmem:[%s7394_s30 + $0x50] sm:$0xf]  ;;  %v6647_v41 = vld [vmem:[%s7394_s30 + $0x48] sm:$0xf0] }
 0x1b3   : > { %v8490_v60 = vpop.f32.mrf.mxu3  ;;  %v8595_v39 = vmul.f32 %v8177_v17, %v1322_v38  ;;  %v6398_v22 = vor.u32 %v7030_v33, %v6395_v26  ;;  %v1960_v38 = vmax.f32 %v1936_v3, 0.0  ;;  %v2516_v17 = vmul.f32 %v2409_v43, %v8156_v45  ;;  %v6743_v35 = vld [vmem:[%s8338_s26 + $0x1] ss:$8 sm:$0x3] }
 0x1b4   : > { %11422 = vst [vmem:[#allocation41_spill] sm:$0xff] %v8501_v61  ;;  %v6394_v61 = vor.u32 %v7031_v0, %v6393_v47  ;;  %v3218_v47 = vld [vmem:[%s11298_s1 + $0x150] sm:$0xff]  ;;  %v5102_v0 = vld [vmem:[%s11298_s1 + $0xe0] sm:$0xff]  ;;  %3648 = vmatpush.bf16.msra.mxu1 %v6726_v23  ;;  %3688 = vmatpush.bf16.msra.mxu2 %v6658_v34  ;;  %v1943_v20 = vmax.f32 %v8570_v36, 0.0  ;;  %v8616_v33 = vmul.f32 %v8260_v7, %v1942_v8  ;;  %v1961_v26 = vmax.f32 %v1937_v5, 0.0  ;;  %v5103_v36 = vld [vmem:[%s11298_s1 + $0xe8] sm:$0xff] }
 0x1b5   : > { %v7106_v23 = vld [vmem:[%s7394_s30 + $0xc4] sm:$0xf]  ;;  %v6654_v56 = vor.u32 %v7093_v4, %v6653_v44  ;;  %3256 = vperm.xlu2 %7174, %v3218_v47   ;;  %5119 = vperm.xlu0 %7172, %v5102_v0   ;;  %v8620_v55 = vmul.f32 %v2029_v12, %v1960_v38  ;;  %v6718_v34 = vor.u32 %v7109_v2, %v6717_v58  ;;  %v6645_v8 = vld [vmem:[%s7394_s30 + $0x40] sm:$0xf]  ;;  %v7091_v0 = vld [vmem:[%s7394_s30 + $0x44] sm:$0xf0] }
 0x1b6   : > { %v8542_v54 = vpop.f32.mrf.mxu1  ;;  %v8582_v13 = vpop.f32.mrf.mxu2  ;;  %v2487_v3 = vadd.f32 %v8490_v60, %v8484_v46  ;;  %6552 = vmatmul.msk.bf16.gmra.mxu1 %vm937_vm1, %v6398_v22  ;;  %v8630_v43 = vmul.f32 %v2029_v12, %v1961_v26  ;;  %v6714_v47 = vor.u32 %v7106_v23, %v6711_v24  ;;  %v6709_v58 = vld [vmem:[%s7394_s30 + $0xc0] sm:$0xf]  ;;  %v7107_v46 = vld [vmem:[%s7394_s30 + $0xc4] sm:$0xf0]  ;;  %v8637_v60 = vmul.f32 %v8605_v21, %v8223_v32  ;;  %v7088_v23 = vld [vmem:[%s7394_s30 + $0x34] sm:$0xf] }
 0x1b7   : > { %11426 = vst [vmem:[#allocation45_spill] sm:$0xff] %v8620_v55  ;;  %3610 = vmatpush.bf16.msra.mxu0 %v6654_v56  ;;  %6558 = vmatmul.msk.bf16.gmra.mxu3 %vm937_vm1, %v6398_v22  ;;  %v2540_v12 = vadd.f32 %v2516_v17, %v8190_v40  ;;  %v8643_v2 = vmul.f32 %v8260_v7, %v1943_v20  ;;  %v6639_v24 = vld [vmem:[%s7394_s30 + $0x38] sm:$0xf0]  ;;  %v6701_v55 = vld [vmem:[%s7394_s30 + $0xb0] sm:$0xf] }
 0x1b8   : > { %11427 = vst [vmem:[#allocation46_spill] sm:$0xff] %v8630_v43  ;;  %3649 = vmatpush.bf16.msra.mxu1 %v6718_v34  ;;  %v2517_v5 = vmul.f32 %v2487_v3, %v8142_v29  ;;  %3728 = vmatpush.bf16.msra.mxu3 %v6714_v47  ;;  %v2411_v38 = vadd.f32 %v8542_v54, %v8540_v6  ;;  %v3219_v56 = vld [vmem:[%s11298_s1 + $0x158] sm:$0xff] }
 0x1b9   : > { %3075 = vmatmul.bf16.gmra.mxu2 %v6394_v61  ;;  %2997 = vmatmul.bf16.gmra.mxu0 %v6394_v61  ;;  %v6650_v61 = vor.u32 %v7090_v48, %v6647_v41  ;;  %v2603_v48 = vpop.permute.xlu1 %2602  ;;  %v8645_v41 = vperm.slane %v6743_v35, 0  ;;  %v2564_v26 = vmax.f32 %v2540_v12, 0.0  ;;  %v6646_v7 = vor.u32 %v7091_v0, %v6645_v8  ;;  %v5105_v6 = vld [vmem:[%s11298_s1 + $0xf8] sm:$0xff] }
 0x1ba   : > { %v2374_v4 = vpop.f32.mrf.mxu0  ;;  %v2541_v17 = vadd.f32 %v2517_v5, %v8192_v50  ;;  %5124 = vperm.xlu1 %7173, %v5103_v36   ;;  %v6710_v20 = vor.u32 %v7107_v46, %v6709_v58  ;;  %v7104_v36 = vld [vmem:[%s7394_s30 + $0xb4] sm:$0xf]  ;;  %v6703_v8 = vld [vmem:[%s7394_s30 + $0xb8] sm:$0xf0]  ;;  %v8667_v0 = vperm.slane %v6743_v35, 1  ;;  %v6642_v58 = vor.u32 %v7088_v23, %v6639_v24  ;;  %v2608_v46 = vpop.permute.xlu2 %2607 }
 0x1bb   : > { %v2488_v51 = vpop.f32.mrf.mxu3  ;;  %3689 = vmatpush.bf16.msra.mxu2 %v6650_v61  ;;  %v2660_v47 = vmul.f32 %v2603_v48, %v2564_v26  ;;  %3611 = vmatpush.bf16.msra.mxu0 %v6646_v7  ;;  %v6637_v26 = vld [vmem:[%s7394_s30 + $0x30] sm:$0xf]  ;;  %v7089_v7 = vld [vmem:[%s7394_s30 + $0x34] sm:$0xf0] }
 0x1bc   : > { %v2489_v32 = vadd.f32 %v2488_v51, %v8582_v13  ;;  %v8661_v13 = vmul.f32 %v8566_v28, %v8616_v33  ;;  %v2518_v51 = vmul.f32 %v2411_v38, %v8156_v45  ;;  %v2565_v61 = vmax.f32 %v2541_v17, 0.0  ;;  %3650 = vmatpush.bf16.msra.mxu1 %v6710_v20 }
 0x1bd   : > { %3261 = vperm.xlu2 %7174, %v3219_v56   ;;  %5134 = vperm.xlu0 %7172, %v5105_v6   ;;  %v3979_v20 = vmul.f32 %v8605_v21, %v8643_v2  ;;  %v7033_v56 = vld [vmem:[%s11297_s0 + $0x144] sm:$0xf0]  ;;  %v6638_v43 = vor.u32 %v7089_v7, %v6637_v26  ;;  %v1923_v26 = vadd.f32 %v8448_v11, %v8192_v50 }
 0x1be   : > { %v2413_v44 = vpop.f32.mrf.mxu1  ;;  %v2452_v22 = vpop.f32.mrf.mxu2  ;;  %v2519_v34 = vmul.f32 %v2489_v32, %v8142_v29  ;;  %v2542_v5 = vadd.f32 %v2518_v51, %v8190_v40  ;;  %v2661_v35 = vmul.f32 %v2603_v48, %v2565_v61  ;;  %v6706_v32 = vor.u32 %v7104_v36, %v6703_v8  ;;  %v5106_v48 = vld [vmem:[%s11298_s1 + $0x100] sm:$0xff] }
 0x1bf   : > { %v2414_v3 = vadd.f32 %v2413_v44, %v2374_v4  ;;  %v6401_v4 = vld [vmem:[%s11297_s0 + $0x140] sm:$0xf]  ;;  %v4025_v44 = vmul.f32 %v8645_v41, %v2660_v47  ;;  %3690 = vmatpush.bf16.msra.mxu2 %v6642_v58  ;;  %3612 = vmatpush.bf16.msra.mxu0 %v6638_v43 }
 0x1c0   : > { %v2543_v12 = vadd.f32 %v2519_v34, %v8192_v50  ;;  %v2566_v6 = vmax.f32 %v2542_v5, 0.0  ;;  %v6403_v34 = vld [vmem:[%s11297_s0 + $0x148] sm:$0xf0]  ;;  %3729 = vmatpush.bf16.msra.mxu3 %v6706_v32  ;;  %v2613_v5 = vpop.permute.xlu0 %2612 }
 0x1c1   : > { %v2520_v38 = vmul.f32 %v2414_v3, %v8156_v45  ;;  %v4026_v3 = vmul.f32 %v8667_v0, %v2661_v35  ;;  %v8695_v36 = vadd.f32 %v4025_v44, %v8609_v52  ;;  %v1922_v52 = vadd.f32 %v8404_v16, %v8190_v40 }
 0x1c2   : > { %v2376_v24 = vpop.f32.mrf.mxu0  ;;  %v2567_v51 = vmax.f32 %v2543_v12, 0.0  ;;  %v8698_v47 = vmul.f32 %v2608_v46, %v2566_v6  ;;  %v6402_v35 = vor.u32 %v7033_v56, %v6401_v4  ;;  %5139 = vperm.xlu1 %7173, %v5106_v48  }
 0x1c3   : > { %v2491_v54 = vpop.f32.mrf.mxu3  ;;  %v8707_v44 = vadd.f32 %v4026_v3, %v8637_v60  ;;  %v3980_v3 = vmul.f32 %v8566_v28, %v8296_v31 }
 0x1c4   : > { %v2492_v23 = vadd.f32 %v2491_v54, %v2452_v22  ;;  %v2544_v22 = vadd.f32 %v2520_v38, %v8190_v40  ;;  %v7032_v54 = vld [vmem:[%s11297_s0 + $0x144] sm:$0xf]  ;;  %11428 = vst [vmem:[#allocation47_spill] sm:$0xff] %v8698_v47  ;;  %v8700_v58 = vmul.f32 %v2608_v46, %v2567_v51  ;;  %v4027_v16 = vmul.f32 %v8645_v41, %v8698_v47  ;;  %v6613_v47 = vld [vmem:[%s7394_s30] sm:$0xf] }
 0x1c5   : > { %v3844_v46 = vld [vmem:[%s11298_s1 + $0x1c0] sm:$0xff]  ;;  %v6406_v7 = vor.u32 %v7032_v54, %v6403_v34  ;;  %v6702_v51 = vor.u32 %v7105_v27, %v6701_v55  ;;  %v1946_v34 = vmax.f32 %v1922_v52, 0.0  ;;  %v1875_v52 = vadd.f32 %v8163_v57, %v8154_v42 }
 0x1c6   : > { %v2415_v17 = vpop.f32.mrf.mxu1  ;;  %v2521_v8 = vmul.f32 %v2492_v23, %v8142_v29  ;;  %11429 = vst [vmem:[#allocation48_spill] sm:$0xff] %v8700_v58  ;;  %v2568_v12 = vmax.f32 %v2544_v22, 0.0  ;;  %v2454_v38 = vpop.f32.mrf.mxu2  ;;  %v4028_v60 = vmul.f32 %v8667_v0, %v8700_v58  ;;  %v4041_v48 = vadd.f32 %v4027_v16, %v8661_v13  ;;  %3890 = vperm.xlu2 %7174, %v3844_v46   ;;  %v6695_v27 = vld [vmem:[%s7394_s30 + $0xa8] sm:$0xf0]  ;;  %v6629_v46 = vld [vmem:[%s7394_s30 + $0x20] sm:$0xf] }
 0x1c7   : > { %v2416_v61 = vadd.f32 %v2415_v17, %v2376_v24  ;;  %v7086_v24 = vld [vmem:[%s7394_s30 + $0x24] sm:$0xf]  ;;  %v6631_v17 = vld [vmem:[%s7394_s30 + $0x28] sm:$0xf0]  ;;  %6553 = vmatmul.msk.bf16.gmra.mxu1 %vm937_vm1, %v6406_v7  ;;  %6559 = vmatmul.msk.bf16.gmra.mxu3 %vm937_vm1, %v6406_v7  ;;  %v7087_v57 = vld [vmem:[%s7394_s30 + $0x24] sm:$0xf0]  ;;  %v8755_v7 = vmul.f32 %v8284_v1, %v1946_v34 }
 0x1c8   : > { %v2545_v32 = vadd.f32 %v2521_v8, %v8192_v50  ;;  %v8721_v56 = vmul.f32 %v2613_v5, %v2568_v12  ;;  %v4042_v22 = vadd.f32 %v4028_v60, %v3979_v20  ;;  %v6634_v54 = vor.u32 %v7086_v24, %v6631_v17  ;;  %3651 = vmatpush.bf16.msra.mxu1 %v6702_v51  ;;  %v6693_v17 = vld [vmem:[%s7394_s30 + $0xa0] sm:$0xf] }
 0x1c9   : > { %v2522_v6 = vmul.f32 %v2416_v61, %v8156_v45  ;;  %3080 = vmatmul.bf16.gmra.mxu2 %v6402_v35  ;;  %3002 = vmatmul.bf16.gmra.mxu0 %v6402_v35  ;;  %v7102_v61 = vld [vmem:[%s7394_s30 + $0xa4] sm:$0xf]  ;;  %v1947_v20 = vmax.f32 %v1923_v26, 0.0  ;;  %v8735_v12 = vadd.f32 %v8550_v62, %v4041_v48  ;;  %v3981_v35 = vmul.f32 %v8605_v21, %v8298_v59  ;;  %v7103_v26 = vld [vmem:[%s7394_s30 + $0xa4] sm:$0xf0] }
 0x1ca   : > { %v2569_v4 = vmax.f32 %v2545_v32, 0.0  ;;  %11430 = vst [vmem:[#allocation49_spill] sm:$0xff] %v8721_v56  ;;  %v4029_v8 = vmul.f32 %v8645_v41, %v8721_v56  ;;  %v2379_v55 = vpop.f32.mrf.mxu0  ;;  %3691 = vmatpush.bf16.msra.mxu2 %v6634_v54 }
 0x1cb   : > { %v2493_v23 = vpop.f32.mrf.mxu3  ;;  %v8766_v54 = vmul.f32 %v8284_v1, %v1947_v20 }
 0x1cc   : > { %v2494_v11 = vadd.f32 %v2493_v23, %v2454_v38  ;;  %v8727_v43 = vmul.f32 %v2613_v5, %v2569_v4  ;;  %v8738_v38 = vadd.f32 %v8554_v19, %v4042_v22  ;;  %v4043_v62 = vadd.f32 %v4029_v8, %v3980_v3  ;;  %v2618_v4 = vpop.permute.xlu1 %2617  ;;  %v7084_v22 = vld [vmem:[%s7394_s30 + $0x14] sm:$0xf] }
 0x1cd   : > { %v6698_v19 = vor.u32 %v7102_v61, %v6695_v27  ;;  %v2546_v23 = vadd.f32 %v2522_v6, %v8190_v40  ;;  %v3222_v6 = vld [vmem:[%s11298_s1 + $0x170] sm:$0xff] }
 0x1ce   : > { %11431 = vst [vmem:[#allocation50_spill] sm:$0xff] %v8727_v43  ;;  %v2418_v13 = vpop.f32.mrf.mxu1  ;;  %v2523_v5 = vmul.f32 %v2494_v11, %v8142_v29  ;;  %v4030_v32 = vmul.f32 %v8667_v0, %v8727_v43  ;;  %v2457_v42 = vpop.f32.mrf.mxu2  ;;  %v8758_v60 = vadd.f32 %v8532_v37, %v4043_v62  ;;  %v6623_v11 = vld [vmem:[%s7394_s30 + $0x18] sm:$0xf0]  ;;  %v7100_v61 = vld [vmem:[%s7394_s30 + $0x94] sm:$0xf]  ;;  %3276 = vperm.xlu2 %7174, %v3222_v6  }
 0x1cf   : > { %v2419_v51 = vadd.f32 %v2418_v13, %v2379_v55  ;;  %3730 = vmatpush.bf16.msra.mxu3 %v6698_v19  ;;  %v2570_v3 = vmax.f32 %v2546_v23, 0.0  ;;  %v6687_v27 = vld [vmem:[%s7394_s30 + $0x98] sm:$0xf0]  ;;  %v6630_v13 = vor.u32 %v7087_v57, %v6629_v46  ;;  %v6409_v62 = vld [vmem:[%s11297_s0 + $0x150] sm:$0xf]  ;;  %v6626_v23 = vor.u32 %v7084_v22, %v6623_v11 }
 0x1d0   : > { %v2547_v24 = vadd.f32 %v2523_v5, %v8192_v50  ;;  %v4044_v16 = vadd.f32 %v4030_v32, %v3981_v35  ;;  %v6694_v5 = vor.u32 %v7103_v26, %v6693_v17  ;;  %v1902_v35 = vmul.f32 %v8364_v10, %v8156_v45  ;;  %v7035_v57 = vld [vmem:[%s11297_s0 + $0x154] sm:$0xf0]  ;;  %v7034_v17 = vld [vmem:[%s11297_s0 + $0x154] sm:$0xf]  ;;  %v6411_v26 = vld [vmem:[%s11297_s0 + $0x158] sm:$0xf0]  ;;  %v2623_v11 = vpop.permute.xlu2 %2622 }
 0x1d1   : > { %v2524_v55 = vmul.f32 %v2419_v51, %v8156_v45  ;;  %v8776_v32 = vmul.f32 %v2618_v4, %v2570_v3  ;;  %3613 = vmatpush.bf16.msra.mxu0 %v6630_v13  ;;  %v3982_v10 = vmul.f32 %v8566_v28, %v8755_v7  ;;  %v4080_v51 = vmul.f32 %v8356_v49, %v8595_v39 }
 0x1d2   : > { %v2571_v34 = vmax.f32 %v2547_v24, 0.0  ;;  %v8771_v37 = vadd.f32 %v8546_v53, %v4044_v16  ;;  %3652 = vmatpush.bf16.msra.mxu1 %v6694_v5  ;;  %v2381_v46 = vpop.f32.mrf.mxu0  ;;  %v6690_v24 = vor.u32 %v7100_v61, %v6687_v27  ;;  %v4081_v6 = vmul.f32 %v8358_v9, %v8598_v25  ;;  %3692 = vmatpush.bf16.msra.mxu2 %v6626_v23 }
 0x1d3   : > { %v2496_v48 = vpop.f32.mrf.mxu3  ;;  %11432 = vst [vmem:[#allocation51_spill] sm:$0xff] %v8776_v32  ;;  %v2548_v53 = vadd.f32 %v2524_v55, %v8190_v40  ;;  %v4031_v16 = vmul.f32 %v8645_v41, %v8776_v32  ;;  %v1926_v22 = vadd.f32 %v1902_v35, %v8190_v40  ;;  %v6410_v13 = vor.u32 %v7035_v57, %v6409_v62 }
 0x1d4   : > { %v2497_v8 = vadd.f32 %v2496_v48, %v2457_v42  ;;  %v8778_v1 = vmul.f32 %v2618_v4, %v2571_v34  ;;  %v3983_v42 = vmul.f32 %v8605_v21, %v8766_v54  ;;  %v1903_v48 = vmul.f32 %v1875_v52, %v8142_v29  ;;  %3731 = vmatpush.bf16.msra.mxu3 %v6690_v24  ;;  %v5101_v52 = vld [vmem:[%s11298_s1 + $0xd8] sm:$0xff] }
 0x1d5   : > { %v4045_v3 = vadd.f32 %v4031_v16, %v3982_v10  ;;  %v2572_v61 = vmax.f32 %v2548_v53, 0.0  ;;  %v6414_v5 = vor.u32 %v7034_v17, %v6411_v26  ;;  %v1326_v53 = vmax.f32 %v8563_v15, 0.0  ;;  %v11437_v26 = vld [vmem:[#allocation34_spill] sm:$0xff] }
 0x1d6   : > { %11433 = vst [vmem:[#allocation52_spill] sm:$0xff] %v8778_v1  ;;  %v2525_v20 = vmul.f32 %v2497_v8, %v8142_v29  ;;  %v2420_v19 = vpop.f32.mrf.mxu1  ;;  %v4032_v4 = vmul.f32 %v8667_v0, %v8778_v1  ;;  %v2459_v27 = vpop.f32.mrf.mxu2  ;;  %v8810_v55 = vadd.f32 %v1903_v48, %v8192_v50  ;;  %v1950_v24 = vmax.f32 %v1926_v22, 0.0  ;;  %5114 = vperm.xlu2 %7174, %v5101_v52   ;;  %v6621_v52 = vld [vmem:[%s7394_s30 + $0x10] sm:$0xf] }
 0x1d7   : > { %v2421_v1 = vadd.f32 %v2420_v19, %v2381_v46  ;;  %v8815_v32 = vadd.f32 %v4080_v51, %v4045_v3  ;;  %v4083_v46 = vmul.f32 %v8358_v9, %v8511_v63  ;;  %v3984_v19 = vmul.f32 %v8566_v28, %v8309_v18  ;;  %6554 = vmatmul.msk.bf16.gmra.mxu1 %vm937_vm1, %v6414_v5  ;;  %v11439_v3 = vld [vmem:[#allocation16_spill] sm:$0xff] }
 0x1d8   : > { %v4046_v34 = vadd.f32 %v4032_v4, %v3983_v42  ;;  %v2549_v8 = vadd.f32 %v2525_v20, %v8192_v50  ;;  %v8819_v20 = vmul.f32 %v2623_v11, %v2572_v61  ;;  %v8833_v16 = vadd.f32 %v8192_v50, %v11437_v26  ;;  %6560 = vmatmul.msk.bf16.gmra.mxu3 %vm937_vm1, %v6414_v5  ;;  %v2628_v5 = vpop.permute.xlu0 %2627  ;;  %v7101_v26 = vld [vmem:[%s7394_s30 + $0x94] sm:$0xf0] }
 0x1d9   : > { %v2526_v42 = vmul.f32 %v2421_v1, %v8156_v45  ;;  %v8837_v15 = vadd.f32 %v8190_v40, %v8452_v30  ;;  %3085 = vmatmul.bf16.gmra.mxu2 %v6410_v13  ;;  %3007 = vmatmul.bf16.gmra.mxu0 %v6410_v13  ;;  %v1951_v22 = vmax.f32 %v8810_v55, 0.0  ;;  %v5104_v13 = vld [vmem:[%s11298_s1 + $0xf0] sm:$0xff] }
 0x1da   : > { %v8817_v23 = vadd.f32 %v4081_v6, %v4046_v34  ;;  %v2573_v10 = vmax.f32 %v2549_v8, 0.0  ;;  %11435 = vst [vmem:[#allocation54_spill] sm:$0xff] %v8819_v20  ;;  %v4033_v17 = vmul.f32 %v8645_v41, %v8819_v20  ;;  %v2384_v4 = vpop.f32.mrf.mxu0  ;;  %v11438_v6 = vld [vmem:[#allocation30_spill] sm:$0xff]  ;;  %v8847_v34 = vmul.f32 %v11439_v3, %v1326_v53  ;;  %v11440_v8 = vld [vmem:[#allocation33_spill] sm:$0xff] }
 0x1db   : > { %v2498_v35 = vpop.f32.mrf.mxu3  ;;  %v2550_v1 = vadd.f32 %v2526_v42, %v8190_v40  ;;  %v3985_v48 = vmul.f32 %v8605_v21, %v11438_v6  ;;  %v8850_v61 = vmul.f32 %v11440_v8, %v1950_v24  ;;  %v11441_v24 = vld [vmem:[#allocation42_spill] sm:$0xff] }
 0x1dc   : > { %11434 = vst [vmem:[#allocation53_spill] sm:$0xff] %v8817_v23  ;;  %v2499_v62 = vadd.f32 %v2498_v35, %v2459_v27  ;;  %v8827_v57 = vmul.f32 %v2623_v11, %v2573_v10  ;;  %v4047_v30 = vadd.f32 %v4033_v17, %v3984_v19  ;;  %v7085_v35 = vld [vmem:[%s7394_s30 + $0x14] sm:$0xf0]  ;;  %v8861_v10 = vadd.f32 %v8192_v50, %v8515_v14  ;;  %v6685_v17 = vld [vmem:[%s7394_s30 + $0x90] sm:$0xf] }
 0x1dd   : > { %v2574_v27 = vmax.f32 %v2550_v1, 0.0  ;;  %v7082_v1 = vld [vmem:[%s7394_s30 + $0x4] sm:$0xf]  ;;  %v6622_v14 = vor.u32 %v7085_v35, %v6621_v52  ;;  %v6686_v43 = vor.u32 %v7101_v26, %v6685_v17  ;;  %v6677_v23 = vld [vmem:[%s7394_s30 + $0x80] sm:$0xf]  ;;  %v3986_v52 = vmul.f32 %v8566_v28, %v8850_v61 }
 0x1de   : > { %11436 = vst [vmem:[#allocation55_spill] sm:$0xff] %v8827_v57  ;;  %v2423_v51 = vpop.f32.mrf.mxu1  ;;  %v4034_v11 = vmul.f32 %v8667_v0, %v8827_v57  ;;  %v2527_v55 = vmul.f32 %v2499_v62, %v8142_v29  ;;  %v8864_v42 = vadd.f32 %v11441_v24, %v4047_v30  ;;  %v2462_v62 = vpop.f32.mrf.mxu2  ;;  %v6679_v30 = vld [vmem:[%s7394_s30 + $0x88] sm:$0xf0]  ;;  %5129 = vperm.xlu2 %7174, %v5104_v13  }
 0x1df   : > { %v2424_v19 = vadd.f32 %v2423_v51, %v2384_v4  ;;  %v8869_v57 = vmul.f32 %v2628_v5, %v2574_v27  ;;  %v1327_v27 = vmax.f32 %v8833_v16, 0.0  ;;  %3614 = vmatpush.bf16.msra.mxu0 %v6622_v14  ;;  %3653 = vmatpush.bf16.msra.mxu1 %v6686_v43  ;;  %v7037_v43 = vld [vmem:[%s11297_s0 + $0x164] sm:$0xf0] }
 0x1e0   : > { %v4048_v53 = vadd.f32 %v4034_v11, %v3985_v48  ;;  %11442 = vst [vmem:[#allocation34_spill] sm:$0xff] %v8864_v42  ;;  %v2551_v20 = vadd.f32 %v2527_v55, %v8192_v50  ;;  %v6615_v48 = vld [vmem:[%s7394_s30 + $0x8] sm:$0xf0]  ;;  %v7098_v11 = vld [vmem:[%s7394_s30 + $0x84] sm:$0xf]  ;;  %v4084_v55 = vmul.f32 %v8356_v49, %v8847_v34 }
 0x1e1   : > { %11443 = vst [vmem:[#allocation30_spill] sm:$0xff] %v8869_v57  ;;  %v2528_v4 = vmul.f32 %v2424_v19, %v8156_v45  ;;  %v6618_v58 = vor.u32 %v7082_v1, %v6615_v48  ;;  %v7083_v42 = vld [vmem:[%s7394_s30 + $0x4] sm:$0xf0]  ;;  %v4035_v35 = vmul.f32 %v8645_v41, %v8869_v57  ;;  %v6682_v17 = vor.u32 %v7098_v11, %v6679_v30 }
 0x1e2   : > { %v8875_v24 = vadd.f32 %v4083_v46, %v4048_v53  ;;  %v7099_v46 = vld [vmem:[%s7394_s30 + $0x84] sm:$0xf0]  ;;  %v8890_v53 = vmul.f32 %v11440_v8, %v1951_v22  ;;  %v8894_v26 = vpop.f32.mrf.mxu0  ;;  %v6614_v48 = vor.u32 %v7083_v42, %v6613_v47  ;;  %v1328_v57 = vmax.f32 %v8837_v15, 0.0  ;;  %v7036_v47 = vld [vmem:[%s11297_s0 + $0x164] sm:$0xf] }
 0x1e3   : > { %v2501_v56 = vpop.f32.mrf.mxu3  ;;  %v2552_v19 = vadd.f32 %v2528_v4, %v8190_v40  ;;  %3693 = vmatpush.bf16.msra.mxu2 %v6618_v58  ;;  %v6678_v14 = vor.u32 %v7099_v46, %v6677_v23  ;;  %v8909_v13 = vmul.f32 %v11439_v3, %v1327_v27  ;;  %v6419_v23 = vld [vmem:[%s11297_s0 + $0x168] sm:$0xf0]  ;;  %3732 = vmatpush.bf16.msra.mxu3 %v6682_v17 }
 0x1e4   : > { %v2502_v51 = vadd.f32 %v2501_v56, %v2462_v62  ;;  %v2575_v56 = vmax.f32 %v2551_v20, 0.0  ;;  %v4049_v62 = vadd.f32 %v4035_v35, %v3986_v52  ;;  %v6417_v20 = vld [vmem:[%s11297_s0 + $0x160] sm:$0xf]  ;;  %3615 = vmatpush.bf16.msra.mxu0 %v6614_v48  ;;  %v3987_v42 = vmul.f32 %v8605_v21, %v8890_v53  ;;  %v11446_v52 = vld [vmem:[#allocation17_spill] sm:$0xff] }
 0x1e5   : > { %v2576_v58 = vmax.f32 %v2552_v19, 0.0  ;;  %3654 = vmatpush.bf16.msra.mxu1 %v6678_v14  ;;  %v6418_v30 = vor.u32 %v7037_v43, %v6417_v20  ;;  %v8931_v35 = vmul.f32 %v11446_v52, %v1328_v57  ;;  %v6422_v46 = vor.u32 %v7036_v47, %v6419_v23 }
 0x1e6   : > { %v2529_v16 = vmul.f32 %v2502_v51, %v8142_v29  ;;  %v8896_v1 = vpop.f32.mrf.mxu1  ;;  %v8905_v22 = vmul.f32 %v2628_v5, %v2575_v56  ;;  %v8917_v15 = vadd.f32 %v4084_v55, %v4049_v62  ;;  %v2633_v5 = vpop.permute.xlu1 %2632  ;;  %v1329_v55 = vmax.f32 %v8861_v10, 0.0 }
 0x1e7   : > { %v8923_v11 = vpop.f32.mrf.mxu2  ;;  %v8925_v4 = vmul.f32 %v2633_v5, %v2576_v58  ;;  %v4085_v19 = vmul.f32 %v8358_v9, %v8909_v13  ;;  %v4086_v58 = vmul.f32 %v8356_v49, %v8931_v35  ;;  %6555 = vmatmul.msk.bf16.gmra.mxu1 %vm937_vm1, %v6422_v46 }
 0x1e8   : > { %11444 = vst [vmem:[#allocation16_spill] sm:$0xff] %v8905_v22  ;;  %v2553_v8 = vadd.f32 %v2529_v16, %v8192_v50  ;;  %v4036_v3 = vmul.f32 %v8667_v0, %v8905_v22  ;;  %v11447_v16 = vld [vmem:[#allocation31_spill] sm:$0xff]  ;;  %v8944_v43 = vmul.f32 %v11446_v52, %v1329_v55  ;;  %6561 = vmatmul.msk.bf16.gmra.mxu3 %vm937_vm1, %v6422_v46  ;;  %v7039_v55 = vld [vmem:[%s11297_s0 + $0x174] sm:$0xf0]  ;;  %v7038_v52 = vld [vmem:[%s11297_s0 + $0x174] sm:$0xf] }
 0x1e9   : > { %11445 = vst [vmem:[#allocation33_spill] sm:$0xff] %v8925_v4  ;;  %v3988_v62 = vmul.f32 %v8566_v28, %v11447_v16  ;;  %v4037_v17 = vmul.f32 %v8645_v41, %v8925_v4  ;;  %3090 = vmatmul.bf16.gmra.mxu2 %v6418_v30  ;;  %3012 = vmatmul.bf16.gmra.mxu0 %v6418_v30  ;;  %v6427_v46 = vld [vmem:[%s11297_s0 + $0x178] sm:$0xf0] }
 0x1ea   : > { %v2577_v51 = vmax.f32 %v2553_v8, 0.0  ;;  %v4050_v56 = vadd.f32 %v4036_v3, %v3987_v42  ;;  %v2389_v10 = vpop.f32.mrf.mxu0  ;;  %v11450_v8 = vld [vmem:[#allocation32_spill] sm:$0xff]  ;;  %v4087_v30 = vmul.f32 %v8358_v9, %v8944_v43 }
 0x1eb   : > { %v8927_v27 = vpop.f32.mrf.mxu3  ;;  %v4051_v14 = vadd.f32 %v4037_v17, %v3988_v62  ;;  %v3989_v28 = vmul.f32 %v8605_v21, %v11450_v8  ;;  %v6565_v17 = vld [vmem:[%s11297_s0 + $0x180] sm:$0xf] }
 0x1ec   : > { %v8939_v48 = vmul.f32 %v2633_v5, %v2577_v51  ;;  %v8941_v57 = vadd.f32 %v4085_v19, %v4050_v56  ;;  %v6430_v19 = vor.u32 %v7038_v52, %v6427_v46  ;;  %v11460_v46 = vld [vmem:[#allocation5_spill] sm:$0xff] }
 0x1ed   : > { %v8956_v42 = vadd.f32 %v4086_v58, %v4051_v14  ;;  %v7071_v14 = vld [vmem:[%s11297_s0 + $0x184] sm:$0xf0]  ;;  %v6567_v58 = vld [vmem:[%s11297_s0 + $0x188] sm:$0xf0] }
 0x1ee   : > { %11448 = vst [vmem:[#allocation42_spill] sm:$0xff] %v8939_v48  ;;  %v2428_v20 = vpop.f32.mrf.mxu1  ;;  %v4038_v41 = vmul.f32 %v8667_v0, %v8939_v48  ;;  %v6425_v0 = vld [vmem:[%s11297_s0 + $0x170] sm:$0xf] }
 0x1ef   : > { %11449 = vst [vmem:[#allocation17_spill] sm:$0xff] %v8941_v57  ;;  %v8954_v47 = vadd.f32 %v2428_v20, %v2389_v10  ;;  %v2467_v5 = vpop.f32.mrf.mxu2  ;;  %v6426_v56 = vor.u32 %v7039_v55, %v6425_v0  ;;  %v7070_v20 = vld [vmem:[%s11297_s0 + $0x184] sm:$0xf] }
 0x1f0   : > { %v4052_v23 = vadd.f32 %v4038_v41, %v3989_v28  ;;  %11452 = vst [vmem:[#allocation32_spill] sm:$0xff] %v8956_v42  ;;  %v6566_v28 = vor.u32 %v7071_v14, %v6565_v17  ;;  %v6570_v41 = vor.u32 %v7070_v20, %v6567_v58 }
 0x1f1   : > { %11451 = vst [vmem:[#allocation31_spill] sm:$0xff] %v8954_v47 }
 0x1f2   : > { %v8962_v21 = vadd.f32 %v4087_v30, %v4052_v23  ;;  %v8978_v62 = vpop.f32.mrf.mxu0 }
 0x1f3   : > { %v2506_v3 = vpop.f32.mrf.mxu3  ;;  %11455 = vst [vmem:[#allocation58_spill] sm:$0xff] %v8978_v62 }
 0x1f4   : > { %v8960_v51 = vadd.f32 %v2506_v3, %v2467_v5  ;;  %11454 = vst [vmem:[#allocation57_spill] sm:$0xff] %v8962_v21  ;;  %v8998_v3 = vpop.permute.xlu2 %2637 }
 0x1f5   : > { %11459 = vst [vmem:[#allocation62_spill] sm:$0xff] %v8998_v3 }
 0x1f6   : > { %11453 = vst [vmem:[#allocation56_spill] sm:$0xff] %v8960_v51  ;;  %v8986_v10 = vpop.f32.mrf.mxu1 }
 0x1f7   : > { %6556 = vmatmul.msk.bf16.gmra.mxu1 %vm937_vm1, %v6430_v19  ;;  %11456 = vst [vmem:[#allocation59_spill] sm:$0xff] %v8986_v10  ;;  %v8994_v23 = vpop.f32.mrf.mxu2  ;;  %v6759_v10 = vld [vmem:[%s8338_s26 + $0x21] ss:$8 sm:$0x3] }
 0x1f8   : > { %6562 = vmatmul.msk.bf16.gmra.mxu3 %vm937_vm1, %v6430_v19  ;;  %11457 = vst [vmem:[#allocation60_spill] sm:$0xff] %v8994_v23  ;;  %v11461_v19 = vld [vmem:[#allocation6_spill] sm:$0xff]  ;;  %v6754_v23 = vld [vmem:[%s8338_s26 + $0x14] ss:$8 sm:$0x3] }
 0x1f9   : > { %3095 = vmatmul.bf16.gmra.mxu2 %v6426_v56  ;;  %3017 = vmatmul.bf16.gmra.mxu0 %v6426_v56  ;;  %v1263_v56 = vmul.f32 %v8156_v45, %v11460_v46  ;;  %v1264_v17 = vmul.f32 %v8142_v29, %v11461_v19  ;;  %v6575_v46 = vld [vmem:[%s11297_s0 + $0x198] sm:$0xf0] }
 0x1fb   : > { %v8996_v5 = vpop.f32.mrf.mxu3  ;;  %v1292_v58 = vadd.f32 %v8190_v40, %v1263_v56 }
 0x1fc   : > { %11458 = vst [vmem:[#allocation61_spill] sm:$0xff] %v8996_v5  ;;  %v6749_v5 = vld [vmem:[%s8338_s26 + $0x7] ss:$8 sm:$0x3] }
 0x207   : > { %6731 = vmatmul.msk.bf16.vlgmr.msra.gmra.mxu1 %vm937_vm1, %v6570_v41 }
 0x208   : > { %6737 = vmatmul.msk.bf16.vlgmr.msra.gmra.mxu3 %vm937_vm1, %v6570_v41  ;;  %v2433_v0 = vpop.f32.mrf.mxu1  ;;  %v6573_v41 = vld [vmem:[%s11297_s0 + $0x190] sm:$0xf] }
 0x209   : > { %3694 = vmatmul.bf16.vlgmr.msra.gmra.mxu2 %v6566_v28  ;;  %3616 = vmatmul.bf16.vlgmr.msra.gmra.mxu0 %v6566_v28  ;;  %v1293_v28 = vadd.f32 %v8192_v50, %v1264_v17  ;;  %v2653_v17 = vpop.permute.xlu2 %2652 }
 0x20b   : > { %v2394_v30 = vpop.f32.mrf.mxu0  ;;  %v1317_v21 = vmax.f32 %v1293_v28, 0.0  ;;  %v9035_v28 = vperm.slane %v6749_v5, 1 }
 0x20c   : > { %v2434_v55 = vadd.f32 %v2433_v0, %v2394_v30  ;;  %v7073_v30 = vld [vmem:[%s11297_s0 + $0x194] sm:$0xf0] }
 0x20d   : > { %v6574_v3 = vor.u32 %v7073_v30, %v6573_v41  ;;  %v9040_v30 = vperm.slane %v6754_v23, 0 }
 0x20e   : > { %v2536_v52 = vmul.f32 %v2434_v55, %v8156_v45  ;;  %v2511_v0 = vpop.f32.mrf.mxu3 }
 0x210   : > { %v2560_v14 = vadd.f32 %v2536_v52, %v8190_v40  ;;  %v7072_v52 = vld [vmem:[%s11297_s0 + $0x194] sm:$0xf]  ;;  %v2435_v48 = vpop.f32.mrf.mxu1 }
 0x211   : > { %v2472_v20 = vpop.f32.mrf.mxu2  ;;  %v6578_v51 = vor.u32 %v7072_v52, %v6575_v46  ;;  %v9046_v52 = vperm.slane %v6759_v10, 1 }
 0x212   : > { %v2584_v55 = vmax.f32 %v2560_v14, 0.0  ;;  %v2512_v56 = vadd.f32 %v2511_v0, %v2472_v20  ;;  %v1316_v14 = vmax.f32 %v1292_v58, 0.0  ;;  %v9033_v58 = vperm.slane %v6749_v5, 0 }
 0x213   : > { %v2396_v19 = vpop.f32.mrf.mxu0 }
 0x214   : > { %v9022_v4 = vmul.f32 %v2653_v17, %v2584_v55  ;;  %v2537_v22 = vmul.f32 %v2512_v56, %v8142_v29  ;;  %v11463_v19 = vld [vmem:[#allocation15_spill] sm:$0xff]  ;;  %v11466_v56 = vld [vmem:[#allocation9_spill] sm:$0xff] }
 0x215   : > { %v1412_v48 = vmul.f32 %v11463_v19, %v1316_v14  ;;  %v1413_v55 = vmul.f32 %v11463_v19, %v1317_v21  ;;  %v1279_v5 = vmul.f32 %v8156_v45, %v11466_v56  ;;  %v11467_v14 = vld [vmem:[#allocation10_spill] sm:$0xff]  ;;  %v9072_v56 = vmul.f32 %v9035_v28, %v8511_v63 }
 0x216   : > { %11462 = vst [vmem:[#allocation5_spill] sm:$0xff] %v9022_v4  ;;  %v2561_v47 = vadd.f32 %v2537_v22, %v8192_v50  ;;  %v6764_v4 = vld [vmem:[%s8338_s26 + $0x26] ss:$8 sm:$0x3]  ;;  %v2513_v41 = vpop.f32.mrf.mxu3 }
 0x217   : > { %6732 = vmatmul.msk.bf16.gmra.mxu1 %vm937_vm1, %v6578_v51  ;;  %v9048_v21 = vperm.slane %v6764_v4, 0  ;;  %v9050_v46 = vperm.slane %v6764_v4, 1  ;;  %v11470_v4 = vld [vmem:[#allocation35_spill] sm:$0xff]  ;;  %11472 = vst [vmem:[#allocation10_spill] sm:$0xff] %v9072_v56 }
 0x218   : > { %v2585_v20 = vmax.f32 %v2561_v47, 0.0  ;;  %6738 = vmatmul.msk.bf16.gmra.mxu3 %vm937_vm1, %v6578_v51  ;;  %v9042_v47 = vperm.slane %v6754_v23, 1  ;;  %v1280_v51 = vmul.f32 %v8142_v29, %v11467_v14  ;;  %v9060_v23 = vmul.f32 %v8358_v9, %v1413_v55 }
 0x219   : > { %3699 = vmatmul.bf16.gmra.mxu2 %v6574_v3  ;;  %3621 = vmatmul.bf16.gmra.mxu0 %v6574_v3  ;;  %v2474_v0 = vpop.f32.mrf.mxu2  ;;  %v9044_v3 = vperm.slane %v6759_v10, 0  ;;  %11465 = vst [vmem:[#allocation15_spill] sm:$0xff] %v9050_v46  ;;  %v9068_v41 = vmul.f32 %v9033_v58, %v11470_v4  ;;  %v9078_v9 = vmul.f32 %v9040_v30, %v11470_v4 }
 0x21a   : > { %v9038_v22 = vmul.f32 %v2653_v17, %v2585_v20  ;;  %v9057_v17 = vmul.f32 %v8356_v49, %v1412_v48  ;;  %v11468_v20 = vld [vmem:[#allocation7_spill] sm:$0xff]  ;;  %v11469_v0 = vld [vmem:[#allocation8_spill] sm:$0xff]  ;;  %v1308_v49 = vadd.f32 %v8190_v40, %v1279_v5  ;;  %v1309_v48 = vadd.f32 %v8192_v50, %v1280_v51 }
 0x21b   : > { %v1277_v10 = vmul.f32 %v8156_v45, %v11468_v20  ;;  %v1278_v19 = vmul.f32 %v8142_v29, %v11469_v0  ;;  %11471 = vst [vmem:[#allocation9_spill] sm:$0xff] %v9068_v41  ;;  %v9082_v55 = vmul.f32 %v9042_v47, %v8511_v63  ;;  %v9086_v14 = vmul.f32 %v9044_v3, %v11470_v4  ;;  %v11479_v0 = vld [vmem:[#allocation36_spill] sm:$0xff] }
 0x21c   : > { %11464 = vst [vmem:[#allocation6_spill] sm:$0xff] %v9038_v22  ;;  %v9090_v20 = vmul.f32 %v9046_v52, %v8511_v63  ;;  %v9094_v5 = vmul.f32 %v9048_v21, %v11470_v4  ;;  %v9098_v51 = vmul.f32 %v9050_v46, %v8511_v63  ;;  %v9102_v22 = vmul.f32 %v9033_v58, %v11479_v0 }
 0x21d   : > { %11473 = vst [vmem:[#allocation7_spill] sm:$0xff] %v9078_v9  ;;  %v6581_v9 = vld [vmem:[%s11297_s0 + $0x1a0] sm:$0xf]  ;;  %v1332_v41 = vmax.f32 %v1308_v49, 0.0  ;;  %v9154_v49 = vmul.f32 %v9044_v3, %v8847_v34 }
 0x21e   : > { %11474 = vst [vmem:[#allocation8_spill] sm:$0xff] %v9082_v55  ;;  %v11481_v55 = vld [vmem:[#allocation37_spill] sm:$0xff] }
 0x21f   : > { %11475 = vst [vmem:[#allocation35_spill] sm:$0xff] %v9086_v14  ;;  %v9106_v56 = vmul.f32 %v9035_v28, %v11481_v55  ;;  %v9110_v14 = vmul.f32 %v9040_v30, %v11479_v0  ;;  %v9114_v4 = vmul.f32 %v9042_v47, %v11481_v55  ;;  %v7075_v0 = vld [vmem:[%s11297_s0 + $0x1a4] sm:$0xf0]  ;;  %v9132_v55 = vmul.f32 %v9033_v58, %v8847_v34 }
 0x220   : > { %11476 = vst [vmem:[#allocation63_spill] sm:$0xff] %v9090_v20  ;;  %v11485_v20 = vld [vmem:[#allocation38_spill] sm:$0xff] }
 0x221   : > { %11477 = vst [vmem:[#allocation64_spill] sm:$0xff] %v9094_v5  ;;  %v9118_v63 = vmul.f32 %v9033_v58, %v11485_v20  ;;  %v9136_v20 = vmul.f32 %v9035_v28, %v8909_v13 }
 0x222   : > { %11478 = vst [vmem:[#allocation65_spill] sm:$0xff] %v9098_v51  ;;  %v11487_v51 = vld [vmem:[#allocation39_spill] sm:$0xff] }
 0x223   : > { %11480 = vst [vmem:[#allocation36_spill] sm:$0xff] %v9102_v22  ;;  %v9122_v5 = vmul.f32 %v9035_v28, %v11487_v51  ;;  %v7074_v51 = vld [vmem:[%s11297_s0 + $0x1a4] sm:$0xf]  ;;  %v1306_v22 = vadd.f32 %v8190_v40, %v1277_v10  ;;  %v9182_v10 = vmul.f32 %v9040_v30, %v8595_v39 }
 0x224   : > { %11482 = vst [vmem:[#allocation37_spill] sm:$0xff] %v9106_v56  ;;  %v6583_v56 = vld [vmem:[%s11297_s0 + $0x1a8] sm:$0xf0] }
 0x225   : > { %11483 = vst [vmem:[#allocation66_spill] sm:$0xff] %v9110_v14  ;;  %v9146_v14 = vmul.f32 %v9040_v30, %v8847_v34 }
 0x226   : > { %11484 = vst [vmem:[#allocation67_spill] sm:$0xff] %v9114_v4  ;;  %v1333_v4 = vmax.f32 %v1309_v48, 0.0  ;;  %v9158_v48 = vmul.f32 %v9046_v52, %v8909_v13 }
 0x227   : > { %11486 = vst [vmem:[#allocation38_spill] sm:$0xff] %v9118_v63  ;;  %v6582_v63 = vor.u32 %v7075_v0, %v6581_v9  ;;  %v9194_v9 = vmul.f32 %v9046_v52, %v8598_v25  ;;  %v3032_v0 = vpop.f32.mrf.mxu1 }
 0x228   : > { %11488 = vst [vmem:[#allocation39_spill] sm:$0xff] %v9122_v5  ;;  %v9166_v5 = vpop.permute.xlu0 %2642 }
 0x229   : > { %11489 = vst [vmem:[#allocation68_spill] sm:$0xff] %v9132_v55  ;;  %v9150_v55 = vmul.f32 %v9042_v47, %v8909_v13  ;;  %3704 = vmatmul.bf16.gmra.mxu2 %v6582_v63  ;;  %3626 = vmatmul.bf16.gmra.mxu0 %v6582_v63  ;;  %v9230_v63 = vmul.f32 %v9048_v21, %v8931_v35 }
 0x22a   : > { %11490 = vst [vmem:[#allocation69_spill] sm:$0xff] %v9136_v20  ;;  %v9162_v20 = vmul.f32 %v9048_v21, %v8847_v34  ;;  %v2993_v34 = vpop.f32.mrf.mxu0 }
 0x22b   : > { %11491 = vst [vmem:[#allocation70_spill] sm:$0xff] %v9146_v14  ;;  %v1307_v14 = vadd.f32 %v8192_v50, %v1278_v19  ;;  %v9186_v19 = vmul.f32 %v9042_v47, %v8598_v25 }
 0x22c   : > { %11492 = vst [vmem:[#allocation71_spill] sm:$0xff] %v9150_v55  ;;  %v9170_v55 = vmul.f32 %v9050_v46, %v8909_v13  ;;  %v9190_v13 = vmul.f32 %v9044_v3, %v8595_v39 }
 0x22d   : > { %11493 = vst [vmem:[#allocation72_spill] sm:$0xff] %v9154_v49  ;;  %v9174_v49 = vmul.f32 %v9033_v58, %v8595_v39 }
 0x22e   : > { %11494 = vst [vmem:[#allocation73_spill] sm:$0xff] %v9158_v48  ;;  %v9178_v48 = vmul.f32 %v9035_v28, %v8598_v25 }
 0x22f   : > { %11495 = vst [vmem:[#allocation74_spill] sm:$0xff] %v9162_v20  ;;  %v6586_v20 = vor.u32 %v7074_v51, %v6583_v56  ;;  %v9198_v56 = vmul.f32 %v9033_v58, %v8931_v35  ;;  %v9202_v51 = vmul.f32 %v9035_v28, %v8944_v43 }
 0x230   : > { %11496 = vst [vmem:[#allocation75_spill] sm:$0xff] %v9166_v5 }
 0x231   : > { %11497 = vst [vmem:[#allocation76_spill] sm:$0xff] %v9170_v55  ;;  %v11506_v55 = vld [vmem:[#allocation18_spill] sm:$0xff]  ;;  %6733 = vmatmul.msk.bf16.gmra.mxu1 %vm937_vm1, %v6586_v20  ;;  %6739 = vmatmul.msk.bf16.gmra.mxu3 %vm937_vm1, %v6586_v20 }
 0x232   : > { %11498 = vst [vmem:[#allocation77_spill] sm:$0xff] %v9174_v49  ;;  %v1429_v39 = vmul.f32 %v11506_v55, %v1333_v4  ;;  %v11507_v49 = vld [vmem:[#allocation11_spill] sm:$0xff] }
 0x233   : > { %11499 = vst [vmem:[#allocation78_spill] sm:$0xff] %v9178_v48  ;;  %v1428_v48 = vmul.f32 %v11506_v55, %v1332_v41  ;;  %v1281_v25 = vmul.f32 %v8156_v45, %v11507_v49  ;;  %v11510_v41 = vld [vmem:[#allocation12_spill] sm:$0xff]  ;;  %v6745_v49 = vld [vmem:[%s8338_s26 + $0x3] ss:$8 sm:$0x3] }
 0x234   : > { %11500 = vst [vmem:[#allocation79_spill] sm:$0xff] %v9182_v10  ;;  %v1331_v10 = vmax.f32 %v1307_v14, 0.0  ;;  %v9226_v14 = vmul.f32 %v9046_v52, %v8944_v43 }
 0x235   : > { %11501 = vst [vmem:[#allocation80_spill] sm:$0xff] %v9186_v19  ;;  %v3033_v19 = vadd.f32 %v3032_v0, %v2993_v34  ;;  %v1282_v34 = vmul.f32 %v8142_v29, %v11510_v41  ;;  %v1310_v55 = vadd.f32 %v8190_v40, %v1281_v25  ;;  %v9240_v0 = vmul.f32 %v9040_v30, %v1428_v48 }
 0x236   : > { %11502 = vst [vmem:[#allocation81_spill] sm:$0xff] %v9190_v13  ;;  %v1330_v13 = vmax.f32 %v1306_v22, 0.0  ;;  %v9222_v22 = vmul.f32 %v9044_v3, %v8931_v35  ;;  %v9248_v25 = vmul.f32 %v9044_v3, %v1428_v48  ;;  %v9262_v5 = vmul.f32 %v9048_v21, %v1428_v48 }
 0x237   : > { %11503 = vst [vmem:[#allocation82_spill] sm:$0xff] %v9194_v9  ;;  %v3140_v4 = vmul.f32 %v3033_v19, %v8156_v45  ;;  %v9237_v19 = vmul.f32 %v9050_v46, %v8944_v43  ;;  %v1311_v41 = vadd.f32 %v8192_v50, %v1282_v34  ;;  %v3110_v9 = vpop.f32.mrf.mxu3 }
 0x238   : > { %11504 = vst [vmem:[#allocation83_spill] sm:$0xff] %v9198_v56  ;;  %v9210_v56 = vmul.f32 %v9040_v30, %v8931_v35  ;;  %v9245_v35 = vmul.f32 %v9042_v47, %v1429_v39 }
 0x239   : > { %11505 = vst [vmem:[#allocation84_spill] sm:$0xff] %v9202_v51  ;;  %v9214_v51 = vmul.f32 %v9042_v47, %v8944_v43  ;;  %v9252_v43 = vpop.permute.xlu1 %2647  ;;  %v1335_v62 = vmax.f32 %v1311_v41, 0.0 }
 0x23a   : > { %11508 = vst [vmem:[#allocation18_spill] sm:$0xff] %v9210_v56  ;;  %v9259_v56 = vperm.slane %v6745_v49, 0 }
 0x23b   : > { %11509 = vst [vmem:[#allocation11_spill] sm:$0xff] %v9214_v51  ;;  %v3071_v51 = vpop.f32.mrf.mxu2 }
 0x23c   : > { %11511 = vst [vmem:[#allocation12_spill] sm:$0xff] %v9222_v22 }
 0x23d   : > { %11512 = vst [vmem:[#allocation85_spill] sm:$0xff] %v9226_v14  ;;  %v3164_v14 = vadd.f32 %v3140_v4, %v8190_v40 }
 0x23e   : > { %11513 = vst [vmem:[#allocation86_spill] sm:$0xff] %v9230_v63  ;;  %v11518_v63 = vld [vmem:[#allocation21_spill] sm:$0xff] }
 0x23f   : > { %11514 = vst [vmem:[#allocation87_spill] sm:$0xff] %v9237_v19  ;;  %v1426_v20 = vmul.f32 %v11518_v63, %v1330_v13  ;;  %v1427_v22 = vmul.f32 %v11518_v63, %v1331_v10  ;;  %v9255_v19 = vmul.f32 %v9046_v52, %v1429_v39  ;;  %v3188_v4 = vmax.f32 %v3164_v14, 0.0  ;;  %v3227_v63 = vpop.permute.xlu0 %3226 }
 0x240   : > { %11515 = vst [vmem:[#allocation88_spill] sm:$0xff] %v9240_v0  ;;  %v11521_v0 = vld [vmem:[#allocation13_spill] sm:$0xff]  ;;  %v9265_v13 = vmul.f32 %v9050_v46, %v1429_v39  ;;  %v1334_v10 = vmax.f32 %v1310_v55, 0.0 }
 0x241   : > { %11516 = vst [vmem:[#allocation89_spill] sm:$0xff] %v9245_v35  ;;  %v1283_v34 = vmul.f32 %v8156_v45, %v11521_v0  ;;  %v2995_v35 = vpop.f32.mrf.mxu0  ;;  %v3284_v42 = vmul.f32 %v3227_v63, %v3188_v4  ;;  %v9269_v14 = vmul.f32 %v9033_v58, %v1426_v20  ;;  %v9272_v57 = vmul.f32 %v9035_v28, %v1427_v22  ;;  %v6589_v28 = vld [vmem:[%s11297_s0 + $0x1b0] sm:$0xf]  ;;  %v6747_v4 = vld [vmem:[%s8338_s26 + $0x5] ss:$8 sm:$0x3] }
 0x242   : > { %11517 = vst [vmem:[#allocation90_spill] sm:$0xff] %v9248_v25  ;;  %v3111_v25 = vadd.f32 %v3110_v9, %v3071_v51  ;;  %v9275_v48 = vmul.f32 %v9040_v30, %v1426_v20  ;;  %v9279_v9 = vmul.f32 %v9042_v47, %v1427_v22  ;;  %v4088_v51 = vadd.f32 %v9057_v17, %v8695_v36  ;;  %v7077_v30 = vld [vmem:[%s11297_s0 + $0x1b4] sm:$0xf0]  ;;  %v7076_v17 = vld [vmem:[%s11297_s0 + $0x1b4] sm:$0xf] }
 0x243   : > { %11519 = vst [vmem:[#allocation21_spill] sm:$0xff] %v9252_v43  ;;  %v3034_v43 = vpop.f32.mrf.mxu1  ;;  %v4123_v55 = vmul.f32 %v9259_v56, %v3284_v42  ;;  %v9292_v41 = vmul.f32 %v9044_v3, %v1426_v20  ;;  %v9295_v47 = vmul.f32 %v9046_v52, %v1427_v22 }
 0x244   : > { %11520 = vst [vmem:[#allocation91_spill] sm:$0xff] %v9255_v19  ;;  %v1312_v19 = vadd.f32 %v8190_v40, %v1283_v34  ;;  %v3035_v0 = vadd.f32 %v3034_v43, %v2995_v35  ;;  %v3141_v39 = vmul.f32 %v3111_v25, %v8142_v29  ;;  %v11530_v35 = vld [vmem:[#allocation23_spill] sm:$0xff]  ;;  %v6591_v25 = vld [vmem:[%s11297_s0 + $0x1b8] sm:$0xf0] }
 0x245   : > { %11522 = vst [vmem:[#allocation13_spill] sm:$0xff] %v9262_v5  ;;  %v1430_v36 = vmul.f32 %v11530_v35, %v1334_v10  ;;  %v1431_v43 = vmul.f32 %v11530_v35, %v1335_v62  ;;  %v3073_v5 = vpop.f32.mrf.mxu2  ;;  %v9311_v10 = vmul.f32 %v9048_v21, %v1426_v20  ;;  %v6594_v35 = vor.u32 %v7076_v17, %v6591_v25 }
 0x246   : > { %11523 = vst [vmem:[#allocation92_spill] sm:$0xff] %v9265_v13  ;;  %v3142_v58 = vmul.f32 %v3035_v0, %v8156_v45  ;;  %v3165_v42 = vadd.f32 %v3141_v39, %v8192_v50  ;;  %v1336_v34 = vmax.f32 %v1312_v19, 0.0  ;;  %v9307_v0 = vadd.f32 %v4123_v55, %v4088_v51  ;;  %v3112_v51 = vpop.f32.mrf.mxu3 }
 0x247   : > { %11524 = vst [vmem:[#allocation93_spill] sm:$0xff] %v9269_v14  ;;  %v9323_v20 = vperm.slane %v6747_v4, 0  ;;  %v9331_v17 = vperm.slane %v6747_v4, 1  ;;  %v4089_v25 = vadd.f32 %v9060_v23, %v8707_v44  ;;  %6734 = vmatmul.msk.bf16.gmra.mxu1 %vm937_vm1, %v6594_v35  ;;  %6740 = vmatmul.msk.bf16.gmra.mxu3 %vm937_vm1, %v6594_v35  ;;  %v11555_v14 = vld [vmem:[#allocation24_spill] sm:$0xff] }
 0x248   : > { %11525 = vst [vmem:[#allocation94_spill] sm:$0xff] %v9272_v57  ;;  %v3166_v13 = vadd.f32 %v3142_v58, %v8190_v40  ;;  %v3189_v39 = vmax.f32 %v3165_v42, 0.0  ;;  %v9316_v57 = vmul.f32 %v9050_v46, %v1427_v22  ;;  %v9321_v58 = vmul.f32 %v9044_v3, %v1430_v36  ;;  %v3232_v42 = vpop.permute.xlu1 %3231  ;;  %v6752_v3 = vld [vmem:[%s8338_s26 + $0x12] ss:$8 sm:$0x3] }
 0x249   : > { %11526 = vst [vmem:[#allocation95_spill] sm:$0xff] %v9275_v48  ;;  %v2998_v55 = vpop.f32.mrf.mxu0  ;;  %v9326_v22 = vmul.f32 %v9046_v52, %v1431_v43  ;;  %v9339_v52 = vmul.f32 %v9048_v21, %v1430_v36  ;;  %v9354_v23 = vmul.f32 %v9323_v20, %v8616_v33  ;;  %v11554_v48 = vld [vmem:[#allocation22_spill] sm:$0xff] }
 0x24a   : > { %11527 = vst [vmem:[#allocation96_spill] sm:$0xff] %v9279_v9  ;;  %v6590_v9 = vor.u32 %v7077_v30, %v6589_v28  ;;  %v3190_v19 = vmax.f32 %v3166_v13, 0.0  ;;  %v3113_v28 = vadd.f32 %v3112_v51, %v3073_v5  ;;  %v9361_v51 = vperm.slane %v6752_v3, 0 }
 0x24b   : > { %11528 = vst [vmem:[#allocation97_spill] sm:$0xff] %v9292_v41  ;;  %v11533_v41 = vld [vmem:[#allocation14_spill] sm:$0xff]  ;;  %v3037_v30 = vpop.f32.mrf.mxu1 }
 0x24c   : > { %11529 = vst [vmem:[#allocation98_spill] sm:$0xff] %v9295_v47  ;;  %v9313_v47 = vperm.slane %v6745_v49, 1  ;;  %v1284_v62 = vmul.f32 %v8142_v29, %v11533_v41  ;;  %v3285_v49 = vmul.f32 %v3227_v63, %v3189_v39  ;;  %v3038_v13 = vadd.f32 %v3037_v30, %v2998_v55  ;;  %3709 = vmatmul.bf16.gmra.mxu2 %v6590_v9  ;;  %v6757_v39 = vld [vmem:[%s8338_s26 + $0x17] ss:$8 sm:$0x3] }
 0x24d   : > { %11531 = vst [vmem:[#allocation23_spill] sm:$0xff] %v9311_v10  ;;  %v9329_v10 = vmul.f32 %v3232_v42, %v3190_v19  ;;  %v3143_v5 = vmul.f32 %v3113_v28, %v8142_v29  ;;  %3631 = vmatmul.bf16.gmra.mxu0 %v6590_v9  ;;  %v6762_v9 = vld [vmem:[%s8338_s26 + $0x24] ss:$8 sm:$0x3]  ;;  %v9363_v55 = vperm.slane %v6752_v3, 1  ;;  %v3076_v28 = vpop.f32.mrf.mxu2  ;;  %v9374_v30 = vmul.f32 %v9331_v17, %v8643_v2 }
 0x24e   : > { %11532 = vst [vmem:[#allocation99_spill] sm:$0xff] %v9316_v57  ;;  %v11536_v57 = vld [vmem:[#allocation25_spill] sm:$0xff]  ;;  %v4124_v63 = vmul.f32 %v9313_v47, %v3285_v49  ;;  %v3144_v19 = vmul.f32 %v3038_v13, %v8156_v45  ;;  %v9350_v44 = vadd.f32 %v8192_v50, %v1284_v62  ;;  %v9376_v13 = vperm.slane %v6757_v39, 0 }
 0x24f   : > { %11534 = vst [vmem:[#allocation14_spill] sm:$0xff] %v9321_v58  ;;  %v1432_v41 = vmul.f32 %v11536_v57, %v1336_v34  ;;  %v9342_v34 = vmul.f32 %v9050_v46, %v1431_v43  ;;  %v4125_v4 = vmul.f32 %v9259_v56, %v9329_v10  ;;  %v3167_v43 = vadd.f32 %v3143_v5, %v8192_v50  ;;  %v3115_v5 = vpop.f32.mrf.mxu3 }
 0x250   : > { %11535 = vst [vmem:[#allocation100_spill] sm:$0xff] %v9326_v22  ;;  %v9357_v36 = vadd.f32 %v4124_v63, %v4089_v25  ;;  %v3168_v62 = vadd.f32 %v3144_v19, %v8190_v40  ;;  %v9378_v25 = vperm.slane %v6757_v39, 1  ;;  %v9380_v3 = vperm.slane %v6762_v9, 0 }
 0x251   : > { %11537 = vst [vmem:[#allocation101_spill] sm:$0xff] %v9339_v52  ;;  %v9366_v49 = vadd.f32 %v4125_v4, %v8735_v12  ;;  %v9370_v33 = vmul.f32 %v9048_v21, %v1432_v41  ;;  %v3191_v35 = vmax.f32 %v3167_v43, 0.0  ;;  %v9382_v63 = vperm.slane %v6762_v9, 1  ;;  %v3000_v4 = vpop.f32.mrf.mxu0  ;;  %v3237_v41 = vpop.permute.xlu2 %3236 }
 0x252   : > { %11538 = vst [vmem:[#allocation102_spill] sm:$0xff] %v9342_v34  ;;  %v3192_v12 = vmax.f32 %v3168_v62, 0.0  ;;  %v9386_v21 = vmul.f32 %v9323_v20, %v8755_v7  ;;  %v9390_v2 = vmul.f32 %v9331_v17, %v8766_v54  ;;  %v3116_v39 = vadd.f32 %v3115_v5, %v3076_v28  ;;  %v11547_v34 = vld [vmem:[#allocation19_spill] sm:$0xff] }
 0x253   : > { %11539 = vst [vmem:[#allocation103_spill] sm:$0xff] %v9350_v44  ;;  %v9392_v19 = vmul.f32 %v3232_v42, %v3191_v35  ;;  %v3039_v43 = vpop.f32.mrf.mxu1  ;;  %v9396_v9 = vmul.f32 %v9361_v51, %v8755_v7  ;;  %v9400_v62 = vmul.f32 %v9363_v55, %v8766_v54  ;;  %v11548_v42 = vld [vmem:[#allocation20_spill] sm:$0xff]  ;;  %v9415_v22 = vmul.f32 %v9378_v25, %v8766_v54 }
 0x254   : > { %11540 = vst [vmem:[#allocation104_spill] sm:$0xff] %v9370_v33  ;;  %v9402_v46 = vmul.f32 %v3237_v41, %v3192_v12  ;;  %v3040_v57 = vadd.f32 %v3039_v43, %v3000_v4  ;;  %v9406_v33 = vmul.f32 %v9376_v13, %v8755_v7  ;;  %v1802_v35 = vadd.f32 %v11548_v42, %v11547_v34  ;;  %v6597_v34 = vld [vmem:[%s11297_s0 + $0x1c0] sm:$0xf]  ;;  %v9438_v42 = vpop.permute.xlu0 %3241 }
 0x255   : > { %11541 = vst [vmem:[#allocation105_spill] sm:$0xff] %v9382_v63  ;;  %v4126_v28 = vmul.f32 %v9313_v47, %v9392_v19  ;;  %v3145_v5 = vmul.f32 %v3116_v39, %v8142_v29  ;;  %v9419_v12 = vmul.f32 %v9323_v20, %v8296_v31  ;;  %v7079_v39 = vld [vmem:[%s11297_s0 + $0x1c4] sm:$0xf0]  ;;  %v9432_v54 = vmul.f32 %v9331_v17, %v8298_v59 }
 0x256   : > { %11542 = vst [vmem:[#allocation106_spill] sm:$0xff] %v9386_v21  ;;  %v4127_v7 = vmul.f32 %v9259_v56, %v9402_v46  ;;  %v3146_v4 = vmul.f32 %v3040_v57, %v8156_v45  ;;  %v9436_v43 = vmul.f32 %v9361_v51, %v8296_v31  ;;  %v9446_v58 = vmul.f32 %v9363_v55, %v8298_v59 }
 0x257   : > { %11543 = vst [vmem:[#allocation107_spill] sm:$0xff] %v9390_v2  ;;  %v9441_v57 = vadd.f32 %v4126_v28, %v8738_v38  ;;  %v3169_v52 = vadd.f32 %v3145_v5, %v8192_v50  ;;  %v3078_v2 = vpop.f32.mrf.mxu2  ;;  %v7078_v38 = vld [vmem:[%s11297_s0 + $0x1c4] sm:$0xf]  ;;  %v6599_v28 = vld [vmem:[%s11297_s0 + $0x1c8] sm:$0xf0]  ;;  %v9462_v59 = vmul.f32 %v9323_v20, %v8309_v18  ;;  %v9467_v5 = vmul.f32 %v9331_v17, %v11438_v6 }
 0x258   : > { %11544 = vst [vmem:[#allocation108_spill] sm:$0xff] %v9396_v9  ;;  %v3170_v31 = vadd.f32 %v3146_v4, %v8190_v40  ;;  %v9475_v4 = vmul.f32 %v9363_v55, %v11438_v6  ;;  %v3117_v9 = vpop.f32.mrf.mxu3 }
 0x259   : > { %11545 = vst [vmem:[#allocation109_spill] sm:$0xff] %v9400_v62  ;;  %v9451_v62 = vadd.f32 %v4127_v7, %v8758_v60  ;;  %v6598_v60 = vor.u32 %v7079_v39, %v6597_v34  ;;  %v9471_v7 = vmul.f32 %v9361_v51, %v8309_v18  ;;  %v3118_v39 = vadd.f32 %v3117_v9, %v3078_v2 }
 0x25a   : > { %11546 = vst [vmem:[#allocation110_spill] sm:$0xff] %v9406_v33  ;;  %v3194_v33 = vmax.f32 %v3170_v31, 0.0 }
 0x25b   : > { %11549 = vst [vmem:[#allocation19_spill] sm:$0xff] %v9415_v22  ;;  %v1880_v22 = vadd.f32 %v11555_v14, %v11554_v48  ;;  %v1906_v14 = vmul.f32 %v1802_v35, %v8156_v45  ;;  %v3193_v48 = vmax.f32 %v3169_v52, 0.0  ;;  %v9479_v35 = vmul.f32 %v9376_v13, %v8309_v18  ;;  %v9481_v52 = vpop.permute.xlu1 %3850 }
 0x25c   : > { %11550 = vst [vmem:[#allocation20_spill] sm:$0xff] %v9432_v54  ;;  %v9491_v31 = vmul.f32 %v9438_v42, %v3194_v33  ;;  %v3147_v9 = vmul.f32 %v3118_v39, %v8142_v29  ;;  %3714 = vmatmul.bf16.gmra.mxu2 %v6598_v60  ;;  %v11567_v33 = vld [vmem:[#allocation27_spill] sm:$0xff]  ;;  %v9523_v39 = vmul.f32 %v9361_v51, %v11447_v16  ;;  %v9535_v44 = vpop.permute.xlu0 %3860 }
 0x25d   : > { %11551 = vst [vmem:[#allocation111_spill] sm:$0xff] %v9436_v43  ;;  %v9483_v34 = vmul.f32 %v3237_v41, %v3193_v48  ;;  %v1930_v41 = vadd.f32 %v1906_v14, %v8190_v40  ;;  %3636 = vmatmul.bf16.gmra.mxu0 %v6598_v60  ;;  %v9527_v60 = vmul.f32 %v9376_v13, %v11447_v16 }
 0x25e   : > { %11552 = vst [vmem:[#allocation112_spill] sm:$0xff] %v9441_v57 }
 0x25f   : > { %11553 = vst [vmem:[#allocation113_spill] sm:$0xff] %v9446_v58  ;;  %v3003_v58 = vpop.f32.mrf.mxu0  ;;  %v4128_v2 = vmul.f32 %v9313_v47, %v9483_v34 }
 0x260   : > { %11556 = vst [vmem:[#allocation22_spill] sm:$0xff] %v9451_v62 }
 0x261   : > { %11557 = vst [vmem:[#allocation24_spill] sm:$0xff] %v9462_v59  ;;  %v6602_v59 = vor.u32 %v7078_v38, %v6599_v28  ;;  %v9503_v38 = vmul.f32 %v9382_v63, %v11438_v6  ;;  %v4129_v28 = vmul.f32 %v9259_v56, %v9491_v31  ;;  %v9515_v48 = vadd.f32 %v4128_v2, %v8771_v37  ;;  %v3081_v2 = vpop.f32.mrf.mxu2 }
 0x262   : > { %11558 = vst [vmem:[#allocation114_spill] sm:$0xff] %v9467_v5  ;;  %v3042_v5 = vpop.f32.mrf.mxu1 }
 0x263   : > { %11559 = vst [vmem:[#allocation115_spill] sm:$0xff] %v9471_v7  ;;  %v9487_v7 = vmul.f32 %v9378_v25, %v11438_v6  ;;  %v3043_v21 = vadd.f32 %v3042_v5, %v3003_v58  ;;  %v11566_v58 = vld [vmem:[#allocation26_spill] sm:$0xff]  ;;  %v3171_v5 = vadd.f32 %v3147_v9, %v8192_v50  ;;  %6735 = vmatmul.msk.bf16.gmra.mxu1 %vm937_vm1, %v6602_v59  ;;  %v1954_v9 = vmax.f32 %v1930_v41, 0.0 }
 0x264   : > { %11560 = vst [vmem:[#allocation116_spill] sm:$0xff] %v9475_v4  ;;  %v1907_v4 = vmul.f32 %v1880_v22, %v8142_v29  ;;  %v9507_v22 = vmul.f32 %v9323_v20, %v11447_v16  ;;  %6741 = vmatmul.msk.bf16.gmra.mxu3 %vm937_vm1, %v6602_v59  ;;  %v9531_v37 = vadd.f32 %v4129_v28, %v8815_v32  ;;  %v9537_v59 = vpop.permute.xlu2 %3855  ;;  %v3120_v28 = vpop.f32.mrf.mxu3 }
 0x265   : > { %11561 = vst [vmem:[#allocation117_spill] sm:$0xff] %v9479_v35  ;;  %v9495_v35 = vmul.f32 %v9380_v3, %v8309_v18  ;;  %v1807_v18 = vadd.f32 %v11567_v33, %v11566_v58  ;;  %v3148_v6 = vmul.f32 %v3043_v21, %v8156_v45  ;;  %v11572_v21 = vld [vmem:[#allocation28_spill] sm:$0xff]  ;;  %v11573_v33 = vld [vmem:[#allocation29_spill] sm:$0xff]  ;;  %v9546_v32 = vmul.f32 %v9363_v55, %v11450_v8 }
 0x266   : > { %11562 = vst [vmem:[#allocation118_spill] sm:$0xff] %v9487_v7  ;;  %v1931_v58 = vadd.f32 %v1907_v4, %v8192_v50  ;;  %v1885_v14 = vadd.f32 %v11573_v33, %v11572_v21  ;;  %v9550_v4 = vmul.f32 %v9378_v25, %v11450_v8  ;;  %v11582_v7 = vld [vmem:[#allocation40_spill] sm:$0xff] }
 0x267   : > { %11563 = vst [vmem:[#allocation119_spill] sm:$0xff] %v9495_v35  ;;  %v1910_v41 = vmul.f32 %v1807_v18, %v8156_v45  ;;  %v3005_v21 = vpop.f32.mrf.mxu0  ;;  %v9570_v18 = vmul.f32 %v9361_v51, %v8850_v61  ;;  %v11592_v35 = vld [vmem:[#allocation34_spill] sm:$0xff] }
 0x268   : > { %11564 = vst [vmem:[#allocation120_spill] sm:$0xff] %v9503_v38 }
 0x269   : > { %11565 = vst [vmem:[#allocation121_spill] sm:$0xff] %v9507_v22  ;;  %v3195_v22 = vmax.f32 %v3171_v5, 0.0  ;;  %v9555_v5 = vmul.f32 %v9380_v3, %v11447_v16 }
 0x26a   : > { %11568 = vst [vmem:[#allocation26_spill] sm:$0xff] %v9515_v48  ;;  %v3044_v38 = vpop.f32.mrf.mxu1 }
 0x26b   : > { %11569 = vst [vmem:[#allocation27_spill] sm:$0xff] %v9523_v39  ;;  %v3172_v39 = vadd.f32 %v3148_v6, %v8190_v40  ;;  %v9558_v6 = vmul.f32 %v9438_v42, %v3195_v22  ;;  %v3045_v16 = vadd.f32 %v3044_v38, %v3005_v21  ;;  %v2050_v42 = vmul.f32 %v11582_v7, %v1954_v9  ;;  %v6605_v38 = vld [vmem:[%s11297_s0 + $0x1d0] sm:$0xf] }
 0x26c   : > { %11570 = vst [vmem:[#allocation122_spill] sm:$0xff] %v9527_v60  ;;  %v9542_v60 = vmul.f32 %v9331_v17, %v11450_v8  ;;  %v1911_v22 = vmul.f32 %v1885_v14, %v8142_v29  ;;  %v7081_v14 = vld [vmem:[%s11297_s0 + $0x1d4] sm:$0xf0]  ;;  %v9593_v9 = vmul.f32 %v9376_v13, %v8850_v61  ;;  %v3122_v48 = vpop.f32.mrf.mxu3  ;;  %v9632_v62 = vpop.permute.xlu2 %3865 }
 0x26d   : > { %11571 = vst [vmem:[#allocation123_spill] sm:$0xff] %v9531_v37  ;;  %v3196_v33 = vmax.f32 %v3172_v39, 0.0  ;;  %v3247_v39 = vpop.permute.xlu1 %3246 }
 0x26e   : > { %11574 = vst [vmem:[#allocation28_spill] sm:$0xff] %v9535_v44 }
 0x26f   : > { %11575 = vst [vmem:[#allocation29_spill] sm:$0xff] %v9542_v60  ;;  %v3121_v60 = vadd.f32 %v3120_v28, %v3081_v2  ;;  %v4130_v2 = vmul.f32 %v9313_v47, %v9558_v6  ;;  %v9577_v28 = vmul.f32 %v3247_v39, %v3196_v33  ;;  %v9604_v33 = vmul.f32 %v9363_v55, %v8890_v53  ;;  %v3008_v54 = vpop.f32.mrf.mxu0 }
 0x270   : > { %11576 = vst [vmem:[#allocation124_spill] sm:$0xff] %v9546_v32  ;;  %v9562_v32 = vmul.f32 %v9382_v63, %v11450_v8  ;;  %v1934_v8 = vadd.f32 %v1910_v41, %v8190_v40  ;;  %v11586_v41 = vld [vmem:[#allocation53_spill] sm:$0xff] }
 0x271   : > { %11577 = vst [vmem:[#allocation125_spill] sm:$0xff] %v9550_v4  ;;  %v9566_v4 = vmul.f32 %v9323_v20, %v8850_v61  ;;  %v9600_v21 = vadd.f32 %v4130_v2, %v11586_v41  ;;  %v7080_v2 = vld [vmem:[%s11297_s0 + $0x1d4] sm:$0xf]  ;;  %v6607_v41 = vld [vmem:[%s11297_s0 + $0x1d8] sm:$0xf0] }
 0x272   : > { %11578 = vst [vmem:[#allocation126_spill] sm:$0xff] %v9555_v5  ;;  %v1955_v5 = vmax.f32 %v1931_v58, 0.0  ;;  %v9589_v58 = vmul.f32 %v9331_v17, %v8890_v53  ;;  %v6610_v43 = vor.u32 %v7080_v2, %v6607_v41  ;;  %v6748_v41 = vld [vmem:[%s8338_s26 + $0x6] ss:$8 sm:$0x3] }
 0x273   : > { %11579 = vst [vmem:[#allocation127_spill] sm:$0xff] %v9562_v32  ;;  %v3149_v32 = vmul.f32 %v3121_v60, %v8142_v29  ;;  %v9597_v60 = vmul.f32 %v9380_v3, %v8850_v61  ;;  %v3083_v61 = vpop.f32.mrf.mxu2 }
 0x274   : > { %11580 = vst [vmem:[#allocation128_spill] sm:$0xff] %v9566_v4  ;;  %v3150_v4 = vmul.f32 %v3045_v16, %v8156_v45  ;;  %v9608_v16 = vmul.f32 %v9378_v25, %v8890_v53  ;;  %v3123_v44 = vadd.f32 %v3122_v48, %v3083_v61  ;;  %6736 = vmatmul.msk.bf16.gmra.mxu1 %vm937_vm1, %v6610_v43 }
 0x275   : > { %11581 = vst [vmem:[#allocation129_spill] sm:$0xff] %v9570_v18  ;;  %v9627_v18 = vmul.f32 %v9323_v20, %v2050_v42  ;;  %v9641_v20 = vmul.f32 %v9380_v3, %v2050_v42  ;;  %6742 = vmatmul.msk.bf16.gmra.mxu3 %vm937_vm1, %v6610_v43 }
 0x276   : > { %11583 = vst [vmem:[#allocation40_spill] sm:$0xff] %v9589_v58  ;;  %v9612_v58 = vmul.f32 %v9382_v63, %v8890_v53  ;;  %v6606_v53 = vor.u32 %v7081_v14, %v6605_v38  ;;  %v3151_v48 = vmul.f32 %v3123_v44, %v8142_v29  ;;  %v11603_v44 = vld [vmem:[#allocation41_spill] sm:$0xff] }
 0x277   : > { %11584 = vst [vmem:[#allocation130_spill] sm:$0xff] %v9593_v9  ;;  %v4131_v9 = vmul.f32 %v9259_v56, %v9577_v28  ;;  %v9675_v2 = vmul.f32 %v9376_v13, %v11603_v44 }
 0x278   : > { %11585 = vst [vmem:[#allocation131_spill] sm:$0xff] %v9597_v60  ;;  %v3174_v60 = vadd.f32 %v3150_v4, %v8190_v40  ;;  %v9635_v4 = vmul.f32 %v9361_v51, %v2050_v42  ;;  %3719 = vmatmul.bf16.gmra.mxu2 %v6606_v53  ;;  %3641 = vmatmul.bf16.gmra.mxu0 %v6606_v53 }
 0x279   : > { %11587 = vst [vmem:[#allocation53_spill] sm:$0xff] %v9600_v21  ;;  %v1958_v21 = vmax.f32 %v1934_v8, 0.0  ;;  %v9630_v37 = vadd.f32 %v4131_v9, %v11592_v35  ;;  %v3252_v35 = vpop.permute.xlu0 %3251 }
 0x27a   : > { %11588 = vst [vmem:[#allocation132_spill] sm:$0xff] %v9604_v33  ;;  %v1935_v33 = vadd.f32 %v1911_v22, %v8192_v50  ;;  %v3198_v22 = vmax.f32 %v3174_v60, 0.0 }
 0x27b   : > { %11589 = vst [vmem:[#allocation133_spill] sm:$0xff] %v9608_v16  ;;  %v3173_v16 = vadd.f32 %v3149_v32, %v8192_v50  ;;  %v3047_v32 = vpop.f32.mrf.mxu1  ;;  %v3086_v53 = vpop.f32.mrf.mxu2 }
 0x27c   : > { %11590 = vst [vmem:[#allocation134_spill] sm:$0xff] %v9612_v58  ;;  %v2051_v58 = vmul.f32 %v11582_v7, %v1955_v5  ;;  %v9638_v7 = vmul.f32 %v9376_v13, %v2050_v42  ;;  %v3048_v5 = vadd.f32 %v3047_v32, %v3008_v54  ;;  %v1959_v8 = vmax.f32 %v1935_v33, 0.0  ;;  %v6753_v32 = vld [vmem:[%s8338_s26 + $0x13] ss:$8 sm:$0x3] }
 0x27d   : > { %11591 = vst [vmem:[#allocation135_spill] sm:$0xff] %v9627_v18  ;;  %v3197_v57 = vmax.f32 %v3173_v16, 0.0  ;;  %v9645_v14 = vmul.f32 %v3252_v35, %v3198_v22  ;;  %v11600_v16 = vld [vmem:[#allocation44_spill] sm:$0xff] }
 0x27e   : > { %11593 = vst [vmem:[#allocation34_spill] sm:$0xff] %v9630_v37  ;;  %v9649_v9 = vmul.f32 %v9331_v17, %v2051_v58  ;;  %v9652_v60 = vmul.f32 %v9363_v55, %v2051_v58  ;;  %v2054_v42 = vmul.f32 %v11600_v16, %v1958_v21  ;;  %v3152_v61 = vmul.f32 %v3048_v5, %v8156_v45  ;;  %v11605_v21 = vld [vmem:[#allocation43_spill] sm:$0xff] }
 0x27f   : > { %11594 = vst [vmem:[#allocation136_spill] sm:$0xff] %v9632_v62  ;;  %v9643_v38 = vmul.f32 %v3247_v39, %v3197_v57  ;;  %v9657_v54 = vmul.f32 %v9378_v25, %v2051_v58  ;;  %v9660_v57 = vmul.f32 %v9382_v63, %v2051_v58  ;;  %v9664_v39 = vmul.f32 %v9361_v51, %v11603_v44 }
 0x280   : > { %11595 = vst [vmem:[#allocation137_spill] sm:$0xff] %v9635_v4  ;;  %v9671_v33 = vmul.f32 %v9363_v55, %v11605_v21  ;;  %v9679_v58 = vmul.f32 %v9380_v3, %v11603_v44  ;;  %v4133_v51 = vmul.f32 %v9259_v56, %v9645_v14  ;;  %v9687_v22 = vmul.f32 %v9378_v25, %v11605_v21 }
 0x281   : > { %11596 = vst [vmem:[#allocation138_spill] sm:$0xff] %v9638_v7  ;;  %v4132_v17 = vmul.f32 %v9313_v47, %v9643_v38  ;;  %v2055_v55 = vmul.f32 %v11600_v16, %v1959_v8  ;;  %v3175_v44 = vadd.f32 %v3151_v48, %v8192_v50  ;;  %v3125_v8 = vpop.f32.mrf.mxu3  ;;  %v3010_v16 = vpop.f32.mrf.mxu0  ;;  %v11629_v7 = vld [vmem:[#allocation59_spill] sm:$0xff] }
 0x282   : > { %11597 = vst [vmem:[#allocation139_spill] sm:$0xff] %v9641_v20  ;;  %v9703_v43 = vadd.f32 %v4133_v51, %v8917_v15  ;;  %v9720_v51 = vperm.slane %v6753_v32, 1 }
 0x283   : > { %11598 = vst [vmem:[#allocation140_spill] sm:$0xff] %v9649_v9  ;;  %v9692_v5 = vadd.f32 %v4132_v17, %v8875_v24  ;;  %v9708_v24 = vperm.slane %v6748_v41, 1  ;;  %v3199_v48 = vmax.f32 %v3175_v44, 0.0  ;;  %v3126_v17 = vadd.f32 %v3125_v8, %v3086_v53  ;;  %v11617_v44 = vld [vmem:[#allocation45_spill] sm:$0xff] }
 0x284   : > { %11599 = vst [vmem:[#allocation141_spill] sm:$0xff] %v9652_v60  ;;  %v9731_v8 = vmul.f32 %v9380_v3, %v11617_v44 }
 0x285   : > { %11601 = vst [vmem:[#allocation44_spill] sm:$0xff] %v9657_v54  ;;  %v3153_v53 = vmul.f32 %v3126_v17, %v8142_v29  ;;  %v6763_v17 = vld [vmem:[%s8338_s26 + $0x25] ss:$8 sm:$0x3] }
 0x286   : > { %11602 = vst [vmem:[#allocation142_spill] sm:$0xff] %v9660_v57  ;;  %v9723_v57 = vmul.f32 %v3252_v35, %v3199_v48  ;;  %v11620_v35 = vld [vmem:[#allocation48_spill] sm:$0xff]  ;;  %v11621_v48 = vld [vmem:[#allocation49_spill] sm:$0xff]  ;;  %v9782_v20 = vperm.slane %v6763_v17, 1 }
 0x287   : > { %11604 = vst [vmem:[#allocation41_spill] sm:$0xff] %v9664_v39  ;;  %v3049_v39 = vpop.f32.mrf.mxu1 }
 0x288   : > { %11606 = vst [vmem:[#allocation43_spill] sm:$0xff] %v9671_v33  ;;  %v9697_v33 = vmul.f32 %v9382_v63, %v11605_v21  ;;  %v9711_v21 = vmul.f32 %v9380_v3, %v2054_v42  ;;  %v9715_v15 = vadd.f32 %v3049_v39, %v3010_v16  ;;  %v2426_v39 = vadd.f32 %v8896_v1, %v8894_v26 }
 0x289   : > { %11607 = vst [vmem:[#allocation143_spill] sm:$0xff] %v9675_v2  ;;  %v9706_v2 = vperm.slane %v6748_v41, 0  ;;  %v3257_v41 = vpop.permute.xlu2 %3256  ;;  %v9743_v16 = vmul.f32 %v9708_v24, %v11620_v35  ;;  %v4134_v3 = vmul.f32 %v9313_v47, %v9723_v57  ;;  %v11622_v35 = vld [vmem:[#allocation50_spill] sm:$0xff]  ;;  %v3127_v60 = vpop.f32.mrf.mxu3 }
 0x28a   : > { %11608 = vst [vmem:[#allocation144_spill] sm:$0xff] %v9679_v58  ;;  %v9700_v58 = vmul.f32 %v9376_v13, %v2054_v42  ;;  %v9713_v13 = vperm.slane %v6753_v32, 0  ;;  %v9727_v42 = vmul.f32 %v9382_v63, %v2055_v55  ;;  %v9764_v63 = vmul.f32 %v9708_v24, %v11622_v35  ;;  %v3013_v9 = vpop.f32.mrf.mxu0 }
 0x28b   : > { %11609 = vst [vmem:[#allocation145_spill] sm:$0xff] %v9687_v22  ;;  %v3176_v22 = vadd.f32 %v3152_v61, %v8190_v40  ;;  %v9718_v61 = vmul.f32 %v9378_v25, %v2055_v55  ;;  %v9747_v55 = vmul.f32 %v9706_v2, %v11621_v48 }
 0x28c   : > { %11610 = vst [vmem:[#allocation146_spill] sm:$0xff] %v9692_v5  ;;  %v9754_v26 = vmul.f32 %v9713_v13, %v11621_v48 }
 0x28d   : > { %11611 = vst [vmem:[#allocation147_spill] sm:$0xff] %v9697_v33  ;;  %v6758_v33 = vld [vmem:[%s8338_s26 + $0x20] ss:$8 sm:$0x3] }
 0x28e   : > { %11612 = vst [vmem:[#allocation148_spill] sm:$0xff] %v9700_v58  ;;  %v3200_v58 = vmax.f32 %v3176_v22, 0.0  ;;  %v11619_v22 = vld [vmem:[#allocation47_spill] sm:$0xff]  ;;  %v9756_v1 = vperm.slane %v6758_v33, 0 }
 0x28f   : > { %11613 = vst [vmem:[#allocation149_spill] sm:$0xff] %v9703_v43  ;;  %v9739_v32 = vmul.f32 %v9706_v2, %v11619_v22  ;;  %v3088_v22 = vpop.f32.mrf.mxu2 }
 0x290   : > { %11614 = vst [vmem:[#allocation150_spill] sm:$0xff] %v9711_v21  ;;  %v9735_v25 = vmul.f32 %v3257_v41, %v3200_v58  ;;  %v2504_v58 = vadd.f32 %v8927_v27, %v8923_v11  ;;  %v9774_v21 = vperm.slane %v6758_v33, 1  ;;  %v9776_v11 = vperm.slane %v6763_v17, 0  ;;  %v11630_v33 = vld [vmem:[#allocation51_spill] sm:$0xff]  ;;  %v11633_v17 = vld [vmem:[#allocation52_spill] sm:$0xff] }
 0x291   : > { %11615 = vst [vmem:[#allocation151_spill] sm:$0xff] %v9718_v61  ;;  %v3177_v61 = vadd.f32 %v3153_v53, %v8192_v50  ;;  %v2530_v27 = vmul.f32 %v2426_v39, %v8156_v45  ;;  %v3052_v53 = vpop.f32.mrf.mxu1  ;;  %v9790_v18 = vmul.f32 %v9706_v2, %v11630_v33  ;;  %v9799_v43 = vmul.f32 %v9708_v24, %v11633_v17 }
 0x292   : > { %11616 = vst [vmem:[#allocation152_spill] sm:$0xff] %v9727_v42  ;;  %v4135_v44 = vmul.f32 %v9259_v56, %v9735_v25  ;;  %v11623_v42 = vld [vmem:[#allocation17_spill] sm:$0xff]  ;;  %v11625_v56 = vld [vmem:[#allocation32_spill] sm:$0xff]  ;;  %v2531_v39 = vmul.f32 %v2504_v58, %v8142_v29  ;;  %v9811_v58 = vmul.f32 %v9720_v51, %v11633_v17 }
 0x293   : > { %11618 = vst [vmem:[#allocation45_spill] sm:$0xff] %v9731_v8  ;;  %v9768_v8 = vmul.f32 %v9720_v51, %v11622_v35  ;;  %v9771_v48 = vadd.f32 %v4134_v3, %v11623_v42  ;;  %v11628_v35 = vld [vmem:[#allocation58_spill] sm:$0xff]  ;;  %v3201_v42 = vmax.f32 %v3177_v61, 0.0  ;;  %v9786_v3 = vadd.f32 %v3127_v60, %v3088_v22  ;;  %v11635_v60 = vld [vmem:[#allocation31_spill] sm:$0xff] }
 0x294   : > { %v9780_v54 = vadd.f32 %v4135_v44, %v11625_v56  ;;  %11627 = vst [vmem:[#allocation49_spill] sm:$0xff] %v9782_v20  ;;  %v2431_v4 = vadd.f32 %v11629_v7, %v11628_v35  ;;  %v11632_v44 = vld [vmem:[#allocation61_spill] sm:$0xff]  ;;  %v9803_v7 = vmul.f32 %v9713_v13, %v11630_v33  ;;  %v2532_v61 = vmul.f32 %v11635_v60, %v8156_v45  ;;  %v11638_v35 = vld [vmem:[#allocation56_spill] sm:$0xff]  ;;  %v11640_v60 = vld [vmem:[#allocation54_spill] sm:$0xff] }
 0x295   : > { %11624 = vst [vmem:[#allocation47_spill] sm:$0xff] %v9771_v48  ;;  %v11631_v48 = vld [vmem:[#allocation60_spill] sm:$0xff]  ;;  %v9807_v22 = vmul.f32 %v3257_v41, %v3201_v42  ;;  %v9826_v41 = vmul.f32 %v9706_v2, %v11640_v60 }
 0x296   : > { %11626 = vst [vmem:[#allocation48_spill] sm:$0xff] %v9780_v54  ;;  %v2509_v56 = vadd.f32 %v11632_v44, %v11631_v48  ;;  %v9795_v54 = vadd.f32 %v3052_v53, %v3013_v9  ;;  %v9815_v9 = vmul.f32 %v9756_v1, %v11630_v33  ;;  %v2554_v48 = vadd.f32 %v2530_v27, %v8190_v40 }
 0x297   : > { %11634 = vst [vmem:[#allocation50_spill] sm:$0xff] %v9799_v43  ;;  %v2533_v53 = vmul.f32 %v11638_v35, %v8142_v29  ;;  %v9822_v44 = vmul.f32 %v9774_v21, %v11633_v17  ;;  %v2534_v42 = vmul.f32 %v2431_v4, %v8156_v45  ;;  %v4136_v5 = vmul.f32 %v9313_v47, %v9807_v22  ;;  %v3091_v37 = vpop.f32.mrf.mxu2  ;;  %v3130_v43 = vpop.f32.mrf.mxu3 }
 0x298   : > { %11636 = vst [vmem:[#allocation17_spill] sm:$0xff] %v9811_v58  ;;  %v9833_v33 = vmul.f32 %v9713_v13, %v11640_v60  ;;  %v9837_v27 = vmul.f32 %v9756_v1, %v11640_v60  ;;  %v2555_v17 = vadd.f32 %v2531_v39, %v8192_v50  ;;  %v2535_v35 = vmul.f32 %v2509_v56, %v8142_v29 }
 0x299   : > { %11637 = vst [vmem:[#allocation32_spill] sm:$0xff] %v9815_v9  ;;  %v9847_v47 = vmul.f32 %v9776_v11, %v11640_v60  ;;  %v2556_v4 = vadd.f32 %v2532_v61, %v8190_v40  ;;  %v2578_v56 = vmax.f32 %v2554_v48, 0.0  ;;  %v3015_v9 = vpop.f32.mrf.mxu0  ;;  %v11652_v61 = vld [vmem:[#allocation30_spill] sm:$0xff] }
 0x29a   : > { %11639 = vst [vmem:[#allocation58_spill] sm:$0xff] %v9822_v44  ;;  %v11644_v44 = vld [vmem:[#allocation55_spill] sm:$0xff]  ;;  %v9875_v48 = vmul.f32 %v9713_v13, %v11652_v61 }
 0x29b   : > { %11641 = vst [vmem:[#allocation59_spill] sm:$0xff] %v9826_v41  ;;  %v9843_v41 = vmul.f32 %v9708_v24, %v11644_v44  ;;  %v9859_v39 = vmul.f32 %v9774_v21, %v11644_v44  ;;  %v9864_v60 = vmul.f32 %v9782_v20, %v11644_v44 }
 0x29c   : > { %11642 = vst [vmem:[#allocation51_spill] sm:$0xff] %v9833_v33  ;;  %v11647_v33 = vld [vmem:[#allocation57_spill] sm:$0xff] }
 0x29d   : > { %11643 = vst [vmem:[#allocation60_spill] sm:$0xff] %v9837_v27  ;;  %v9851_v58 = vadd.f32 %v4136_v5, %v11647_v33  ;;  %v9855_v27 = vmul.f32 %v9720_v51, %v11644_v44  ;;  %v9868_v5 = vmul.f32 %v9706_v2, %v11652_v61  ;;  %v2558_v33 = vadd.f32 %v2534_v42, %v8190_v40 }
 0x29e   : > { %11645 = vst [vmem:[#allocation61_spill] sm:$0xff] %v9843_v41  ;;  %v2557_v41 = vadd.f32 %v2533_v53, %v8192_v50  ;;  %v2579_v53 = vmax.f32 %v2555_v17, 0.0  ;;  %v9882_v44 = vmul.f32 %v9756_v1, %v11652_v61  ;;  %v2580_v42 = vmax.f32 %v2556_v4, 0.0 }
 0x29f   : > { %11646 = vst [vmem:[#allocation52_spill] sm:$0xff] %v9847_v47 }
 0x2a0   : > { %11648 = vst [vmem:[#allocation31_spill] sm:$0xff] %v9851_v58  ;;  %v9871_v58 = vadd.f32 %v3130_v43, %v3091_v37  ;;  %v11657_v37 = vld [vmem:[#allocation16_spill] sm:$0xff] }
 0x2a1   : > { %11649 = vst [vmem:[#allocation56_spill] sm:$0xff] %v9855_v27  ;;  %v3054_v27 = vpop.f32.mrf.mxu1  ;;  %v9890_v43 = vmul.f32 %v9708_v24, %v11657_v37  ;;  %v9894_v17 = vmul.f32 %v9720_v51, %v11657_v37 }
 0x2a2   : > { %11650 = vst [vmem:[#allocation54_spill] sm:$0xff] %v9859_v39  ;;  %v2559_v39 = vadd.f32 %v2535_v35, %v8192_v50  ;;  %v9878_v47 = vadd.f32 %v3054_v27, %v3015_v9  ;;  %v9898_v9 = vmul.f32 %v9774_v21, %v11657_v37  ;;  %v11661_v27 = vld [vmem:[#allocation62_spill] sm:$0xff] }
 0x2a3   : > { %11651 = vst [vmem:[#allocation55_spill] sm:$0xff] %v9864_v60  ;;  %v2674_v35 = vmul.f32 %v11661_v27, %v2578_v56  ;;  %v2675_v56 = vmul.f32 %v11661_v27, %v2579_v53 }
 0x2a4   : > { %11653 = vst [vmem:[#allocation57_spill] sm:$0xff] %v9868_v5  ;;  %v9886_v5 = vmul.f32 %v9776_v11, %v11652_v61  ;;  %v9903_v61 = vmul.f32 %v9782_v20, %v11657_v37  ;;  %v2583_v37 = vmax.f32 %v2559_v39, 0.0 }
 0x2a5   : > { %11654 = vst [vmem:[#allocation30_spill] sm:$0xff] %v9875_v48  ;;  %v9940_v39 = vmul.f32 %v9706_v2, %v2674_v35  ;;  %v9943_v27 = vmul.f32 %v9713_v13, %v2674_v35  ;;  %v9947_v60 = vmul.f32 %v9756_v1, %v2674_v35 }
 0x2a6   : > { %11655 = vst [vmem:[#allocation153_spill] sm:$0xff] %v9882_v44  ;;  %v2581_v44 = vmax.f32 %v2557_v41, 0.0 }
 0x2a7   : > { %11656 = vst [vmem:[#allocation154_spill] sm:$0xff] %v9886_v5  ;;  %v11663_v5 = vld [vmem:[#allocation33_spill] sm:$0xff] }
 0x2a8   : > { %11658 = vst [vmem:[#allocation16_spill] sm:$0xff] %v9890_v43  ;;  %v9907_v48 = vmul.f32 %v9706_v2, %v11663_v5  ;;  %v9911_v4 = vmul.f32 %v9713_v13, %v11663_v5  ;;  %v9915_v43 = vmul.f32 %v9756_v1, %v11663_v5  ;;  %v9919_v41 = vmul.f32 %v9776_v11, %v11663_v5 }
 0x2a9   : > { %11659 = vst [vmem:[#allocation155_spill] sm:$0xff] %v9894_v17  ;;  %v2582_v17 = vmax.f32 %v2558_v33, 0.0  ;;  %v3057_v2 = vpop.f32.mrf.mxu1 }
 0x2aa   : > { %11660 = vst [vmem:[#allocation156_spill] sm:$0xff] %v9898_v9  ;;  %v11668_v9 = vld [vmem:[#allocation42_spill] sm:$0xff] }
 0x2ab   : > { %11662 = vst [vmem:[#allocation62_spill] sm:$0xff] %v9903_v61  ;;  %v3093_v61 = vpop.f32.mrf.mxu2  ;;  %v9928_v33 = vmul.f32 %v9720_v51, %v11668_v9  ;;  %v9937_v53 = vmul.f32 %v9782_v20, %v11668_v9 }
 0x2ac   : > { %11664 = vst [vmem:[#allocation33_spill] sm:$0xff] %v9907_v48  ;;  %v9924_v48 = vmul.f32 %v9708_v24, %v11668_v9 }
 0x2ad   : > { %11665 = vst [vmem:[#allocation157_spill] sm:$0xff] %v9911_v4  ;;  %v11672_v4 = vld [vmem:[#allocation75_spill] sm:$0xff] }
 0x2ae   : > { %11666 = vst [vmem:[#allocation158_spill] sm:$0xff] %v9915_v43  ;;  %v9932_v43 = vmul.f32 %v9774_v21, %v11668_v9  ;;  %v2676_v5 = vmul.f32 %v11672_v4, %v2580_v42  ;;  %v9950_v42 = vmul.f32 %v9776_v11, %v2674_v35  ;;  %v6755_v35 = vld [vmem:[%s8338_s26 + $0x15] ss:$8 sm:$0x3] }
 0x2af   : > { %11667 = vst [vmem:[#allocation159_spill] sm:$0xff] %v9919_v41  ;;  %v3018_v41 = vpop.f32.mrf.mxu0 }
 0x2b0   : > { %11669 = vst [vmem:[#allocation42_spill] sm:$0xff] %v9924_v48  ;;  %v2677_v48 = vmul.f32 %v11672_v4, %v2581_v44  ;;  %v9960_v44 = vmul.f32 %v9720_v51, %v2675_v56 }
 0x2b1   : > { %11670 = vst [vmem:[#allocation160_spill] sm:$0xff] %v9928_v33  ;;  %v3132_v33 = vpop.f32.mrf.mxu3 }
 0x2b2   : > { %11671 = vst [vmem:[#allocation161_spill] sm:$0xff] %v9932_v43  ;;  %v11678_v43 = vld [vmem:[#allocation21_spill] sm:$0xff]  ;;  %v9954_v62 = vadd.f32 %v3132_v33, %v3093_v61  ;;  %v9972_v61 = vmul.f32 %v9782_v20, %v2675_v56  ;;  %v9978_v33 = vmul.f32 %v9756_v1, %v2676_v5 }
 0x2b3   : > { %11673 = vst [vmem:[#allocation75_spill] sm:$0xff] %v9937_v53  ;;  %v2678_v9 = vmul.f32 %v11678_v43, %v2582_v17  ;;  %v6750_v53 = vld [vmem:[%s8338_s26 + $0x10] ss:$8 sm:$0x3]  ;;  %v2679_v4 = vmul.f32 %v11678_v43, %v2583_v37  ;;  %v9969_v17 = vmul.f32 %v9774_v21, %v2675_v56  ;;  %v9981_v43 = vmul.f32 %v9776_v11, %v2676_v5 }
 0x2b4   : > { %11674 = vst [vmem:[#allocation162_spill] sm:$0xff] %v9940_v39  ;;  %v9957_v39 = vmul.f32 %v9708_v24, %v2675_v56  ;;  %v9975_v24 = vmul.f32 %v9713_v13, %v2676_v5  ;;  %v9984_v37 = vmul.f32 %v9720_v51, %v2677_v48  ;;  %v9992_v56 = vmul.f32 %v9774_v21, %v2677_v48  ;;  %v6765_v5 = vld [vmem:[%s8338_s26 + $0x27] ss:$8 sm:$0x3] }
 0x2b5   : > { %11675 = vst [vmem:[#allocation163_spill] sm:$0xff] %v9943_v27  ;;  %v9963_v27 = vpop.permute.xlu1 %3870  ;;  %v9995_v13 = vmul.f32 %v9782_v20, %v2677_v48  ;;  %v10004_v51 = vmul.f32 %v9776_v11, %v2678_v9  ;;  %v11694_v48 = vld [vmem:[#allocation5_spill] sm:$0xff] }
 0x2b6   : > { %11676 = vst [vmem:[#allocation164_spill] sm:$0xff] %v9947_v60 }
 0x2b7   : > { %11677 = vst [vmem:[#allocation165_spill] sm:$0xff] %v9950_v42  ;;  %v9966_v42 = vadd.f32 %v3057_v2, %v3018_v41  ;;  %v9986_v41 = vperm.slane %v6750_v53, 0  ;;  %v9988_v2 = vperm.slane %v6750_v53, 1  ;;  %v10010_v53 = vmul.f32 %v9782_v20, %v2679_v4  ;;  %v3020_v20 = vpop.f32.mrf.mxu0 }
 0x2b8   : > { %11679 = vst [vmem:[#allocation21_spill] sm:$0xff] %v9957_v39 }
 0x2b9   : > { %11680 = vst [vmem:[#allocation166_spill] sm:$0xff] %v9960_v44 }
 0x2ba   : > { %11681 = vst [vmem:[#allocation167_spill] sm:$0xff] %v9963_v27 }
 0x2bb   : > { %11682 = vst [vmem:[#allocation168_spill] sm:$0xff] %v9969_v17  ;;  %v6760_v17 = vld [vmem:[%s8338_s26 + $0x22] ss:$8 sm:$0x3] }
 0x2bc   : > { %11683 = vst [vmem:[#allocation169_spill] sm:$0xff] %v9972_v61  ;;  %v10022_v61 = vperm.slane %v6760_v17, 1 }
 0x2bd   : > { %11684 = vst [vmem:[#allocation170_spill] sm:$0xff] %v9975_v24  ;;  %v9998_v24 = vmul.f32 %v9756_v1, %v2678_v9  ;;  %v10018_v1 = vpop.permute.xlu0 %3875  ;;  %v10028_v9 = vmul.f32 %v9986_v41, %v9329_v10  ;;  %v3155_v10 = vmul.f32 %v9786_v3, %v8142_v29  ;;  %v3262_v3 = vpop.permute.xlu2 %3261 }
 0x2be   : > { %11685 = vst [vmem:[#allocation171_spill] sm:$0xff] %v9978_v33  ;;  %v10000_v33 = vperm.slane %v6755_v35, 0  ;;  %v10085_v44 = vmul.f32 %v10022_v61, %v9558_v6 }
 0x2bf   : > { %11686 = vst [vmem:[#allocation172_spill] sm:$0xff] %v9981_v43  ;;  %v10012_v43 = vperm.slane %v6755_v35, 1  ;;  %v10034_v35 = vperm.slane %v6765_v5, 0  ;;  %v3179_v60 = vadd.f32 %v3155_v10, %v8192_v50 }
 0x2c0   : > { %11687 = vst [vmem:[#allocation173_spill] sm:$0xff] %v9984_v37  ;;  %v10007_v37 = vmul.f32 %v9774_v21, %v2679_v4  ;;  %v3154_v21 = vmul.f32 %v9715_v15, %v8156_v45  ;;  %v10032_v4 = vmul.f32 %v9988_v2, %v9392_v19  ;;  %v10044_v15 = vmul.f32 %v10000_v33, %v9402_v46  ;;  %v3059_v19 = vpop.f32.mrf.mxu1 }
 0x2c1   : > { %11688 = vst [vmem:[#allocation174_spill] sm:$0xff] %v9992_v56  ;;  %v3096_v56 = vpop.f32.mrf.mxu2  ;;  %v10056_v20 = vmul.f32 %v10012_v43, %v9483_v34  ;;  %v3156_v19 = vmul.f32 %v9795_v54, %v8156_v45  ;;  %v10101_v39 = vmul.f32 %v10034_v35, %v9577_v28  ;;  %v10128_v10 = vmul.f32 %v10000_v33, %v9645_v14 }
 0x2c2   : > { %11689 = vst [vmem:[#allocation175_spill] sm:$0xff] %v9995_v13  ;;  %v10016_v13 = vmul.f32 %v9776_v11, %v11694_v48  ;;  %v10036_v11 = vperm.slane %v6765_v5, 1  ;;  %v3135_v48 = vpop.f32.mrf.mxu3  ;;  %v10052_v5 = vmul.f32 %v9988_v2, %v9483_v34  ;;  %v3178_v34 = vadd.f32 %v3154_v21, %v8190_v40 }
 0x2c3   : > { %11690 = vst [vmem:[#allocation176_spill] sm:$0xff] %v9998_v24  ;;  %v10020_v24 = vperm.slane %v6760_v17, 0  ;;  %v10040_v17 = vmul.f32 %v9986_v41, %v9402_v46  ;;  %v10064_v46 = vmul.f32 %v10000_v33, %v9491_v31  ;;  %v10093_v21 = vmul.f32 %v10000_v33, %v9577_v28 }
 0x2c4   : > { %11691 = vst [vmem:[#allocation177_spill] sm:$0xff] %v10004_v51  ;;  %v10081_v51 = vmul.f32 %v10012_v43, %v9558_v6  ;;  %v10118_v27 = vmul.f32 %v10036_v11, %v9643_v38 }
 0x2c5   : > { %11692 = vst [vmem:[#allocation178_spill] sm:$0xff] %v10007_v37  ;;  %v10077_v37 = vpop.permute.xlu1 %3880  ;;  %v10097_v54 = vmul.f32 %v10020_v24, %v9577_v28 }
 0x2c6   : > { %11693 = vst [vmem:[#allocation179_spill] sm:$0xff] %v10010_v53  ;;  %v10060_v53 = vmul.f32 %v9986_v41, %v9491_v31 }
 0x2c7   : > { %11695 = vst [vmem:[#allocation5_spill] sm:$0xff] %v10016_v13  ;;  %v10048_v13 = vadd.f32 %v3135_v48, %v3096_v56  ;;  %v10068_v56 = vmul.f32 %v10020_v24, %v9491_v31  ;;  %v10072_v48 = vmul.f32 %v9988_v2, %v9558_v6  ;;  %v10089_v31 = vmul.f32 %v9986_v41, %v9577_v28 }
 0x2c8   : > { %11696 = vst [vmem:[#allocation180_spill] sm:$0xff] %v10018_v1  ;;  %v10105_v6 = vmul.f32 %v9988_v2, %v9643_v38  ;;  %v10114_v1 = vmul.f32 %v10022_v61, %v9643_v38  ;;  %v3157_v28 = vmul.f32 %v9871_v58, %v8142_v29  ;;  %v10141_v58 = vmul.f32 %v9988_v2, %v9723_v57 }
 0x2c9   : > { %11697 = vst [vmem:[#allocation181_spill] sm:$0xff] %v10036_v11 }
 0x2ca   : > { %11698 = vst [vmem:[#allocation182_spill] sm:$0xff] %v10077_v37  ;;  %v10110_v37 = vmul.f32 %v10012_v43, %v9643_v38  ;;  %v10137_v38 = vmul.f32 %v10034_v35, %v9645_v14 }
 0x2cb   : > { %11699 = vst [vmem:[#allocation183_spill] sm:$0xff] %v10085_v44 }
 0x2cc   : > { %11700 = vst [vmem:[#allocation184_spill] sm:$0xff] %v10089_v31 }
 0x2cd   : > { %11701 = vst [vmem:[#allocation185_spill] sm:$0xff] %v10093_v21 }
 0x2ce   : > { %11702 = vst [vmem:[#allocation186_spill] sm:$0xff] %v10097_v54  ;;  %v3180_v54 = vadd.f32 %v3156_v19, %v8190_v40  ;;  %v10149_v19 = vmul.f32 %v10012_v43, %v9723_v57 }
 0x2cf   : > { %11703 = vst [vmem:[#allocation187_spill] sm:$0xff] %v10101_v39  ;;  %v3098_v39 = vpop.f32.mrf.mxu2 }
 0x2d0   : > { %11704 = vst [vmem:[#allocation188_spill] sm:$0xff] %v10105_v6  ;;  %v10124_v6 = vmul.f32 %v9986_v41, %v9645_v14  ;;  %v3158_v39 = vmul.f32 %v9878_v47, %v8156_v45  ;;  %v10161_v47 = vmul.f32 %v9986_v41, %v9735_v25 }
 0x2d1   : > { %11705 = vst [vmem:[#allocation189_spill] sm:$0xff] %v10110_v37  ;;  %v3202_v37 = vmax.f32 %v3178_v34, 0.0  ;;  %v10145_v34 = vpop.permute.xlu0 %3885 }
 0x2d2   : > { %11706 = vst [vmem:[#allocation190_spill] sm:$0xff] %v10114_v1  ;;  %v10133_v1 = vmul.f32 %v10020_v24, %v9645_v14  ;;  %v10157_v14 = vmul.f32 %v10036_v11, %v9723_v57 }
 0x2d3   : > { %11707 = vst [vmem:[#allocation191_spill] sm:$0xff] %v10118_v27 }
 0x2d4   : > { %11708 = vst [vmem:[#allocation192_spill] sm:$0xff] %v10124_v6  ;;  %v3137_v6 = vpop.f32.mrf.mxu3 }
 0x2d5   : > { %11709 = vst [vmem:[#allocation193_spill] sm:$0xff] %v10128_v10  ;;  %v3617_v10 = vpop.f32.mrf.mxu0  ;;  %v3181_v6 = vadd.f32 %v3157_v28, %v8192_v50  ;;  %v3182_v28 = vadd.f32 %v3158_v39, %v8190_v40  ;;  %v6746_v39 = vld [vmem:[%s8338_s26 + $0x4] ss:$8 sm:$0x3] }
 0x2d6   : > { %11710 = vst [vmem:[#allocation194_spill] sm:$0xff] %v10133_v1  ;;  %v10153_v1 = vmul.f32 %v10022_v61, %v9723_v57  ;;  %v10172_v57 = vmul.f32 %v10020_v24, %v9735_v25 }
 0x2d7   : > { %11711 = vst [vmem:[#allocation195_spill] sm:$0xff] %v10137_v38  ;;  %v3656_v38 = vpop.f32.mrf.mxu1 }
 0x2d8   : > { %11712 = vst [vmem:[#allocation196_spill] sm:$0xff] %v10141_v58  ;;  %v3203_v58 = vmax.f32 %v3179_v60, 0.0  ;;  %v3298_v60 = vmul.f32 %v3262_v3, %v3202_v37  ;;  %v10190_v37 = vmul.f32 %v10012_v43, %v9807_v22 }
 0x2d9   : > { %11713 = vst [vmem:[#allocation197_spill] sm:$0xff] %v10145_v34  ;;  %v3159_v34 = vmul.f32 %v9954_v62, %v8142_v29  ;;  %v3160_v62 = vmul.f32 %v9966_v42, %v8156_v45  ;;  %v10199_v42 = vmul.f32 %v10036_v11, %v9807_v22  ;;  %v3272_v31 = vpop.permute.xlu0 %3271 }
 0x2da   : > { %11714 = vst [vmem:[#allocation198_spill] sm:$0xff] %v10149_v19  ;;  %v3657_v19 = vadd.f32 %v3656_v38, %v3617_v10  ;;  %v10182_v38 = vpop.permute.xlu2 %3890  ;;  %v10204_v27 = vmul.f32 %v9986_v41, %v3298_v60 }
 0x2db   : > { %11715 = vst [vmem:[#allocation199_spill] sm:$0xff] %v10153_v1  ;;  %v10168_v1 = vmul.f32 %v10000_v33, %v9735_v25 }
 0x2dc   : > { %11716 = vst [vmem:[#allocation200_spill] sm:$0xff] %v10157_v14  ;;  %v3204_v14 = vmax.f32 %v3180_v54, 0.0  ;;  %v3764_v10 = vmul.f32 %v3657_v19, %v8156_v45  ;;  %v3299_v54 = vmul.f32 %v3262_v3, %v3203_v58  ;;  %v3205_v19 = vmax.f32 %v3181_v6, 0.0 }
 0x2dd   : > { %11717 = vst [vmem:[#allocation201_spill] sm:$0xff] %v10161_v47  ;;  %v10176_v47 = vmul.f32 %v10034_v35, %v9735_v25  ;;  %v10194_v25 = vmul.f32 %v10022_v61, %v9807_v22  ;;  %v10210_v3 = vmul.f32 %v10020_v24, %v3298_v60  ;;  %v10213_v6 = vperm.slane %v6746_v39, 0  ;;  %v3619_v21 = vpop.f32.mrf.mxu0 }
 0x2de   : > { %11718 = vst [vmem:[#allocation202_spill] sm:$0xff] %v10168_v1  ;;  %v10186_v1 = vmul.f32 %v9988_v2, %v9807_v22  ;;  %v3184_v22 = vadd.f32 %v3160_v62, %v8190_v40  ;;  %v10219_v41 = vmul.f32 %v9988_v2, %v3299_v54  ;;  %v10226_v44 = vmul.f32 %v10022_v61, %v3299_v54 }
 0x2df   : > { %11719 = vst [vmem:[#allocation203_spill] sm:$0xff] %v10172_v57  ;;  %v3695_v57 = vpop.f32.mrf.mxu2 }
 0x2e0   : > { %11720 = vst [vmem:[#allocation204_spill] sm:$0xff] %v10176_v47  ;;  %v3267_v47 = vpop.permute.xlu1 %3266 }
 0x2e1   : > { %11721 = vst [vmem:[#allocation205_spill] sm:$0xff] %v10182_v38  ;;  %v3183_v38 = vadd.f32 %v3159_v34, %v8192_v50  ;;  %v3300_v58 = vmul.f32 %v3267_v47, %v3204_v14  ;;  %v3734_v34 = vpop.f32.mrf.mxu3  ;;  %v3301_v14 = vmul.f32 %v3267_v47, %v3205_v19  ;;  %v10244_v19 = vperm.slane %v6746_v39, 1 }
 0x2e2   : > { %11722 = vst [vmem:[#allocation206_spill] sm:$0xff] %v10186_v1  ;;  %v3788_v1 = vadd.f32 %v3764_v10, %v8190_v40  ;;  %v10216_v10 = vmul.f32 %v10034_v35, %v3298_v60 }
 0x2e3   : > { %11723 = vst [vmem:[#allocation207_spill] sm:$0xff] %v10190_v37  ;;  %v10207_v37 = vmul.f32 %v10000_v33, %v3298_v60  ;;  %v10229_v60 = vmul.f32 %v10036_v11, %v3299_v54  ;;  %v10232_v2 = vmul.f32 %v10000_v33, %v3300_v58  ;;  %v10247_v33 = vmul.f32 %v10012_v43, %v3301_v14 }
 0x2e4   : > { %11724 = vst [vmem:[#allocation208_spill] sm:$0xff] %v10194_v25  ;;  %v3206_v25 = vmax.f32 %v3182_v28, 0.0  ;;  %v3207_v28 = vmax.f32 %v3183_v38, 0.0 }
 0x2e5   : > { %11725 = vst [vmem:[#allocation209_spill] sm:$0xff] %v10199_v42  ;;  %v3812_v42 = vmax.f32 %v3788_v1, 0.0 }
 0x2e6   : > { %11726 = vst [vmem:[#allocation210_spill] sm:$0xff] %v10204_v27  ;;  %v3735_v27 = vadd.f32 %v3734_v34, %v3695_v57  ;;  %v3302_v57 = vmul.f32 %v3272_v31, %v3206_v25  ;;  %v3208_v34 = vmax.f32 %v3184_v22, 0.0  ;;  %v6751_v22 = vld [vmem:[%s8338_s26 + $0x11] ss:$8 sm:$0x3] }
 0x2e7   : > { %11727 = vst [vmem:[#allocation211_spill] sm:$0xff] %v10207_v37  ;;  %v10222_v37 = vmul.f32 %v10012_v43, %v3299_v54  ;;  %v3908_v62 = vmul.f32 %v9481_v52, %v3812_v42  ;;  %v10241_v42 = vmul.f32 %v10034_v35, %v3300_v58 }
 0x2e8   : > { %11728 = vst [vmem:[#allocation212_spill] sm:$0xff] %v10210_v3  ;;  %v3658_v3 = vpop.f32.mrf.mxu1 }
 0x2e9   : > { %11729 = vst [vmem:[#allocation213_spill] sm:$0xff] %v10222_v37  ;;  %v3659_v1 = vadd.f32 %v3658_v3, %v3619_v21  ;;  %v3765_v37 = vmul.f32 %v3735_v27, %v8142_v29  ;;  %v4172_v47 = vmul.f32 %v10213_v6, %v3908_v62  ;;  %v10238_v21 = vmul.f32 %v10020_v24, %v3300_v58  ;;  %v3697_v62 = vpop.f32.mrf.mxu2 }
 0x2ea   : > { %11731 = vst [vmem:[#allocation215_spill] sm:$0xff] %v10247_v33  ;;  %v3303_v27 = vmul.f32 %v3272_v31, %v3207_v28  ;;  %v10258_v58 = vmul.f32 %v10036_v11, %v3301_v14  ;;  %v10263_v31 = vmul.f32 %v10020_v24, %v3302_v57 }
 0x2eb   : > { %v3766_v38 = vmul.f32 %v3659_v1, %v8156_v45  ;;  %11730 = vst [vmem:[#allocation214_spill] sm:$0xff] %v10238_v21  ;;  %v3789_v54 = vadd.f32 %v3765_v37, %v8192_v50  ;;  %v4186_v25 = vadd.f32 %v4172_v47, %v9307_v0  ;;  %v10252_v1 = vpop.permute.xlu2 %3276  ;;  %v10255_v21 = vmul.f32 %v10022_v61, %v3301_v14  ;;  %v3736_v47 = vpop.f32.mrf.mxu3 }
 0x2ec   : > { %11732 = vst [vmem:[#allocation216_spill] sm:$0xff] %v10252_v1  ;;  %v3161_v37 = vmul.f32 %v10048_v13, %v8142_v29  ;;  %v3304_v0 = vmul.f32 %v10252_v1, %v3208_v34  ;;  %v3737_v13 = vadd.f32 %v3736_v47, %v3697_v62  ;;  %v10274_v33 = vmul.f32 %v10022_v61, %v3303_v27 }
 0x2ed   : > { %v3790_v3 = vadd.f32 %v3766_v38, %v8190_v40  ;;  %11733 = vst [vmem:[#allocation217_spill] sm:$0xff] %v10255_v21  ;;  %v3813_v43 = vmax.f32 %v3789_v54, 0.0  ;;  %v4223_v39 = vadd.f32 %v9354_v23, %v4186_v25  ;;  %v3622_v38 = vpop.f32.mrf.mxu0  ;;  %v10268_v21 = vmul.f32 %v10034_v35, %v3302_v57  ;;  %v6756_v25 = vld [vmem:[%s8338_s26 + $0x16] ss:$8 sm:$0x3] }
 0x2ee   : > { %11734 = vst [vmem:[#allocation218_spill] sm:$0xff] %v10258_v58  ;;  %v10271_v58 = vperm.slane %v6751_v22, 0  ;;  %v10283_v57 = vadd.f32 %v3161_v37, %v8192_v50  ;;  %v3767_v62 = vmul.f32 %v3737_v13, %v8142_v29  ;;  %v10288_v61 = vmul.f32 %v10034_v35, %v3304_v0 }
 0x2ef   : > { %v3814_v28 = vmax.f32 %v3790_v3, 0.0  ;;  %v3909_v14 = vmul.f32 %v9481_v52, %v3813_v43  ;;  %11735 = vst [vmem:[#allocation219_spill] sm:$0xff] %v10274_v33  ;;  %v4260_v24 = vadd.f32 %v9739_v32, %v4223_v39  ;;  %v10280_v3 = vmul.f32 %v10036_v11, %v3303_v27  ;;  %v11739_v43 = vld [vmem:[#allocation38_spill] sm:$0xff] }
 0x2f0   : > { %v3661_v54 = vpop.f32.mrf.mxu1  ;;  %11737 = vst [vmem:[#allocation221_spill] sm:$0xff] %v10283_v57  ;;  %v3791_v27 = vadd.f32 %v3767_v62, %v8192_v50  ;;  %v10297_v37 = vperm.slane %v6756_v25, 0 }
 0x2f1   : > { %v3910_v23 = vmul.f32 %v9537_v59, %v3814_v28  ;;  %v3662_v34 = vadd.f32 %v3661_v54, %v3622_v38  ;;  %11736 = vst [vmem:[#allocation220_spill] sm:$0xff] %v10280_v3  ;;  %v4173_v52 = vmul.f32 %v10244_v19, %v3909_v14  ;;  %v4297_v39 = vadd.f32 %v11739_v43, %v4260_v24  ;;  %v6761_v14 = vld [vmem:[%s8338_s26 + $0x23] ss:$8 sm:$0x3]  ;;  %v3700_v24 = vpop.f32.mrf.mxu2 }
 0x2f2   : > { %11738 = vst [vmem:[#allocation222_spill] sm:$0xff] %v10288_v61  ;;  %v10295_v38 = vperm.slane %v6751_v22, 1  ;;  %v10306_v22 = vperm.slane %v6756_v25, 1 }
 0x2f3   : > { %v4174_v32 = vmul.f32 %v10213_v6, %v3910_v23  ;;  %v3768_v28 = vmul.f32 %v3662_v34, %v8156_v45  ;;  %v4187_v47 = vadd.f32 %v4173_v52, %v9357_v36  ;;  %v4334_v35 = vadd.f32 %v10028_v9, %v4297_v39  ;;  %v3739_v1 = vpop.f32.mrf.mxu3  ;;  %v10312_v9 = vld [vmem:[%s8338_s26 + $0x30] ss:$8 sm:$0x3] }
 0x2f4   : > { %v4357_v0 = vmul.f32 %v10271_v58, %v3910_v23  ;;  %v3815_v52 = vmax.f32 %v3791_v27, 0.0  ;;  %v11741_v27 = vld [vmem:[#allocation28_spill] sm:$0xff] }
 0x2f5   : > { %v4188_v13 = vadd.f32 %v4174_v32, %v9366_v49  ;;  %v3792_v54 = vadd.f32 %v3768_v28, %v8190_v40  ;;  %v4224_v36 = vadd.f32 %v9374_v30, %v4187_v47  ;;  %v3624_v49 = vpop.f32.mrf.mxu0  ;;  %v10309_v32 = vperm.slane %v6761_v14, 0  ;;  %v11740_v47 = vld [vmem:[#allocation111_spill] sm:$0xff] }
 0x2f6   : > { %v4371_v43 = vadd.f32 %v4357_v0, %v4334_v35  ;;  %v3911_v39 = vmul.f32 %v9537_v59, %v3815_v52  ;;  %v3740_v28 = vadd.f32 %v3739_v1, %v3700_v24  ;;  %v10316_v30 = vperm.slane %v6761_v14, 1  ;;  %v11743_v59 = vld [vmem:[#allocation36_spill] sm:$0xff] }
 0x2f7   : > { %v4225_v62 = vadd.f32 %v9419_v12, %v4188_v13  ;;  %v3816_v11 = vmax.f32 %v3792_v54, 0.0  ;;  %v4261_v23 = vadd.f32 %v9743_v16, %v4224_v36  ;;  %v11742_v54 = vld [vmem:[#allocation39_spill] sm:$0xff]  ;;  %v10325_v16 = vperm.slane %v10312_v9, 0  ;;  %v11744_v36 = vld [vmem:[#allocation112_spill] sm:$0xff] }
 0x2f8   : > { %v3663_v34 = vpop.f32.mrf.mxu1  ;;  %v4408_v12 = vadd.f32 %v11740_v47, %v4371_v43  ;;  %v4175_v0 = vmul.f32 %v10244_v19, %v3911_v39  ;;  %v3769_v61 = vmul.f32 %v3740_v28, %v8142_v29  ;;  %v11745_v43 = vld [vmem:[#allocation66_spill] sm:$0xff]  ;;  %v11747_v47 = vld [vmem:[#allocation20_spill] sm:$0xff] }
 0x2f9   : > { %v4262_v25 = vadd.f32 %v9747_v55, %v4225_v62  ;;  %v3912_v13 = vmul.f32 %v11741_v27, %v3816_v11  ;;  %v3664_v35 = vadd.f32 %v3663_v34, %v3624_v49  ;;  %v4298_v57 = vadd.f32 %v11742_v54, %v4261_v23  ;;  %v11746_v23 = vld [vmem:[#allocation22_spill] sm:$0xff] }
 0x2fa   : > { %v4445_v14 = vadd.f32 %v9754_v26, %v4408_v12  ;;  %v4358_v55 = vmul.f32 %v10295_v38, %v3911_v39  ;;  %v4189_v11 = vadd.f32 %v4175_v0, %v11744_v36  ;;  %v3793_v62 = vadd.f32 %v3769_v61, %v8192_v50 }
 0x2fb   : > { %v4299_v1 = vadd.f32 %v11743_v59, %v4262_v25  ;;  %v4176_v24 = vmul.f32 %v10213_v6, %v3912_v13  ;;  %v4335_v34 = vadd.f32 %v10032_v4, %v4298_v57  ;;  %v4359_v52 = vmul.f32 %v10271_v58, %v3912_v13  ;;  %v11748_v59 = vld [vmem:[#allocation106_spill] sm:$0xff] }
 0x2fc   : > { %v4482_v49 = vadd.f32 %v11745_v43, %v4445_v14  ;;  %v3770_v26 = vmul.f32 %v3664_v35, %v8156_v45  ;;  %v4226_v39 = vadd.f32 %v11747_v47, %v4189_v11  ;;  %v4542_v54 = vmul.f32 %v10297_v37, %v3912_v13  ;;  %v3702_v14 = vpop.f32.mrf.mxu2  ;;  %v3741_v43 = vpop.f32.mrf.mxu3  ;;  %v11750_v13 = vld [vmem:[#allocation108_spill] sm:$0xff] }
 0x2fd   : > { %v4190_v28 = vadd.f32 %v4176_v24, %v11746_v23  ;;  %v4336_v25 = vadd.f32 %v10040_v17, %v4299_v1  ;;  %v4372_v12 = vadd.f32 %v4358_v55, %v4335_v34  ;;  %v3817_v0 = vmax.f32 %v3793_v62, 0.0  ;;  %v11749_v17 = vld [vmem:[#allocation113_spill] sm:$0xff] }
 0x2fe   : > { %v4519_v36 = vadd.f32 %v10044_v15, %v4482_v49  ;;  %v3794_v61 = vadd.f32 %v3770_v26, %v8190_v40  ;;  %v4263_v24 = vadd.f32 %v9764_v63, %v4226_v39  ;;  %v3742_v11 = vadd.f32 %v3741_v43, %v3702_v14  ;;  %v11752_v63 = vld [vmem:[#allocation77_spill] sm:$0xff]  ;;  %v11758_v14 = vld [vmem:[#allocation32_spill] sm:$0xff] }
 0x2ff   : > { %v4227_v4 = vadd.f32 %v11748_v59, %v4190_v28  ;;  %v4373_v57 = vadd.f32 %v4359_v52, %v4336_v25  ;;  %v4409_v1 = vadd.f32 %v11749_v17, %v4372_v12  ;;  %v3913_v35 = vmul.f32 %v11741_v27, %v3817_v0  ;;  %v11751_v52 = vld [vmem:[#allocation37_spill] sm:$0xff]  ;;  %v11753_v27 = vld [vmem:[#allocation110_spill] sm:$0xff]  ;;  %v11754_v12 = vld [vmem:[#allocation67_spill] sm:$0xff] }
 0x300   : > { %v4556_v62 = vadd.f32 %v4542_v54, %v4519_v36  ;;  %v3818_v23 = vmax.f32 %v3794_v61, 0.0  ;;  %v4300_v28 = vadd.f32 %v11751_v52, %v4263_v24  ;;  %v11755_v54 = vld [vmem:[#allocation26_spill] sm:$0xff]  ;;  %v11757_v36 = vld [vmem:[#allocation79_spill] sm:$0xff] }
 0x301   : > { %v4264_v55 = vadd.f32 %v9790_v18, %v4227_v4  ;;  %v4410_v34 = vadd.f32 %v11750_v13, %v4373_v57  ;;  %v4446_v15 = vadd.f32 %v9768_v8, %v4409_v1  ;;  %v4177_v49 = vmul.f32 %v10244_v19, %v3913_v35  ;;  %v11756_v57 = vld [vmem:[#allocation136_spill] sm:$0xff]  ;;  %v11759_v17 = vld [vmem:[#allocation107_spill] sm:$0xff] }
 0x302   : > { %v4360_v25 = vmul.f32 %v10295_v38, %v3913_v35  ;;  %v4593_v39 = vadd.f32 %v11753_v27, %v4556_v62  ;;  %v4543_v18 = vmul.f32 %v10306_v22, %v3913_v35  ;;  %v4337_v4 = vadd.f32 %v10052_v5, %v4300_v28  ;;  %v11761_v28 = vld [vmem:[#allocation50_spill] sm:$0xff] }
 0x303   : > { %v4301_v26 = vadd.f32 %v11752_v63, %v4264_v55  ;;  %v4447_v47 = vadd.f32 %v9803_v7, %v4410_v34  ;;  %v4483_v0 = vadd.f32 %v11754_v12, %v4446_v15  ;;  %v4191_v59 = vadd.f32 %v4177_v49, %v11755_v54  ;;  %v11760_v34 = vld [vmem:[#allocation81_spill] sm:$0xff]  ;;  %v11763_v63 = vld [vmem:[#allocation123_spill] sm:$0xff]  ;;  %v11764_v54 = vld [vmem:[#allocation78_spill] sm:$0xff] }
 0x304   : > { %v3914_v8 = vmul.f32 %v11756_v57, %v3818_v23  ;;  %v4630_v43 = vadd.f32 %v11758_v14, %v4593_v39  ;;  %v3771_v7 = vmul.f32 %v3742_v11, %v8142_v29  ;;  %v4374_v55 = vadd.f32 %v4360_v25, %v4337_v4  ;;  %v3627_v25 = vpop.f32.mrf.mxu0  ;;  %v11767_v14 = vld [vmem:[#allocation24_spill] sm:$0xff] }
 0x305   : > { %v4484_v61 = vadd.f32 %v11757_v36, %v4447_v47  ;;  %v4338_v24 = vadd.f32 %v10060_v53, %v4301_v26  ;;  %v4228_v1 = vadd.f32 %v11759_v17, %v4191_v59  ;;  %v4520_v35 = vadd.f32 %v10056_v20, %v4483_v0  ;;  %v11762_v53 = vld [vmem:[#allocation109_spill] sm:$0xff]  ;;  %v3666_v47 = vpop.f32.mrf.mxu1  ;;  %v3744_v0 = vpop.f32.mrf.mxu3  ;;  %v11766_v36 = vld [vmem:[#allocation19_spill] sm:$0xff] }
 0x306   : > { %v4178_v13 = vmul.f32 %v10213_v6, %v3914_v8  ;;  %v4667_v62 = vadd.f32 %v11760_v34, %v4630_v43  ;;  %v4361_v5 = vmul.f32 %v10271_v58, %v3914_v8  ;;  %v4544_v52 = vmul.f32 %v10297_v37, %v3914_v8  ;;  %v11765_v59 = vld [vmem:[#allocation17_spill] sm:$0xff] }
 0x307   : > { %v4521_v23 = vadd.f32 %v10064_v46, %v4484_v61  ;;  %v4265_v15 = vadd.f32 %v11761_v28, %v4228_v1  ;;  %v4411_v49 = vadd.f32 %v11762_v53, %v4374_v55  ;;  %v4557_v11 = vadd.f32 %v4543_v18, %v4520_v35  ;;  %v11768_v18 = vld [vmem:[#allocation115_spill] sm:$0xff]  ;;  %v11769_v1 = vld [vmem:[#allocation117_spill] sm:$0xff]  ;;  %v11774_v53 = vld [vmem:[#allocation60_spill] sm:$0xff] }
 0x308   : > { %v4192_v26 = vadd.f32 %v4178_v13, %v11763_v63  ;;  %v4375_v20 = vadd.f32 %v4361_v5, %v4338_v24  ;;  %v4704_v39 = vadd.f32 %v10068_v56, %v4667_v62  ;;  %v4727_v12 = vmul.f32 %v10309_v32, %v3914_v8  ;;  %v3705_v13 = vpop.f32.mrf.mxu2  ;;  %v11770_v56 = vld [vmem:[#allocation80_spill] sm:$0xff]  ;;  %v11771_v8 = vld [vmem:[#allocation58_spill] sm:$0xff]  ;;  %v11772_v5 = vld [vmem:[#allocation59_spill] sm:$0xff] }
 0x309   : > { %v4558_v27 = vadd.f32 %v4544_v52, %v4521_v23  ;;  %v4302_v46 = vadd.f32 %v11764_v54, %v4265_v15  ;;  %v4448_v4 = vadd.f32 %v11765_v59, %v4411_v49  ;;  %v4594_v61 = vadd.f32 %v11766_v36, %v4557_v11  ;;  %v11773_v28 = vld [vmem:[#allocation51_spill] sm:$0xff] }
 0x30a   : > { %v4229_v43 = vadd.f32 %v11767_v14, %v4192_v26  ;;  %v4412_v17 = vadd.f32 %v11768_v18, %v4375_v20  ;;  %v4741_v35 = vadd.f32 %v4727_v12, %v4704_v39  ;;  %v3795_v24 = vadd.f32 %v3771_v7, %v8192_v50  ;;  %v11775_v11 = vld [vmem:[#allocation119_spill] sm:$0xff]  ;;  %v11776_v20 = vld [vmem:[#allocation82_spill] sm:$0xff]  ;;  %v11777_v39 = vld [vmem:[#allocation9_spill] sm:$0xff] }
 0x30b   : > { %v4595_v55 = vadd.f32 %v11769_v1, %v4558_v27  ;;  %v4485_v34 = vadd.f32 %v11770_v56, %v4448_v4  ;;  %v4631_v62 = vadd.f32 %v11771_v8, %v4594_v61  ;;  %v4339_v52 = vadd.f32 %v10072_v48, %v4302_v46  ;;  %v11778_v59 = vld [vmem:[#allocation7_spill] sm:$0xff]  ;;  %v11780_v14 = vld [vmem:[#allocation52_spill] sm:$0xff] }
 0x30c   : > { %v4266_v23 = vadd.f32 %v11772_v5, %v4229_v43  ;;  %v4449_v15 = vadd.f32 %v11773_v28, %v4412_v17  ;;  %v4778_v63 = vadd.f32 %v11775_v11, %v4741_v35  ;;  %v3819_v26 = vmax.f32 %v3795_v24, 0.0  ;;  %v11779_v36 = vld [vmem:[#allocation35_spill] sm:$0xff]  ;;  %v11782_v1 = vld [vmem:[#allocation184_spill] sm:$0xff]  ;;  %v11785_v5 = vld [vmem:[#allocation186_spill] sm:$0xff]  ;;  %v3629_v28 = vpop.f32.mrf.mxu0 }
 0x30d   : > { %v4632_v49 = vadd.f32 %v11774_v53, %v4595_v55  ;;  %v4668_v27 = vadd.f32 %v11776_v20, %v4631_v62  ;;  %v4522_v12 = vadd.f32 %v10081_v51, %v4485_v34  ;;  %v3667_v54 = vadd.f32 %v3666_v47, %v3627_v25  ;;  %v11781_v43 = vld [vmem:[#allocation183_spill] sm:$0xff]  ;;  %v11783_v24 = vld [vmem:[#allocation64_spill] sm:$0xff]  ;;  %v11786_v53 = vld [vmem:[#allocation53_spill] sm:$0xff] }
 0x30e   : > { %v4303_v7 = vadd.f32 %v11777_v39, %v4266_v23  ;;  %v4486_v4 = vadd.f32 %v11778_v59, %v4449_v15  ;;  %v4815_v48 = vadd.f32 %v11780_v14, %v4778_v63  ;;  %v3915_v46 = vmul.f32 %v11756_v57, %v3819_v26  ;;  %v11784_v57 = vld [vmem:[#allocation185_spill] sm:$0xff]  ;;  %v3668_v15 = vpop.f32.mrf.mxu1  ;;  %v11787_v11 = vld [vmem:[#allocation187_spill] sm:$0xff]  ;;  %v3746_v26 = vpop.f32.mrf.mxu3 }
 0x30f   : > { %v4669_v61 = vadd.f32 %v11779_v36, %v4632_v49  ;;  %v4705_v18 = vadd.f32 %v11781_v43, %v4668_v27  ;;  %v3772_v17 = vmul.f32 %v3667_v54, %v8156_v45  ;;  %v3745_v35 = vadd.f32 %v3744_v0, %v3705_v13  ;;  %v11788_v54 = vld [vmem:[#allocation114_spill] sm:$0xff]  ;;  %v11792_v43 = vld [vmem:[#allocation167_spill] sm:$0xff] }
 0x310   : > { %v4340_v55 = vadd.f32 %v11782_v1, %v4303_v7  ;;  %v4852_v56 = vadd.f32 %v11783_v24, %v4815_v48  ;;  %v4179_v51 = vmul.f32 %v10244_v19, %v3915_v46  ;;  %v4362_v25 = vmul.f32 %v10295_v38, %v3915_v46 }
 0x311   : > { %v4545_v47 = vmul.f32 %v10306_v22, %v3915_v46  ;;  %v4728_v34 = vmul.f32 %v10316_v30, %v3915_v46  ;;  %v3796_v8 = vadd.f32 %v3772_v17, %v8190_v40  ;;  %v4523_v62 = vadd.f32 %v11784_v57, %v4486_v4  ;;  %v11789_v4 = vld [vmem:[#allocation116_spill] sm:$0xff]  ;;  %v3707_v46 = vpop.f32.mrf.mxu2 }
 0x312   : > { %v4706_v23 = vadd.f32 %v11785_v5, %v4669_v61  ;;  %v4193_v0 = vadd.f32 %v4179_v51, %v11786_v53  ;;  %v4376_v13 = vadd.f32 %v4362_v25, %v4339_v52  ;;  %v4889_v63 = vadd.f32 %v11787_v11, %v4852_v56  ;;  %v11790_v61 = vld [vmem:[#allocation118_spill] sm:$0xff]  ;;  %v11791_v52 = vld [vmem:[#allocation120_spill] sm:$0xff] }
 0x313   : > { %v4559_v49 = vadd.f32 %v4545_v47, %v4522_v12  ;;  %v4742_v20 = vadd.f32 %v4728_v34, %v4705_v18  ;;  %v3820_v27 = vmax.f32 %v3796_v8, 0.0  ;;  %v3773_v39 = vmul.f32 %v3745_v35, %v8142_v29  ;;  %v11793_v35 = vld [vmem:[#allocation61_spill] sm:$0xff]  ;;  %v11795_v51 = vld [vmem:[#allocation54_spill] sm:$0xff]  ;;  %v11796_v34 = vld [vmem:[#allocation55_spill] sm:$0xff] }
 0x314   : > { %v10413_v7 = vperm.slane %v10312_v9, 1  ;;  %v4230_v59 = vadd.f32 %v11788_v54, %v4193_v0  ;;  %v4413_v36 = vadd.f32 %v11789_v4, %v4376_v13  ;;  %v3669_v48 = vadd.f32 %v3668_v15, %v3629_v28  ;;  %v11794_v9 = vld [vmem:[#allocation56_spill] sm:$0xff]  ;;  %v11797_v15 = vld [vmem:[#allocation10_spill] sm:$0xff] }
 0x315   : > { %v4596_v14 = vadd.f32 %v11790_v61, %v4559_v49  ;;  %v4779_v12 = vadd.f32 %v11791_v52, %v4742_v20  ;;  %v3916_v17 = vmul.f32 %v11792_v43, %v3820_v27  ;;  %v3797_v18 = vadd.f32 %v3773_v39, %v8192_v50  ;;  %v11798_v0 = vld [vmem:[#allocation8_spill] sm:$0xff]  ;;  %v11799_v49 = vld [vmem:[#allocation63_spill] sm:$0xff]  ;;  %v11800_v20 = vld [vmem:[#allocation65_spill] sm:$0xff] }
 0x316   : > { %v10421_v1 = vadd.f32 %v3746_v26, %v3707_v46  ;;  %v4267_v24 = vadd.f32 %v11793_v35, %v4230_v59  ;;  %v4450_v56 = vadd.f32 %v11794_v9, %v4413_v36  ;;  %v3774_v47 = vmul.f32 %v3669_v48, %v8156_v45  ;;  %v11801_v39 = vld [vmem:[#allocation34_spill] sm:$0xff]  ;;  %v11802_v48 = vld [vmem:[#allocation188_spill] sm:$0xff]  ;;  %v11804_v35 = vld [vmem:[#allocation129_spill] sm:$0xff] }
 0x317   : > { %v4633_v25 = vadd.f32 %v11795_v51, %v4596_v14  ;;  %v4816_v8 = vadd.f32 %v11796_v34, %v4779_v12  ;;  %v4180_v57 = vmul.f32 %v10213_v6, %v3916_v17  ;;  %v4363_v5 = vmul.f32 %v10271_v58, %v3916_v17  ;;  %v11803_v52 = vld [vmem:[#allocation128_spill] sm:$0xff]  ;;  %v11805_v9 = vld [vmem:[#allocation130_spill] sm:$0xff]  ;;  %v11806_v51 = vld [vmem:[#allocation189_spill] sm:$0xff] }
 0x318   : > { %v4546_v28 = vmul.f32 %v10297_v37, %v3916_v17  ;;  %v4304_v53 = vadd.f32 %v11797_v15, %v4267_v24  ;;  %v4487_v13 = vadd.f32 %v11798_v0, %v4450_v56  ;;  %v4729_v26 = vmul.f32 %v10309_v32, %v3916_v17  ;;  %v11807_v34 = vld [vmem:[#allocation131_spill] sm:$0xff] }
 0x319   : > { %v4670_v11 = vadd.f32 %v11799_v49, %v4633_v25  ;;  %v4853_v27 = vadd.f32 %v11800_v20, %v4816_v8  ;;  %v4194_v54 = vadd.f32 %v4180_v57, %v11801_v39  ;;  %v4377_v59 = vadd.f32 %v4363_v5, %v4340_v55  ;;  %v11810_v57 = vld [vmem:[#allocation30_spill] sm:$0xff]  ;;  %v11812_v0 = vld [vmem:[#allocation191_spill] sm:$0xff] }
 0x31a   : > { %v4560_v4 = vadd.f32 %v4546_v28, %v4523_v62  ;;  %v4743_v36 = vadd.f32 %v4729_v26, %v4706_v23  ;;  %v4912_v61 = vmul.f32 %v10325_v16, %v3916_v17  ;;  %v3821_v14 = vmax.f32 %v3797_v18, 0.0  ;;  %v11808_v62 = vld [vmem:[#allocation190_spill] sm:$0xff]  ;;  %v11809_v17 = vld [vmem:[#allocation57_spill] sm:$0xff] }
 0x31b   : > { %v4341_v46 = vadd.f32 %v11802_v48, %v4304_v53  ;;  %v4231_v12 = vadd.f32 %v11803_v52, %v4194_v54  ;;  %v4414_v24 = vadd.f32 %v11804_v35, %v4377_v59  ;;  %v4524_v25 = vadd.f32 %v11806_v51, %v4487_v13  ;;  %v11811_v28 = vld [vmem:[#allocation153_spill] sm:$0xff]  ;;  %v11813_v26 = vld [vmem:[#allocation154_spill] sm:$0xff] }
 0x31c   : > { %v4597_v56 = vadd.f32 %v11805_v9, %v4560_v4  ;;  %v4780_v8 = vadd.f32 %v11807_v34, %v4743_v36  ;;  %v10444_v15 = vadd.f32 %v4912_v61, %v4889_v63  ;;  %v3917_v55 = vmul.f32 %v11792_v43, %v3821_v14  ;;  %v11814_v4 = vld [vmem:[#allocation146_spill] sm:$0xff]  ;;  %v11815_v61 = vld [vmem:[#allocation68_spill] sm:$0xff] }
 0x31d   : > { %v4707_v23 = vadd.f32 %v11808_v62, %v4670_v11  ;;  %v4268_v18 = vadd.f32 %v11809_v17, %v4231_v12  ;;  %v4451_v5 = vadd.f32 %v11810_v57, %v4414_v24  ;;  %v4890_v49 = vadd.f32 %v11812_v0, %v4853_v27  ;;  %v11816_v48 = vld [vmem:[#allocation70_spill] sm:$0xff]  ;;  %v11819_v34 = vld [vmem:[#allocation132_spill] sm:$0xff]  ;;  %v11821_v17 = vld [vmem:[#allocation193_spill] sm:$0xff] }
 0x31e   : > { %v4634_v53 = vadd.f32 %v11811_v28, %v4597_v56  ;;  %v4817_v20 = vadd.f32 %v11813_v26, %v4780_v8  ;;  %v10455_v13 = vmul.f32 %v10444_v15, %v10444_v15  ;;  %v4181_v63 = vmul.f32 %v10244_v19, %v3917_v55  ;;  %v11818_v56 = vld [vmem:[#allocation40_spill] sm:$0xff]  ;;  %v11822_v57 = vld [vmem:[#allocation133_spill] sm:$0xff]  ;;  %v11827_v26 = vld [vmem:[#allocation155_spill] sm:$0xff] }
 0x31f   : > { %v4364_v43 = vmul.f32 %v10295_v38, %v3917_v55  ;;  %v4547_v11 = vmul.f32 %v10306_v22, %v3917_v55  ;;  %v4730_v39 = vmul.f32 %v10316_v30, %v3917_v55  ;;  %v4913_v54 = vmul.f32 %v10413_v7, %v3917_v55  ;;  %v11820_v62 = vld [vmem:[#allocation192_spill] sm:$0xff] }
 0x320   : > { %v3798_v59 = vadd.f32 %v3774_v47, %v8190_v40  ;;  %v4195_v27 = vadd.f32 %v4181_v63, %v11814_v4  ;;  %v4305_v14 = vadd.f32 %v11815_v61, %v4268_v18  ;;  %v4488_v52 = vadd.f32 %v11816_v48, %v4451_v5  ;;  %v11826_v5 = vld [vmem:[#allocation16_spill] sm:$0xff]  ;;  %v3671_v4 = vpop.f32.mrf.mxu1  ;;  %v11831_v61 = vld [vmem:[#allocation62_spill] sm:$0xff] }
 0x321   : > { %v4378_v36 = vadd.f32 %v4364_v43, %v4341_v46  ;;  %v4561_v12 = vadd.f32 %v4547_v11, %v4524_v25  ;;  %v4744_v35 = vadd.f32 %v4730_v39, %v4707_v23  ;;  %v10466_v24 = vadd.f32 %v4913_v54, %v4890_v49  ;;  %v11823_v46 = vld [vmem:[#allocation134_spill] sm:$0xff]  ;;  %v11825_v25 = vld [vmem:[#allocation180_spill] sm:$0xff] }
 0x322   : > { %v3822_v9 = vmax.f32 %v3798_v59, 0.0  ;;  %v4232_v51 = vadd.f32 %v11818_v56, %v4195_v27  ;;  %v4342_v55 = vadd.f32 %v11820_v62, %v4305_v14  ;;  %v4525_v47 = vadd.f32 %v11821_v17, %v4488_v52  ;;  %v11828_v43 = vld [vmem:[#allocation72_spill] sm:$0xff]  ;;  %v11829_v39 = vld [vmem:[#allocation74_spill] sm:$0xff]  ;;  %v3632_v59 = vpop.f32.mrf.mxu0 }
 0x323   : > { %11817 = vst [vmem:[#allocation38_spill] sm:$0xff] %v10466_v24  ;;  %v4415_v8 = vadd.f32 %v11819_v34, %v4378_v36  ;;  %v4598_v28 = vadd.f32 %v11822_v57, %v4561_v12  ;;  %v4781_v0 = vadd.f32 %v11823_v46, %v4744_v35  ;;  %v10476_v18 = vmul.f32 %v10466_v24, %v10466_v24  ;;  %v11830_v27 = vld [vmem:[#allocation156_spill] sm:$0xff]  ;;  %v11832_v35 = vld [vmem:[#allocation194_spill] sm:$0xff]  ;;  %v11834_v34 = vld [vmem:[#allocation149_spill] sm:$0xff] }
 0x324   : > { %v3918_v23 = vmul.f32 %v11825_v25, %v3822_v9  ;;  %v4269_v49 = vadd.f32 %v11826_v5, %v4232_v51  ;;  %v4671_v11 = vadd.f32 %v11828_v43, %v4634_v53  ;;  %v4854_v54 = vadd.f32 %v11829_v39, %v4817_v20  ;;  %v11833_v51 = vld [vmem:[#allocation195_spill] sm:$0xff]  ;;  %v11835_v46 = vld [vmem:[#allocation69_spill] sm:$0xff]  ;;  %v11882_v24 = vld [vmem:[#allocation138_spill] sm:$0xff] }
 0x325   : > { %11824 = vst [vmem:[#allocation111_spill] sm:$0xff] %v10476_v18  ;;  %v4452_v63 = vadd.f32 %v11827_v26, %v4415_v8  ;;  %v4635_v36 = vadd.f32 %v11830_v27, %v4598_v28  ;;  %v4818_v14 = vadd.f32 %v11831_v61, %v4781_v0  ;;  %v3775_v17 = vmul.f32 %v10421_v1, %v8142_v29  ;;  %v11836_v5 = vld [vmem:[#allocation71_spill] sm:$0xff]  ;;  %v11837_v43 = vld [vmem:[#allocation121_spill] sm:$0xff]  ;;  %v11841_v1 = vld [vmem:[#allocation196_spill] sm:$0xff] }
 0x326   : > { %v4182_v48 = vmul.f32 %v10213_v6, %v3918_v23  ;;  %v4365_v52 = vmul.f32 %v10271_v58, %v3918_v23  ;;  %v4548_v12 = vmul.f32 %v10297_v37, %v3918_v23  ;;  %v4708_v9 = vadd.f32 %v11832_v35, %v4671_v11  ;;  %v11838_v39 = vld [vmem:[#allocation27_spill] sm:$0xff] }
 0x327   : > { %v4731_v56 = vmul.f32 %v10309_v32, %v3918_v23  ;;  %v4891_v53 = vadd.f32 %v11833_v51, %v4854_v54  ;;  %v4914_v62 = vmul.f32 %v10325_v16, %v3918_v23  ;;  %v4306_v0 = vadd.f32 %v11835_v46, %v4269_v49  ;;  %v11843_v49 = vld [vmem:[#allocation33_spill] sm:$0xff] }
 0x328   : > { %v4196_v20 = vadd.f32 %v4182_v48, %v11834_v34  ;;  %v4379_v8 = vadd.f32 %v4365_v52, %v4342_v55  ;;  %v4562_v57 = vadd.f32 %v4548_v12, %v4525_v47  ;;  %v4489_v26 = vadd.f32 %v11836_v5, %v4452_v63  ;;  %v3749_v55 = vpop.f32.mrf.mxu3  ;;  %v11839_v48 = vld [vmem:[#allocation122_spill] sm:$0xff]  ;;  %v11844_v63 = vld [vmem:[#allocation157_spill] sm:$0xff]  ;;  %v11848_v5 = vld [vmem:[#allocation76_spill] sm:$0xff] }
 0x329   : > { %v4745_v28 = vadd.f32 %v4731_v56, %v4708_v9  ;;  %v10499_v61 = vadd.f32 %v4914_v62, %v4891_v53  ;;  %v3799_v54 = vadd.f32 %v3775_v17, %v8192_v50  ;;  %v11840_v52 = vld [vmem:[#allocation126_spill] sm:$0xff]  ;;  %v4343_v47 = vadd.f32 %v11841_v1, %v4306_v0  ;;  %v11846_v17 = vld [vmem:[#allocation159_spill] sm:$0xff]  ;;  %v11847_v46 = vld [vmem:[#allocation73_spill] sm:$0xff] }
 0x32a   : > { %v4233_v11 = vadd.f32 %v11837_v43, %v4196_v20  ;;  %v4416_v27 = vadd.f32 %v11838_v39, %v4379_v8  ;;  %v4599_v23 = vadd.f32 %v11839_v48, %v4562_v57  ;;  %v11842_v12 = vld [vmem:[#allocation198_spill] sm:$0xff]  ;;  %v3710_v20 = vpop.f32.mrf.mxu2  ;;  %v4855_v0 = vadd.f32 %v11848_v5, %v4818_v14 }
 0x32b   : > { %v4782_v35 = vadd.f32 %v11840_v52, %v4745_v28  ;;  %v4526_v9 = vadd.f32 %v11842_v12, %v4489_v26  ;;  %v10510_v34 = vmul.f32 %v10499_v61, %v10499_v61  ;;  %v3823_v53 = vmax.f32 %v3799_v54, 0.0  ;;  %v11845_v8 = vld [vmem:[#allocation158_spill] sm:$0xff]  ;;  %v11851_v52 = vld [vmem:[#allocation199_spill] sm:$0xff]  ;;  %v11852_v12 = vld [vmem:[#allocation200_spill] sm:$0xff] }
 0x32c   : > { %v4270_v56 = vadd.f32 %v11843_v49, %v4233_v11  ;;  %v4453_v51 = vadd.f32 %v11844_v63, %v4416_v27  ;;  %v4636_v62 = vadd.f32 %v11845_v8, %v4599_v23  ;;  %v4672_v28 = vadd.f32 %v11847_v46, %v4635_v36  ;;  %v11849_v11 = vld [vmem:[#allocation83_spill] sm:$0xff]  ;;  %v11850_v27 = vld [vmem:[#allocation18_spill] sm:$0xff]  ;;  %v11853_v49 = vld [vmem:[#allocation12_spill] sm:$0xff] }
 0x32d   : > { %v4819_v57 = vadd.f32 %v11846_v17, %v4782_v35  ;;  %v3919_v26 = vmul.f32 %v11825_v25, %v3823_v53  ;;  %v3672_v43 = vadd.f32 %v3671_v4, %v3632_v59  ;;  %v4892_v54 = vadd.f32 %v11852_v12, %v4855_v0  ;;  %v11854_v23 = vld [vmem:[#allocation86_spill] sm:$0xff]  ;;  %v3634_v35 = vpop.f32.mrf.mxu0  ;;  %v3673_v17 = vpop.f32.mrf.mxu1  ;;  %v11859_v12 = vld [vmem:[#allocation203_spill] sm:$0xff] }
 0x32e   : > { %v4307_v39 = vadd.f32 %v11849_v11, %v4270_v56  ;;  %v4490_v48 = vadd.f32 %v11850_v27, %v4453_v51  ;;  %v4709_v1 = vadd.f32 %v11851_v52, %v4672_v28  ;;  %v4673_v63 = vadd.f32 %v11853_v49, %v4636_v62  ;;  %v11855_v51 = vld [vmem:[#allocation201_spill] sm:$0xff]  ;;  %v11856_v46 = vld [vmem:[#allocation202_spill] sm:$0xff]  ;;  %v11857_v28 = vld [vmem:[#allocation47_spill] sm:$0xff] }
 0x32f   : > { %v4856_v8 = vadd.f32 %v11854_v23, %v4819_v57  ;;  %v4183_v36 = vmul.f32 %v10244_v19, %v3919_v26  ;;  %v4366_v14 = vmul.f32 %v10295_v38, %v3919_v26  ;;  %v4549_v25 = vmul.f32 %v10306_v22, %v3919_v26  ;;  %v11860_v23 = vld [vmem:[#allocation204_spill] sm:$0xff] }
 0x330   : > { %v4732_v59 = vmul.f32 %v10316_v30, %v3919_v26  ;;  %v4915_v4 = vmul.f32 %v10413_v7, %v3919_v26  ;;  %v3776_v56 = vmul.f32 %v3672_v43, %v8156_v45  ;;  %v4344_v53 = vadd.f32 %v11855_v51, %v4307_v39  ;;  %v11861_v26 = vld [vmem:[#allocation29_spill] sm:$0xff]  ;;  %v11862_v43 = vld [vmem:[#allocation124_spill] sm:$0xff] }
 0x331   : > { %v4527_v62 = vadd.f32 %v11856_v46, %v4490_v48  ;;  %v4197_v57 = vadd.f32 %v4183_v36, %v11857_v28  ;;  %v4380_v5 = vadd.f32 %v4366_v14, %v4343_v47  ;;  %v4563_v0 = vadd.f32 %v4549_v25, %v4526_v9  ;;  %v11863_v39 = vld [vmem:[#allocation125_spill] sm:$0xff]  ;;  %v11864_v48 = vld [vmem:[#allocation127_spill] sm:$0xff]  ;;  %v3751_v36 = vpop.f32.mrf.mxu3  ;;  %v11866_v14 = vld [vmem:[#allocation42_spill] sm:$0xff] }
 0x332   : > { %v4746_v11 = vadd.f32 %v4732_v59, %v4709_v1  ;;  %v10532_v27 = vadd.f32 %v4915_v4, %v4892_v54  ;;  %v3800_v52 = vadd.f32 %v3776_v56, %v8190_v40  ;;  %v4710_v49 = vadd.f32 %v11859_v12, %v4673_v63  ;;  %v11867_v25 = vld [vmem:[#allocation160_spill] sm:$0xff]  ;;  %v11868_v59 = vld [vmem:[#allocation161_spill] sm:$0xff]  ;;  %v11869_v56 = vld [vmem:[#allocation75_spill] sm:$0xff] }
 0x333   : > { %v4893_v3 = vadd.f32 %v11860_v23, %v4856_v8  ;;  %v4234_v33 = vadd.f32 %v11861_v26, %v4197_v57  ;;  %v4417_v18 = vadd.f32 %v11862_v43, %v4380_v5  ;;  %v4600_v51 = vadd.f32 %v11863_v39, %v4563_v0  ;;  %v3712_v57 = vpop.f32.mrf.mxu2  ;;  %v11870_v5 = vld [vmem:[#allocation182_spill] sm:$0xff]  ;;  %v11871_v26 = vld [vmem:[#allocation84_spill] sm:$0xff] }
 0x334   : > { %11858 = vst [vmem:[#allocation28_spill] sm:$0xff] %v10532_v27  ;;  %v4783_v46 = vadd.f32 %v11864_v48, %v4746_v11  ;;  %v10543_v47 = vmul.f32 %v10532_v27, %v10532_v27  ;;  %v3824_v9 = vmax.f32 %v3800_v52, 0.0  ;;  %v3750_v1 = vadd.f32 %v3749_v55, %v3710_v20  ;;  %v11872_v55 = vld [vmem:[#allocation11_spill] sm:$0xff]  ;;  %v11881_v27 = vld [vmem:[#allocation137_spill] sm:$0xff] }
 0x335   : > { %v3674_v54 = vadd.f32 %v3673_v17, %v3634_v35  ;;  %v4271_v63 = vadd.f32 %v11866_v14, %v4234_v33  ;;  %v4454_v8 = vadd.f32 %v11867_v25, %v4417_v18  ;;  %v4637_v4 = vadd.f32 %v11868_v59, %v4600_v51  ;;  %v11873_v35 = vld [vmem:[#allocation85_spill] sm:$0xff]  ;;  %v11874_v17 = vld [vmem:[#allocation87_spill] sm:$0xff] }
 0x336   : > { %11865 = vst [vmem:[#allocation39_spill] sm:$0xff] %v10543_v47  ;;  %v4820_v28 = vadd.f32 %v11869_v56, %v4783_v46  ;;  %v3920_v0 = vmul.f32 %v11870_v5, %v3824_v9  ;;  %v3777_v11 = vmul.f32 %v3750_v1, %v8142_v29  ;;  %v3752_v23 = vadd.f32 %v3751_v36, %v3712_v57  ;;  %v3637_v46 = vpop.f32.mrf.mxu0  ;;  %v3676_v9 = vpop.f32.mrf.mxu1  ;;  %v11880_v47 = vld [vmem:[#allocation135_spill] sm:$0xff] }
 0x337   : > { %v3778_v12 = vmul.f32 %v3674_v54, %v8156_v45  ;;  %v4308_v52 = vadd.f32 %v11871_v26, %v4271_v63  ;;  %v4491_v20 = vadd.f32 %v11872_v55, %v4454_v8  ;;  %v4674_v33 = vadd.f32 %v11873_v35, %v4637_v4  ;;  %v11875_v54 = vld [vmem:[#allocation206_spill] sm:$0xff]  ;;  %v11876_v63 = vld [vmem:[#allocation207_spill] sm:$0xff]  ;;  %v11877_v8 = vld [vmem:[#allocation48_spill] sm:$0xff] }
 0x338   : > { %v4857_v18 = vadd.f32 %v11874_v17, %v4820_v28  ;;  %v4184_v43 = vmul.f32 %v10213_v6, %v3920_v0  ;;  %v4367_v39 = vmul.f32 %v10271_v58, %v3920_v0  ;;  %v4550_v51 = vmul.f32 %v10297_v37, %v3920_v0  ;;  %v11878_v26 = vld [vmem:[#allocation208_spill] sm:$0xff]  ;;  %v11879_v35 = vld [vmem:[#allocation209_spill] sm:$0xff] }
 0x339   : > { %v4733_v48 = vmul.f32 %v10309_v32, %v3920_v0  ;;  %v4916_v36 = vmul.f32 %v10325_v16, %v3920_v0  ;;  %v3801_v1 = vadd.f32 %v3777_v11, %v8192_v50  ;;  %v4345_v14 = vadd.f32 %v11875_v54, %v4308_v52  ;;  %v11883_v54 = vld [vmem:[#allocation139_spill] sm:$0xff] }
 0x33a   : > { %v4528_v25 = vadd.f32 %v11876_v63, %v4491_v20  ;;  %v4198_v59 = vadd.f32 %v4184_v43, %v11877_v8  ;;  %v4381_v4 = vadd.f32 %v4367_v39, %v4344_v53  ;;  %v4564_v6 = vadd.f32 %v4550_v51, %v4527_v62  ;;  %v11889_v8 = vld [vmem:[#allocation95_spill] sm:$0xff] }
 0x33b   : > { %v4747_v56 = vadd.f32 %v4733_v48, %v4710_v49  ;;  %v10565_v28 = vadd.f32 %v4916_v36, %v4893_v3  ;;  %v3825_v57 = vmax.f32 %v3801_v1, 0.0  ;;  %v4711_v55 = vadd.f32 %v11878_v26, %v4674_v33  ;;  %v11884_v49 = vld [vmem:[#allocation162_spill] sm:$0xff]  ;;  %v11885_v33 = vld [vmem:[#allocation163_spill] sm:$0xff] }
 0x33c   : > { %v4894_v17 = vadd.f32 %v11879_v35, %v4857_v18  ;;  %v4235_v0 = vadd.f32 %v11880_v47, %v4198_v59  ;;  %v4418_v11 = vadd.f32 %v11881_v27, %v4381_v4  ;;  %v4601_v52 = vadd.f32 %v11882_v24, %v4564_v6  ;;  %v11886_v18 = vld [vmem:[#allocation164_spill] sm:$0xff]  ;;  %v11887_v47 = vld [vmem:[#allocation165_spill] sm:$0xff]  ;;  %v10580_v27 = vpop.f32.mrf.mxu3  ;;  %v10589_v4 = vpop.f32.mrf.mxu2  ;;  %v11890_v6 = vld [vmem:[#allocation31_spill] sm:$0xff] }
 0x33d   : > { %v4784_v20 = vadd.f32 %v11883_v54, %v4747_v56  ;;  %v3921_v43 = vmul.f32 %v11870_v5, %v3825_v57  ;;  %v3802_v53 = vadd.f32 %v3778_v12, %v8190_v40  ;;  %v3779_v3 = vmul.f32 %v3752_v23, %v8142_v29 }
 0x33e   : > { %v3677_v62 = vadd.f32 %v3676_v9, %v3637_v46  ;;  %v4272_v39 = vadd.f32 %v11884_v49, %v4235_v0  ;;  %v4455_v51 = vadd.f32 %v11885_v33, %v4418_v11  ;;  %v4638_v48 = vadd.f32 %v11886_v18, %v4601_v52  ;;  %v11888_v9 = vld [vmem:[#allocation93_spill] sm:$0xff]  ;;  %v11892_v52 = vld [vmem:[#allocation210_spill] sm:$0xff]  ;;  %v10599_v49 = vpop.f32.mrf.mxu1 }
 0x33f   : > { %v4821_v36 = vadd.f32 %v11887_v47, %v4784_v20  ;;  %v4185_v24 = vmul.f32 %v10244_v19, %v3921_v43  ;;  %v4368_v1 = vmul.f32 %v10295_v38, %v3921_v43  ;;  %v4551_v5 = vmul.f32 %v10306_v22, %v3921_v43  ;;  %v11891_v0 = vld [vmem:[#allocation197_spill] sm:$0xff]  ;;  %v11893_v20 = vld [vmem:[#allocation211_spill] sm:$0xff]  ;;  %v11896_v47 = vld [vmem:[#allocation44_spill] sm:$0xff] }
 0x340   : > { %v4734_v12 = vmul.f32 %v10316_v30, %v3921_v43  ;;  %v4917_v23 = vmul.f32 %v10413_v7, %v3921_v43  ;;  %v3826_v46 = vmax.f32 %v3802_v53, 0.0  ;;  %v4309_v63 = vadd.f32 %v11888_v9, %v4272_v39  ;;  %v10597_v53 = vpop.f32.mrf.mxu0  ;;  %v11894_v39 = vld [vmem:[#allocation140_spill] sm:$0xff] }
 0x341   : > { %v4492_v59 = vadd.f32 %v11889_v8, %v4455_v51  ;;  %v4199_v56 = vadd.f32 %v4185_v24, %v11890_v6  ;;  %v4382_v57 = vadd.f32 %v4368_v1, %v4345_v14  ;;  %v4565_v26 = vadd.f32 %v4551_v5, %v4528_v25  ;;  %v11895_v51 = vld [vmem:[#allocation141_spill] sm:$0xff]  ;;  %v11897_v25 = vld [vmem:[#allocation142_spill] sm:$0xff] }
 0x342   : > { %v4748_v19 = vadd.f32 %v4734_v12, %v4711_v55  ;;  %v10592_v35 = vadd.f32 %v4917_v23, %v4894_v17  ;;  %v3922_v11 = vmul.f32 %v11891_v0, %v3826_v46  ;;  %v4346_v54 = vadd.f32 %v11892_v52, %v4309_v63  ;;  %v11898_v1 = vld [vmem:[#allocation97_spill] sm:$0xff]  ;;  %v11899_v23 = vld [vmem:[#allocation23_spill] sm:$0xff] }
 0x343   : > { %v4529_v43 = vadd.f32 %v11893_v20, %v4492_v59  ;;  %v4236_v33 = vadd.f32 %v11894_v39, %v4199_v56  ;;  %v4419_v18 = vadd.f32 %v11895_v51, %v4382_v57  ;;  %v4602_v14 = vadd.f32 %v11896_v47, %v4565_v26  ;;  %v11900_v8 = vld [vmem:[#allocation21_spill] sm:$0xff]  ;;  %v11901_v57 = vld [vmem:[#allocation212_spill] sm:$0xff] }
 0x344   : > { %v4785_v55 = vadd.f32 %v11897_v25, %v4748_v19  ;;  %v4369_v17 = vmul.f32 %v10271_v58, %v3922_v11  ;;  %v4552_v24 = vmul.f32 %v10297_v37, %v3922_v11  ;;  %v4675_v5 = vadd.f32 %v11898_v1, %v4638_v48  ;;  %v11902_v19 = vld [vmem:[#allocation166_spill] sm:$0xff]  ;;  %v11904_v51 = vld [vmem:[#allocation168_spill] sm:$0xff] }
 0x345   : > { %v4735_v12 = vmul.f32 %v10309_v32, %v3922_v11  ;;  %v4858_v46 = vadd.f32 %v11899_v23, %v4821_v36  ;;  %v4918_v9 = vmul.f32 %v10325_v16, %v3922_v11  ;;  %v3803_v63 = vadd.f32 %v3779_v3, %v8192_v50  ;;  %v11903_v48 = vld [vmem:[#allocation94_spill] sm:$0xff]  ;;  %v11905_v36 = vld [vmem:[#allocation41_spill] sm:$0xff]  ;;  %v11906_v11 = vld [vmem:[#allocation143_spill] sm:$0xff] }
 0x346   : > { %v4273_v59 = vadd.f32 %v11900_v8, %v4236_v33  ;;  %v4383_v6 = vadd.f32 %v4369_v17, %v4346_v54  ;;  %v4566_v56 = vadd.f32 %v4552_v24, %v4529_v43  ;;  %v4712_v26 = vadd.f32 %v11901_v57, %v4675_v5  ;;  %v11907_v23 = vld [vmem:[#allocation96_spill] sm:$0xff]  ;;  %v10621_v54 = vpop.f32.mrf.mxu3  ;;  %v11908_v17 = vld [vmem:[#allocation98_spill] sm:$0xff]  ;;  %v11911_v8 = vld [vmem:[#allocation169_spill] sm:$0xff] }
 0x347   : > { %v4456_v58 = vadd.f32 %v11902_v19, %v4419_v18  ;;  %v4895_v52 = vadd.f32 %v10216_v10, %v4858_v46  ;;  %v3827_v20 = vmax.f32 %v3803_v63, 0.0  ;;  %v4639_v47 = vadd.f32 %v11904_v51, %v4602_v14  ;;  %v11909_v5 = vld [vmem:[#allocation144_spill] sm:$0xff]  ;;  %v11910_v14 = vld [vmem:[#allocation213_spill] sm:$0xff]  ;;  %v11914_v51 = vld [vmem:[#allocation171_spill] sm:$0xff] }
 0x348   : > { %v4310_v39 = vadd.f32 %v11903_v48, %v4273_v59  ;;  %v4420_v25 = vadd.f32 %v11905_v36, %v4383_v6  ;;  %v4603_v1 = vadd.f32 %v11906_v11, %v4566_v56  ;;  %v4749_v3 = vadd.f32 %v4735_v12, %v4712_v26  ;;  %v10632_v6 = vpop.f32.mrf.mxu2  ;;  %v11912_v26 = vld [vmem:[#allocation99_spill] sm:$0xff] }
 0x349   : > { %v4493_v33 = vadd.f32 %v11907_v23, %v4456_v58  ;;  %v10623_v43 = vadd.f32 %v4918_v9, %v4895_v52  ;;  %v3923_v18 = vmul.f32 %v11891_v0, %v3827_v20  ;;  %v4676_v24 = vadd.f32 %v11908_v17, %v4639_v47  ;;  %v10645_v58 = vpop.f32.mrf.mxu0  ;;  %v10647_v52 = vpop.f32.mrf.mxu1  ;;  %v11917_v17 = vld [vmem:[#allocation145_spill] sm:$0xff] }
 0x34a   : > { %v4347_v10 = vadd.f32 %v10219_v41, %v4310_v39  ;;  %v4786_v46 = vadd.f32 %v11909_v5, %v4749_v3  ;;  %v4822_v59 = vadd.f32 %v11911_v8, %v4785_v55  ;;  %v3780_v12 = vmul.f32 %v3677_v62, %v8156_v45  ;;  %v11913_v39 = vld [vmem:[#allocation170_spill] sm:$0xff]  ;;  %v11915_v3 = vld [vmem:[#allocation172_spill] sm:$0xff] }
 0x34b   : > { %v4530_v63 = vadd.f32 %v11910_v14, %v4493_v33  ;;  %v10636_v9 = vmul.f32 %v10623_v43, %v10623_v43  ;;  %v4370_v0 = vmul.f32 %v10295_v38, %v3923_v18  ;;  %v4553_v41 = vmul.f32 %v10306_v22, %v3923_v18  ;;  %v11916_v33 = vld [vmem:[#allocation43_spill] sm:$0xff]  ;;  %v11918_v5 = vld [vmem:[#allocation88_spill] sm:$0xff]  ;;  %v11919_v8 = vld [vmem:[#allocation90_spill] sm:$0xff] }
 0x34c   : > { %v4713_v56 = vadd.f32 %v10226_v44, %v4676_v24  ;;  %v4736_v57 = vmul.f32 %v10316_v30, %v3923_v18  ;;  %v4859_v19 = vadd.f32 %v11912_v26, %v4822_v59  ;;  %v4919_v55 = vmul.f32 %v10413_v7, %v3923_v18  ;;  %v11924_v26 = vld [vmem:[#allocation173_spill] sm:$0xff] }
 0x34d   : > { %v3804_v62 = vadd.f32 %v3780_v12, %v8190_v40  ;;  %v4384_v20 = vadd.f32 %v4370_v0, %v4347_v10  ;;  %v4567_v48 = vadd.f32 %v4553_v41, %v4530_v63  ;;  %v4457_v38 = vadd.f32 %v11913_v39, %v4420_v25  ;;  %v11920_v10 = vld [vmem:[#allocation147_spill] sm:$0xff]  ;;  %v11921_v25 = vld [vmem:[#allocation205_spill] sm:$0xff] }
 0x34e   : > { %v4640_v47 = vadd.f32 %v11914_v51, %v4603_v1  ;;  %v4750_v36 = vadd.f32 %v4736_v57, %v4713_v56  ;;  %v4896_v44 = vadd.f32 %v10229_v60, %v4859_v19  ;;  %v4823_v23 = vadd.f32 %v11915_v3, %v4786_v46  ;;  %v11922_v0 = vld [vmem:[#allocation13_spill] sm:$0xff]  ;;  %v11923_v56 = vld [vmem:[#allocation214_spill] sm:$0xff]  ;;  %v11927_v3 = vld [vmem:[#allocation175_spill] sm:$0xff] }
 0x34f   : > { %v3828_v11 = vmax.f32 %v3804_v62, 0.0  ;;  %v4421_v18 = vadd.f32 %v11916_v33, %v4384_v20  ;;  %v4604_v24 = vadd.f32 %v11917_v17, %v4567_v48  ;;  %v4494_v14 = vadd.f32 %v11918_v5, %v4457_v38  ;;  %v11928_v5 = vld [vmem:[#allocation215_spill] sm:$0xff] }
 0x350   : > { %v4677_v59 = vadd.f32 %v11919_v8, %v4640_v47  ;;  %v4787_v63 = vadd.f32 %v11920_v10, %v4750_v36  ;;  %v10658_v12 = vadd.f32 %v4919_v55, %v4896_v44  ;;  %v4860_v41 = vadd.f32 %v11922_v0, %v4823_v23  ;;  %v10674_v39 = vpop.f32.mrf.mxu2  ;;  %v11926_v47 = vld [vmem:[#allocation174_spill] sm:$0xff]  ;;  %v11929_v8 = vld [vmem:[#allocation91_spill] sm:$0xff]  ;;  %v11930_v10 = vld [vmem:[#allocation148_spill] sm:$0xff] }
 0x351   : > { %v3924_v1 = vmul.f32 %v11921_v25, %v3828_v11  ;;  %v4531_v60 = vadd.f32 %v10232_v2, %v4494_v14  ;;  %v3755_v57 = vadd.f32 %v10580_v27, %v10589_v4  ;;  %v4458_v19 = vadd.f32 %v11924_v26, %v4421_v18  ;;  %v10676_v2 = vpop.f32.mrf.mxu3  ;;  %v11925_v4 = vld [vmem:[#allocation89_spill] sm:$0xff]  ;;  %v3683_v33 = vpop.f32.mrf.mxu1  ;;  %v11934_v26 = vld [vmem:[#allocation218_spill] sm:$0xff] }
 0x352   : > { %v4714_v46 = vadd.f32 %v11923_v56, %v4677_v59  ;;  %v10669_v62 = vmul.f32 %v10658_v12, %v10658_v12  ;;  %v4897_v48 = vadd.f32 %v10241_v42, %v4860_v41  ;;  %v4641_v36 = vadd.f32 %v11926_v47, %v4604_v24  ;;  %v3644_v42 = vpop.f32.mrf.mxu0  ;;  %v11931_v24 = vld [vmem:[#allocation150_spill] sm:$0xff]  ;;  %v11932_v41 = vld [vmem:[#allocation92_spill] sm:$0xff]  ;;  %v11933_v56 = vld [vmem:[#allocation217_spill] sm:$0xff] }
 0x353   : > { %v4554_v55 = vmul.f32 %v10297_v37, %v3924_v1  ;;  %v4737_v20 = vmul.f32 %v10309_v32, %v3924_v1  ;;  %v4920_v38 = vmul.f32 %v10325_v16, %v3924_v1  ;;  %v3781_v27 = vmul.f32 %v3755_v57, %v8142_v29 }
 0x354   : > { %v4495_v51 = vadd.f32 %v11925_v4, %v4458_v19  ;;  %v4824_v37 = vadd.f32 %v11927_v3, %v4787_v63  ;;  %v3679_v23 = vadd.f32 %v10599_v49, %v10597_v53  ;;  %v4678_v59 = vadd.f32 %v11929_v8, %v4641_v36 }
 0x355   : > { %v4568_v44 = vadd.f32 %v4554_v55, %v4531_v60  ;;  %v4751_v11 = vadd.f32 %v4737_v20, %v4714_v46  ;;  %v10685_v18 = vadd.f32 %v4920_v38, %v4897_v48  ;;  %v3805_v17 = vadd.f32 %v3781_v27, %v8192_v50  ;;  %v11935_v20 = vld [vmem:[#allocation176_spill] sm:$0xff]  ;;  %v11936_v38 = vld [vmem:[#allocation177_spill] sm:$0xff] }
 0x356   : > { %v4532_v14 = vadd.f32 %v11928_v5, %v4495_v51  ;;  %v4861_v60 = vadd.f32 %v11932_v41, %v4824_v37  ;;  %v3782_v63 = vmul.f32 %v3679_v23, %v8156_v45  ;;  %v4715_v46 = vadd.f32 %v11933_v56, %v4678_v59  ;;  %v11938_v37 = vld [vmem:[#allocation101_spill] sm:$0xff]  ;;  %v3896_v5 = vpop.permute.xlu1 %3895  ;;  %v11939_v56 = vld [vmem:[#allocation151_spill] sm:$0xff] }
 0x357   : > { %v4605_v1 = vadd.f32 %v11930_v10, %v4568_v44  ;;  %v4788_v0 = vadd.f32 %v11931_v24, %v4751_v11  ;;  %v4972_v53 = vmul.f32 %v10685_v18, %v10685_v18  ;;  %v3829_v49 = vmax.f32 %v3805_v17, 0.0  ;;  %v11937_v11 = vld [vmem:[#allocation14_spill] sm:$0xff] }
 0x358   : > { %v4940_v57 = vadd.f32 %v10499_v61, %v10444_v15  ;;  %v4898_v19 = vadd.f32 %v11934_v26, %v4861_v60  ;;  %v3806_v55 = vadd.f32 %v3782_v63, %v8190_v40  ;;  %v4968_v47 = vmul.f32 %v10565_v28, %v10565_v28  ;;  %v3722_v33 = vpop.f32.mrf.mxu2 }
 0x359   : > { %v4642_v48 = vadd.f32 %v11935_v20, %v4605_v1  ;;  %v4825_v27 = vadd.f32 %v11936_v38, %v4788_v0  ;;  %v3925_v4 = vmul.f32 %v11921_v25, %v3829_v49  ;;  %v4978_v36 = vadd.f32 %v10510_v34, %v10455_v13  ;;  %v3761_v17 = vpop.f32.mrf.mxu3  ;;  %v11943_v38 = vld [vmem:[#allocation178_spill] sm:$0xff] }
 0x35a   : > { %v4941_v51 = vadd.f32 %v4940_v57, %v10565_v28  ;;  %v3830_v44 = vmax.f32 %v3806_v55, 0.0  ;;  %v3757_v42 = vadd.f32 %v10621_v54, %v10632_v6 }
 0x35b   : > { %v4679_v3 = vadd.f32 %v11937_v11, %v4642_v48  ;;  %v4862_v23 = vadd.f32 %v11938_v37, %v4825_v27  ;;  %v4555_v25 = vmul.f32 %v10306_v22, %v3925_v4  ;;  %v4738_v8 = vmul.f32 %v10316_v30, %v3925_v4  ;;  %v11944_v27 = vld [vmem:[#allocation179_spill] sm:$0xff] }
 0x35c   : > { %v4921_v59 = vmul.f32 %v10413_v7, %v3925_v4  ;;  %v4942_v10 = vadd.f32 %v4941_v51, %v10623_v43  ;;  %v3926_v13 = vmul.f32 %v3896_v5, %v3830_v44  ;;  %v4979_v24 = vadd.f32 %v4978_v36, %v4968_v47  ;;  %v11945_v36 = vld [vmem:[#allocation45_spill] sm:$0xff] }
 0x35d   : > { %v4716_v34 = vadd.f32 %v10263_v31, %v4679_v3  ;;  %v4899_v1 = vadd.f32 %v10268_v21, %v4862_v23  ;;  %v4569_v0 = vadd.f32 %v4555_v25, %v4532_v14  ;;  %v4752_v41 = vadd.f32 %v4738_v8, %v4715_v46  ;;  %v11940_v31 = vld [vmem:[#allocation152_spill] sm:$0xff]  ;;  %v11941_v14 = vld [vmem:[#allocation38_spill] sm:$0xff]  ;;  %v11948_v25 = vld [vmem:[#allocation111_spill] sm:$0xff] }
 0x35e   : > { %v10719_v54 = vadd.f32 %v4921_v59, %v4898_v19  ;;  %v4943_v6 = vadd.f32 %v4942_v10, %v10685_v18  ;;  %v4739_v22 = vmul.f32 %v10309_v32, %v3926_v13  ;;  %v4922_v60 = vmul.f32 %v10325_v16, %v3926_v13  ;;  %v11942_v46 = vld [vmem:[#allocation28_spill] sm:$0xff]  ;;  %v11949_v8 = vld [vmem:[#allocation39_spill] sm:$0xff]  ;;  %v11950_v10 = vld [vmem:[#allocation5_spill] sm:$0xff] }
 0x35f   : > { %v4980_v63 = vadd.f32 %v4979_v24, %v10636_v9  ;;  %v3783_v49 = vmul.f32 %v3757_v42, %v8142_v29  ;;  %v4606_v57 = vadd.f32 %v11939_v56, %v4569_v0  ;;  %v4789_v26 = vadd.f32 %v11940_v31, %v4752_v41  ;;  %v11947_v42 = vld [vmem:[#allocation102_spill] sm:$0xff]  ;;  %v11951_v0 = vld [vmem:[#allocation219_spill] sm:$0xff]  ;;  %v11953_v31 = vld [vmem:[#allocation104_spill] sm:$0xff] }
 0x360   : > { %v4973_v21 = vmul.f32 %v10719_v54, %v10719_v54  ;;  %v4952_v19 = vadd.f32 %v11942_v46, %v11941_v14  ;;  %v4753_v55 = vadd.f32 %v4739_v22, %v4716_v34  ;;  %v10732_v20 = vadd.f32 %v4922_v60, %v4899_v1 }
 0x361   : > { %v4981_v32 = vadd.f32 %v4980_v63, %v4972_v53  ;;  %v3807_v48 = vadd.f32 %v3783_v49, %v8192_v50  ;;  %v4643_v9 = vadd.f32 %v11943_v38, %v4606_v57  ;;  %v4826_v4 = vadd.f32 %v11944_v27, %v4789_v26  ;;  %v11946_v53 = vld [vmem:[#allocation100_spill] sm:$0xff] }
 0x362   : > { %v4953_v51 = vadd.f32 %v4952_v19, %v10592_v35  ;;  %v4969_v47 = vmul.f32 %v10592_v35, %v10592_v35  ;;  %v4790_v44 = vadd.f32 %v11945_v36, %v4753_v55  ;;  %v4944_v11 = vadd.f32 %v4943_v6, %v10732_v20  ;;  %v11952_v6 = vld [vmem:[#allocation220_spill] sm:$0xff]  ;;  %v11954_v19 = vld [vmem:[#allocation103_spill] sm:$0xff]  ;;  %v11956_v55 = vld [vmem:[#allocation25_spill] sm:$0xff] }
 0x363   : > { %v4974_v3 = vmul.f32 %v10732_v20, %v10732_v20  ;;  %v3831_v37 = vmax.f32 %v3807_v48, 0.0  ;;  %v4680_v23 = vadd.f32 %v11946_v53, %v4643_v9  ;;  %v4863_v33 = vadd.f32 %v11947_v42, %v4826_v4  ;;  %v11961_v36 = vld [vmem:[#allocation49_spill] sm:$0xff]  ;;  %v11964_v53 = vld [vmem:[#allocation216_spill] sm:$0xff] }
 0x364   : > { %v4954_v17 = vadd.f32 %v4953_v51, %v10658_v12  ;;  %v4990_v59 = vadd.f32 %v11949_v8, %v11948_v25  ;;  %v4827_v13 = vadd.f32 %v11950_v10, %v4790_v44  ;;  %v3682_v24 = vadd.f32 %v10647_v52, %v10645_v58  ;;  %v11957_v58 = vld [vmem:[#allocation46_spill] sm:$0xff]  ;;  %v11958_v52 = vld [vmem:[#allocation105_spill] sm:$0xff]  ;;  %v11965_v8 = vld [vmem:[#allocation15_spill] sm:$0xff] }
 0x365   : > { %v4982_v34 = vadd.f32 %v4981_v32, %v4974_v3  ;;  %v3927_v1 = vmul.f32 %v3896_v5, %v3831_v37  ;;  %v4717_v41 = vadd.f32 %v11951_v0, %v4680_v23  ;;  %v4900_v22 = vadd.f32 %v11952_v6, %v4863_v33  ;;  %v11962_v3 = vld [vmem:[#allocation221_spill] sm:$0xff] }
 0x366   : > { %v4955_v60 = vadd.f32 %v4954_v17, %v10719_v54  ;;  %v4991_v63 = vadd.f32 %v4990_v59, %v4969_v47  ;;  %v3784_v57 = vmul.f32 %v3682_v24, %v8156_v45  ;;  %v4864_v26 = vadd.f32 %v11953_v31, %v4827_v13  ;;  %v11959_v45 = vld [vmem:[#allocation222_spill] sm:$0xff]  ;;  %v11966_v0 = vld [vmem:[#allocation181_spill] sm:$0xff] }
 0x367   : > { %v4740_v49 = vmul.f32 %v10316_v30, %v3927_v1  ;;  %v4923_v56 = vmul.f32 %v10413_v7, %v3927_v1  ;;  %v11955_v5 = vmax.f32 %v11954_v19, 0.0  ;;  %v4777_v48 = vmul.f32 %v11958_v52, %v11957_v58  ;;  %v11960_v47 = vld [vmem:[#allocation6_spill] sm:$0xff] }
 0x368   : > { %v4992_v38 = vadd.f32 %v4991_v63, %v10669_v62  ;;  %v3760_v9 = vadd.f32 %v10676_v2, %v10674_v39  ;;  %v3808_v4 = vadd.f32 %v3784_v57, %v8190_v40  ;;  %v4901_v51 = vadd.f32 %v11959_v45, %v4864_v26  ;;  %v3901_v40 = vpop.permute.xlu0 %3900 }
 0x369   : > { %v1433_v32 = vmul.f32 %v11956_v55, %v11955_v5  ;;  %v4754_v27 = vadd.f32 %v4740_v49, %v4717_v41  ;;  %v10767_v30 = vadd.f32 %v4923_v56, %v4900_v22  ;;  %v4814_v44 = vmul.f32 %v11961_v36, %v11960_v47 }
 0x36a   : > { %v11963_v37 = vmax.f32 %v11962_v3, 0.0  ;;  %v4993_v42 = vadd.f32 %v4992_v38, %v4973_v21  ;;  %v3785_v62 = vmul.f32 %v3760_v9, %v8142_v29  ;;  %v3832_v17 = vmax.f32 %v3808_v4, 0.0 }
 0x36b   : > { %v4791_v33 = vadd.f32 %v4777_v48, %v4754_v27  ;;  %v4956_v39 = vadd.f32 %v4955_v60, %v10767_v30  ;;  %v4975_v2 = vmul.f32 %v10767_v30, %v10767_v30  ;;  %v4851_v59 = vmul.f32 %v11965_v8, %v1433_v32 }
 0x36c   : > { %v3305_v23 = vmul.f32 %v11964_v53, %v11963_v37  ;;  %v3809_v25 = vadd.f32 %v3785_v62, %v8192_v50  ;;  %v3928_v1 = vmul.f32 %v3901_v40, %v3832_v17 }
 0x36d   : > { %v4828_v10 = vadd.f32 %v4814_v44, %v4791_v33  ;;  %v4994_v13 = vadd.f32 %v4993_v42, %v4975_v2 }
 0x36e   : > { %v3833_v24 = vmax.f32 %v3809_v25, 0.0  ;;  %v4888_v21 = vmul.f32 %v11966_v0, %v3305_v23  ;;  %v4924_v29 = vmul.f32 %v10325_v16, %v3928_v1 }
 0x36f   : > { %v4865_v41 = vadd.f32 %v4851_v59, %v4828_v10 }
 0x370   : > { %v3929_v6 = vmul.f32 %v3901_v40, %v3833_v24  ;;  %v10784_v22 = vadd.f32 %v4924_v29, %v4901_v51 }
 0x371   : > { %v4902_v60 = vadd.f32 %v4888_v21, %v4865_v41 }
 0x372   : > { %v4925_v63 = vmul.f32 %v10413_v7, %v3929_v6  ;;  %v4945_v49 = vadd.f32 %v4944_v11, %v10784_v22  ;;  %v4976_v50 = vmul.f32 %v10784_v22, %v10784_v22 }
 0x374   : > { %v10790_v56 = vadd.f32 %v4925_v63, %v4902_v60  ;;  %v4946_v57 = vrot.slane %v4945_v49, 4  ;;  %v4983_v31 = vadd.f32 %v4982_v34, %v4976_v50 }
 0x376   : > { %v4957_v26 = vadd.f32 %v4956_v39, %v10790_v56  ;;  %v4977_v16 = vmul.f32 %v10790_v56, %v10790_v56  ;;  %v4947_v19 = vadd.f32 %v4946_v57, %v4945_v49  ;;  %v4984_v5 = vrot.slane %v4983_v31, 4 }
 0x378   : > { %v4958_v55 = vrot.slane %v4957_v26, 4  ;;  %v4995_v32 = vadd.f32 %v4994_v13, %v4977_v16  ;;  %v4948_v58 = vrot.slane %v4947_v19, 2  ;;  %v4985_v7 = vadd.f32 %v4984_v5, %v4983_v31  ;;  %v5010_v31 = vld [vmem:[%s671_s29] sm:$0x3] }
 0x37a   : > { %v4959_v52 = vadd.f32 %v4958_v55, %v4957_v26  ;;  %v4996_v11 = vrot.slane %v4995_v32, 4  ;;  %v4949_v48 = vadd.f32 %v4948_v58, %v4947_v19  ;;  %v4986_v38 = vrot.slane %v4985_v7, 2  ;;  %v5110_v55 = vpop.permute.xlu1 %5109 }
 0x37c   : > { %v4960_v9 = vrot.slane %v4959_v52, 2  ;;  %v4997_v27 = vadd.f32 %v4996_v11, %v4995_v32  ;;  %v4950_v4 = vrot.slane %v4949_v48, 1  ;;  %v4987_v45 = vadd.f32 %v4986_v38, %v4985_v7 }
 0x37e   : > { %v4961_v34 = vadd.f32 %v4960_v9, %v4959_v52  ;;  %v4998_v51 = vrot.slane %v4997_v27, 2  ;;  %v4951_v47 = vadd.f32 %v4950_v4, %v4949_v48  ;;  %v4988_v36 = vrot.slane %v4987_v45, 1 }
 0x380   : > { %v4962_v44 = vrot.slane %v4961_v34, 1  ;;  %v4999_v3 = vadd.f32 %v4998_v51, %v4997_v27  ;;  %v4989_v37 = vadd.f32 %v4988_v36, %v4987_v45  ;;  %v5002_v53 = vmul.f32 0.020408163, %v4951_v47  ;;  %v5039_v45 = vld [vmem:[%s676_s15] sm:$0x3] }
 0x382   : > { %v4963_v23 = vadd.f32 %v4962_v44, %v4961_v34  ;;  %v5000_v42 = vrot.slane %v4999_v3, 1  ;;  %v5004_v62 = vmul.f32 0.020408163, %v4989_v37  ;;  %v5006_v33 = vmul.f32 %v5002_v53, %v5002_v53  ;;  %v5115_v37 = vpop.permute.xlu2 %5114 }
 0x384   : > { %v5001_v39 = vadd.f32 %v5000_v42, %v4999_v3  ;;  %v5003_v2 = vmul.f32 0.020408163, %v4963_v23  ;;  %v5008_v17 = vsub.f32 %v5004_v62, %v5006_v33  ;;  %v5120_v3 = vpop.permute.xlu0 %5119 }
 0x386   : > { %v5005_v40 = vmul.f32 0.020408163, %v5001_v39  ;;  %v5007_v25 = vmul.f32 %v5003_v2, %v5003_v2  ;;  %v5011_v8 = vadd.f32 1e-05, %v5008_v17 }
 0x388   : > { %v5009_v59 = vsub.f32 %v5005_v40, %v5007_v25  ;;  %7179 = vrsqrt.f32 %v5011_v8  ;;  %vm5019_vm13 = vweird.f32 %v5011_v8 }
 0x38a   : > { %v5012_v10 = vadd.f32 1e-05, %v5009_v59 }
 0x38c   : > { %7181 = vrsqrt.f32 %v5012_v10  ;;  %vm5029_vm11 = vweird.f32 %v5012_v10 }
 0x38e   : > { %v7180_v13 = vpop.eup %7179 }
 0x38f   : > { %v5014_v1 = vmul.f32 %v7180_v13, %v5011_v8  ;;  %vm5020_vm10 = vweird.f32 %v7180_v13 }
 0x390   : > { %vm5021_vm14 = vmor %vm5019_vm13, %vm5020_vm10 }
 0x391   : > { %v5015_v0 = vmul.f32 %v7180_v13, %v5014_v1 }
 0x392   : > { %v7182_v24 = vpop.eup %7181 }
 0x393   : > { %v5024_v21 = vmul.f32 %v7182_v24, %v5012_v10  ;;  %v5016_v29 = vmul.f32 0.5, %v5015_v0  ;;  %vm5030_vm9 = vweird.f32 %v7182_v24 }
 0x394   : > { %vm5031_vm12 = vmor %vm5029_vm11, %vm5030_vm9 }
 0x395   : > { %v5025_v41 = vmul.f32 %v7182_v24, %v5024_v21  ;;  %v5017_v6 = vsub.f32 1.5, %v5016_v29 }
 0x397   : > { %v5026_v60 = vmul.f32 0.5, %v5025_v41  ;;  %v5018_v49 = vmul.f32 %v7180_v13, %v5017_v6 }
 0x399   : > { %v5027_v63 = vsub.f32 1.5, %v5026_v60  ;;  %v5022_v16 = vsel %vm5021_vm14, %v7180_v13, %v5018_v49 }
 0x39b   : > { %v5028_v50 = vmul.f32 %v7182_v24, %v5027_v63 }
 0x39d   : > { %v5032_v57 = vsel %vm5031_vm12, %v7182_v24, %v5028_v50 }
 0x39e   : > { %v5035_v26 = vrot.slane %v5032_v57, 7 }
 0x3a0   : > { %v5036_v19 = vsel %vm1245_vm7, %v5022_v16, %v5035_v26  ;;  %v5135_v26 = vpop.permute.xlu0 %5134  ;;  %v5130_v16 = vpop.permute.xlu2 %5129 }
 0x3a1   : > { %v5038_v5 = vmul.f32 %v5036_v19, %v5010_v31 }
 0x3a3   : > { %v5041_v32 = vperm.slane %v5038_v5, 0  ;;  %v5042_v58 = vperm.slane %v5038_v5, 1 }
 0x3a5   : > { %v5045_v7 = vmul.f32 %v5041_v32, %v5002_v53  ;;  %v5046_v52 = vmul.f32 %v5042_v58, %v5003_v2  ;;  %v5053_v11 = vmul.f32 %v5041_v32, %v10444_v15  ;;  %v5054_v48 = vmul.f32 %v5042_v58, %v11941_v14 }
 0x3a6   : > { %v5055_v38 = vmul.f32 %v5041_v32, %v10499_v61  ;;  %v5056_v9 = vmul.f32 %v5042_v58, %v11942_v46  ;;  %v5057_v27 = vmul.f32 %v5041_v32, %v10565_v28  ;;  %v5058_v4 = vmul.f32 %v5042_v58, %v10592_v35 }
 0x3a7   : > { %v5049_v34 = vrot.slane %v5046_v52, 7  ;;  %v5059_v51 = vmul.f32 %v5041_v32, %v10623_v43  ;;  %v5060_v47 = vmul.f32 %v5042_v58, %v10658_v12  ;;  %v5061_v36 = vmul.f32 %v5041_v32, %v10685_v18  ;;  %v5125_v12 = vpop.permute.xlu1 %5124 }
 0x3a8   : > { %v5062_v15 = vmul.f32 %v5042_v58, %v10719_v54  ;;  %v5063_v14 = vmul.f32 %v5041_v32, %v10732_v20  ;;  %v5064_v61 = vmul.f32 %v5042_v58, %v10767_v30  ;;  %v5065_v46 = vmul.f32 %v5041_v32, %v10784_v22 }
 0x3a9   : > { %v5050_v28 = vsel %vm1245_vm7, %v5045_v7, %v5049_v34  ;;  %v5066_v35 = vmul.f32 %v5042_v58, %v10790_v56 }
 0x3aa   : > { %v5052_v44 = vsub.f32 %v5039_v45, %v5050_v28 }
 0x3ac   : > { %v5068_v43 = vperm.slane %v5052_v44, 0  ;;  %v5069_v53 = vperm.slane %v5052_v44, 1 }
 0x3ae   : > { %v5072_v23 = vadd.f32 %v5068_v43, %v5053_v11  ;;  %v5073_v18 = vadd.f32 %v5069_v53, %v5054_v48  ;;  %v5074_v42 = vadd.f32 %v5068_v43, %v5055_v38  ;;  %v5075_v54 = vadd.f32 %v5069_v53, %v5056_v9 }
 0x3af   : > { %v5076_v62 = vadd.f32 %v5068_v43, %v5057_v27  ;;  %v5077_v20 = vadd.f32 %v5069_v53, %v5058_v4  ;;  %v5078_v33 = vadd.f32 %v5068_v43, %v5059_v51  ;;  %v5079_v30 = vadd.f32 %v5069_v53, %v5060_v47  ;;  %v5140_v7 = vpop.permute.xlu1 %5139 }
 0x3b0   : > { %v5080_v39 = vadd.f32 %v5068_v43, %v5061_v36  ;;  %v5081_v22 = vadd.f32 %v5069_v53, %v5062_v15  ;;  %v5082_v2 = vadd.f32 %v5068_v43, %v5063_v14  ;;  %v5083_v17 = vadd.f32 %v5069_v53, %v5064_v61 }
 0x3b1   : > { %v5084_v40 = vadd.f32 %v5068_v43, %v5065_v46  ;;  %v5085_v56 = vadd.f32 %v5069_v53, %v5066_v35  ;;  %v5086_v25 = vmax.f32 %v5072_v23, 0.0  ;;  %v5087_v8 = vmax.f32 %v5073_v18, 0.0 }
 0x3b2   : > { %v5088_v59 = vmax.f32 %v5074_v42, 0.0  ;;  %v5089_v10 = vmax.f32 %v5075_v54, 0.0  ;;  %v5090_v13 = vmax.f32 %v5076_v62, 0.0  ;;  %v5091_v1 = vmax.f32 %v5077_v20, 0.0 }
 0x3b3   : > { %v5092_v24 = vmax.f32 %v5078_v33, 0.0  ;;  %v5093_v0 = vmax.f32 %v5079_v30, 0.0  ;;  %v5094_v21 = vmax.f32 %v5080_v39, 0.0  ;;  %v5095_v29 = vmax.f32 %v5081_v22, 0.0 }
 0x3b4   : > { %v5096_v41 = vmax.f32 %v5082_v2, 0.0  ;;  %v5097_v6 = vmax.f32 %v5083_v17, 0.0  ;;  %v5098_v60 = vmax.f32 %v5084_v40, 0.0  ;;  %v5099_v63 = vmax.f32 %v5085_v56, 0.0  ;;  %5159 = sbr.rel (%p6767_p10) target bundleno = 968 (0x3c8), region = 129 }
 0x3b5   : > { %v10819_v49 = vmul.f32 %v5110_v55, %v5086_v25  ;;  %v10821_v50 = vmul.f32 %v5110_v55, %v5087_v8  ;;  %v10823_v57 = vmul.f32 %v5115_v37, %v5088_v59  ;;  %v10825_v31 = vmul.f32 %v5115_v37, %v5089_v10 }
 0x3b6   : > { %v10827_v19 = vmul.f32 %v5120_v3, %v5090_v13  ;;  %v10829_v5 = vmul.f32 %v5120_v3, %v5091_v1  ;;  %v10831_v32 = vmul.f32 %v5125_v12, %v5092_v24  ;;  %v10833_v58 = vmul.f32 %v5125_v12, %v5093_v0 }
 0x3b7   : > { %v10835_v52 = vmul.f32 %v5130_v16, %v5094_v21  ;;  %v10837_v11 = vmul.f32 %v5130_v16, %v5095_v29  ;;  %v10839_v55 = vmul.f32 %v5135_v26, %v5096_v41  ;;  %v10841_v48 = vmul.f32 %v5135_v26, %v5097_v6 }
 0x3b8   : > { %v10843_v38 = vmul.f32 %v5140_v7, %v5098_v60  ;;  %v10845_v9 = vmul.f32 %v5140_v7, %v5099_v63 }
 0x3b9   : > { %v7212_v27 = vmov 0.0  }
 0x3ba   : > { %5160 = vst [vmem:[%s11308_s11] sm:$0xff] %v7212_v27 }
 0x3bb   : > { %5161 = vst.msk [vmem:[%s11308_s11 + $0x8] sm:$0xff] %vm937_vm1, %v7212_v27 }
 0x3bc   : > { %5162 = vst [vmem:[%s11308_s11 + $0x10] sm:$0xff] %v7212_v27 }
 0x3bd   : > { %5163 = vst.msk [vmem:[%s11308_s11 + $0x18] sm:$0xff] %vm937_vm1, %v7212_v27 }
 0x3be   : > { %5164 = vst [vmem:[%s11308_s11 + $0x20] sm:$0xff] %v7212_v27 }
 0x3bf   : > { %5165 = vst.msk [vmem:[%s11308_s11 + $0x28] sm:$0xff] %vm937_vm1, %v7212_v27 }
 0x3c0   : > { %5166 = vst [vmem:[%s11308_s11 + $0x30] sm:$0xff] %v7212_v27 }
 0x3c1   : > { %5167 = vst.msk [vmem:[%s11308_s11 + $0x38] sm:$0xff] %vm937_vm1, %v7212_v27 }
 0x3c2   : > { %5168 = vst [vmem:[%s11308_s11 + $0x40] sm:$0xff] %v7212_v27 }
 0x3c3   : > { %5169 = vst.msk [vmem:[%s11308_s11 + $0x48] sm:$0xff] %vm937_vm1, %v7212_v27 }
 0x3c4   : > { %5170 = vst [vmem:[%s11308_s11 + $0x50] sm:$0xff] %v7212_v27 }
 0x3c5   : > { %5171 = vst.msk [vmem:[%s11308_s11 + $0x58] sm:$0xff] %vm937_vm1, %v7212_v27 }
 0x3c6   : > { %5172 = vst [vmem:[%s11308_s11 + $0x60] sm:$0xff] %v7212_v27 }
 0x3c7   : > { %5173 = vst.msk [vmem:[%s11308_s11 + $0x68] sm:$0xff] %vm937_vm1, %v7212_v27 }
 0x3c8 PF: > { %v6826_v4 = vld [vmem:[%s7407_s14 + $0x70] sm:$0xf]  ;;  %v7127_v45 = vld [vmem:[%s7407_s14 + $0x74] sm:$0xf0]  ;;  %v7126_v36 = vld [vmem:[%s7407_s14 + $0x74] sm:$0xf] }
 0x3c9   : > { %v6890_v34 = vld [vmem:[%s7407_s14 + $0xf0] sm:$0xf]  ;;  %v6827_v51 = vor.u32 %v7127_v45, %v6826_v4  ;;  %v7143_v47 = vld [vmem:[%s7407_s14 + $0xf4] sm:$0xf0]  ;;  %v6828_v15 = vld [vmem:[%s7407_s14 + $0x78] sm:$0xf0] }
 0x3ca   : > { %v6891_v14 = vor.u32 %v7143_v47, %v6890_v34  ;;  %v6831_v61 = vor.u32 %v7126_v36, %v6828_v15  ;;  %v7142_v46 = vld [vmem:[%s7407_s14 + $0xf4] sm:$0xf]  ;;  %v6892_v28 = vld [vmem:[%s7407_s14 + $0xf8] sm:$0xf0]  ;;  %v6818_v35 = vld [vmem:[%s7407_s14 + $0x60] sm:$0xf] }
 0x3cb   : > { %5388 = vmatpush.bf16.msrb.mxu0 %v6827_v51  ;;  %v6895_v44 = vor.u32 %v7142_v46, %v6892_v28  ;;  %v7125_v3 = vld [vmem:[%s7407_s14 + $0x64] sm:$0xf0]  ;;  %v6882_v37 = vld [vmem:[%s7407_s14 + $0xe0] sm:$0xf]  ;;  %v7124_v23 = vld [vmem:[%s7407_s14 + $0x64] sm:$0xf] }
 0x3cc   : > { %v7141_v43 = vld [vmem:[%s7407_s14 + $0xe4] sm:$0xf0]  ;;  %5416 = vmatpush.bf16.msrb.mxu1 %v6891_v14  ;;  %5444 = vmatpush.bf16.msrb.mxu2 %v6831_v61  ;;  %v6819_v53 = vor.u32 %v7125_v3, %v6818_v35  ;;  %v6820_v18 = vld [vmem:[%s7407_s14 + $0x68] sm:$0xf0]  ;;  %v7140_v42 = vld [vmem:[%s7407_s14 + $0xe4] sm:$0xf] }
 0x3cd   : > { %v6883_v12 = vor.u32 %v7141_v43, %v6882_v37  ;;  %5472 = vmatpush.bf16.msrb.mxu3 %v6895_v44  ;;  %v6823_v54 = vor.u32 %v7124_v23, %v6820_v18  ;;  %v6884_v62 = vld [vmem:[%s7407_s14 + $0xe8] sm:$0xf0]  ;;  %v6810_v20 = vld [vmem:[%s7407_s14 + $0x50] sm:$0xf]  ;;  %v7123_v33 = vld [vmem:[%s7407_s14 + $0x54] sm:$0xf0] }
 0x3ce   : > { %v6887_v30 = vor.u32 %v7140_v42, %v6884_v62  ;;  %v6874_v39 = vld [vmem:[%s7407_s14 + $0xd0] sm:$0xf]  ;;  %v7139_v22 = vld [vmem:[%s7407_s14 + $0xd4] sm:$0xf0]  ;;  %v7122_v2 = vld [vmem:[%s7407_s14 + $0x54] sm:$0xf]  ;;  %v6811_v17 = vor.u32 %v7123_v33, %v6810_v20 }
 0x3cf   : > { %5389 = vmatpush.bf16.msrb.mxu0 %v6819_v53  ;;  %v6812_v40 = vld [vmem:[%s7407_s14 + $0x58] sm:$0xf0]  ;;  %v7138_v56 = vld [vmem:[%s7407_s14 + $0xd4] sm:$0xf]  ;;  %v6875_v8 = vor.u32 %v7139_v22, %v6874_v39  ;;  %v6802_v10 = vld [vmem:[%s7407_s14 + $0x40] sm:$0xf] }
 0x3d0   : > { %v6876_v25 = vld [vmem:[%s7407_s14 + $0xd8] sm:$0xf0]  ;;  %5417 = vmatpush.bf16.msrb.mxu1 %v6883_v12  ;;  %5445 = vmatpush.bf16.msrb.mxu2 %v6823_v54  ;;  %v6815_v59 = vor.u32 %v7122_v2, %v6812_v40  ;;  %v7121_v13 = vld [vmem:[%s7407_s14 + $0x44] sm:$0xf0]  ;;  %v6866_v1 = vld [vmem:[%s7407_s14 + $0xc0] sm:$0xf] }
 0x3d1   : > { %5473 = vmatpush.bf16.msrb.mxu3 %v6887_v30  ;;  %v6879_v24 = vor.u32 %v7138_v56, %v6876_v25  ;;  %v7137_v0 = vld [vmem:[%s7407_s14 + $0xc4] sm:$0xf0]  ;;  %v7120_v21 = vld [vmem:[%s7407_s14 + $0x44] sm:$0xf]  ;;  %v6804_v29 = vld [vmem:[%s7407_s14 + $0x48] sm:$0xf0]  ;;  %v6803_v60 = vor.u32 %v7121_v13, %v6802_v10 }
 0x3d2   : > { %v7136_v41 = vld [vmem:[%s7407_s14 + $0xc4] sm:$0xf]  ;;  %v6868_v6 = vld [vmem:[%s7407_s14 + $0xc8] sm:$0xf0]  ;;  %v6867_v63 = vor.u32 %v7137_v0, %v6866_v1  ;;  %v6807_v26 = vor.u32 %v7120_v21, %v6804_v29  ;;  %v6794_v16 = vld [vmem:[%s7407_s14 + $0x30] sm:$0xf] }
 0x3d3   : > { %5390 = vmatpush.bf16.msrb.mxu0 %v6811_v17  ;;  %v7119_v7 = vld [vmem:[%s7407_s14 + $0x34] sm:$0xf0]  ;;  %v6858_v27 = vld [vmem:[%s7407_s14 + $0xb0] sm:$0xf]  ;;  %v6871_v4 = vor.u32 %v7136_v41, %v6868_v6  ;;  %v7118_v34 = vld [vmem:[%s7407_s14 + $0x34] sm:$0xf] }
 0x3d4   : > { %5418 = vmatpush.bf16.msrb.mxu1 %v6875_v8  ;;  %5446 = vmatpush.bf16.msrb.mxu2 %v6815_v59  ;;  %v7135_v45 = vld [vmem:[%s7407_s14 + $0xb4] sm:$0xf0]  ;;  %v6796_v51 = vld [vmem:[%s7407_s14 + $0x38] sm:$0xf0]  ;;  %v7134_v47 = vld [vmem:[%s7407_s14 + $0xb4] sm:$0xf]  ;;  %v6795_v15 = vor.u32 %v7119_v7, %v6794_v16  ;;  %v5189_v16 = vpack.c.bf16 %v10825_v31, %v10821_v50  ;;  %v5190_v7 = vpack.c.bf16 %v10831_v32, %v10827_v19 }
 0x3d5   : > { %5474 = vmatpush.bf16.msrb.mxu3 %v6879_v24  ;;  %v6860_v36 = vld [vmem:[%s7407_s14 + $0xb8] sm:$0xf0]  ;;  %v6859_v14 = vor.u32 %v7135_v45, %v6858_v27  ;;  %v6799_v61 = vor.u32 %v7118_v34, %v6796_v51  ;;  %v6786_v46 = vld [vmem:[%s7407_s14 + $0x20] sm:$0xf]  ;;  %v7117_v28 = vld [vmem:[%s7407_s14 + $0x24] sm:$0xf0]  ;;  %v5191_v27 = vpack.c.bf16 %v10833_v58, %v10829_v5  ;;  %v5193_v50 = vpack.c.bf16 %v10841_v48, %v10837_v11 }
 0x3d6   : > { %v6850_v35 = vld [vmem:[%s7407_s14 + $0xa0] sm:$0xf]  ;;  %v6863_v44 = vor.u32 %v7134_v47, %v6860_v36  ;;  %v7133_v3 = vld [vmem:[%s7407_s14 + $0xa4] sm:$0xf0]  ;;  %v7116_v37 = vld [vmem:[%s7407_s14 + $0x24] sm:$0xf]  ;;  %v6787_v23 = vor.u32 %v7117_v28, %v6786_v46  ;;  %v5195_v31 = vpack.c.bf16 %v10845_v9, %v10845_v9 }
 0x3d7   : > { %5391 = vmatpush.bf16.msrb.mxu0 %v6803_v60  ;;  %v6788_v43 = vld [vmem:[%s7407_s14 + $0x28] sm:$0xf0]  ;;  %v7132_v53 = vld [vmem:[%s7407_s14 + $0xa4] sm:$0xf]  ;;  %v6851_v18 = vor.u32 %v7133_v3, %v6850_v35  ;;  %v6778_v54 = vld [vmem:[%s7407_s14 + $0x10] sm:$0xf] }
 0x3d8   : > { %5419 = vmatpush.bf16.msrb.mxu1 %v6867_v63  ;;  %5447 = vmatpush.bf16.msrb.mxu2 %v6807_v26  ;;  %v6852_v12 = vld [vmem:[%s7407_s14 + $0xa8] sm:$0xf0]  ;;  %v6791_v42 = vor.u32 %v7116_v37, %v6788_v43  ;;  %v7115_v62 = vld [vmem:[%s7407_s14 + $0x14] sm:$0xf0]  ;;  %v6842_v20 = vld [vmem:[%s7407_s14 + $0x90] sm:$0xf]  ;;  %v5188_v26 = vpack.c.bf16 %v10823_v57, %v10819_v49  ;;  %v5192_v49 = vpack.c.bf16 %v10839_v55, %v10835_v52 }
 0x3d9   : > { %5475 = vmatpush.bf16.msrb.mxu3 %v6871_v4  ;;  %v6855_v33 = vor.u32 %v7132_v53, %v6852_v12  ;;  %v7131_v30 = vld [vmem:[%s7407_s14 + $0x94] sm:$0xf0]  ;;  %v7114_v39 = vld [vmem:[%s7407_s14 + $0x14] sm:$0xf]  ;;  %v6780_v22 = vld [vmem:[%s7407_s14 + $0x18] sm:$0xf0]  ;;  %v6779_v40 = vor.u32 %v7115_v62, %v6778_v54  ;;  %v5194_v57 = vpack.c.bf16 %v10843_v38, %v10843_v38 }
 0x3da   : > { %v7130_v2 = vld [vmem:[%s7407_s14 + $0x94] sm:$0xf]  ;;  %v6844_v17 = vld [vmem:[%s7407_s14 + $0x98] sm:$0xf0]  ;;  %v6843_v56 = vor.u32 %v7131_v30, %v6842_v20  ;;  %v6783_v25 = vor.u32 %v7114_v39, %v6780_v22  ;;  %v6770_v8 = vld [vmem:[%s7407_s14] sm:$0xf] }
 0x3db   : > { %5392 = vmatpush.bf16.msrb.mxu0 %v6795_v15  ;;  %v7113_v59 = vld [vmem:[%s7407_s14 + $0x4] sm:$0xf0]  ;;  %v6834_v10 = vld [vmem:[%s7407_s14 + $0x80] sm:$0xf]  ;;  %v6847_v13 = vor.u32 %v7130_v2, %v6844_v17  ;;  %v7112_v24 = vld [vmem:[%s7407_s14 + $0x4] sm:$0xf] }
 0x3dc   : > { %5420 = vmatpush.bf16.msrb.mxu1 %v6859_v14  ;;  %5448 = vmatpush.bf16.msrb.mxu2 %v6799_v61  ;;  %v7129_v1 = vld [vmem:[%s7407_s14 + $0x84] sm:$0xf0]  ;;  %v6772_v0 = vld [vmem:[%s7407_s14 + $0x8] sm:$0xf0]  ;;  %v7128_v21 = vld [vmem:[%s7407_s14 + $0x84] sm:$0xf]  ;;  %v6771_v41 = vor.u32 %v7113_v59, %v6770_v8 }
 0x3dd   : > { %5476 = vmatpush.bf16.msrb.mxu3 %v6863_v44  ;;  %v6836_v29 = vld [vmem:[%s7407_s14 + $0x88] sm:$0xf0]  ;;  %v6835_v6 = vor.u32 %v7129_v1, %v6834_v10  ;;  %v6775_v60 = vor.u32 %v7112_v24, %v6772_v0  ;;  %v5174_v5 = vld [vmem:[%s11308_s11] sm:$0xff]  ;;  %v5176_v4 = vld [vmem:[%s11308_s11 + $0x10] sm:$0xff]  ;;  %p6896_p11 = scmp.ne.s32.totalorder %s7289_s20, 5 }
 0x3de   : > { %v6839_v63 = vor.u32 %v7128_v21, %v6836_v29  ;;  %v5175_v55 = vld [vmem:[%s11308_s11 + $0x8] sm:$0xff]  ;;  %v5177_v15 = vld [vmem:[%s11308_s11 + $0x18] sm:$0xff]  ;;  %v5178_v28 = vld [vmem:[%s11308_s11 + $0x20] sm:$0xff] }
 0x3df   : > { %5393 = vmatpush.bf16.msrb.mxu0 %v6787_v23  ;;  %v5179_v53 = vld [vmem:[%s11308_s11 + $0x28] sm:$0xff]  ;;  %v5181_v39 = vld [vmem:[%s11308_s11 + $0x38] sm:$0xff]  ;;  %v5184_v21 = vld [vmem:[%s11308_s11 + $0x50] sm:$0xff] }
 0x3e0   : > { %5421 = vmatpush.bf16.msrb.mxu1 %v6851_v18  ;;  %5449 = vmatpush.bf16.msrb.mxu2 %v6791_v42  ;;  %v5180_v42 = vld [vmem:[%s11308_s11 + $0x30] sm:$0xff] }
 0x3e1   : > { %5477 = vmatpush.bf16.msrb.mxu3 %v6855_v33 }
 0x3e3   : > { %5394 = vmatpush.bf16.msrb.mxu0 %v6779_v40  ;;  %v5182_v40 = vld [vmem:[%s11308_s11 + $0x40] sm:$0xff] }
 0x3e4   : > { %5422 = vmatpush.bf16.msrb.mxu1 %v6843_v56  ;;  %5450 = vmatpush.bf16.msrb.mxu2 %v6783_v25 }
 0x3e5   : > { %5478 = vmatpush.bf16.msrb.mxu3 %v6847_v13  ;;  %v5183_v13 = vld [vmem:[%s11308_s11 + $0x48] sm:$0xff] }
 0x3e7   : > { %5395 = vmatpush.bf16.msrb.mxu0 %v6771_v41 }
 0x3e8   : > { %5423 = vmatpush.bf16.msrb.mxu1 %v6835_v6  ;;  %5451 = vmatpush.bf16.msrb.mxu2 %v6775_v60 }
 0x3e9   : > { %5479 = vmatpush.bf16.msrb.mxu3 %v6839_v63 }
 0x3ea   : > { %5396 = vmatmul.bf16.vlgmr.msrb.gmra.mxu0 %v5188_v26 }
 0x3eb   : > { %5424 = vmatmul.bf16.vlgmr.msrb.gmra.mxu1 %v5189_v16  ;;  %5452 = vmatmul.bf16.vlgmr.msrb.gmra.mxu2 %v5188_v26  ;;  %v5185_v26 = vld [vmem:[%s11308_s11 + $0x58] sm:$0xff] }
 0x3ec   : > { %5480 = vmatmul.bf16.vlgmr.msrb.gmra.mxu3 %v5189_v16 }
 0x3fa   : > { %5401 = vmatmul.bf16.gmra.mxu0 %v5190_v7 }
 0x3fb   : > { %5429 = vmatmul.bf16.gmra.mxu1 %v5191_v27  ;;  %5457 = vmatmul.bf16.gmra.mxu2 %v5190_v7 }
 0x3fc   : > { %5485 = vmatmul.bf16.gmra.mxu3 %v5191_v27 }
 0x40a   : > { %5406 = vmatmul.bf16.gmra.mxu0 %v5192_v49 }
 0x40b   : > { %5434 = vmatmul.bf16.gmra.mxu1 %v5193_v50  ;;  %5462 = vmatmul.bf16.gmra.mxu2 %v5192_v49  ;;  %v5186_v49 = vld [vmem:[%s11308_s11 + $0x60] sm:$0xff] }
 0x40c   : > { %5490 = vmatmul.bf16.gmra.mxu3 %v5193_v50 }
 0x41a   : > { %5411 = vmatmul.bf16.gmra.mxu0 %v5194_v57 }
 0x41b   : > { %5439 = vmatmul.bf16.gmra.mxu1 %v5195_v31  ;;  %5467 = vmatmul.bf16.gmra.mxu2 %v5194_v57 }
 0x41c   : > { %5495 = vmatmul.bf16.gmra.mxu3 %v5195_v31 }
 0x467   : > { %v5397_v19 = vpop.f32.mrf.mxu0 }
 0x468   : > { %v5425_v32 = vpop.f32.mrf.mxu1 }
 0x469   : > { %v5426_v58 = vadd.f32 %v5425_v32, %v5397_v19  ;;  %v5187_v32 = vld [vmem:[%s11308_s11 + $0x68] sm:$0xff] }
 0x46b   : > { %v5500_v52 = vadd.f32 %v5426_v58, %v5174_v5 }
 0x46d   : > { %5514 = vst [vmem:[%s11308_s11] sm:$0xff] %v5500_v52 }
 0x46e   : > { %v5453_v11 = vpop.f32.mrf.mxu2 }
 0x46f   : > { %v5481_v48 = vpop.f32.mrf.mxu3  ;;  %v5399_v38 = vpop.f32.mrf.mxu0 }
 0x470   : > { %v5482_v9 = vadd.f32 %v5481_v48, %v5453_v11  ;;  %v5427_v45 = vpop.f32.mrf.mxu1 }
 0x471   : > { %v5428_v34 = vadd.f32 %v5427_v45, %v5399_v38 }
 0x472   : > { %v5501_v51 = vadd.f32 %v5482_v9, %v5175_v55 }
 0x473   : > { %v5502_v47 = vadd.f32 %v5428_v34, %v5176_v4 }
 0x474   : > { %5515 = vst.msk [vmem:[%s11308_s11 + $0x8] sm:$0xff] %vm937_vm1, %v5501_v51 }
 0x475   : > { %5516 = vst [vmem:[%s11308_s11 + $0x10] sm:$0xff] %v5502_v47 }
 0x476   : > { %v5455_v36 = vpop.f32.mrf.mxu2 }
 0x477   : > { %v5483_v14 = vpop.f32.mrf.mxu3  ;;  %v5402_v61 = vpop.f32.mrf.mxu0 }
 0x478   : > { %v5484_v46 = vadd.f32 %v5483_v14, %v5455_v36  ;;  %v5430_v35 = vpop.f32.mrf.mxu1 }
 0x479   : > { %v5431_v44 = vadd.f32 %v5430_v35, %v5402_v61 }
 0x47a   : > { %v5503_v3 = vadd.f32 %v5484_v46, %v5177_v15 }
 0x47b   : > { %v5504_v37 = vadd.f32 %v5431_v44, %v5178_v28 }
 0x47c   : > { %5517 = vst.msk [vmem:[%s11308_s11 + $0x18] sm:$0xff] %vm937_vm1, %v5503_v3 }
 0x47d   : > { %5518 = vst [vmem:[%s11308_s11 + $0x20] sm:$0xff] %v5504_v37 }
 0x47e   : > { %v5458_v43 = vpop.f32.mrf.mxu2 }
 0x47f   : > { %v5486_v12 = vpop.f32.mrf.mxu3  ;;  %v5404_v23 = vpop.f32.mrf.mxu0 }
 0x480   : > { %v5487_v18 = vadd.f32 %v5486_v12, %v5458_v43  ;;  %v5432_v54 = vpop.f32.mrf.mxu1 }
 0x481   : > { %v5433_v62 = vadd.f32 %v5432_v54, %v5404_v23 }
 0x482   : > { %v5505_v20 = vadd.f32 %v5487_v18, %v5179_v53 }
 0x483   : > { %v5506_v33 = vadd.f32 %v5433_v62, %v5180_v42 }
 0x484   : > { %5519 = vst.msk [vmem:[%s11308_s11 + $0x28] sm:$0xff] %vm937_vm1, %v5505_v20 }
 0x485   : > { %5520 = vst [vmem:[%s11308_s11 + $0x30] sm:$0xff] %v5506_v33 }
 0x486   : > { %v5460_v30 = vpop.f32.mrf.mxu2 }
 0x487   : > { %v5488_v22 = vpop.f32.mrf.mxu3  ;;  %v5407_v2 = vpop.f32.mrf.mxu0 }
 0x488   : > { %v5489_v17 = vadd.f32 %v5488_v22, %v5460_v30  ;;  %v5435_v56 = vpop.f32.mrf.mxu1 }
 0x489   : > { %v5436_v25 = vadd.f32 %v5435_v56, %v5407_v2 }
 0x48a   : > { %v5507_v8 = vadd.f32 %v5489_v17, %v5181_v39 }
 0x48b   : > { %v5508_v59 = vadd.f32 %v5436_v25, %v5182_v40 }
 0x48c   : > { %5521 = vst.msk [vmem:[%s11308_s11 + $0x38] sm:$0xff] %vm937_vm1, %v5507_v8 }
 0x48d   : > { %5522 = vst [vmem:[%s11308_s11 + $0x40] sm:$0xff] %v5508_v59 }
 0x48e   : > { %v5463_v10 = vpop.f32.mrf.mxu2 }
 0x48f   : > { %v5491_v1 = vpop.f32.mrf.mxu3  ;;  %v5409_v24 = vpop.f32.mrf.mxu0 }
 0x490   : > { %v5492_v0 = vadd.f32 %v5491_v1, %v5463_v10  ;;  %v5437_v29 = vpop.f32.mrf.mxu1 }
 0x491   : > { %v5438_v41 = vadd.f32 %v5437_v29, %v5409_v24 }
 0x492   : > { %v5509_v6 = vadd.f32 %v5492_v0, %v5183_v13 }
 0x493   : > { %v5510_v60 = vadd.f32 %v5438_v41, %v5184_v21 }
 0x494   : > { %5523 = vst.msk [vmem:[%s11308_s11 + $0x48] sm:$0xff] %vm937_vm1, %v5509_v6 }
 0x495   : > { %5524 = vst [vmem:[%s11308_s11 + $0x50] sm:$0xff] %v5510_v60 }
 0x496   : > { %v5465_v63 = vpop.f32.mrf.mxu2 }
 0x497   : > { %v5493_v16 = vpop.f32.mrf.mxu3  ;;  %v5412_v7 = vpop.f32.mrf.mxu0 }
 0x498   : > { %v5494_v27 = vadd.f32 %v5493_v16, %v5465_v63  ;;  %v5440_v50 = vpop.f32.mrf.mxu1 }
 0x499   : > { %v5441_v57 = vadd.f32 %v5440_v50, %v5412_v7 }
 0x49a   : > { %v5511_v31 = vadd.f32 %v5494_v27, %v5185_v26 }
 0x49b   : > { %v5512_v19 = vadd.f32 %v5441_v57, %v5186_v49 }
 0x49c   : > { %5525 = vst.msk [vmem:[%s11308_s11 + $0x58] sm:$0xff] %vm937_vm1, %v5511_v31 }
 0x49d   : > { %5526 = vst [vmem:[%s11308_s11 + $0x60] sm:$0xff] %v5512_v19 }
 0x49e   : > { %v5468_v5 = vpop.f32.mrf.mxu2 }
 0x49f   : > { %v5496_v58 = vpop.f32.mrf.mxu3  ;;  %v5414_v52 = vpop.f32.mrf.mxu0 }
 0x4a0   : > { %v5497_v11 = vadd.f32 %v5496_v58, %v5468_v5  ;;  %v5442_v55 = vpop.f32.mrf.mxu1 }
 0x4a2   : > { %v5513_v48 = vadd.f32 %v5497_v11, %v5187_v32 }
 0x4a3   : > { %5531 = sbr.rel (%p6896_p11) target bundleno = 1272 (0x4f8), region = 133 }
 0x4a4   : > { %5527 = vst.msk [vmem:[%s11308_s11 + $0x68] sm:$0xff] %vm937_vm1, %v5513_v48 }
 0x4a6   : > { %v5470_v38 = vpop.f32.mrf.mxu2 }
 0x4a7   : > { %v5498_v9 = vpop.f32.mrf.mxu3 }
 0x4a8   : > { %v11072_v4 = vld [vmem:[%s11308_s11] sm:$0xff]  ;;  %v11077_v45 = vld [vmem:[%s11308_s11 + $0x8] sm:$0xff]  ;;  %v11082_v34 = vld [vmem:[%s11308_s11 + $0x10] sm:$0xff] }
 0x4a9   : > { %v11087_v51 = vld [vmem:[%s11308_s11 + $0x18] sm:$0xff]  ;;  %v11092_v47 = vld [vmem:[%s11308_s11 + $0x20] sm:$0xff]  ;;  %v11097_v36 = vld [vmem:[%s11308_s11 + $0x28] sm:$0xff]  ;;  %v5546_v15 = vadd.f32 %v11082_v34, %v11072_v4  ;;  %v5558_v14 = vsel %vm937_vm1, %v11077_v45, 0.0  ;;  %v5577_v53 = vmul.f32 %v11072_v4, %v11072_v4  ;;  %v5578_v12 = vmul.f32 %v11077_v45, %v11077_v45 }
 0x4aa   : > { %v11106_v61 = vld [vmem:[%s11308_s11 + $0x30] sm:$0xff]  ;;  %v11111_v46 = vld [vmem:[%s11308_s11 + $0x38] sm:$0xff]  ;;  %v5559_v28 = vsel %vm937_vm1, %v11087_v51, 0.0  ;;  %v5561_v35 = vsel %vm937_vm1, %v11097_v36, 0.0  ;;  %v11120_v44 = vld [vmem:[%s11308_s11 + $0x48] sm:$0xff]  ;;  %v5579_v42 = vmul.f32 %v11082_v34, %v11082_v34  ;;  %v5580_v54 = vmul.f32 %v11087_v51, %v11087_v51 }
 0x4ab   : > { %v11125_v3 = vld [vmem:[%s11308_s11 + $0x58] sm:$0xff]  ;;  %v5547_v37 = vadd.f32 %v5546_v15, %v11092_v47  ;;  %v5560_v43 = vadd.f32 %v5559_v28, %v5558_v14  ;;  %v11135_v23 = vld [vmem:[%s11308_s11 + $0x40] sm:$0xff]  ;;  %v5563_v18 = vsel %vm937_vm1, %v11111_v46, 0.0  ;;  %v5582_v62 = vmul.f32 %v11097_v36, %v11097_v36  ;;  %v11149_v30 = vld [vmem:[%s11308_s11 + $0x50] sm:$0xff] }
 0x4ac   : > { %v11154_v39 = vld [vmem:[%s11308_s11 + $0x68] sm:$0xff]  ;;  %v5565_v22 = vsel %vm937_vm1, %v11120_v44, 0.0  ;;  %v5567_v2 = vsel %vm937_vm1, %v11125_v3, 0.0  ;;  %v5581_v17 = vmul.f32 %v11092_v47, %v11092_v47  ;;  %v5584_v40 = vmul.f32 %v11111_v46, %v11111_v46  ;;  %v11172_v10 = vld [vmem:[%s11308_s11 + $0x60] sm:$0xff] }
 0x4ad   : > { %v5548_v20 = vadd.f32 %v5547_v37, %v11106_v61  ;;  %v5562_v33 = vadd.f32 %v5561_v35, %v5560_v43  ;;  %v5583_v8 = vmul.f32 %v11106_v61, %v11106_v61  ;;  %v5586_v59 = vmul.f32 %v11120_v44, %v11120_v44 }
 0x4ae   : > { %v5591_v13 = vadd.f32 %v5579_v42, %v5577_v53  ;;  %v5603_v1 = vsel %vm937_vm1, %v5578_v12, 0.0  ;;  %v5604_v24 = vsel %vm937_vm1, %v5580_v54, 0.0  ;;  %v5606_v0 = vsel %vm937_vm1, %v5582_v62, 0.0 }
 0x4af   : > { %v5549_v56 = vadd.f32 %v5548_v20, %v11135_v23  ;;  %v5564_v25 = vadd.f32 %v5563_v18, %v5562_v33  ;;  %v5569_v41 = vsel %vm937_vm1, %v11154_v39, 0.0  ;;  %v5605_v6 = vadd.f32 %v5604_v24, %v5603_v1 }
 0x4b0   : > { %v5585_v60 = vmul.f32 %v11135_v23, %v11135_v23  ;;  %v5588_v63 = vmul.f32 %v11125_v3, %v11125_v3  ;;  %v5592_v26 = vadd.f32 %v5591_v13, %v5581_v17  ;;  %v5608_v16 = vsel %vm937_vm1, %v5584_v40, 0.0 }
 0x4b1   : > { %v5550_v21 = vadd.f32 %v5549_v56, %v11149_v30  ;;  %v5566_v29 = vadd.f32 %v5565_v22, %v5564_v25  ;;  %v5607_v49 = vadd.f32 %v5606_v0, %v5605_v6  ;;  %v5587_v50 = vmul.f32 %v11149_v30, %v11149_v30 }
 0x4b2   : > { %v5590_v57 = vmul.f32 %v11154_v39, %v11154_v39  ;;  %v5593_v31 = vadd.f32 %v5592_v26, %v5583_v8  ;;  %v5610_v19 = vsel %vm937_vm1, %v5586_v59, 0.0  ;;  %v5589_v52 = vmul.f32 %v11172_v10, %v11172_v10 }
 0x4b3   : > { %v5551_v7 = vadd.f32 %v5550_v21, %v11172_v10  ;;  %v5568_v27 = vadd.f32 %v5567_v2, %v5566_v29  ;;  %v5609_v58 = vadd.f32 %v5608_v16, %v5607_v49  ;;  %v5612_v55 = vsel %vm937_vm1, %v5588_v63, 0.0 }
 0x4b4   : > { %v5594_v11 = vadd.f32 %v5593_v31, %v5585_v60  ;;  %v5614_v14 = vsel %vm937_vm1, %v5590_v57, 0.0 }
 0x4b5   : > { %v5552_v5 = vrot.slane %v5551_v7, 4  ;;  %v5570_v32 = vadd.f32 %v5569_v41, %v5568_v27  ;;  %v5611_v9 = vadd.f32 %v5610_v19, %v5609_v58 }
 0x4b6   : > { %v5595_v15 = vadd.f32 %v5594_v11, %v5587_v50 }
 0x4b7   : > { %v5553_v48 = vadd.f32 %v5552_v5, %v5551_v7  ;;  %v5571_v38 = vrot.slane %v5570_v32, 4  ;;  %v5613_v37 = vadd.f32 %v5612_v55, %v5611_v9 }
 0x4b8   : > { %v5596_v43 = vadd.f32 %v5595_v15, %v5589_v52  ;;  %v5630_v15 = vld [vmem:[%s11306_s9] sm:$0x3] }
 0x4b9   : > { %v5554_v28 = vrot.slane %v5553_v48, 2  ;;  %v5572_v35 = vadd.f32 %v5571_v38, %v5570_v32  ;;  %v5615_v18 = vadd.f32 %v5614_v14, %v5613_v37 }
 0x4ba   : > { %v5597_v42 = vrot.slane %v5596_v43, 4 }
 0x4bb   : > { %v5555_v53 = vadd.f32 %v5554_v28, %v5553_v48  ;;  %v5573_v12 = vrot.slane %v5572_v35, 2  ;;  %v5616_v20 = vrot.slane %v5615_v18, 4  ;;  %v5692_v28 = vld [vmem:[%s11307_s10] sm:$0x3] }
 0x4bc   : > { %v5598_v33 = vadd.f32 %v5597_v42, %v5596_v43  ;;  %v5694_v42 = vperm.slane %v5692_v28, 0 }
 0x4bd   : > { %v5556_v54 = vrot.slane %v5555_v53, 1  ;;  %v5574_v62 = vadd.f32 %v5573_v12, %v5572_v35  ;;  %v5617_v17 = vadd.f32 %v5616_v20, %v5615_v18 }
 0x4be   : > { %v5599_v40 = vrot.slane %v5598_v33, 2 }
 0x4bf   : > { %v5557_v22 = vadd.f32 %v5556_v54, %v5555_v53  ;;  %v5575_v2 = vrot.slane %v5574_v62, 1  ;;  %v5618_v25 = vrot.slane %v5617_v17, 2 }
 0x4c0   : > { %v5600_v8 = vadd.f32 %v5599_v40, %v5598_v33 }
 0x4c1   : > { %v5576_v56 = vadd.f32 %v5575_v2, %v5574_v62  ;;  %v11195_v59 = vmul.f32 0.020408163, %v5557_v22  ;;  %v5619_v13 = vadd.f32 %v5618_v25, %v5617_v17 }
 0x4c2   : > { %v5601_v24 = vrot.slane %v5600_v8, 1 }
 0x4c3   : > { %v11197_v1 = vmul.f32 0.020408163, %v5576_v56  ;;  %v5620_v0 = vrot.slane %v5619_v13, 1  ;;  %v5626_v29 = vmul.f32 %v11195_v59, %v11195_v59  ;;  %v5659_v37 = vsub.f32 %v11072_v4, %v11195_v59 }
 0x4c4   : > { %v5602_v21 = vadd.f32 %v5601_v24, %v5600_v8  ;;  %v5661_v12 = vsub.f32 %v11082_v34, %v11195_v59  ;;  %v5663_v54 = vsub.f32 %v11092_v47, %v11195_v59  ;;  %v5695_v4 = vperm.slane %v5692_v28, 1 }
 0x4c5   : > { %v5621_v41 = vadd.f32 %v5620_v0, %v5619_v13  ;;  %v5627_v6 = vmul.f32 %v11197_v1, %v11197_v1  ;;  %v5660_v53 = vsub.f32 %v11077_v45, %v11197_v1  ;;  %v5662_v18 = vsub.f32 %v11087_v51, %v11197_v1 }
 0x4c6   : > { %v5624_v60 = vmul.f32 0.020408163, %v5602_v21  ;;  %v5664_v62 = vsub.f32 %v11097_v36, %v11197_v1  ;;  %v5665_v22 = vsub.f32 %v11106_v61, %v11195_v59  ;;  %v5666_v45 = vsub.f32 %v11111_v46, %v11197_v1 }
 0x4c7   : > { %v5625_v63 = vmul.f32 0.020408163, %v5621_v41  ;;  %v5667_v34 = vsub.f32 %v11135_v23, %v11195_v59  ;;  %v5668_v36 = vsub.f32 %v11120_v44, %v11197_v1  ;;  %v5669_v25 = vsub.f32 %v11149_v30, %v11195_v59 }
 0x4c8   : > { %v5628_v26 = vsub.f32 %v5624_v60, %v5626_v29  ;;  %v5670_v23 = vsub.f32 %v11125_v3, %v11197_v1  ;;  %v5671_v44 = vsub.f32 %v11172_v10, %v11195_v59 }
 0x4c9   : > { %v5629_v16 = vsub.f32 %v5625_v63, %v5627_v6  ;;  %v5672_v6 = vsub.f32 %v11154_v39, %v11197_v1 }
 0x4ca   : > { %v5631_v7 = vadd.f32 1e-05, %v5628_v26 }
 0x4cb   : > { %v5632_v27 = vadd.f32 1e-05, %v5629_v16 }
 0x4cc   : > { %7183 = vrsqrt.f32 %v5631_v7  ;;  %vm5639_vm15 = vweird.f32 %v5631_v7 }
 0x4cd   : > { %7185 = vrsqrt.f32 %v5632_v27  ;;  %vm5649_vm2 = vweird.f32 %v5632_v27 }
 0x4d2   : > { %v7184_v49 = vpop.eup %7183 }
 0x4d3   : > { %v7186_v50 = vpop.eup %7185  ;;  %v5634_v57 = vmul.f32 %v7184_v49, %v5631_v7  ;;  %vm5640_vm0 = vweird.f32 %v7184_v49 }
 0x4d4   : > { %v5644_v31 = vmul.f32 %v7186_v50, %v5632_v27  ;;  %vm5650_vm3 = vweird.f32 %v7186_v50  ;;  %vm5641_vm4 = vmor %vm5639_vm15, %vm5640_vm0 }
 0x4d5   : > { %v5635_v19 = vmul.f32 %v7184_v49, %v5634_v57  ;;  %vm5651_vm5 = vmor %vm5649_vm2, %vm5650_vm3 }
 0x4d6   : > { %v5645_v5 = vmul.f32 %v7186_v50, %v5644_v31 }
 0x4d7   : > { %v5636_v32 = vmul.f32 0.5, %v5635_v19 }
 0x4d8   : > { %v5646_v58 = vmul.f32 0.5, %v5645_v5 }
 0x4d9   : > { %v5637_v52 = vsub.f32 1.5, %v5636_v32 }
 0x4da   : > { %v5647_v11 = vsub.f32 1.5, %v5646_v58 }
 0x4db   : > { %v5638_v55 = vmul.f32 %v7184_v49, %v5637_v52 }
 0x4dc   : > { %v5648_v48 = vmul.f32 %v7186_v50, %v5647_v11 }
 0x4dd   : > { %v5642_v38 = vsel %vm5641_vm4, %v7184_v49, %v5638_v55 }
 0x4de   : > { %v5652_v9 = vsel %vm5651_vm5, %v7186_v50, %v5648_v48 }
 0x4df   : > { %v5655_v14 = vrot.slane %v5652_v9, 7 }
 0x4e1   : > { %v5656_v35 = vsel %vm1245_vm7, %v5642_v38, %v5655_v14 }
 0x4e2   : > { %v5658_v43 = vmul.f32 %v5656_v35, %v5630_v15 }
 0x4e4   : > { %v5674_v20 = vperm.slane %v5658_v43, 0  ;;  %v5675_v33 = vperm.slane %v5658_v43, 1 }
 0x4e6   : > { %v5678_v51 = vmul.f32 %v5674_v20, %v5659_v37  ;;  %v5679_v2 = vmul.f32 %v5675_v33, %v5660_v53  ;;  %v5680_v17 = vmul.f32 %v5674_v20, %v5661_v12  ;;  %v5681_v40 = vmul.f32 %v5675_v33, %v5662_v18 }
 0x4e7   : > { %v5682_v47 = vmul.f32 %v5674_v20, %v5663_v54  ;;  %v5683_v56 = vmul.f32 %v5675_v33, %v5664_v62  ;;  %v5684_v24 = vmul.f32 %v5674_v20, %v5665_v22  ;;  %v5685_v0 = vmul.f32 %v5675_v33, %v5666_v45 }
 0x4e8   : > { %v5698_v8 = vadd.f32 %v5694_v42, %v5678_v51  ;;  %v5699_v61 = vadd.f32 %v5695_v4, %v5679_v2  ;;  %v5700_v13 = vadd.f32 %v5694_v42, %v5680_v17  ;;  %v5701_v46 = vadd.f32 %v5695_v4, %v5681_v40 }
 0x4e9   : > { %v5702_v21 = vadd.f32 %v5694_v42, %v5682_v47  ;;  %v5686_v29 = vmul.f32 %v5674_v20, %v5667_v34  ;;  %v5703_v30 = vadd.f32 %v5695_v4, %v5683_v56  ;;  %v5687_v41 = vmul.f32 %v5675_v33, %v5668_v36 }
 0x4ea   : > { %5712 = vst [vmem:[%s11308_s11] sm:$0xff] %v5698_v8  ;;  %v5704_v3 = vadd.f32 %v5694_v42, %v5684_v24  ;;  %v5688_v60 = vmul.f32 %v5674_v20, %v5669_v25  ;;  %v5705_v10 = vadd.f32 %v5695_v4, %v5685_v0  ;;  %v5689_v59 = vmul.f32 %v5675_v33, %v5670_v23 }
 0x4eb   : > { %5713 = vst.msk [vmem:[%s11308_s11 + $0x8] sm:$0xff] %vm937_vm1, %v5699_v61  ;;  %v5706_v63 = vadd.f32 %v5694_v42, %v5686_v29  ;;  %v5690_v26 = vmul.f32 %v5674_v20, %v5671_v44  ;;  %v5707_v39 = vadd.f32 %v5695_v4, %v5687_v41  ;;  %v5691_v1 = vmul.f32 %v5675_v33, %v5672_v6 }
 0x4ec   : > { %5714 = vst [vmem:[%s11308_s11 + $0x10] sm:$0xff] %v5700_v13  ;;  %v5708_v16 = vadd.f32 %v5694_v42, %v5688_v60  ;;  %v5709_v7 = vadd.f32 %v5695_v4, %v5689_v59 }
 0x4ed   : > { %5715 = vst.msk [vmem:[%s11308_s11 + $0x18] sm:$0xff] %vm937_vm1, %v5701_v46  ;;  %v5710_v27 = vadd.f32 %v5694_v42, %v5690_v26  ;;  %v5711_v49 = vadd.f32 %v5695_v4, %v5691_v1 }
 0x4ee   : > { %5716 = vst [vmem:[%s11308_s11 + $0x20] sm:$0xff] %v5702_v21 }
 0x4ef   : > { %5717 = vst.msk [vmem:[%s11308_s11 + $0x28] sm:$0xff] %vm937_vm1, %v5703_v30 }
 0x4f0   : > { %5718 = vst [vmem:[%s11308_s11 + $0x30] sm:$0xff] %v5704_v3 }
 0x4f1   : > { %5719 = vst.msk [vmem:[%s11308_s11 + $0x38] sm:$0xff] %vm937_vm1, %v5705_v10 }
 0x4f2   : > { %5720 = vst [vmem:[%s11308_s11 + $0x40] sm:$0xff] %v5706_v63 }
 0x4f3   : > { %5721 = vst.msk [vmem:[%s11308_s11 + $0x48] sm:$0xff] %vm937_vm1, %v5707_v39 }
 0x4f4   : > { %5722 = vst [vmem:[%s11308_s11 + $0x50] sm:$0xff] %v5708_v16 }
 0x4f5   : > { %5723 = vst.msk [vmem:[%s11308_s11 + $0x58] sm:$0xff] %vm937_vm1, %v5709_v7 }
 0x4f6   : > { %5724 = vst [vmem:[%s11308_s11 + $0x60] sm:$0xff] %v5710_v27 }
 0x4f7   : > { %5725 = vst.msk [vmem:[%s11308_s11 + $0x68] sm:$0xff] %vm937_vm1, %v5711_v49 }
 0x4f8 PF: > { %p18_p12 = scmp.ge.s32.totalorder %s7292_s21, 8   ;;  %s11967_s17 = smov %s7205_s18 }
 0x4f9   : > { %s11968_s18 = smov %s7301_s24  ;;  %s11969_s19 = smov %s7292_s21 }
 0x4fa   :  { %20 = sbr.rel (!%p18_p12) target bundleno = 2 (0x2), region = 211 }

</bundles_post_ra>
